<compile_context>
chip_gen: v5e
topology: v5e:2x2
jax: 0.10.0
libtpu: 0.0.40
codegen_flags: <defaults>
</compile_context>

<pallas_src>
import functools
import math

import jax
import jax.numpy as jnp
from jax import lax
from jax.experimental import pallas as pl
from jax.experimental.pallas import tpu as pltpu

HIGHEST = jax.lax.Precision.HIGHEST   # used only by the pure-JAX reference


def _round_up(x, m):
    return (x + m - 1) // m * m


def _vmem_budget():
    """Returns (physical VMEM bytes, safe per-call vmem_limit_bytes)."""
    try:
        cap = int(pltpu.get_tpu_info().vmem_capacity_bytes)
    except Exception:
        cap = 64 * 1024 * 1024
    limit = max(32 * 1024 * 1024,
                min(cap - 16 * 1024 * 1024, 100 * 1024 * 1024))
    return cap, limit


# --------------------------------------------------------------------------
# Deformable RoI pool (mmcv deform_roi_pool_forward semantics)
# --------------------------------------------------------------------------
def _deform_roi_pool_kernel(gbidx_ref, gtlo_ref, gthi_ref, prm_ref, img_ref,
                            grid_ref, out_ref, acc_ref, *, H, W, G, PP,
                            HW_TILE, SLAB, gh, gw, inv_count):
    """grid = (num RoI groups, H*W chunks).

    gbidx/gtlo/gthi : (NG,) int32 scalar prefetch (image index, chunk window)
    prm_ref  : (1, G*PP, 4) f32  [start_w, start_h, step_w, step_h] per bin
    img_ref  : (1, C, HW_TILE) bf16 chunk of the group's feature map
    grid_ref : (2, HW_TILE) f32  [h, w] pixel coordinates of the chunk
    out_ref  : (1, G*PP, C)  -- lane-dense in C
    acc_ref  : (G*PP, C) f32 accumulator scratch
    """
    del gbidx_ref                       # only used by the index_maps
    g = pl.program_id(0)
    t = pl.program_id(1)

    @pl.when(t == 0)
    def _():
        acc_ref[...] = jnp.zeros_like(acc_ref)

    in_window = jnp.logical_and(t >= gtlo_ref[g], t <= gthi_ref[g])

    @pl.when(in_window)
    def _():
        prm = prm_ref[0]                                  # (G*PP, 4) f32
        start_w = prm[:, 0:1]
        start_h = prm[:, 1:2]
        step_w = prm[:, 2:3]
        step_h = prm[:, 3:4]

        n_slab = HW_TILE // SLAB
        for s in range(n_slab):                           # static unrolled
            gchunk = grid_ref[:, pl.ds(s * SLAB, SLAB)]   # (2, SLAB)
            hg = gchunk[0:1, :]                           # (1, SLAB)
            wg = gchunk[1:2, :]

            # Separable bilinear weights (built in f32):
            #   sum_{iy,ix} wy*wx == (sum_iy wy) * (sum_ix wx)
            wy_sum = jnp.zeros((G * PP, SLAB), jnp.float32)
            for iy in range(gh):
                y = start_h + (iy + 0.5) * step_h                     # (G*PP,1)
                my = jnp.logical_and(y >= -1.0, y <= float(H)).astype(jnp.float32)
                yc = jnp.clip(y, 0.0, float(H - 1))
                wy_sum = wy_sum + jnp.maximum(1.0 - jnp.abs(yc - hg), 0.0) * my
            wx_sum = jnp.zeros((G * PP, SLAB), jnp.float32)
            for ix in range(gw):
                xx = start_w + (ix + 0.5) * step_w
                mx = jnp.logical_and(xx >= -1.0, xx <= float(W)).astype(jnp.float32)
                xc = jnp.clip(xx, 0.0, float(W - 1))
                wx_sum = wx_sum + jnp.maximum(1.0 - jnp.abs(xc - wg), 0.0) * mx

            # Fold 1/count into the weight before the bf16 cast.
            w_acc = (wy_sum * (wx_sum * inv_count)).astype(jnp.bfloat16)
            img = img_ref[0, :, pl.ds(s * SLAB, SLAB)]    # (C, SLAB) bf16

            # (G*PP, SLAB) x (C, SLAB)^T -> (G*PP, C): lane-dense output in C.
            acc_ref[...] += lax.dot_general(
                w_acc, img, (((1,), (1,)), ((), ())),
                preferred_element_type=jnp.float32)

    @pl.when(t == pl.num_programs(1) - 1)
    def _():
        out_ref[0] = acc_ref[...].astype(out_ref.dtype)


def deform_roi_pool(x, rois, offset, *, output_size, spatial_scale=1.0,
                    sampling_ratio=2, gamma=0.1, roi_group=None,
                    hw_tile_bytes=None, slab_lanes=512, out_dtype=jnp.float32):
    """x: (B,C,H,W); rois: (N,5) [idx,x1,y1,x2,y2]; offset: (N, Ph*Pw, 2).

    Returns the pooled features in (N, Ph*Pw, C) layout (lane-dense in C).
    """
    if sampling_ratio <= 0:
        # TODO(synk): sampling_ratio == 0 (per-RoI adaptive sampling grid)
        # needs data-dependent trip counts; not implemented here.
        raise NotImplementedError("sampling_ratio must be > 0 in this kernel")
    B, C, H, W = x.shape
    N = rois.shape[0]
    P = int(output_size)
    PP = P * P
    HW = H * W
    gh = gw = int(sampling_ratio)
    inv_count = 1.0 / float(max(gh * gw, 1))
    gamma = float(gamma)
    ss = float(spatial_scale)

    cap, vmem_limit = _vmem_budget()
    if hw_tile_bytes is None:
        # Bigger chunks on 128 MiB chips (v5e/v6e), tighter on 64 MiB (v7x).
        hw_tile_bytes = 6 * 2**20 if cap >= 100 * 2**20 else 2 * 2**20
    if roi_group is None:
        roi_group = max(1, -(-256 // PP))      # fill ~256 MXU rows
    G = int(roi_group)

    # ----- H*W chunking (multiple of the slab, bounded by a byte budget) ---
    hw_tile = min(_round_up(HW, 128),
                  max(128, (hw_tile_bytes // max(2 * C, 1)) // 128 * 128))
    slab = max(128, (min(int(slab_lanes), hw_tile) // 128) * 128)
    hw_tile = _round_up(hw_tile, slab)
    hw_pad = _round_up(HW, hw_tile)
    n_hw = hw_pad // hw_tile

    x_flat = x.reshape(B, C, HW).astype(jnp.bfloat16)
    if hw_pad != HW:
        x_flat = jnp.pad(x_flat, ((0, 0), (0, 0), (0, hw_pad - HW)))
    hw_idx = jnp.arange(hw_pad, dtype=jnp.int32)
    hwgrid = jnp.stack([(hw_idx // W).astype(jnp.float32),
                        (hw_idx % W).astype(jnp.float32)], axis=0)  # (2, hw_pad)

    # ----- per-RoI / per-bin sampling params (host side, f32) --------------
    rois = rois.astype(jnp.float32)
    offset = offset.astype(jnp.float32)
    bidx = rois[:, 0].astype(jnp.int32)
    x1 = rois[:, 1] * ss - 0.5
    y1 = rois[:, 2] * ss - 0.5
    x2 = rois[:, 3] * ss - 0.5
    y2 = rois[:, 4] * ss - 0.5
    roi_w = x2 - x1
    roi_h = y2 - y1
    bin_w = roi_w / P
    bin_h = roi_h / P
    ph = (jnp.arange(PP, dtype=jnp.int32) // P).astype(jnp.float32)
    pw = (jnp.arange(PP, dtype=jnp.int32) % P).astype(jnp.float32)
    start_w = x1[:, None] + gamma * roi_w[:, None] * offset[:, :, 0] + pw[None, :] * bin_w[:, None]
    start_h = y1[:, None] + gamma * roi_h[:, None] * offset[:, :, 1] + ph[None, :] * bin_h[:, None]
    step_w = jnp.broadcast_to((bin_w / gw)[:, None], (N, PP))
    step_h = jnp.broadcast_to((bin_h / gh)[:, None], (N, PP))
    prm = jnp.stack([start_w, start_h, step_w, step_h], axis=-1)      # (N, PP, 4)

    # ----- per-RoI footprint -> chunk window (conservative bounds) ---------
    y_a = start_h + 0.5 * step_h
    y_b = start_h + (gh - 0.5) * step_h
    y_min = jnp.minimum(y_a, y_b).min(axis=1)
    y_max = jnp.maximum(y_a, y_b).max(axis=1)
    row_lo = jnp.clip(jnp.floor(y_min).astype(jnp.int32) - 1, 0, H - 1)
    row_hi = jnp.clip(jnp.ceil(y_max).astype(jnp.int32) + 1, 0, H - 1)
    tlo = (row_lo * W) // hw_tile
    thi = (row_hi * W + (W - 1)) // hw_tile

    # ----- sort by batch idx, pad each batch segment to a multiple of G ----
    order = jnp.argsort(bidx)
    bidx_s = bidx[order]
    counts = jnp.sum(bidx[None, :] == jnp.arange(B, dtype=jnp.int32)[:, None],
                     axis=1).astype(jnp.int32)
    padded_counts = ((counts + G - 1) // G) * G
    seg_starts_p = jnp.concatenate(
        [jnp.zeros((1,), jnp.int32), jnp.cumsum(padded_counts)[:-1].astype(jnp.int32)])
    seg_starts_s = jnp.concatenate(
        [jnp.zeros((1,), jnp.int32), jnp.cumsum(counts)[:-1].astype(jnp.int32)])
    rank = jnp.arange(N, dtype=jnp.int32) - seg_starts_s[bidx_s]
    slot = (seg_starts_p[bidx_s] + rank).astype(jnp.int32)   # padded slot / sorted roi

    N_alloc = _round_up(N + B * (G - 1), G)
    NG = N_alloc // G

    prm_p = jnp.zeros((N_alloc, PP, 4), jnp.float32).at[slot].set(prm[order])
    bidx_p = jnp.zeros((N_alloc,), jnp.int32).at[slot].set(bidx_s)
    big = jnp.iinfo(jnp.int32).max // 2
    tlo_p = jnp.full((N_alloc,), big, jnp.int32).at[slot].set(tlo[order].astype(jnp.int32))
    thi_p = jnp.full((N_alloc,), -1, jnp.int32).at[slot].set(thi[order].astype(jnp.int32))

    gbidx = bidx_p.reshape(NG, G).max(axis=1).astype(jnp.int32)
    gtlo = jnp.clip(tlo_p.reshape(NG, G).min(axis=1), 0, n_hw - 1).astype(jnp.int32)
    gthi = jnp.clip(thi_p.reshape(NG, G).max(axis=1), 0, n_hw - 1).astype(jnp.int32)
    gthi = jnp.maximum(gthi, gtlo)

    # slot of every ORIGINAL roi (for the final gather back to input order)
    inv_slot = jnp.zeros((N,), jnp.int32).at[order].set(slot)

    prm_g = prm_p.reshape(NG, G * PP, 4)

    kernel = functools.partial(
        _deform_roi_pool_kernel, H=H, W=W, G=G, PP=PP, HW_TILE=hw_tile,
        SLAB=slab, gh=gh, gw=gw, inv_count=inv_count)

    def img_map(g, t, gbidx_r, gtlo_r, gthi_r):
        tc = jnp.minimum(jnp.maximum(t, gtlo_r[g]), gthi_r[g])
        return (gbidx_r[g], 0, tc)

    def grid_map(g, t, gbidx_r, gtlo_r, gthi_r):
        tc = jnp.minimum(jnp.maximum(t, gtlo_r[g]), gthi_r[g])
        return (0, tc)

    out = pl.pallas_call(
        kernel,
        out_shape=jax.ShapeDtypeStruct((NG, G * PP, C), out_dtype),
        grid_spec=pltpu.PrefetchScalarGridSpec(
            num_scalar_prefetch=3,
            grid=(NG, n_hw),
            in_specs=[
                pl.BlockSpec((1, G * PP, 4),
                             lambda g, t, gb, lo, hi: (g, 0, 0)),     # bin params
                pl.BlockSpec((1, C, hw_tile), img_map),               # image chunk
                pl.BlockSpec((2, hw_tile), grid_map),                 # pixel coords
            ],
            out_specs=pl.BlockSpec((1, G * PP, C),
                                   lambda g, t, gb, lo, hi: (g, 0, 0)),
            scratch_shapes=[pltpu.VMEM((G * PP, C), jnp.float32)],
        ),
        compiler_params=pltpu.CompilerParams(
            dimension_semantics=("parallel", "arbitrary"),
            vmem_limit_bytes=vmem_limit),
    )(gbidx, gtlo, gthi, prm_g, x_flat, hwgrid)

    out = out.reshape(N_alloc, PP, C)[inv_slot]       # back to input RoI order
    return out                                        # (N, PP, C)


def pooled_to_nchw(pooled, channels, output_size):
    n = pooled.shape[0]
    P = int(output_size)
    return pooled.transpose(0, 2, 1).reshape(n, channels, P, P)


# --------------------------------------------------------------------------
# Tiled fused linear (+ activation) kernel for the FC heads (bf16 operands)
# --------------------------------------------------------------------------
def _linear_kernel(x_ref, w_ref, b_ref, o_ref, acc_ref, *, act):
    k = pl.program_id(2)

    @pl.when(k == 0)
    def _():
        acc_ref[...] = jnp.zeros_like(acc_ref)

    acc_ref[...] += jnp.dot(x_ref[...], w_ref[...],
                            preferred_element_type=jnp.float32)

    @pl.when(k == pl.num_programs(2) - 1)
    def _():
        y = acc_ref[...] + b_ref[...]
        if act == "relu":
            y = jnp.maximum(y, 0.0)
        elif act == "sigmoid":
            y = 1.0 / (1.0 + jnp.exp(-y))
        o_ref[...] = y.astype(o_ref.dtype)


def _fc_tiles(k_dim, out_dim):
    tk = min(512, _round_up(k_dim, 128))
    tn = min(256, _round_up(out_dim, 128))
    return tk, tn


def linear_packed(x, wp, bp, *, k_dim, out_dim, act="none", tm=256):
    """x: (n, k_dim) any float dtype; wp: pre-padded bf16 (kpad, opad);
    bp: pre-padded f32 (1, opad)."""
    n = x.shape[0]
    kpad, opad = wp.shape
    tk, tn = _fc_tiles(k_dim, out_dim)
    tm = min(tm, _round_up(n, 8))
    npad = _round_up(n, tm)
    _, vmem_limit = _vmem_budget()

    xp = jnp.pad(x.astype(jnp.bfloat16), ((0, npad - n), (0, kpad - k_dim)))

    out = pl.pallas_call(
        functools.partial(_linear_kernel, act=act),
        out_shape=jax.ShapeDtypeStruct((npad, opad), jnp.float32),
        grid_spec=pltpu.PrefetchScalarGridSpec(
            num_scalar_prefetch=0,
            grid=(npad // tm, opad // tn, kpad // tk),
            in_specs=[
                pl.BlockSpec((tm, tk), lambda i, j, k: (i, k)),
                pl.BlockSpec((tk, tn), lambda i, j, k: (k, j)),
                pl.BlockSpec((1, tn), lambda i, j, k: (0, j)),
            ],
            out_specs=pl.BlockSpec((tm, tn), lambda i, j, k: (i, j)),
            scratch_shapes=[pltpu.VMEM((tm, tn), jnp.float32)],
        ),
        compiler_params=pltpu.CompilerParams(
            dimension_semantics=("parallel", "parallel", "arbitrary"),
            vmem_limit_bytes=vmem_limit),
    )(xp, wp, bp)
    return out[:n, :out_dim]


# --------------------------------------------------------------------------
# GeDeformRoIPoolPack
# --------------------------------------------------------------------------
def init_ge_deform_roi_pool_pack(key, output_size, output_channels,
                                 deform_fc_channels=1024):
    P = int(output_size)
    feat = P * P * output_channels

    def _linear_init(k, fin, fout):
        kw, kb = jax.random.split(k)
        bound = 1.0 / math.sqrt(fin)
        w = jax.random.uniform(kw, (fin, fout), jnp.float32, -bound, bound)
        b = jax.random.uniform(kb, (fout,), jnp.float32, -bound, bound)
        return w, b

    ks = jax.random.split(key, 3)
    params = {}
    params["rescale_w"], params["rescale_b"] = _linear_init(ks[0], feat, P * P * 2)
    params["off_w1"], params["off_b1"] = _linear_init(ks[1], feat, deform_fc_channels)
    params["off_w2"], params["off_b2"] = _linear_init(ks[2], deform_fc_channels,
                                                      deform_fc_channels)
    # Last offset_fc layer is zero-initialized in the PyTorch module __init__.
    params["off_w3"] = jnp.zeros((deform_fc_channels, P * P * 2), jnp.float32)
    params["off_b3"] = jnp.zeros((P * P * 2,), jnp.float32)
    return params


def pack_fc_params(params, *, output_size, output_channels,
                   deform_fc_channels=1024):
    """Pre-pad / pre-cast (bf16) / row-permute the FC weights ONCE, outside
    jit, so no per-call padding copies are made.  The first-layer rows are
    permuted so the pooled (N, PP, C) output feeds the FCs without a
    transpose (canonical PyTorch feat order is c*PP+p; kernel feat is p*C+c).
    """
    P = int(output_size)
    PP = P * P
    C = int(output_channels)
    feat = PP * C
    idx = jnp.arange(feat)
    perm = (idx % C) * PP + (idx // C)      # new_w[p*C+c] = old_w[c*PP+p]

    def pk(w, b, k_dim, out_dim, permute=False):
        tk, tn = _fc_tiles(k_dim, out_dim)
        kpad = _round_up(k_dim, tk)
        opad = _round_up(out_dim, tn)
        if permute:
            w = w[perm]
        wp = jnp.pad(w, ((0, kpad - k_dim), (0, opad - out_dim))).astype(jnp.bfloat16)
        bp = jnp.pad(b.reshape(1, -1).astype(jnp.float32),
                     ((0, 0), (0, opad - out_dim)))
        return wp, bp

    packed = {}
    packed["rescale_w"], packed["rescale_b"] = pk(
        params["rescale_w"], params["rescale_b"], feat, 2 * PP, permute=True)
    packed["off_w1"], packed["off_b1"] = pk(
        params["off_w1"], params["off_b1"], feat, deform_fc_channels, permute=True)
    packed["off_w2"], packed["off_b2"] = pk(
        params["off_w2"], params["off_b2"], deform_fc_channels, deform_fc_channels)
    packed["off_w3"], packed["off_b3"] = pk(
        params["off_w3"], params["off_b3"], deform_fc_channels, 2 * PP)
    return packed


def rescale_roi(rois, scale_factor):
    cx = (rois[:, 1] + rois[:, 3]) * 0.5
    cy = (rois[:, 2] + rois[:, 4]) * 0.5
    w = rois[:, 3] - rois[:, 1]
    h = rois[:, 4] - rois[:, 2]
    new_cx = cx + scale_factor[:, 0]
    new_cy = cy + scale_factor[:, 1]
    new_w = w * scale_factor[:, 2]
    new_h = h * scale_factor[:, 3]
    x1 = new_cx - new_w * 0.5
    x2 = new_cx + new_w * 0.5
    y1 = new_cy - new_h * 0.5
    y2 = new_cy + new_h * 0.5
    return jnp.stack((rois[:, 0], x1, y1, x2, y2), axis=-1)


def ge_deform_roi_pool_pack_forward(packed, x, rois, *, output_size,
                                    output_channels, deform_fc_channels=1024,
                                    spatial_scale=1.0, sampling_ratio=2,
                                    gamma=0.1, sigma=0.5):
    assert x.shape[1] == output_channels
    N = rois.shape[0]
    C = x.shape[1]
    P = int(output_size)
    PP = P * P
    dfc = int(deform_fc_channels)

    # First pool: no offsets (offset=None in PyTorch -> zeros here).
    zero_off = jnp.zeros((N, PP, 2), jnp.float32)
    pooled_cls = deform_roi_pool(x, rois, zero_off, output_size=P,
                                 spatial_scale=spatial_scale,
                                 sampling_ratio=sampling_ratio, gamma=gamma)

    # feat stays in the kernel's (N, PP*C) order; FC weights were row-permuted.
    feat = pooled_cls.reshape(N, PP * C)

    rescale = linear_packed(feat, packed["rescale_w"], packed["rescale_b"],
                            k_dim=PP * C, out_dim=2 * PP, act="sigmoid")
    rescale = 1.0 + sigma * rescale
    new_rois = rescale_roi(rois, rescale)

    h1 = linear_packed(feat, packed["off_w1"], packed["off_b1"],
                       k_dim=PP * C, out_dim=dfc, act="relu")
    h2 = linear_packed(h1, packed["off_w2"], packed["off_b2"],
                       k_dim=dfc, out_dim=dfc, act="relu")
    off = linear_packed(h2, packed["off_w3"], packed["off_b3"],
                        k_dim=dfc, out_dim=2 * PP, act="none")       # (N, 2*PP)
    # PyTorch layout (N, 2, Ph, Pw) -> kernel layout (N, Ph*Pw, 2)
    off_k = off.reshape(N, 2, PP).transpose(0, 2, 1)

    pooled_reg = deform_roi_pool(x, new_rois, off_k, output_size=P,
                                 spatial_scale=spatial_scale,
                                 sampling_ratio=sampling_ratio, gamma=gamma)

    x_cls = pooled_to_nchw(pooled_cls, C, P)
    x_reg = pooled_to_nchw(pooled_reg, C, P)
    return x_cls, x_reg


# --------------------------------------------------------------------------
# Pure-JAX reference (same semantics) for a correctness sanity check
# --------------------------------------------------------------------------
def _deform_roi_pool_ref(x, rois, offset, output_size, spatial_scale,
                         sampling_ratio, gamma):
    B, C, H, W = x.shape
    N = rois.shape[0]
    P = int(output_size)
    PP = P * P
    gh = gw = sampling_ratio
    count = max(gh * gw, 1)
    bidx = rois[:, 0].astype(jnp.int32)
    x1 = rois[:, 1] * spatial_scale - 0.5
    y1 = rois[:, 2] * spatial_scale - 0.5
    x2 = rois[:, 3] * spatial_scale - 0.5
    y2 = rois[:, 4] * spatial_scale - 0.5
    rw, rh = x2 - x1, y2 - y1
    bw, bh = rw / P, rh / P
    ph = (jnp.arange(PP) // P).astype(jnp.float32)
    pw = (jnp.arange(PP) % P).astype(jnp.float32)
    sw = x1[:, None] + gamma * rw[:, None] * offset[:, :, 0] + pw[None, :] * bw[:, None]
    sh = y1[:, None] + gamma * rh[:, None] * offset[:, :, 1] + ph[None, :] * bh[:, None]
    hg = jnp.arange(H, dtype=jnp.float32)
    wg = jnp.arange(W, dtype=jnp.float32)
    imgs = x[bidx]
    out = jnp.zeros((N, C, PP), jnp.float32)
    for iy in range(gh):
        yy = sh + (iy + 0.5) * bh[:, None] / gh
        my = ((yy >= -1.0) & (yy <= H)).astype(jnp.float32)
        yc = jnp.clip(yy, 0.0, H - 1)
        wy = jnp.maximum(1.0 - jnp.abs(yc[..., None] - hg), 0.0) * my[..., None]
        for ix in range(gw):
            xx = sw + (ix + 0.5) * bw[:, None] / gw
            mx = ((xx >= -1.0) & (xx <= W)).astype(jnp.float32)
            xc = jnp.clip(xx, 0.0, W - 1)
            wx = jnp.maximum(1.0 - jnp.abs(xc[..., None] - wg), 0.0) * mx[..., None]
            wfull = wy[:, :, :, None] * wx[:, :, None, :]
            out = out + jnp.einsum('nchw,nphw->ncp', imgs, wfull,
                                   precision=HIGHEST)
    return (out / count).reshape(N, C, P, P)


def _ge_forward_ref(params, x, rois, *, output_size, spatial_scale,
                    sampling_ratio, gamma, sigma):
    N = rois.shape[0]
    P = int(output_size)
    PP = P * P
    zero_off = jnp.zeros((N, PP, 2), jnp.float32)
    x_cls = _deform_roi_pool_ref(x, rois, zero_off, P, spatial_scale,
                                 sampling_ratio, gamma)
    feat = x_cls.reshape(N, -1)
    rescale = 1.0 + sigma * jax.nn.sigmoid(
        jnp.dot(feat, params["rescale_w"], precision=HIGHEST) + params["rescale_b"])
    new_rois = rescale_roi(rois, rescale)
    h1 = jax.nn.relu(jnp.dot(feat, params["off_w1"], precision=HIGHEST) + params["off_b1"])
    h2 = jax.nn.relu(jnp.dot(h1, params["off_w2"], precision=HIGHEST) + params["off_b2"])
    off = jnp.dot(h2, params["off_w3"], precision=HIGHEST) + params["off_b3"]
    off_k = off.reshape(N, 2, PP).transpose(0, 2, 1)
    x_reg = _deform_roi_pool_ref(x, new_rois, off_k, P, spatial_scale,
                                 sampling_ratio, gamma)
    return x_cls, x_reg


# --------------------------------------------------------------------------
if __name__ == "__main__":
    key = jax.random.PRNGKey(0)
    k_x, k_p, k_x2, k_o2 = jax.random.split(key, 4)

    B, C, H, W = 2, 4, 16, 16
    P = 7                       # output_size
    x = jax.random.normal(k_x, (B, C, H, W), jnp.float32)
    rois = jnp.array([[0.0, 1.0, 2.0, 13.0, 14.0],
                      [1.0, 0.5, 0.5, 10.5, 9.0],
                      [0.0, 3.0, 4.0, 8.0, 15.0]], jnp.float32)

    params = init_ge_deform_roi_pool_pack(k_p, output_size=P,
                                          output_channels=C,
                                          deform_fc_channels=1024)
    # Pad / cast / permute FC weights ONCE, outside jit.
    packed = pack_fc_params(params, output_size=P, output_channels=C,
                            deform_fc_channels=1024)

    fwd = jax.jit(functools.partial(
        ge_deform_roi_pool_pack_forward, output_size=P, output_channels=C,
        deform_fc_channels=1024, spatial_scale=1.0, sampling_ratio=2,
        gamma=0.1, sigma=0.5))
    x_cls, x_reg = fwd(packed, x, rois)
    jax.block_until_ready((x_cls, x_reg))

    # Sanity check against a pure-JAX reference (kernel runs bf16 on the MXU,
    # reference is f32 HIGHEST -> tolerance accounts for the precision gap).
    r_cls, r_reg = _ge_forward_ref(params, x, rois, output_size=P,
                                   spatial_scale=1.0, sampling_ratio=2,
                                   gamma=0.1, sigma=0.5)
    assert x_cls.shape == (rois.shape[0], C, P, P)
    assert x_reg.shape == (rois.shape[0], C, P, P)
    assert jnp.allclose(x_cls, r_cls, atol=4e-2, rtol=4e-2)
    assert jnp.allclose(x_reg, r_reg, atol=4e-2, rtol=4e-2)

    # Extra check: exercise multi-chunk footprint gating (a chunk outside one
    # group's window is skipped), multi-slab weight build and RoI grouping
    # with non-128-multiple H*W.
    H2, W2 = 18, 15
    x2 = jax.random.normal(k_x2, (B, C, H2, W2), jnp.float32)
    rois2 = jnp.array([[1.0, 0.5, 1.0, 13.0, 16.0],
                       [0.0, 2.0, 3.0, 11.0, 12.0]], jnp.float32)
    off2 = 0.05 * jax.random.normal(k_o2, (2, P * P, 2), jnp.float32)
    y_k = deform_roi_pool(x2, rois2, off2, output_size=P, spatial_scale=1.0,
                          sampling_ratio=2, gamma=0.1,
                          hw_tile_bytes=2048, slab_lanes=128, roi_group=2)
    y_k = pooled_to_nchw(y_k, C, P)
    jax.block_until_ready(y_k)
    y_r = _deform_roi_pool_ref(x2, rois2, off2, P, 1.0, 2, 0.1)
    assert jnp.allclose(y_k, y_r, atol=3e-2, rtol=3e-2)

    print("KERNEL_OK")
</pallas_src>

<mosaic_0001>
module attributes {stable_mosaic.version = 11 : i64} {
  func.func @_deform_roi_pool_kernel(%arg0: i32, %arg1: i32, %arg2: memref<3xi32, #tpu.memory_space<smem>>, %arg3: memref<3xi32, #tpu.memory_space<smem>>, %arg4: memref<3xi32, #tpu.memory_space<smem>>, %arg5: memref<1x294x4xf32, #tpu.memory_space<vmem>>, %arg6: memref<1x4x256xbf16, #tpu.memory_space<vmem>>, %arg7: memref<2x256xf32, #tpu.memory_space<vmem>>, %arg8: memref<1x294x4xf32, #tpu.memory_space<vmem>>, %arg9: memref<294x4xf32, #tpu.memory_space<vmem>>) attributes {dimension_semantics = [#tpu.dimension_semantics<parallel>, #tpu.dimension_semantics<arbitrary>], iteration_bounds = array<i64: 3, 1>, scalar_prefetch = 3 : i64, scratch_operands = 1 : i64, tpu.core_type = #tpu.core_type<tc>, window_params = [{transform_indices = @transform_0, window_bounds = array<i64: 1, 294, 4>}, {transform_indices = @transform_1, window_bounds = array<i64: 1, 4, 256>}, {transform_indices = @transform_2, window_bounds = array<i64: 2, 256>}, {transform_indices = @transform_3, window_bounds = array<i64: 1, 294, 4>}]} {
    %c0_i32 = arith.constant 0 : i32
    %0 = arith.cmpi eq, %arg1, %c0_i32 : i32
    %1 = arith.extui %0 : i1 to i32
    %c0_i32_0 = arith.constant 0 : i32
    %2 = arith.cmpi ne, %1, %c0_i32_0 : i32
    scf.if %2 {
      %cst = arith.constant 0.000000e+00 : f32
      %15 = vector.broadcast %cst : f32 to vector<294x4xf32>
      %c0 = arith.constant 0 : index
      %c0_4 = arith.constant 0 : index
      %16 = vector.load %arg9[%c0, %c0_4] : memref<294x4xf32, #tpu.memory_space<vmem>>, vector<294x4xf32>
      tpu.vector_store %arg9[%c0, %c0_4], %15 {strides = array<i32>} : memref<294x4xf32, #tpu.memory_space<vmem>>, vector<294x4xf32>,
    } else {
    }
    %3 = arith.index_cast %arg0 : i32 to index
    %4 = memref.load %arg3[%3] : memref<3xi32, #tpu.memory_space<smem>>
    %5 = arith.cmpi sge, %arg1, %4 : i32
    %6 = arith.index_cast %arg0 : i32 to index
    %7 = memref.load %arg4[%6] : memref<3xi32, #tpu.memory_space<smem>>
    %8 = arith.cmpi sle, %arg1, %7 : i32
    %9 = arith.andi %5, %8 : i1
    %10 = arith.extui %9 : i1 to i32
    %c0_i32_1 = arith.constant 0 : i32
    %11 = arith.cmpi ne, %10, %c0_i32_1 : i32
    scf.if %11 {
      %c0 = arith.constant 0 : index
      %c0_4 = arith.constant 0 : index
      %c0_5 = arith.constant 0 : index
      %15 = vector.load %arg5[%c0, %c0_4, %c0_5] : memref<1x294x4xf32, #tpu.memory_space<vmem>>, vector<1x294x4xf32>
      %16 = vector.shape_cast %15 : vector<1x294x4xf32> to vector<294x4xf32>
      %17 = vector.extract_strided_slice %16 {offsets = [0, 0], sizes = [294, 1], strides = [1, 1]} : vector<294x4xf32> to vector<294x1xf32>
      %18 = vector.extract_strided_slice %16 {offsets = [0, 1], sizes = [294, 1], strides = [1, 1]} : vector<294x4xf32> to vector<294x1xf32>
      %19 = vector.extract_strided_slice %16 {offsets = [0, 2], sizes = [294, 1], strides = [1, 1]} : vector<294x4xf32> to vector<294x1xf32>
      %20 = vector.extract_strided_slice %16 {offsets = [0, 3], sizes = [294, 1], strides = [1, 1]} : vector<294x4xf32> to vector<294x1xf32>
      %c0_6 = arith.constant 0 : index
      %c0_7 = arith.constant 0 : index
      %21 = vector.load %arg7[%c0_6, %c0_7] : memref<2x256xf32, #tpu.memory_space<vmem>>, vector<2x256xf32>
      %22 = vector.extract_strided_slice %21 {offsets = [0, 0], sizes = [1, 256], strides = [1, 1]} : vector<2x256xf32> to vector<1x256xf32>
      %23 = vector.extract_strided_slice %21 {offsets = [1, 0], sizes = [1, 256], strides = [1, 1]} : vector<2x256xf32> to vector<1x256xf32>
      %cst = arith.constant 0.000000e+00 : f32
      %24 = vector.broadcast %cst : f32 to vector<294x256xf32>
      %cst_8 = arith.constant 5.000000e-01 : f32
      %25 = vector.broadcast %cst_8 : f32 to vector<294x1xf32>
      %26 = arith.mulf %25, %20 : vector<294x1xf32>
      %27 = arith.addf %18, %26 : vector<294x1xf32>
      %cst_9 = arith.constant -1.000000e+00 : f32
      %28 = vector.broadcast %cst_9 : f32 to vector<294x1xf32>
      %29 = arith.cmpf oge, %27, %28 : vector<294x1xf32>
      %cst_10 = arith.constant 1.600000e+01 : f32
      %30 = vector.broadcast %cst_10 : f32 to vector<294x1xf32>
      %31 = arith.cmpf ole, %27, %30 : vector<294x1xf32>
      %32 = arith.andi %29, %31 : vector<294x1xi1>
      %33 = arith.extui %32 : vector<294x1xi1> to vector<294x1xi32>
      %34 = arith.sitofp %33 : vector<294x1xi32> to vector<294x1xf32>
      %cst_11 = arith.constant 0.000000e+00 : f32
      %cst_12 = arith.constant 1.500000e+01 : f32
      %35 = vector.broadcast %cst_11 : f32 to vector<294x1xf32>
      %36 = arith.maximumf %35, %27 : vector<294x1xf32>
      %37 = vector.broadcast %cst_12 : f32 to vector<294x1xf32>
      %38 = arith.minimumf %37, %36 : vector<294x1xf32>
      %39 = vector.broadcast %38 : vector<294x1xf32> to vector<294x256xf32>
      %40 = vector.broadcast %22 : vector<1x256xf32> to vector<294x256xf32>
      %41 = arith.subf %39, %40 : vector<294x256xf32>
      %42 = math.absf %41 : vector<294x256xf32>
      %cst_13 = arith.constant 1.000000e+00 : f32
      %43 = vector.broadcast %cst_13 : f32 to vector<294x256xf32>
      %44 = arith.subf %43, %42 : vector<294x256xf32>
      %cst_14 = arith.constant 0.000000e+00 : f32
      %45 = vector.broadcast %cst_14 : f32 to vector<294x256xf32>
      %46 = arith.maximumf %44, %45 : vector<294x256xf32>
      %47 = vector.broadcast %34 : vector<294x1xf32> to vector<294x256xf32>
      %48 = arith.mulf %46, %47 : vector<294x256xf32>
      %49 = arith.addf %24, %48 : vector<294x256xf32>
      %cst_15 = arith.constant 1.500000e+00 : f32
      %50 = vector.broadcast %cst_15 : f32 to vector<294x1xf32>
      %51 = arith.mulf %50, %20 : vector<294x1xf32>
      %52 = arith.addf %18, %51 : vector<294x1xf32>
      %cst_16 = arith.constant -1.000000e+00 : f32
      %53 = vector.broadcast %cst_16 : f32 to vector<294x1xf32>
      %54 = arith.cmpf oge, %52, %53 : vector<294x1xf32>
      %cst_17 = arith.constant 1.600000e+01 : f32
      %55 = vector.broadcast %cst_17 : f32 to vector<294x1xf32>
      %56 = arith.cmpf ole, %52, %55 : vector<294x1xf32>
      %57 = arith.andi %54, %56 : vector<294x1xi1>
      %58 = arith.extui %57 : vector<294x1xi1> to vector<294x1xi32>
      %59 = arith.sitofp %58 : vector<294x1xi32> to vector<294x1xf32>
      %cst_18 = arith.constant 0.000000e+00 : f32
      %cst_19 = arith.constant 1.500000e+01 : f32
      %60 = vector.broadcast %cst_18 : f32 to vector<294x1xf32>
      %61 = arith.maximumf %60, %52 : vector<294x1xf32>
      %62 = vector.broadcast %cst_19 : f32 to vector<294x1xf32>
      %63 = arith.minimumf %62, %61 : vector<294x1xf32>
      %64 = vector.broadcast %63 : vector<294x1xf32> to vector<294x256xf32>
      %65 = vector.broadcast %22 : vector<1x256xf32> to vector<294x256xf32>
      %66 = arith.subf %64, %65 : vector<294x256xf32>
      %67 = math.absf %66 : vector<294x256xf32>
      %cst_20 = arith.constant 1.000000e+00 : f32
      %68 = vector.broadcast %cst_20 : f32 to vector<294x256xf32>
      %69 = arith.subf %68, %67 : vector<294x256xf32>
      %cst_21 = arith.constant 0.000000e+00 : f32
      %70 = vector.broadcast %cst_21 : f32 to vector<294x256xf32>
      %71 = arith.maximumf %69, %70 : vector<294x256xf32>
      %72 = vector.broadcast %59 : vector<294x1xf32> to vector<294x256xf32>
      %73 = arith.mulf %71, %72 : vector<294x256xf32>
      %74 = arith.addf %49, %73 : vector<294x256xf32>
      %cst_22 = arith.constant 0.000000e+00 : f32
      %75 = vector.broadcast %cst_22 : f32 to vector<294x256xf32>
      %cst_23 = arith.constant 5.000000e-01 : f32
      %76 = vector.broadcast %cst_23 : f32 to vector<294x1xf32>
      %77 = arith.mulf %76, %19 : vector<294x1xf32>
      %78 = arith.addf %17, %77 : vector<294x1xf32>
      %cst_24 = arith.constant -1.000000e+00 : f32
      %79 = vector.broadcast %cst_24 : f32 to vector<294x1xf32>
      %80 = arith.cmpf oge, %78, %79 : vector<294x1xf32>
      %cst_25 = arith.constant 1.600000e+01 : f32
      %81 = vector.broadcast %cst_25 : f32 to vector<294x1xf32>
      %82 = arith.cmpf ole, %78, %81 : vector<294x1xf32>
      %83 = arith.andi %80, %82 : vector<294x1xi1>
      %84 = arith.extui %83 : vector<294x1xi1> to vector<294x1xi32>
      %85 = arith.sitofp %84 : vector<294x1xi32> to vector<294x1xf32>
      %cst_26 = arith.constant 0.000000e+00 : f32
      %cst_27 = arith.constant 1.500000e+01 : f32
      %86 = vector.broadcast %cst_26 : f32 to vector<294x1xf32>
      %87 = arith.maximumf %86, %78 : vector<294x1xf32>
      %88 = vector.broadcast %cst_27 : f32 to vector<294x1xf32>
      %89 = arith.minimumf %88, %87 : vector<294x1xf32>
      %90 = vector.broadcast %89 : vector<294x1xf32> to vector<294x256xf32>
      %91 = vector.broadcast %23 : vector<1x256xf32> to vector<294x256xf32>
      %92 = arith.subf %90, %91 : vector<294x256xf32>
      %93 = math.absf %92 : vector<294x256xf32>
      %cst_28 = arith.constant 1.000000e+00 : f32
      %94 = vector.broadcast %cst_28 : f32 to vector<294x256xf32>
      %95 = arith.subf %94, %93 : vector<294x256xf32>
      %cst_29 = arith.constant 0.000000e+00 : f32
      %96 = vector.broadcast %cst_29 : f32 to vector<294x256xf32>
      %97 = arith.maximumf %95, %96 : vector<294x256xf32>
      %98 = vector.broadcast %85 : vector<294x1xf32> to vector<294x256xf32>
      %99 = arith.mulf %97, %98 : vector<294x256xf32>
      %100 = arith.addf %75, %99 : vector<294x256xf32>
      %cst_30 = arith.constant 1.500000e+00 : f32
      %101 = vector.broadcast %cst_30 : f32 to vector<294x1xf32>
      %102 = arith.mulf %101, %19 : vector<294x1xf32>
      %103 = arith.addf %17, %102 : vector<294x1xf32>
      %cst_31 = arith.constant -1.000000e+00 : f32
      %104 = vector.broadcast %cst_31 : f32 to vector<294x1xf32>
      %105 = arith.cmpf oge, %103, %104 : vector<294x1xf32>
      %cst_32 = arith.constant 1.600000e+01 : f32
      %106 = vector.broadcast %cst_32 : f32 to vector<294x1xf32>
      %107 = arith.cmpf ole, %103, %106 : vector<294x1xf32>
      %108 = arith.andi %105, %107 : vector<294x1xi1>
      %109 = arith.extui %108 : vector<294x1xi1> to vector<294x1xi32>
      %110 = arith.sitofp %109 : vector<294x1xi32> to vector<294x1xf32>
      %cst_33 = arith.constant 0.000000e+00 : f32
      %cst_34 = arith.constant 1.500000e+01 : f32
      %111 = vector.broadcast %cst_33 : f32 to vector<294x1xf32>
      %112 = arith.maximumf %111, %103 : vector<294x1xf32>
      %113 = vector.broadcast %cst_34 : f32 to vector<294x1xf32>
      %114 = arith.minimumf %113, %112 : vector<294x1xf32>
      %115 = vector.broadcast %114 : vector<294x1xf32> to vector<294x256xf32>
      %116 = vector.broadcast %23 : vector<1x256xf32> to vector<294x256xf32>
      %117 = arith.subf %115, %116 : vector<294x256xf32>
      %118 = math.absf %117 : vector<294x256xf32>
      %cst_35 = arith.constant 1.000000e+00 : f32
      %119 = vector.broadcast %cst_35 : f32 to vector<294x256xf32>
      %120 = arith.subf %119, %118 : vector<294x256xf32>
      %cst_36 = arith.constant 0.000000e+00 : f32
      %121 = vector.broadcast %cst_36 : f32 to vector<294x256xf32>
      %122 = arith.maximumf %120, %121 : vector<294x256xf32>
      %123 = vector.broadcast %110 : vector<294x1xf32> to vector<294x256xf32>
      %124 = arith.mulf %122, %123 : vector<294x256xf32>
      %125 = arith.addf %100, %124 : vector<294x256xf32>
      %cst_37 = arith.constant 2.500000e-01 : f32
      %126 = vector.broadcast %cst_37 : f32 to vector<294x256xf32>
      %127 = arith.mulf %125, %126 : vector<294x256xf32>
      %128 = arith.mulf %74, %127 : vector<294x256xf32>
      %129 = arith.truncf %128 : vector<294x256xf32> to vector<294x256xbf16>
      %c0_38 = arith.constant 0 : index
      %c0_39 = arith.constant 0 : index
      %c0_40 = arith.constant 0 : index
      %130 = vector.load %arg6[%c0_38, %c0_39, %c0_40] : memref<1x4x256xbf16, #tpu.memory_space<vmem>>, vector<1x4x256xbf16>
      %131 = vector.shape_cast %130 : vector<1x4x256xbf16> to vector<4x256xbf16>
      %c0_41 = arith.constant 0 : index
      %c0_42 = arith.constant 0 : index
      %132 = vector.load %arg9[%c0_41, %c0_42] : memref<294x4xf32, #tpu.memory_space<vmem>>, vector<294x4xf32>
      %cst_43 = arith.constant dense<0.000000e+00> : vector<294x4xf32>
      %133 = tpu.matmul %129, %131, %cst_43 {dimension_numbers = #tpu.dot_dimension_numbers<[1], [1], [0], [0], [0, 0, 1, 0], [], []>} : vector<294x256xbf16>, vector<4x256xbf16>, vector<294x4xf32> -> vector<294x4xf32>
      %134 = arith.addf %132, %133 : vector<294x4xf32>
      %c0_44 = arith.constant 0 : index
      %c0_45 = arith.constant 0 : index
      %135 = vector.load %arg9[%c0_44, %c0_45] : memref<294x4xf32, #tpu.memory_space<vmem>>, vector<294x4xf32>
      tpu.vector_store %arg9[%c0_44, %c0_45], %134 {strides = array<i32>} : memref<294x4xf32, #tpu.memory_space<vmem>>, vector<294x4xf32>,
    } else {
    }
    %c0_i32_2 = arith.constant 0 : i32
    %12 = arith.cmpi eq, %arg1, %c0_i32_2 : i32
    %13 = arith.extui %12 : i1 to i32
    %c0_i32_3 = arith.constant 0 : i32
    %14 = arith.cmpi ne, %13, %c0_i32_3 : i32
    scf.if %14 {
      %c0 = arith.constant 0 : index
      %c0_4 = arith.constant 0 : index
      %15 = vector.load %arg9[%c0, %c0_4] : memref<294x4xf32, #tpu.memory_space<vmem>>, vector<294x4xf32>
      %c0_5 = arith.constant 0 : index
      %c0_6 = arith.constant 0 : index
      %c0_7 = arith.constant 0 : index
      %16 = vector.load %arg8[%c0_5, %c0_6, %c0_7] : memref<1x294x4xf32, #tpu.memory_space<vmem>>, vector<1x294x4xf32>
      %17 = vector.shape_cast %16 : vector<1x294x4xf32> to vector<294x4xf32>
      %18 = vector.shape_cast %15 : vector<294x4xf32> to vector<1x294x4xf32>
      tpu.vector_store %arg8[%c0_5, %c0_6, %c0_7], %18 {strides = array<i32>} : memref<1x294x4xf32, #tpu.memory_space<vmem>>, vector<1x294x4xf32>,
    } else {
    }
    return
  }
  func.func @transform_0(%arg0: i32, %arg1: i32, %arg2: memref<3xi32, #tpu.memory_space<smem>>, %arg3: memref<3xi32, #tpu.memory_space<smem>>, %arg4: memref<3xi32, #tpu.memory_space<smem>>) -> (i32, i32, i32) {
    %c0_i32 = arith.constant 0 : i32
    %c0_i32_0 = arith.constant 0 : i32
    %c0_i32_1 = arith.constant 0 : i32
    return %arg0, %c0_i32, %c0_i32_0 : i32, i32, i32
  }
  func.func @transform_1(%arg0: i32, %arg1: i32, %arg2: memref<3xi32, #tpu.memory_space<smem>>, %arg3: memref<3xi32, #tpu.memory_space<smem>>, %arg4: memref<3xi32, #tpu.memory_space<smem>>) -> (i32, i32, i32) {
    %0 = arith.index_cast %arg0 : i32 to index
    %1 = memref.load %arg3[%0] : memref<3xi32, #tpu.memory_space<smem>>
    %2 = arith.maxsi %arg1, %1 : i32
    %3 = arith.index_cast %arg0 : i32 to index
    %4 = memref.load %arg4[%3] : memref<3xi32, #tpu.memory_space<smem>>
    %5 = arith.minsi %2, %4 : i32
    %6 = arith.index_cast %arg0 : i32 to index
    %7 = memref.load %arg2[%6] : memref<3xi32, #tpu.memory_space<smem>>
    %c0_i32 = arith.constant 0 : i32
    %c0_i32_0 = arith.constant 0 : i32
    return %7, %c0_i32, %5 : i32, i32, i32
  }
  func.func @transform_2(%arg0: i32, %arg1: i32, %arg2: memref<3xi32, #tpu.memory_space<smem>>, %arg3: memref<3xi32, #tpu.memory_space<smem>>, %arg4: memref<3xi32, #tpu.memory_space<smem>>) -> (i32, i32) {
    %0 = arith.index_cast %arg0 : i32 to index
    %1 = memref.load %arg3[%0] : memref<3xi32, #tpu.memory_space<smem>>
    %2 = arith.maxsi %arg1, %1 : i32
    %3 = arith.index_cast %arg0 : i32 to index
    %4 = memref.load %arg4[%3] : memref<3xi32, #tpu.memory_space<smem>>
    %5 = arith.minsi %2, %4 : i32
    %c0_i32 = arith.constant 0 : i32
    %c0_i32_0 = arith.constant 0 : i32
    return %c0_i32, %5 : i32, i32
  }
  func.func @transform_3(%arg0: i32, %arg1: i32, %arg2: memref<3xi32, #tpu.memory_space<smem>>, %arg3: memref<3xi32, #tpu.memory_space<smem>>, %arg4: memref<3xi32, #tpu.memory_space<smem>>) -> (i32, i32, i32) {
    %c0_i32 = arith.constant 0 : i32
    %c0_i32_0 = arith.constant 0 : i32
    %c0_i32_1 = arith.constant 0 : i32
    return %arg0, %c0_i32, %c0_i32_0 : i32, i32, i32
  }
}

module attributes {stable_mosaic.version = 11 : i64} {
  func.func @_linear_kernel(%arg0: i32, %arg1: i32, %arg2: i32, %arg3: memref<8x256xbf16, #tpu.memory_space<vmem>>, %arg4: memref<256x256xbf16, #tpu.memory_space<vmem>>, %arg5: memref<1x256xf32, #tpu.memory_space<vmem>>, %arg6: memref<8x256xf32, #tpu.memory_space<vmem>>, %arg7: memref<8x256xf32, #tpu.memory_space<vmem>>) attributes {dimension_semantics = [#tpu.dimension_semantics<parallel>, #tpu.dimension_semantics<parallel>, #tpu.dimension_semantics<arbitrary>], iteration_bounds = array<i64: 1, 4, 1>, scalar_prefetch = 0 : i64, scratch_operands = 1 : i64, tpu.core_type = #tpu.core_type<tc>, window_params = [{transform_indices = @transform_0, window_bounds = array<i64: 8, 256>}, {transform_indices = @transform_1, window_bounds = array<i64: 256, 256>}, {transform_indices = @transform_2, window_bounds = array<i64: 1, 256>}, {transform_indices = @transform_3, window_bounds = array<i64: 8, 256>}]} {
    %c0_i32 = arith.constant 0 : i32
    %0 = arith.cmpi eq, %arg2, %c0_i32 : i32
    %1 = arith.extui %0 : i1 to i32
    %c0_i32_0 = arith.constant 0 : i32
    %2 = arith.cmpi ne, %1, %c0_i32_0 : i32
    scf.if %2 {
      %cst_10 = arith.constant 0.000000e+00 : f32
      %12 = vector.broadcast %cst_10 : f32 to vector<8x256xf32>
      %c0_11 = arith.constant 0 : index
      %c0_12 = arith.constant 0 : index
      %13 = vector.load %arg7[%c0_11, %c0_12] : memref<8x256xf32, #tpu.memory_space<vmem>>, vector<8x256xf32>
      tpu.vector_store %arg7[%c0_11, %c0_12], %12 {strides = array<i32>} : memref<8x256xf32, #tpu.memory_space<vmem>>, vector<8x256xf32>,
    } else {
    }
    %c0 = arith.constant 0 : index
    %c0_1 = arith.constant 0 : index
    %3 = vector.load %arg7[%c0, %c0_1] : memref<8x256xf32, #tpu.memory_space<vmem>>, vector<8x256xf32>
    %c0_2 = arith.constant 0 : index
    %c0_3 = arith.constant 0 : index
    %4 = vector.load %arg3[%c0_2, %c0_3] : memref<8x256xbf16, #tpu.memory_space<vmem>>, vector<8x256xbf16>
    %c0_4 = arith.constant 0 : index
    %c0_5 = arith.constant 0 : index
    %5 = vector.load %arg4[%c0_4, %c0_5] : memref<256x256xbf16, #tpu.memory_space<vmem>>, vector<256x256xbf16>
    %cst = arith.constant dense<0.000000e+00> : vector<8x256xf32>
    %6 = tpu.matmul %4, %5, %cst {dimension_numbers = #tpu.dot_dimension_numbers<[1], [0], [0], [1], [0, 0, 1, 1], [], []>} : vector<8x256xbf16>, vector<256x256xbf16>, vector<8x256xf32> -> vector<8x256xf32>
    %7 = arith.addf %3, %6 : vector<8x256xf32>
    %c0_6 = arith.constant 0 : index
    %c0_7 = arith.constant 0 : index
    %8 = vector.load %arg7[%c0_6, %c0_7] : memref<8x256xf32, #tpu.memory_space<vmem>>, vector<8x256xf32>
    tpu.vector_store %arg7[%c0_6, %c0_7], %7 {strides = array<i32>} : memref<8x256xf32, #tpu.memory_space<vmem>>, vector<8x256xf32>,
    %c0_i32_8 = arith.constant 0 : i32
    %9 = arith.cmpi eq, %arg2, %c0_i32_8 : i32
    %10 = arith.extui %9 : i1 to i32
    %c0_i32_9 = arith.constant 0 : i32
    %11 = arith.cmpi ne, %10, %c0_i32_9 : i32
    scf.if %11 {
      %c0_10 = arith.constant 0 : index
      %c0_11 = arith.constant 0 : index
      %12 = vector.load %arg7[%c0_10, %c0_11] : memref<8x256xf32, #tpu.memory_space<vmem>>, vector<8x256xf32>
      %c0_12 = arith.constant 0 : index
      %c0_13 = arith.constant 0 : index
      %13 = vector.load %arg5[%c0_12, %c0_13] : memref<1x256xf32, #tpu.memory_space<vmem>>, vector<1x256xf32>
      %14 = vector.broadcast %13 : vector<1x256xf32> to vector<8x256xf32>
      %15 = arith.addf %12, %14 : vector<8x256xf32>
      %cst_14 = arith.constant 0.000000e+00 : f32
      %16 = vector.broadcast %cst_14 : f32 to vector<8x256xf32>
      %17 = arith.maximumf %15, %16 : vector<8x256xf32>
      %c0_15 = arith.constant 0 : index
      %c0_16 = arith.constant 0 : index
      %18 = vector.load %arg6[%c0_15, %c0_16] : memref<8x256xf32, #tpu.memory_space<vmem>>, vector<8x256xf32>
      tpu.vector_store %arg6[%c0_15, %c0_16], %17 {strides = array<i32>} : memref<8x256xf32, #tpu.memory_space<vmem>>, vector<8x256xf32>,
    } else {
    }
    return
  }
  func.func @transform_0(%arg0: i32, %arg1: i32, %arg2: i32) -> (i32, i32) {
    %c0_i32 = arith.constant 0 : i32
    return %arg0, %arg2 : i32, i32
  }
  func.func @transform_1(%arg0: i32, %arg1: i32, %arg2: i32) -> (i32, i32) {
    %c0_i32 = arith.constant 0 : i32
    return %arg2, %arg1 : i32, i32
  }
  func.func @transform_2(%arg0: i32, %arg1: i32, %arg2: i32) -> (i32, i32) {
    %c0_i32 = arith.constant 0 : i32
    %c0_i32_0 = arith.constant 0 : i32
    return %c0_i32, %arg1 : i32, i32
  }
  func.func @transform_3(%arg0: i32, %arg1: i32, %arg2: i32) -> (i32, i32) {
    %c0_i32 = arith.constant 0 : i32
    return %arg0, %arg1 : i32, i32
  }
}

module attributes {stable_mosaic.version = 11 : i64} {
  func.func @_linear_kernel(%arg0: i32, %arg1: i32, %arg2: i32, %arg3: memref<8x512xbf16, #tpu.memory_space<vmem>>, %arg4: memref<512x256xbf16, #tpu.memory_space<vmem>>, %arg5: memref<1x256xf32, #tpu.memory_space<vmem>>, %arg6: memref<8x256xf32, #tpu.memory_space<vmem>>, %arg7: memref<8x256xf32, #tpu.memory_space<vmem>>) attributes {dimension_semantics = [#tpu.dimension_semantics<parallel>, #tpu.dimension_semantics<parallel>, #tpu.dimension_semantics<arbitrary>], iteration_bounds = array<i64: 1, 4, 2>, scalar_prefetch = 0 : i64, scratch_operands = 1 : i64, tpu.core_type = #tpu.core_type<tc>, window_params = [{transform_indices = @transform_0, window_bounds = array<i64: 8, 512>}, {transform_indices = @transform_1, window_bounds = array<i64: 512, 256>}, {transform_indices = @transform_2, window_bounds = array<i64: 1, 256>}, {transform_indices = @transform_3, window_bounds = array<i64: 8, 256>}]} {
    %c0_i32 = arith.constant 0 : i32
    %0 = arith.cmpi eq, %arg2, %c0_i32 : i32
    %1 = arith.extui %0 : i1 to i32
    %c0_i32_0 = arith.constant 0 : i32
    %2 = arith.cmpi ne, %1, %c0_i32_0 : i32
    scf.if %2 {
      %cst_9 = arith.constant 0.000000e+00 : f32
      %12 = vector.broadcast %cst_9 : f32 to vector<8x256xf32>
      %c0_10 = arith.constant 0 : index
      %c0_11 = arith.constant 0 : index
      %13 = vector.load %arg7[%c0_10, %c0_11] : memref<8x256xf32, #tpu.memory_space<vmem>>, vector<8x256xf32>
      tpu.vector_store %arg7[%c0_10, %c0_11], %12 {strides = array<i32>} : memref<8x256xf32, #tpu.memory_space<vmem>>, vector<8x256xf32>,
    } else {
    }
    %c0 = arith.constant 0 : index
    %c0_1 = arith.constant 0 : index
    %3 = vector.load %arg7[%c0, %c0_1] : memref<8x256xf32, #tpu.memory_space<vmem>>, vector<8x256xf32>
    %c0_2 = arith.constant 0 : index
    %c0_3 = arith.constant 0 : index
    %4 = vector.load %arg3[%c0_2, %c0_3] : memref<8x512xbf16, #tpu.memory_space<vmem>>, vector<8x512xbf16>
    %c0_4 = arith.constant 0 : index
    %c0_5 = arith.constant 0 : index
    %5 = vector.load %arg4[%c0_4, %c0_5] : memref<512x256xbf16, #tpu.memory_space<vmem>>, vector<512x256xbf16>
    %cst = arith.constant dense<0.000000e+00> : vector<8x256xf32>
    %6 = tpu.matmul %4, %5, %cst {dimension_numbers = #tpu.dot_dimension_numbers<[1], [0], [0], [1], [0, 0, 1, 1], [], []>} : vector<8x512xbf16>, vector<512x256xbf16>, vector<8x256xf32> -> vector<8x256xf32>
    %7 = arith.addf %3, %6 : vector<8x256xf32>
    %c0_6 = arith.constant 0 : index
    %c0_7 = arith.constant 0 : index
    %8 = vector.load %arg7[%c0_6, %c0_7] : memref<8x256xf32, #tpu.memory_space<vmem>>, vector<8x256xf32>
    tpu.vector_store %arg7[%c0_6, %c0_7], %7 {strides = array<i32>} : memref<8x256xf32, #tpu.memory_space<vmem>>, vector<8x256xf32>,
    %c1_i32 = arith.constant 1 : i32
    %9 = arith.cmpi eq, %arg2, %c1_i32 : i32
    %10 = arith.extui %9 : i1 to i32
    %c0_i32_8 = arith.constant 0 : i32
    %11 = arith.cmpi ne, %10, %c0_i32_8 : i32
    scf.if %11 {
      %c0_9 = arith.constant 0 : index
      %c0_10 = arith.constant 0 : index
      %12 = vector.load %arg7[%c0_9, %c0_10] : memref<8x256xf32, #tpu.memory_space<vmem>>, vector<8x256xf32>
      %c0_11 = arith.constant 0 : index
      %c0_12 = arith.constant 0 : index
      %13 = vector.load %arg5[%c0_11, %c0_12] : memref<1x256xf32, #tpu.memory_space<vmem>>, vector<1x256xf32>
      %14 = vector.broadcast %13 : vector<1x256xf32> to vector<8x256xf32>
      %15 = arith.addf %12, %14 : vector<8x256xf32>
      %cst_13 = arith.constant 0.000000e+00 : f32
      %16 = vector.broadcast %cst_13 : f32 to vector<8x256xf32>
      %17 = arith.maximumf %15, %16 : vector<8x256xf32>
      %c0_14 = arith.constant 0 : index
      %c0_15 = arith.constant 0 : index
      %18 = vector.load %arg6[%c0_14, %c0_15] : memref<8x256xf32, #tpu.memory_space<vmem>>, vector<8x256xf32>
      tpu.vector_store %arg6[%c0_14, %c0_15], %17 {strides = array<i32>} : memref<8x256xf32, #tpu.memory_space<vmem>>, vector<8x256xf32>,
    } else {
    }
    return
  }
  func.func @transform_0(%arg0: i32, %arg1: i32, %arg2: i32) -> (i32, i32) {
    %c0_i32 = arith.constant 0 : i32
    return %arg0, %arg2 : i32, i32
  }
  func.func @transform_1(%arg0: i32, %arg1: i32, %arg2: i32) -> (i32, i32) {
    %c0_i32 = arith.constant 0 : i32
    return %arg2, %arg1 : i32, i32
  }
  func.func @transform_2(%arg0: i32, %arg1: i32, %arg2: i32) -> (i32, i32) {
    %c0_i32 = arith.constant 0 : i32
    %c0_i32_0 = arith.constant 0 : i32
    return %c0_i32, %arg1 : i32, i32
  }
  func.func @transform_3(%arg0: i32, %arg1: i32, %arg2: i32) -> (i32, i32) {
    %c0_i32 = arith.constant 0 : i32
    return %arg0, %arg1 : i32, i32
  }
}

module attributes {stable_mosaic.version = 11 : i64} {
  func.func @_linear_kernel(%arg0: i32, %arg1: i32, %arg2: i32, %arg3: memref<8x512xbf16, #tpu.memory_space<vmem>>, %arg4: memref<512x128xbf16, #tpu.memory_space<vmem>>, %arg5: memref<1x128xf32, #tpu.memory_space<vmem>>, %arg6: memref<8x128xf32, #tpu.memory_space<vmem>>, %arg7: memref<8x128xf32, #tpu.memory_space<vmem>>) attributes {dimension_semantics = [#tpu.dimension_semantics<parallel>, #tpu.dimension_semantics<parallel>, #tpu.dimension_semantics<arbitrary>], iteration_bounds = array<i64: 1, 1, 2>, scalar_prefetch = 0 : i64, scratch_operands = 1 : i64, tpu.core_type = #tpu.core_type<tc>, window_params = [{transform_indices = @transform_0, window_bounds = array<i64: 8, 512>}, {transform_indices = @transform_1, window_bounds = array<i64: 512, 128>}, {transform_indices = @transform_2, window_bounds = array<i64: 1, 128>}, {transform_indices = @transform_3, window_bounds = array<i64: 8, 128>}]} {
    %c0_i32 = arith.constant 0 : i32
    %0 = arith.cmpi eq, %arg2, %c0_i32 : i32
    %1 = arith.extui %0 : i1 to i32
    %c0_i32_0 = arith.constant 0 : i32
    %2 = arith.cmpi ne, %1, %c0_i32_0 : i32
    scf.if %2 {
      %cst_9 = arith.constant 0.000000e+00 : f32
      %12 = vector.broadcast %cst_9 : f32 to vector<8x128xf32>
      %c0_10 = arith.constant 0 : index
      %c0_11 = arith.constant 0 : index
      %13 = vector.load %arg7[%c0_10, %c0_11] : memref<8x128xf32, #tpu.memory_space<vmem>>, vector<8x128xf32>
      tpu.vector_store %arg7[%c0_10, %c0_11], %12 {strides = array<i32>} : memref<8x128xf32, #tpu.memory_space<vmem>>, vector<8x128xf32>,
    } else {
    }
    %c0 = arith.constant 0 : index
    %c0_1 = arith.constant 0 : index
    %3 = vector.load %arg7[%c0, %c0_1] : memref<8x128xf32, #tpu.memory_space<vmem>>, vector<8x128xf32>
    %c0_2 = arith.constant 0 : index
    %c0_3 = arith.constant 0 : index
    %4 = vector.load %arg3[%c0_2, %c0_3] : memref<8x512xbf16, #tpu.memory_space<vmem>>, vector<8x512xbf16>
    %c0_4 = arith.constant 0 : index
    %c0_5 = arith.constant 0 : index
    %5 = vector.load %arg4[%c0_4, %c0_5] : memref<512x128xbf16, #tpu.memory_space<vmem>>, vector<512x128xbf16>
    %cst = arith.constant dense<0.000000e+00> : vector<8x128xf32>
    %6 = tpu.matmul %4, %5, %cst {dimension_numbers = #tpu.dot_dimension_numbers<[1], [0], [0], [1], [0, 0, 1, 1], [], []>} : vector<8x512xbf16>, vector<512x128xbf16>, vector<8x128xf32> -> vector<8x128xf32>
    %7 = arith.addf %3, %6 : vector<8x128xf32>
    %c0_6 = arith.constant 0 : index
    %c0_7 = arith.constant 0 : index
    %8 = vector.load %arg7[%c0_6, %c0_7] : memref<8x128xf32, #tpu.memory_space<vmem>>, vector<8x128xf32>
    tpu.vector_store %arg7[%c0_6, %c0_7], %7 {strides = array<i32>} : memref<8x128xf32, #tpu.memory_space<vmem>>, vector<8x128xf32>,
    %c1_i32 = arith.constant 1 : i32
    %9 = arith.cmpi eq, %arg2, %c1_i32 : i32
    %10 = arith.extui %9 : i1 to i32
    %c0_i32_8 = arith.constant 0 : i32
    %11 = arith.cmpi ne, %10, %c0_i32_8 : i32
    scf.if %11 {
      %c0_9 = arith.constant 0 : index
      %c0_10 = arith.constant 0 : index
      %12 = vector.load %arg7[%c0_9, %c0_10] : memref<8x128xf32, #tpu.memory_space<vmem>>, vector<8x128xf32>
      %c0_11 = arith.constant 0 : index
      %c0_12 = arith.constant 0 : index
      %13 = vector.load %arg5[%c0_11, %c0_12] : memref<1x128xf32, #tpu.memory_space<vmem>>, vector<1x128xf32>
      %14 = vector.broadcast %13 : vector<1x128xf32> to vector<8x128xf32>
      %15 = arith.addf %12, %14 : vector<8x128xf32>
      %c0_13 = arith.constant 0 : index
      %c0_14 = arith.constant 0 : index
      %16 = vector.load %arg6[%c0_13, %c0_14] : memref<8x128xf32, #tpu.memory_space<vmem>>, vector<8x128xf32>
      tpu.vector_store %arg6[%c0_13, %c0_14], %15 {strides = array<i32>} : memref<8x128xf32, #tpu.memory_space<vmem>>, vector<8x128xf32>,
    } else {
    }
    return
  }
  func.func @transform_0(%arg0: i32, %arg1: i32, %arg2: i32) -> (i32, i32) {
    %c0_i32 = arith.constant 0 : i32
    return %arg0, %arg2 : i32, i32
  }
  func.func @transform_1(%arg0: i32, %arg1: i32, %arg2: i32) -> (i32, i32) {
    %c0_i32 = arith.constant 0 : i32
    return %arg2, %arg1 : i32, i32
  }
  func.func @transform_2(%arg0: i32, %arg1: i32, %arg2: i32) -> (i32, i32) {
    %c0_i32 = arith.constant 0 : i32
    %c0_i32_0 = arith.constant 0 : i32
    return %c0_i32, %arg1 : i32, i32
  }
  func.func @transform_3(%arg0: i32, %arg1: i32, %arg2: i32) -> (i32, i32) {
    %c0_i32 = arith.constant 0 : i32
    return %arg0, %arg1 : i32, i32
  }
}

module attributes {stable_mosaic.version = 11 : i64} {
  func.func @_linear_kernel(%arg0: i32, %arg1: i32, %arg2: i32, %arg3: memref<8x256xbf16, #tpu.memory_space<vmem>>, %arg4: memref<256x128xbf16, #tpu.memory_space<vmem>>, %arg5: memref<1x128xf32, #tpu.memory_space<vmem>>, %arg6: memref<8x128xf32, #tpu.memory_space<vmem>>, %arg7: memref<8x128xf32, #tpu.memory_space<vmem>>) attributes {dimension_semantics = [#tpu.dimension_semantics<parallel>, #tpu.dimension_semantics<parallel>, #tpu.dimension_semantics<arbitrary>], iteration_bounds = array<i64: 1, 1, 1>, scalar_prefetch = 0 : i64, scratch_operands = 1 : i64, tpu.core_type = #tpu.core_type<tc>, window_params = [{transform_indices = @transform_0, window_bounds = array<i64: 8, 256>}, {transform_indices = @transform_1, window_bounds = array<i64: 256, 128>}, {transform_indices = @transform_2, window_bounds = array<i64: 1, 128>}, {transform_indices = @transform_3, window_bounds = array<i64: 8, 128>}]} {
    %c0_i32 = arith.constant 0 : i32
    %0 = arith.cmpi eq, %arg2, %c0_i32 : i32
    %1 = arith.extui %0 : i1 to i32
    %c0_i32_0 = arith.constant 0 : i32
    %2 = arith.cmpi ne, %1, %c0_i32_0 : i32
    scf.if %2 {
      %cst_10 = arith.constant 0.000000e+00 : f32
      %12 = vector.broadcast %cst_10 : f32 to vector<8x128xf32>
      %c0_11 = arith.constant 0 : index
      %c0_12 = arith.constant 0 : index
      %13 = vector.load %arg7[%c0_11, %c0_12] : memref<8x128xf32, #tpu.memory_space<vmem>>, vector<8x128xf32>
      tpu.vector_store %arg7[%c0_11, %c0_12], %12 {strides = array<i32>} : memref<8x128xf32, #tpu.memory_space<vmem>>, vector<8x128xf32>,
    } else {
    }
    %c0 = arith.constant 0 : index
    %c0_1 = arith.constant 0 : index
    %3 = vector.load %arg7[%c0, %c0_1] : memref<8x128xf32, #tpu.memory_space<vmem>>, vector<8x128xf32>
    %c0_2 = arith.constant 0 : index
    %c0_3 = arith.constant 0 : index
    %4 = vector.load %arg3[%c0_2, %c0_3] : memref<8x256xbf16, #tpu.memory_space<vmem>>, vector<8x256xbf16>
    %c0_4 = arith.constant 0 : index
    %c0_5 = arith.constant 0 : index
    %5 = vector.load %arg4[%c0_4, %c0_5] : memref<256x128xbf16, #tpu.memory_space<vmem>>, vector<256x128xbf16>
    %cst = arith.constant dense<0.000000e+00> : vector<8x128xf32>
    %6 = tpu.matmul %4, %5, %cst {dimension_numbers = #tpu.dot_dimension_numbers<[1], [0], [0], [1], [0, 0, 1, 1], [], []>} : vector<8x256xbf16>, vector<256x128xbf16>, vector<8x128xf32> -> vector<8x128xf32>
    %7 = arith.addf %3, %6 : vector<8x128xf32>
    %c0_6 = arith.constant 0 : index
    %c0_7 = arith.constant 0 : index
    %8 = vector.load %arg7[%c0_6, %c0_7] : memref<8x128xf32, #tpu.memory_space<vmem>>, vector<8x128xf32>
    tpu.vector_store %arg7[%c0_6, %c0_7], %7 {strides = array<i32>} : memref<8x128xf32, #tpu.memory_space<vmem>>, vector<8x128xf32>,
    %c0_i32_8 = arith.constant 0 : i32
    %9 = arith.cmpi eq, %arg2, %c0_i32_8 : i32
    %10 = arith.extui %9 : i1 to i32
    %c0_i32_9 = arith.constant 0 : i32
    %11 = arith.cmpi ne, %10, %c0_i32_9 : i32
    scf.if %11 {
      %c0_10 = arith.constant 0 : index
      %c0_11 = arith.constant 0 : index
      %12 = vector.load %arg7[%c0_10, %c0_11] : memref<8x128xf32, #tpu.memory_space<vmem>>, vector<8x128xf32>
      %c0_12 = arith.constant 0 : index
      %c0_13 = arith.constant 0 : index
      %13 = vector.load %arg5[%c0_12, %c0_13] : memref<1x128xf32, #tpu.memory_space<vmem>>, vector<1x128xf32>
      %14 = vector.broadcast %13 : vector<1x128xf32> to vector<8x128xf32>
      %15 = arith.addf %12, %14 : vector<8x128xf32>
      %cst_14 = arith.constant 0.000000e+00 : f32
      %16 = vector.broadcast %cst_14 : f32 to vector<8x128xf32>
      %17 = arith.subf %16, %15 : vector<8x128xf32>
      %18 = math.exp %17 : vector<8x128xf32>
      %cst_15 = arith.constant 1.000000e+00 : f32
      %19 = vector.broadcast %cst_15 : f32 to vector<8x128xf32>
      %20 = arith.addf %19, %18 : vector<8x128xf32>
      %cst_16 = arith.constant 1.000000e+00 : f32
      %21 = vector.broadcast %cst_16 : f32 to vector<8x128xf32>
      %22 = arith.divf %21, %20 : vector<8x128xf32>
      %c0_17 = arith.constant 0 : index
      %c0_18 = arith.constant 0 : index
      %23 = vector.load %arg6[%c0_17, %c0_18] : memref<8x128xf32, #tpu.memory_space<vmem>>, vector<8x128xf32>
      tpu.vector_store %arg6[%c0_17, %c0_18], %22 {strides = array<i32>} : memref<8x128xf32, #tpu.memory_space<vmem>>, vector<8x128xf32>,
    } else {
    }
    return
  }
  func.func @transform_0(%arg0: i32, %arg1: i32, %arg2: i32) -> (i32, i32) {
    %c0_i32 = arith.constant 0 : i32
    return %arg0, %arg2 : i32, i32
  }
  func.func @transform_1(%arg0: i32, %arg1: i32, %arg2: i32) -> (i32, i32) {
    %c0_i32 = arith.constant 0 : i32
    return %arg2, %arg1 : i32, i32
  }
  func.func @transform_2(%arg0: i32, %arg1: i32, %arg2: i32) -> (i32, i32) {
    %c0_i32 = arith.constant 0 : i32
    %c0_i32_0 = arith.constant 0 : i32
    return %c0_i32, %arg1 : i32, i32
  }
  func.func @transform_3(%arg0: i32, %arg1: i32, %arg2: i32) -> (i32, i32) {
    %c0_i32 = arith.constant 0 : i32
    return %arg0, %arg1 : i32, i32
  }
}

</mosaic_0001>

<bundles_post_ra>
// kernel: ge_deform_roi_pool_pack_forward.8
= control target key start
LH: loop header
LB: loop body
LE: loop exit
PB: predicated region body
PF: predicated region fallthrough
CT: control target
= control target key end

     0   :  { %s1103_s12 = smov 0   ;;  %s1105_s13 = smov 0   ;;  %s1308_s0 = inlined_call_operand.vmem [shape: bf16[8,256], index: 0, kind: input, shape index: {}]   ;;  %s1309_s1 = inlined_call_operand.vmem [shape: bf16[256,1024], index: 1, kind: input, shape index: {}]   ;;  %s1310_s2 = inlined_call_operand.vmem [shape: f32[1,1024], index: 2, kind: input, shape index: {}]   ;;  %s1311_s3 = inlined_call_operand.vmem [shape: f32[8,1024], index: 3, kind: output, shape index: {}]  }
   0x1   :  { %s1107_s14 = smov 0   ;;  %s1109_s15 = smov 0  }
   0x2   :  { %s1111_s16 = smov 0  }
   0x3 LB: > { %s28_s17 = sadd.s32 1, %s1077_s15  ;;  %p76_p1 = scmp.ne.s32.totalorder %s1069_s13, %s1065_s12  ;;  %s1081_s16 = sphi %s1111_s16, %s13_s16   ;;  %s1077_s15 = sphi %s1109_s15, %s1315_s15   ;;  %s1073_s14 = sphi %s1107_s14, %s1314_s14   ;;  %s1069_s13 = sphi %s1105_s13, %s1313_s13   ;;  %s1065_s12 = sphi %s1103_s12, %s1312_s12  }
   0x4   : > { %p30_p0 = scmp.ge.s32.totalorder %s28_s17, 4  ;;  %p77_p2 = scmp.eq.s32.totalorder %s1081_s16, 0 }
   0x5   : > { %s69_s19 = sadd.s32 1, %s1069_s13  ;;  %p831_p5 = scmp.ge.s32.totalorder %s1081_s16, 4 }
   0x6   : > { %s1317_s17 = smov (%p30_p0, %s28_s17), 0  ;;  %p78_p3 = por %p77_p2, %p76_p1 }
   0x7   : > { %s65_s18 = ssub.s32 %s1077_s15, %s1317_s17  ;;  %169 = sbr.rel (%p831_p5) target bundleno = 48 (0x30), region = 20 }
   0x8   : > { %p67_p4 = scmp.eq.s32.totalorder %s65_s18, 0 }
   0xa   : > { %s1138_s20 = scalar_select %p67_p4, %s1069_s13, %s69_s19  }
   0xc   : > { %172 = sbr.rel (!%p78_p3) target bundleno = 48 (0x30), region = 24  ;;  %s174_s21 = sand.u32 (%p78_p3), 1, %s1069_s13  }
   0xd   : > { %s970_s22 = sshll.u32 (%p78_p3), %s1077_s15, 3  ;;  %s832_s23 = sshll.u32 (%p78_p3), %s174_s21, 8 }
   0xe   : > { %s1146_s26 = scalar_lea.vmem (%p78_p3), %s1309_s1, %s970_s22  ;;  %s1151_s27 = scalar_lea.vmem (%p78_p3), [#allocation3], %s832_s23 }
   0xf   : > { %v273_v0 = vld [vmem:[%s1146_s26] sm:$0xff] (%p78_p3) }
  0x10   : > { %v275_v1 = vld [vmem:[%s1146_s26 + $0x20] sm:$0xff] (%p78_p3)  ;;  %274 = vst [vmem:[%s1151_s27] sm:$0xff] (%p78_p3), %v273_v0 }
  0x11   : > { %v277_v2 = vld [vmem:[%s1146_s26 + $0x40] sm:$0xff]  ;;  %276 = vst [vmem:[%s1151_s27 + $0x8] sm:$0xff] %v275_v1 }
  0x12   : > { %v279_v3 = vld [vmem:[%s1146_s26 + $0x60] sm:$0xff]  ;;  %278 = vst [vmem:[%s1151_s27 + $0x10] sm:$0xff] %v277_v2 }
  0x13   : > { %v281_v4 = vld [vmem:[%s1146_s26 + $0x80] sm:$0xff]  ;;  %280 = vst [vmem:[%s1151_s27 + $0x18] sm:$0xff] %v279_v3 }
  0x14   : > { %v283_v5 = vld [vmem:[%s1146_s26 + $0xa0] sm:$0xff]  ;;  %282 = vst [vmem:[%s1151_s27 + $0x20] sm:$0xff] %v281_v4 }
  0x15   : > { %v285_v6 = vld [vmem:[%s1146_s26 + $0xc0] sm:$0xff]  ;;  %284 = vst [vmem:[%s1151_s27 + $0x28] sm:$0xff] %v283_v5 }
  0x16   : > { %v287_v7 = vld [vmem:[%s1146_s26 + $0xe0] sm:$0xff]  ;;  %286 = vst [vmem:[%s1151_s27 + $0x30] sm:$0xff] %v285_v6 }
  0x17   : > { %v289_v8 = vld [vmem:[%s1146_s26 + $0x100] sm:$0xff]  ;;  %288 = vst [vmem:[%s1151_s27 + $0x38] sm:$0xff] %v287_v7 }
  0x18   : > { %v291_v9 = vld [vmem:[%s1146_s26 + $0x120] sm:$0xff]  ;;  %290 = vst [vmem:[%s1151_s27 + $0x40] sm:$0xff] %v289_v8 }
  0x19   : > { %v293_v10 = vld [vmem:[%s1146_s26 + $0x140] sm:$0xff]  ;;  %292 = vst [vmem:[%s1151_s27 + $0x48] sm:$0xff] %v291_v9 }
  0x1a   : > { %v295_v11 = vld [vmem:[%s1146_s26 + $0x160] sm:$0xff]  ;;  %294 = vst [vmem:[%s1151_s27 + $0x50] sm:$0xff] %v293_v10 }
  0x1b   : > { %v297_v12 = vld [vmem:[%s1146_s26 + $0x180] sm:$0xff]  ;;  %296 = vst [vmem:[%s1151_s27 + $0x58] sm:$0xff] %v295_v11 }
  0x1c   : > { %v299_v13 = vld [vmem:[%s1146_s26 + $0x1a0] sm:$0xff]  ;;  %298 = vst [vmem:[%s1151_s27 + $0x60] sm:$0xff] %v297_v12 }
  0x1d   : > { %v301_v14 = vld [vmem:[%s1146_s26 + $0x1c0] sm:$0xff]  ;;  %300 = vst [vmem:[%s1151_s27 + $0x68] sm:$0xff] %v299_v13 }
  0x1e   : > { %v303_v15 = vld [vmem:[%s1146_s26 + $0x1e0] sm:$0xff]  ;;  %302 = vst [vmem:[%s1151_s27 + $0x70] sm:$0xff] %v301_v14 }
  0x1f   : > { %v305_v16 = vld [vmem:[%s1146_s26 + $0x200] sm:$0xff]  ;;  %304 = vst [vmem:[%s1151_s27 + $0x78] sm:$0xff] %v303_v15 }
  0x20   : > { %v307_v17 = vld [vmem:[%s1146_s26 + $0x220] sm:$0xff]  ;;  %306 = vst [vmem:[%s1151_s27 + $0x80] sm:$0xff] %v305_v16 }
  0x21   : > { %v309_v18 = vld [vmem:[%s1146_s26 + $0x240] sm:$0xff]  ;;  %308 = vst [vmem:[%s1151_s27 + $0x88] sm:$0xff] %v307_v17 }
  0x22   : > { %v311_v19 = vld [vmem:[%s1146_s26 + $0x260] sm:$0xff]  ;;  %310 = vst [vmem:[%s1151_s27 + $0x90] sm:$0xff] %v309_v18 }
  0x23   : > { %v313_v20 = vld [vmem:[%s1146_s26 + $0x280] sm:$0xff]  ;;  %312 = vst [vmem:[%s1151_s27 + $0x98] sm:$0xff] %v311_v19 }
  0x24   : > { %v315_v21 = vld [vmem:[%s1146_s26 + $0x2a0] sm:$0xff]  ;;  %314 = vst [vmem:[%s1151_s27 + $0xa0] sm:$0xff] %v313_v20 }
  0x25   : > { %v317_v22 = vld [vmem:[%s1146_s26 + $0x2c0] sm:$0xff]  ;;  %316 = vst [vmem:[%s1151_s27 + $0xa8] sm:$0xff] %v315_v21 }
  0x26   : > { %v319_v23 = vld [vmem:[%s1146_s26 + $0x2e0] sm:$0xff]  ;;  %318 = vst [vmem:[%s1151_s27 + $0xb0] sm:$0xff] %v317_v22 }
  0x27   : > { %v321_v24 = vld [vmem:[%s1146_s26 + $0x300] sm:$0xff]  ;;  %320 = vst [vmem:[%s1151_s27 + $0xb8] sm:$0xff] %v319_v23 }
  0x28   : > { %v323_v25 = vld [vmem:[%s1146_s26 + $0x320] sm:$0xff]  ;;  %322 = vst [vmem:[%s1151_s27 + $0xc0] sm:$0xff] %v321_v24 }
  0x29   : > { %v325_v26 = vld [vmem:[%s1146_s26 + $0x340] sm:$0xff]  ;;  %324 = vst [vmem:[%s1151_s27 + $0xc8] sm:$0xff] %v323_v25 }
  0x2a   : > { %v327_v27 = vld [vmem:[%s1146_s26 + $0x360] sm:$0xff]  ;;  %326 = vst [vmem:[%s1151_s27 + $0xd0] sm:$0xff] %v325_v26 }
  0x2b   : > { %v329_v28 = vld [vmem:[%s1146_s26 + $0x380] sm:$0xff]  ;;  %328 = vst [vmem:[%s1151_s27 + $0xd8] sm:$0xff] %v327_v27 }
  0x2c   : > { %v331_v29 = vld [vmem:[%s1146_s26 + $0x3a0] sm:$0xff]  ;;  %330 = vst [vmem:[%s1151_s27 + $0xe0] sm:$0xff] %v329_v28 }
  0x2d   : > { %v333_v30 = vld [vmem:[%s1146_s26 + $0x3c0] sm:$0xff]  ;;  %332 = vst [vmem:[%s1151_s27 + $0xe8] sm:$0xff] %v331_v29 }
  0x2e   : > { %v335_v31 = vld [vmem:[%s1146_s26 + $0x3e0] sm:$0xff]  ;;  %334 = vst [vmem:[%s1151_s27 + $0xf0] sm:$0xff] %v333_v30 }
  0x2f   : > { %336 = vst [vmem:[%s1151_s27 + $0xf8] sm:$0xff] %v335_v31 }
  0x30 PF: > { %p835_p6 = scmp.ge.s32.totalorder %s1081_s16, 1  ;;  %p349_p7 = scmp.lt.s32.totalorder %s1081_s16, 5 }
  0x32   : > { %p350_p8 = pnand %p835_p6, %p349_p7 }
  0x33   : > { %s356_s28 = sand.u32 (!%p350_p8), 1, %s1065_s12   ;;  %s837_s6 = sshll.u32 (!%p350_p8), %s1073_s14, 1 }
  0x34   : > { %353 = sbr.rel (%p350_p8) target bundleno = 233 (0xe9), region = 66  ;;  %s836_s29 = sshll.u32 (!%p350_p8), %s356_s28, 8 }
  0x35   : > { %s1217_s30 = scalar_lea.vmem (!%p350_p8), [#allocation3], %s836_s29  ;;  %p409_p9 = scmp.lt.s32.totalorder (!%p350_p8), %s837_s6, 7 }
  0x39   : > { %v898_v32 = vld [vmem:[%s1217_s30 + $0x70] sm:$0xf]  ;;  %v986_v33 = vld [vmem:[%s1217_s30 + $0x74] sm:$0xf0]  ;;  %v985_v37 = vld [vmem:[%s1217_s30 + $0x74] sm:$0xf] }
  0x3a   : > { %v962_v34 = vld [vmem:[%s1217_s30 + $0xf0] sm:$0xf]  ;;  %v899_v35 = vor.u32 %v986_v33, %v898_v32  ;;  %v1002_v36 = vld [vmem:[%s1217_s30 + $0xf4] sm:$0xf0]  ;;  %v900_v38 = vld [vmem:[%s1217_s30 + $0x78] sm:$0xf0] }
  0x3b   : > { %v963_v39 = vor.u32 %v1002_v36, %v962_v34  ;;  %v903_v40 = vor.u32 %v985_v37, %v900_v38  ;;  %v1001_v41 = vld [vmem:[%s1217_s30 + $0xf4] sm:$0xf]  ;;  %v964_v42 = vld [vmem:[%s1217_s30 + $0xf8] sm:$0xf0]  ;;  %v890_v43 = vld [vmem:[%s1217_s30 + $0x60] sm:$0xf] }
  0x3c   : > { %631 = vmatpush.bf16.msra.mxu0 %v899_v35  ;;  %v967_v44 = vor.u32 %v1001_v41, %v964_v42  ;;  %v984_v45 = vld [vmem:[%s1217_s30 + $0x64] sm:$0xf0]  ;;  %v954_v46 = vld [vmem:[%s1217_s30 + $0xe0] sm:$0xf]  ;;  %v983_v50 = vld [vmem:[%s1217_s30 + $0x64] sm:$0xf] }
  0x3d   : > { %v1000_v47 = vld [vmem:[%s1217_s30 + $0xe4] sm:$0xf0]  ;;  %644 = vmatpush.bf16.msra.mxu1 %v963_v39  ;;  %657 = vmatpush.bf16.msra.mxu2 %v903_v40  ;;  %v891_v48 = vor.u32 %v984_v45, %v890_v43  ;;  %v892_v51 = vld [vmem:[%s1217_s30 + $0x68] sm:$0xf0]  ;;  %v999_v52 = vld [vmem:[%s1217_s30 + $0xe4] sm:$0xf] }
  0x3e   : > { %v955_v49 = vor.u32 %v1000_v47, %v954_v46  ;;  %670 = vmatpush.bf16.msra.mxu3 %v967_v44  ;;  %v895_v53 = vor.u32 %v983_v50, %v892_v51  ;;  %v956_v54 = vld [vmem:[%s1217_s30 + $0xe8] sm:$0xf0]  ;;  %v882_v55 = vld [vmem:[%s1217_s30 + $0x50] sm:$0xf]  ;;  %v982_v56 = vld [vmem:[%s1217_s30 + $0x54] sm:$0xf0] }
  0x3f   : > { %v959_v57 = vor.u32 %v999_v52, %v956_v54  ;;  %v946_v58 = vld [vmem:[%s1217_s30 + $0xd0] sm:$0xf]  ;;  %v998_v59 = vld [vmem:[%s1217_s30 + $0xd4] sm:$0xf0]  ;;  %v981_v60 = vld [vmem:[%s1217_s30 + $0x54] sm:$0xf]  ;;  %v883_v61 = vor.u32 %v982_v56, %v882_v55 }
  0x40   : > { %632 = vmatpush.bf16.msra.mxu0 %v891_v48  ;;  %v884_v62 = vld [vmem:[%s1217_s30 + $0x58] sm:$0xf0]  ;;  %v997_v63 = vld [vmem:[%s1217_s30 + $0xd4] sm:$0xf]  ;;  %v947_v1 = vor.u32 %v998_v59, %v946_v58  ;;  %v874_v3 = vld [vmem:[%s1217_s30 + $0x40] sm:$0xf] }
  0x41   : > { %v948_v0 = vld [vmem:[%s1217_s30 + $0xd8] sm:$0xf0]  ;;  %645 = vmatpush.bf16.msra.mxu1 %v955_v49  ;;  %658 = vmatpush.bf16.msra.mxu2 %v895_v53  ;;  %v887_v2 = vor.u32 %v981_v60, %v884_v62  ;;  %v980_v4 = vld [vmem:[%s1217_s30 + $0x44] sm:$0xf0]  ;;  %v938_v5 = vld [vmem:[%s1217_s30 + $0xc0] sm:$0xf] }
  0x42   : > { %671 = vmatpush.bf16.msra.mxu3 %v959_v57  ;;  %v951_v6 = vor.u32 %v997_v63, %v948_v0  ;;  %v996_v7 = vld [vmem:[%s1217_s30 + $0xc4] sm:$0xf0]  ;;  %v979_v8 = vld [vmem:[%s1217_s30 + $0x44] sm:$0xf]  ;;  %v876_v9 = vld [vmem:[%s1217_s30 + $0x48] sm:$0xf0]  ;;  %v875_v12 = vor.u32 %v980_v4, %v874_v3 }
  0x43   : > { %v995_v10 = vld [vmem:[%s1217_s30 + $0xc4] sm:$0xf]  ;;  %v940_v11 = vld [vmem:[%s1217_s30 + $0xc8] sm:$0xf0]  ;;  %v939_v13 = vor.u32 %v996_v7, %v938_v5  ;;  %v879_v14 = vor.u32 %v979_v8, %v876_v9  ;;  %v866_v15 = vld [vmem:[%s1217_s30 + $0x30] sm:$0xf] }
  0x44   : > { %633 = vmatpush.bf16.msra.mxu0 %v883_v61  ;;  %v978_v16 = vld [vmem:[%s1217_s30 + $0x34] sm:$0xf0]  ;;  %v930_v17 = vld [vmem:[%s1217_s30 + $0xb0] sm:$0xf]  ;;  %v943_v18 = vor.u32 %v995_v10, %v940_v11  ;;  %v977_v20 = vld [vmem:[%s1217_s30 + $0x34] sm:$0xf] }
  0x45   : > { %646 = vmatpush.bf16.msra.mxu1 %v947_v1  ;;  %659 = vmatpush.bf16.msra.mxu2 %v887_v2  ;;  %v994_v19 = vld [vmem:[%s1217_s30 + $0xb4] sm:$0xf0]  ;;  %v868_v21 = vld [vmem:[%s1217_s30 + $0x38] sm:$0xf0]  ;;  %v993_v22 = vld [vmem:[%s1217_s30 + $0xb4] sm:$0xf]  ;;  %v867_v24 = vor.u32 %v978_v16, %v866_v15 }
  0x46   : > { %672 = vmatpush.bf16.msra.mxu3 %v951_v6  ;;  %v932_v23 = vld [vmem:[%s1217_s30 + $0xb8] sm:$0xf0]  ;;  %v931_v25 = vor.u32 %v994_v19, %v930_v17  ;;  %v871_v26 = vor.u32 %v977_v20, %v868_v21  ;;  %v858_v27 = vld [vmem:[%s1217_s30 + $0x20] sm:$0xf]  ;;  %v976_v28 = vld [vmem:[%s1217_s30 + $0x24] sm:$0xf0] }
  0x47   : > { %v922_v29 = vld [vmem:[%s1217_s30 + $0xa0] sm:$0xf]  ;;  %v935_v30 = vor.u32 %v993_v22, %v932_v23  ;;  %v992_v31 = vld [vmem:[%s1217_s30 + $0xa4] sm:$0xf0]  ;;  %v975_v32 = vld [vmem:[%s1217_s30 + $0x24] sm:$0xf]  ;;  %v859_v36 = vor.u32 %v976_v28, %v858_v27 }
  0x48   : > { %634 = vmatpush.bf16.msra.mxu0 %v875_v12  ;;  %v860_v33 = vld [vmem:[%s1217_s30 + $0x28] sm:$0xf0]  ;;  %v991_v34 = vld [vmem:[%s1217_s30 + $0xa4] sm:$0xf]  ;;  %v923_v37 = vor.u32 %v992_v31, %v922_v29  ;;  %v850_v39 = vld [vmem:[%s1217_s30 + $0x10] sm:$0xf] }
  0x49   : > { %647 = vmatpush.bf16.msra.mxu1 %v939_v13  ;;  %660 = vmatpush.bf16.msra.mxu2 %v879_v14  ;;  %v924_v35 = vld [vmem:[%s1217_s30 + $0xa8] sm:$0xf0]  ;;  %v863_v38 = vor.u32 %v975_v32, %v860_v33  ;;  %v974_v40 = vld [vmem:[%s1217_s30 + $0x14] sm:$0xf0]  ;;  %v914_v41 = vld [vmem:[%s1217_s30 + $0x90] sm:$0xf] }
  0x4a   : > { %673 = vmatpush.bf16.msra.mxu3 %v943_v18  ;;  %v927_v42 = vor.u32 %v991_v34, %v924_v35  ;;  %v990_v43 = vld [vmem:[%s1217_s30 + $0x94] sm:$0xf0]  ;;  %v973_v44 = vld [vmem:[%s1217_s30 + $0x14] sm:$0xf]  ;;  %v852_v45 = vld [vmem:[%s1217_s30 + $0x18] sm:$0xf0]  ;;  %v851_v48 = vor.u32 %v974_v40, %v850_v39 }
  0x4b   : > { %v989_v46 = vld [vmem:[%s1217_s30 + $0x94] sm:$0xf]  ;;  %v916_v47 = vld [vmem:[%s1217_s30 + $0x98] sm:$0xf0]  ;;  %v431_v49 = vld [vmem:[%s1308_s0] sm:$0xff]  ;;  %v915_v50 = vor.u32 %v990_v43, %v914_v41  ;;  %v855_v51 = vor.u32 %v973_v44, %v852_v45  ;;  %s1319_s6 = smov (!%p409_p9, %s837_s6), 7 }
  0x4c   : > { %635 = vmatpush.bf16.msra.mxu0 %v867_v24  ;;  %v842_v52 = vld [vmem:[%s1217_s30] sm:$0xf]  ;;  %v972_v53 = vld [vmem:[%s1217_s30 + $0x4] sm:$0xf0]  ;;  %v919_v55 = vor.u32 %v989_v46, %v916_v47  ;;  %v971_v57 = vld [vmem:[%s1217_s30 + $0x4] sm:$0xf]  ;;  %v465_v61 = vunpack.c.l.b16 %v431_v49  ;;  %v466_v63 = vunpack.c.h.b16 %v431_v49  ;;  %s411_s9 = scalar_lea.vmem %s1310_s2, %s1319_s6 }
  0x4d   : > { %648 = vmatpush.bf16.msra.mxu1 %v931_v25  ;;  %661 = vmatpush.bf16.msra.mxu2 %v871_v26  ;;  %v906_v54 = vld [vmem:[%s1217_s30 + $0x80] sm:$0xf]  ;;  %v988_v56 = vld [vmem:[%s1217_s30 + $0x84] sm:$0xf0]  ;;  %v844_v58 = vld [vmem:[%s1217_s30 + $0x8] sm:$0xf0]  ;;  %v843_v62 = vor.u32 %v972_v53, %v842_v52 }
  0x4e   : > { %674 = vmatpush.bf16.msra.mxu3 %v935_v30  ;;  %v987_v59 = vld [vmem:[%s1217_s30 + $0x84] sm:$0xf]  ;;  %v908_v60 = vld [vmem:[%s1217_s30 + $0x88] sm:$0xf0]  ;;  %v907_v0 = vor.u32 %v988_v56, %v906_v54  ;;  %v847_v1 = vor.u32 %v971_v57, %v844_v58  ;;  %v467_v3 = vpack.c.b16 %v465_v61, %v465_v61  ;;  %v468_v4 = vpack.c.b16 %v466_v63, %v466_v63  ;;  %v692_v5 = vld [vmem:[%s411_s9] sm:$0x3] }
  0x4f   : > { %v911_v2 = vor.u32 %v987_v59, %v908_v60  ;;  %v694_v7 = vperm.slane %v692_v5, 0  ;;  %s839_s10 = sshll.u32 %s1319_s6, 3  ;;  %v695_v13 = vperm.slane %v692_v5, 1 }
  0x50   : > { %636 = vmatpush.bf16.msra.mxu0 %v859_v36  ;;  %s421_s18 = scalar_lea.vmem %s1311_s3, %s839_s10 }
  0x51   : > { %649 = vmatpush.bf16.msra.mxu1 %v923_v37  ;;  %662 = vmatpush.bf16.msra.mxu2 %v863_v38 }
  0x52   : > { %675 = vmatpush.bf16.msra.mxu3 %v927_v42 }
  0x54   : > { %637 = vmatpush.bf16.msra.mxu0 %v851_v48 }
  0x55   : > { %650 = vmatpush.bf16.msra.mxu1 %v915_v50  ;;  %663 = vmatpush.bf16.msra.mxu2 %v855_v51 }
  0x56   : > { %676 = vmatpush.bf16.msra.mxu3 %v919_v55 }
  0x58   : > { %638 = vmatpush.bf16.msra.mxu0 %v843_v62 }
  0x59   : > { %651 = vmatpush.bf16.msra.mxu1 %v907_v0  ;;  %664 = vmatpush.bf16.msra.mxu2 %v847_v1 }
  0x5a   : > { %677 = vmatpush.bf16.msra.mxu3 %v911_v2 }
  0x5b   : > { %639 = vmatmul.bf16.vlgmr.msra.gmra.mxu0 %v467_v3 }
  0x5c   : > { %652 = vmatmul.bf16.vlgmr.msra.gmra.mxu1 %v468_v4  ;;  %665 = vmatmul.bf16.vlgmr.msra.gmra.mxu2 %v467_v3 }
  0x5d   : > { %678 = vmatmul.bf16.vlgmr.msra.gmra.mxu3 %v468_v4 }
  0xd8   : > { %v640_v6 = vpop.f32.mrf.mxu0 }
  0xd9   : > { %v653_v8 = vpop.f32.mrf.mxu1 }
  0xda   : > { %v654_v9 = vadd.f32 %v653_v8, %v640_v6 }
  0xdc   : > { %v698_v10 = vadd.f32 %v694_v7, %v654_v9 }
  0xde   : > { %v700_v11 = vmax.f32 %v698_v10, 0.0 }
  0xdf   : > { %v666_v12 = vpop.f32.mrf.mxu2 }
  0xe0   : > { %702 = vst [vmem:[%s421_s18] sm:$0xff] %v700_v11  ;;  %v679_v14 = vpop.f32.mrf.mxu3  ;;  %v642_v15 = vpop.f32.mrf.mxu0 }
  0xe1   : > { %v680_v16 = vadd.f32 %v679_v14, %v666_v12  ;;  %v655_v17 = vpop.f32.mrf.mxu1 }
  0xe3   : > { %v699_v18 = vadd.f32 %v695_v13, %v680_v16 }
  0xe5   : > { %v701_v19 = vmax.f32 %v699_v18, 0.0 }
  0xe7   : > { %703 = vst [vmem:[%s421_s18 + $0x8] sm:$0xff] %v701_v19  ;;  %v668_v20 = vpop.f32.mrf.mxu2 }
  0xe8   : > { %v681_v21 = vpop.f32.mrf.mxu3 }
  0xe9 PF: > { %s13_s16 = sadd.s32 1, %s1081_s16   ;;  %s1312_s12 = smov %s1069_s13 }
  0xea   : > { %p10_p10 = scmp.ge.s32.totalorder %s13_s16, 6   ;;  %s1313_s13 = smov %s1138_s20 }
  0xeb   : > { %s1314_s14 = smov %s1077_s15  ;;  %s1315_s15 = smov %s1317_s17 }
  0xec   :  { %12 = sbr.rel (!%p10_p10) target bundleno = 3 (0x3), region = 119 }

// kernel: ge_deform_roi_pool_pack_forward.9
= control target key start
LH: loop header
LB: loop body
LE: loop exit
PB: predicated region body
PF: predicated region fallthrough
CT: control target
= control target key end

     0   :  { %s1683_s12 = smov 0   ;;  %s1685_s13 = smov 0   ;;  %s2075_s0 = inlined_call_operand.vmem [shape: bf16[8,1024], index: 0, kind: input, shape index: {}]   ;;  %s2076_s1 = inlined_call_operand.vmem [shape: bf16[1024,1024], index: 1, kind: input, shape index: {}]   ;;  %s2077_s2 = inlined_call_operand.vmem [shape: f32[1,1024], index: 2, kind: input, shape index: {}]   ;;  %s2078_s3 = inlined_call_operand.vmem [shape: f32[8,1024], index: 3, kind: output, shape index: {}]  }
   0x1   :  { %s1687_s14 = smov 0   ;;  %s1689_s15 = smov 0  }
   0x2   :  { %s1691_s16 = smov 0   ;;  %s1693_s17 = smov 0  }
   0x3   :  { %s1695_s18 = smov 0  }
   0x4 LB: > { %s25_s19 = sadd.s32 1, %s1652_s16  ;;  %s28_s20 = sadd.s32 1, %s1656_s17  ;;  %s1660_s18 = sphi %s1695_s18, %s13_s18   ;;  %s1656_s17 = sphi %s1693_s17, %s2084_s17   ;;  %s1652_s16 = sphi %s1691_s16, %s2083_s16   ;;  %s1648_s15 = sphi %s1689_s15, %s2082_s15   ;;  %s1644_s14 = sphi %s1687_s14, %s2081_s14   ;;  %s1640_s13 = sphi %s1685_s13, %s2080_s13   ;;  %s1636_s12 = sphi %s1683_s12, %s2079_s12  }
   0x5   : > { %p26_p0 = scmp.ge.s32.totalorder %s25_s19, 2  ;;  %p76_p1 = scmp.ne.s32.totalorder %s1640_s13, %s1636_s12 }
   0x6   : > { %p77_p2 = scmp.eq.s32.totalorder %s1660_s18, 0  ;;  %s69_s24 = sadd.s32 1, %s1640_s13 }
   0x7   : > { %s2086_s19 = smov (%p26_p0, %s25_s19), 0  ;;  %s2088_s20 = smov (!%p26_p0, %s28_s20), %s1656_s17 }
   0x8   : > { %p78_p3 = por %p77_p2, %p76_p1  ;;  %p30_p4 = scmp.ge.s32.totalorder %s2088_s20, 4 }
   0x9   : > { %s64_s21 = ssub.s32 %s1652_s16, %s2086_s19  ;;  %p1211_p6 = scmp.ge.s32.totalorder %s1660_s18, 8 }
   0xa   : > { %s2090_s20 = smov (%p30_p4, %s2088_s20), 0 }
   0xb   : > { %s65_s22 = ssub.s32 %s1656_s17, %s2090_s20  ;;  %156 = sbr.rel (%p1211_p6) target bundleno = 87 (0x57), region = 16 }
   0xc   : > { %s66_s23 = sor.u32 %s65_s22, %s64_s21 }
   0xd   : > { %p67_p5 = scmp.eq.s32.totalorder %s66_s23, 0 }
   0xf   : > { %s1734_s25 = scalar_select %p67_p5, %s1640_s13, %s69_s24  }
  0x10   : > { %172 = sbr.rel (!%p78_p3) target bundleno = 87 (0x57), region = 24  ;;  %s174_s26 = sand.u32 (%p78_p3), 1, %s1640_s13  }
  0x11   : > { %s1214_s27 = sshll.u32 (%p78_p3), %s1656_s17, 1  ;;  %s1212_s28 = sshll.u32 (%p78_p3), %s174_s26, 9 }
  0x12   : > { %s1484_s29 = sshll.u32 (%p78_p3), %s1652_s16, 9  ;;  %s1748_s8 = scalar_lea.vmem (%p78_p3), [#allocation3], %s1212_s28 }
  0x13   : > { %s180_s30 = sadd.s32 (%p78_p3), %s1484_s29, %s1214_s27 }
  0x14   : > { %s1216_s4 = sshll.u32 (%p78_p3), %s180_s30, 2 }
  0x15   : > { %s1743_s7 = scalar_lea.vmem %s2076_s1, %s1216_s4 }
  0x16   : > { %v337_v0 = vld [vmem:[%s1743_s7] sm:$0xff] }
  0x17   : > { %v339_v1 = vld [vmem:[%s1743_s7 + $0x20] sm:$0xff]  ;;  %338 = vst [vmem:[%s1748_s8] sm:$0xff] %v337_v0 }
  0x18   : > { %v341_v2 = vld [vmem:[%s1743_s7 + $0x40] sm:$0xff]  ;;  %340 = vst [vmem:[%s1748_s8 + $0x8] sm:$0xff] %v339_v1 }
  0x19   : > { %v343_v3 = vld [vmem:[%s1743_s7 + $0x60] sm:$0xff]  ;;  %342 = vst [vmem:[%s1748_s8 + $0x10] sm:$0xff] %v341_v2 }
  0x1a   : > { %v345_v4 = vld [vmem:[%s1743_s7 + $0x80] sm:$0xff]  ;;  %344 = vst [vmem:[%s1748_s8 + $0x18] sm:$0xff] %v343_v3 }
  0x1b   : > { %v347_v5 = vld [vmem:[%s1743_s7 + $0xa0] sm:$0xff]  ;;  %346 = vst [vmem:[%s1748_s8 + $0x20] sm:$0xff] %v345_v4 }
  0x1c   : > { %v349_v6 = vld [vmem:[%s1743_s7 + $0xc0] sm:$0xff]  ;;  %348 = vst [vmem:[%s1748_s8 + $0x28] sm:$0xff] %v347_v5 }
  0x1d   : > { %v351_v7 = vld [vmem:[%s1743_s7 + $0xe0] sm:$0xff]  ;;  %350 = vst [vmem:[%s1748_s8 + $0x30] sm:$0xff] %v349_v6 }
  0x1e   : > { %v353_v8 = vld [vmem:[%s1743_s7 + $0x100] sm:$0xff]  ;;  %352 = vst [vmem:[%s1748_s8 + $0x38] sm:$0xff] %v351_v7 }
  0x1f   : > { %v355_v9 = vld [vmem:[%s1743_s7 + $0x120] sm:$0xff]  ;;  %354 = vst [vmem:[%s1748_s8 + $0x40] sm:$0xff] %v353_v8 }
  0x20   : > { %v357_v10 = vld [vmem:[%s1743_s7 + $0x140] sm:$0xff]  ;;  %356 = vst [vmem:[%s1748_s8 + $0x48] sm:$0xff] %v355_v9 }
  0x21   : > { %v359_v11 = vld [vmem:[%s1743_s7 + $0x160] sm:$0xff]  ;;  %358 = vst [vmem:[%s1748_s8 + $0x50] sm:$0xff] %v357_v10 }
  0x22   : > { %v361_v12 = vld [vmem:[%s1743_s7 + $0x180] sm:$0xff]  ;;  %360 = vst [vmem:[%s1748_s8 + $0x58] sm:$0xff] %v359_v11 }
  0x23   : > { %v363_v13 = vld [vmem:[%s1743_s7 + $0x1a0] sm:$0xff]  ;;  %362 = vst [vmem:[%s1748_s8 + $0x60] sm:$0xff] %v361_v12 }
  0x24   : > { %v365_v14 = vld [vmem:[%s1743_s7 + $0x1c0] sm:$0xff]  ;;  %364 = vst [vmem:[%s1748_s8 + $0x68] sm:$0xff] %v363_v13 }
  0x25   : > { %v367_v15 = vld [vmem:[%s1743_s7 + $0x1e0] sm:$0xff]  ;;  %366 = vst [vmem:[%s1748_s8 + $0x70] sm:$0xff] %v365_v14 }
  0x26   : > { %v369_v16 = vld [vmem:[%s1743_s7 + $0x200] sm:$0xff]  ;;  %368 = vst [vmem:[%s1748_s8 + $0x78] sm:$0xff] %v367_v15 }
  0x27   : > { %v371_v17 = vld [vmem:[%s1743_s7 + $0x220] sm:$0xff]  ;;  %370 = vst [vmem:[%s1748_s8 + $0x80] sm:$0xff] %v369_v16 }
  0x28   : > { %v373_v18 = vld [vmem:[%s1743_s7 + $0x240] sm:$0xff]  ;;  %372 = vst [vmem:[%s1748_s8 + $0x88] sm:$0xff] %v371_v17 }
  0x29   : > { %v375_v19 = vld [vmem:[%s1743_s7 + $0x260] sm:$0xff]  ;;  %374 = vst [vmem:[%s1748_s8 + $0x90] sm:$0xff] %v373_v18 }
  0x2a   : > { %v377_v20 = vld [vmem:[%s1743_s7 + $0x280] sm:$0xff]  ;;  %376 = vst [vmem:[%s1748_s8 + $0x98] sm:$0xff] %v375_v19 }
  0x2b   : > { %v379_v21 = vld [vmem:[%s1743_s7 + $0x2a0] sm:$0xff]  ;;  %378 = vst [vmem:[%s1748_s8 + $0xa0] sm:$0xff] %v377_v20 }
  0x2c   : > { %v381_v22 = vld [vmem:[%s1743_s7 + $0x2c0] sm:$0xff]  ;;  %380 = vst [vmem:[%s1748_s8 + $0xa8] sm:$0xff] %v379_v21 }
  0x2d   : > { %v383_v23 = vld [vmem:[%s1743_s7 + $0x2e0] sm:$0xff]  ;;  %382 = vst [vmem:[%s1748_s8 + $0xb0] sm:$0xff] %v381_v22 }
  0x2e   : > { %v385_v24 = vld [vmem:[%s1743_s7 + $0x300] sm:$0xff]  ;;  %384 = vst [vmem:[%s1748_s8 + $0xb8] sm:$0xff] %v383_v23 }
  0x2f   : > { %v387_v25 = vld [vmem:[%s1743_s7 + $0x320] sm:$0xff]  ;;  %386 = vst [vmem:[%s1748_s8 + $0xc0] sm:$0xff] %v385_v24 }
  0x30   : > { %v389_v26 = vld [vmem:[%s1743_s7 + $0x340] sm:$0xff]  ;;  %388 = vst [vmem:[%s1748_s8 + $0xc8] sm:$0xff] %v387_v25 }
  0x31   : > { %v391_v27 = vld [vmem:[%s1743_s7 + $0x360] sm:$0xff]  ;;  %390 = vst [vmem:[%s1748_s8 + $0xd0] sm:$0xff] %v389_v26 }
  0x32   : > { %v393_v28 = vld [vmem:[%s1743_s7 + $0x380] sm:$0xff]  ;;  %392 = vst [vmem:[%s1748_s8 + $0xd8] sm:$0xff] %v391_v27 }
  0x33   : > { %v395_v29 = vld [vmem:[%s1743_s7 + $0x3a0] sm:$0xff]  ;;  %394 = vst [vmem:[%s1748_s8 + $0xe0] sm:$0xff] %v393_v28 }
  0x34   : > { %v397_v30 = vld [vmem:[%s1743_s7 + $0x3c0] sm:$0xff]  ;;  %396 = vst [vmem:[%s1748_s8 + $0xe8] sm:$0xff] %v395_v29 }
  0x35   : > { %v399_v31 = vld [vmem:[%s1743_s7 + $0x3e0] sm:$0xff]  ;;  %398 = vst [vmem:[%s1748_s8 + $0xf0] sm:$0xff] %v397_v30 }
  0x36   : > { %v401_v32 = vld [vmem:[%s1743_s7 + $0x400] sm:$0xff]  ;;  %400 = vst [vmem:[%s1748_s8 + $0xf8] sm:$0xff] %v399_v31 }
  0x37   : > { %v403_v33 = vld [vmem:[%s1743_s7 + $0x420] sm:$0xff]  ;;  %402 = vst [vmem:[%s1748_s8 + $0x100] sm:$0xff] %v401_v32 }
  0x38   : > { %v405_v34 = vld [vmem:[%s1743_s7 + $0x440] sm:$0xff]  ;;  %404 = vst [vmem:[%s1748_s8 + $0x108] sm:$0xff] %v403_v33 }
  0x39   : > { %v407_v35 = vld [vmem:[%s1743_s7 + $0x460] sm:$0xff]  ;;  %406 = vst [vmem:[%s1748_s8 + $0x110] sm:$0xff] %v405_v34 }
  0x3a   : > { %v409_v36 = vld [vmem:[%s1743_s7 + $0x480] sm:$0xff]  ;;  %408 = vst [vmem:[%s1748_s8 + $0x118] sm:$0xff] %v407_v35 }
  0x3b   : > { %v411_v37 = vld [vmem:[%s1743_s7 + $0x4a0] sm:$0xff]  ;;  %410 = vst [vmem:[%s1748_s8 + $0x120] sm:$0xff] %v409_v36 }
  0x3c   : > { %v413_v38 = vld [vmem:[%s1743_s7 + $0x4c0] sm:$0xff]  ;;  %412 = vst [vmem:[%s1748_s8 + $0x128] sm:$0xff] %v411_v37 }
  0x3d   : > { %v415_v39 = vld [vmem:[%s1743_s7 + $0x4e0] sm:$0xff]  ;;  %414 = vst [vmem:[%s1748_s8 + $0x130] sm:$0xff] %v413_v38 }
  0x3e   : > { %v417_v40 = vld [vmem:[%s1743_s7 + $0x500] sm:$0xff]  ;;  %416 = vst [vmem:[%s1748_s8 + $0x138] sm:$0xff] %v415_v39 }
  0x3f   : > { %v419_v41 = vld [vmem:[%s1743_s7 + $0x520] sm:$0xff]  ;;  %418 = vst [vmem:[%s1748_s8 + $0x140] sm:$0xff] %v417_v40 }
  0x40   : > { %v421_v42 = vld [vmem:[%s1743_s7 + $0x540] sm:$0xff]  ;;  %420 = vst [vmem:[%s1748_s8 + $0x148] sm:$0xff] %v419_v41 }
  0x41   : > { %v423_v43 = vld [vmem:[%s1743_s7 + $0x560] sm:$0xff]  ;;  %422 = vst [vmem:[%s1748_s8 + $0x150] sm:$0xff] %v421_v42 }
  0x42   : > { %v425_v44 = vld [vmem:[%s1743_s7 + $0x580] sm:$0xff]  ;;  %424 = vst [vmem:[%s1748_s8 + $0x158] sm:$0xff] %v423_v43 }
  0x43   : > { %v427_v45 = vld [vmem:[%s1743_s7 + $0x5a0] sm:$0xff]  ;;  %426 = vst [vmem:[%s1748_s8 + $0x160] sm:$0xff] %v425_v44 }
  0x44   : > { %v429_v46 = vld [vmem:[%s1743_s7 + $0x5c0] sm:$0xff]  ;;  %428 = vst [vmem:[%s1748_s8 + $0x168] sm:$0xff] %v427_v45 }
  0x45   : > { %v431_v47 = vld [vmem:[%s1743_s7 + $0x5e0] sm:$0xff]  ;;  %430 = vst [vmem:[%s1748_s8 + $0x170] sm:$0xff] %v429_v46 }
  0x46   : > { %v433_v48 = vld [vmem:[%s1743_s7 + $0x600] sm:$0xff]  ;;  %432 = vst [vmem:[%s1748_s8 + $0x178] sm:$0xff] %v431_v47 }
  0x47   : > { %v435_v49 = vld [vmem:[%s1743_s7 + $0x620] sm:$0xff]  ;;  %434 = vst [vmem:[%s1748_s8 + $0x180] sm:$0xff] %v433_v48 }
  0x48   : > { %v437_v50 = vld [vmem:[%s1743_s7 + $0x640] sm:$0xff]  ;;  %436 = vst [vmem:[%s1748_s8 + $0x188] sm:$0xff] %v435_v49 }
  0x49   : > { %v439_v51 = vld [vmem:[%s1743_s7 + $0x660] sm:$0xff]  ;;  %438 = vst [vmem:[%s1748_s8 + $0x190] sm:$0xff] %v437_v50 }
  0x4a   : > { %v441_v52 = vld [vmem:[%s1743_s7 + $0x680] sm:$0xff]  ;;  %440 = vst [vmem:[%s1748_s8 + $0x198] sm:$0xff] %v439_v51 }
  0x4b   : > { %v443_v53 = vld [vmem:[%s1743_s7 + $0x6a0] sm:$0xff]  ;;  %442 = vst [vmem:[%s1748_s8 + $0x1a0] sm:$0xff] %v441_v52 }
  0x4c   : > { %v445_v54 = vld [vmem:[%s1743_s7 + $0x6c0] sm:$0xff]  ;;  %444 = vst [vmem:[%s1748_s8 + $0x1a8] sm:$0xff] %v443_v53 }
  0x4d   : > { %v447_v55 = vld [vmem:[%s1743_s7 + $0x6e0] sm:$0xff]  ;;  %446 = vst [vmem:[%s1748_s8 + $0x1b0] sm:$0xff] %v445_v54 }
  0x4e   : > { %v449_v56 = vld [vmem:[%s1743_s7 + $0x700] sm:$0xff]  ;;  %448 = vst [vmem:[%s1748_s8 + $0x1b8] sm:$0xff] %v447_v55 }
  0x4f   : > { %v451_v57 = vld [vmem:[%s1743_s7 + $0x720] sm:$0xff]  ;;  %450 = vst [vmem:[%s1748_s8 + $0x1c0] sm:$0xff] %v449_v56 }
  0x50   : > { %v453_v58 = vld [vmem:[%s1743_s7 + $0x740] sm:$0xff]  ;;  %452 = vst [vmem:[%s1748_s8 + $0x1c8] sm:$0xff] %v451_v57 }
  0x51   : > { %v455_v59 = vld [vmem:[%s1743_s7 + $0x760] sm:$0xff]  ;;  %454 = vst [vmem:[%s1748_s8 + $0x1d0] sm:$0xff] %v453_v58 }
  0x52   : > { %v457_v60 = vld [vmem:[%s1743_s7 + $0x780] sm:$0xff]  ;;  %456 = vst [vmem:[%s1748_s8 + $0x1d8] sm:$0xff] %v455_v59 }
  0x53   : > { %v459_v61 = vld [vmem:[%s1743_s7 + $0x7a0] sm:$0xff]  ;;  %458 = vst [vmem:[%s1748_s8 + $0x1e0] sm:$0xff] %v457_v60 }
  0x54   : > { %v461_v62 = vld [vmem:[%s1743_s7 + $0x7c0] sm:$0xff]  ;;  %460 = vst [vmem:[%s1748_s8 + $0x1e8] sm:$0xff] %v459_v61 }
  0x55   : > { %v463_v63 = vld [vmem:[%s1743_s7 + $0x7e0] sm:$0xff]  ;;  %462 = vst [vmem:[%s1748_s8 + $0x1f0] sm:$0xff] %v461_v62 }
  0x56   : > { %464 = vst [vmem:[%s1748_s8 + $0x1f8] sm:$0xff] %v463_v63 }
  0x57 PF: > { %p1217_p7 = scmp.ge.s32.totalorder %s1660_s18, 1  ;;  %p477_p8 = scmp.lt.s32.totalorder %s1660_s18, 9 }
  0x59   : > { %p478_p9 = pnand %p1217_p7, %p477_p8 }
  0x5a   : > { %s484_s9 = sand.u32 (!%p478_p9), 1, %s1636_s12   ;;  %s1219_s10 = sshll.u32 (!%p478_p9), %s1644_s14, 2 }
  0x5b   : > { %481 = sbr.rel (%p478_p9) target bundleno = 326 (0x146), region = 66  ;;  %s1218_s11 = sshll.u32 (!%p478_p9), %s484_s9, 9 }
  0x5c   : > { %p527_p10 = scmp.lt.s32.totalorder (!%p478_p9), %s1219_s10, 7  ;;  %s1221_s21 = sshll.u32 (!%p478_p9), %s1648_s15, 1 }
  0x5d   : > { %p537_p11 = scmp.lt.s32.totalorder (!%p478_p9), %s1221_s21, 7  ;;  %s1897_s5 = scalar_lea.vmem (!%p478_p9), [#allocation3], %s1218_s11 }
  0x5e   : > { %p1224_p12 = scmp.ne.s32.totalorder (!%p478_p9), %s1644_s14, 0 }
  0x60   : > { %s2092_s10 = smov (!%p527_p10, %s1219_s10), 7  ;;  %s2094_s21 = smov (!%p537_p11, %s1221_s21), 7 }
  0x61   : > { %s1220_s22 = sshll.u32 %s2092_s10, 2  ;;  %s539_s12 = scalar_lea.vmem %s2077_s2, %s2094_s21 }
  0x62   : > { %s1883_s26 = scalar_lea.vmem %s2075_s0, %s1220_s22  ;;  %s1223_s29 = sshll.u32 %s2094_s21, 3 }
  0x63   : > { %s1895_s15 = scalar_lea.vmem %s2078_s3, %s1223_s29  ;;  %554 = sbr.rel (%p1224_p12) target bundleno = 107 (0x6b), region = 74 }
  0x68   : > { %v1662_v0 = vmov 0.0  }
  0x69   : > { %555 = vst [vmem:[#allocation2] sm:$0xff] %v1662_v0 }
  0x6a   : > { %556 = vst [vmem:[#allocation2 + $0x8] sm:$0xff] %v1662_v0 }
  0x6b PF: > { %v1283_v1 = vld [vmem:[%s1897_s5 + $0x70] sm:$0xf]  ;;  %v1500_v2 = vld [vmem:[%s1897_s5 + $0x74] sm:$0xf0]  ;;  %v1275_v12 = vld [vmem:[%s1897_s5 + $0x60] sm:$0xf] }
  0x6c   : > { %v1347_v3 = vld [vmem:[%s1897_s5 + $0xf0] sm:$0xf]  ;;  %v1284_v4 = vor.u32 %v1500_v2, %v1283_v1  ;;  %v1516_v5 = vld [vmem:[%s1897_s5 + $0xf4] sm:$0xf0]  ;;  %v1498_v14 = vld [vmem:[%s1897_s5 + $0x64] sm:$0xf0] }
  0x6d   : > { %v1411_v6 = vld [vmem:[%s1897_s5 + $0x170] sm:$0xf]  ;;  %v1532_v7 = vld [vmem:[%s1897_s5 + $0x174] sm:$0xf0]  ;;  %v1348_v8 = vor.u32 %v1516_v5, %v1347_v3  ;;  %v1339_v15 = vld [vmem:[%s1897_s5 + $0xe0] sm:$0xf]  ;;  %v1276_v17 = vor.u32 %v1498_v14, %v1275_v12 }
  0x6e   : > { %v1412_v9 = vor.u32 %v1532_v7, %v1411_v6  ;;  %v1475_v10 = vld [vmem:[%s1897_s5 + $0x1f0] sm:$0xf]  ;;  %v1548_v11 = vld [vmem:[%s1897_s5 + $0x1f4] sm:$0xf0]  ;;  %959 = vmatpush.bf16.msra.mxu0 %v1284_v4  ;;  %v1514_v16 = vld [vmem:[%s1897_s5 + $0xe4] sm:$0xf0] }
  0x6f   : > { %v1476_v13 = vor.u32 %v1548_v11, %v1475_v10  ;;  %972 = vmatpush.bf16.msra.mxu1 %v1348_v8  ;;  %v1340_v18 = vor.u32 %v1514_v16, %v1339_v15  ;;  %v1403_v19 = vld [vmem:[%s1897_s5 + $0x160] sm:$0xf]  ;;  %v1530_v20 = vld [vmem:[%s1897_s5 + $0x164] sm:$0xf0]  ;;  %v1267_v24 = vld [vmem:[%s1897_s5 + $0x50] sm:$0xf] }
  0x70   : > { %985 = vmatpush.bf16.msra.mxu2 %v1412_v9  ;;  %v1467_v21 = vld [vmem:[%s1897_s5 + $0x1e0] sm:$0xf]  ;;  %v1404_v22 = vor.u32 %v1530_v20, %v1403_v19  ;;  %v1546_v23 = vld [vmem:[%s1897_s5 + $0x1e4] sm:$0xf0]  ;;  %v1496_v25 = vld [vmem:[%s1897_s5 + $0x54] sm:$0xf0] }
  0x71   : > { %998 = vmatpush.bf16.msra.mxu3 %v1476_v13  ;;  %v1468_v26 = vor.u32 %v1546_v23, %v1467_v21  ;;  %v1331_v27 = vld [vmem:[%s1897_s5 + $0xd0] sm:$0xf]  ;;  %v1512_v28 = vld [vmem:[%s1897_s5 + $0xd4] sm:$0xf0]  ;;  %v1268_v30 = vor.u32 %v1496_v25, %v1267_v24  ;;  %v1259_v36 = vld [vmem:[%s1897_s5 + $0x40] sm:$0xf] }
  0x72   : > { %v1395_v29 = vld [vmem:[%s1897_s5 + $0x150] sm:$0xf]  ;;  %960 = vmatpush.bf16.msra.mxu0 %v1276_v17  ;;  %v1528_v31 = vld [vmem:[%s1897_s5 + $0x154] sm:$0xf0]  ;;  %v1332_v34 = vor.u32 %v1512_v28, %v1331_v27  ;;  %v1494_v37 = vld [vmem:[%s1897_s5 + $0x44] sm:$0xf0] }
  0x73   : > { %v1459_v32 = vld [vmem:[%s1897_s5 + $0x1d0] sm:$0xf]  ;;  %v1544_v33 = vld [vmem:[%s1897_s5 + $0x1d4] sm:$0xf0]  ;;  %973 = vmatpush.bf16.msra.mxu1 %v1340_v18  ;;  %v1396_v35 = vor.u32 %v1528_v31, %v1395_v29  ;;  %v1323_v38 = vld [vmem:[%s1897_s5 + $0xc0] sm:$0xf]  ;;  %v1260_v45 = vor.u32 %v1494_v37, %v1259_v36 }
  0x74   : > { %986 = vmatpush.bf16.msra.mxu2 %v1404_v22  ;;  %v1460_v39 = vor.u32 %v1544_v33, %v1459_v32  ;;  %v1510_v40 = vld [vmem:[%s1897_s5 + $0xc4] sm:$0xf0]  ;;  %v1387_v41 = vld [vmem:[%s1897_s5 + $0x140] sm:$0xf]  ;;  %v1251_v48 = vld [vmem:[%s1897_s5 + $0x30] sm:$0xf] }
  0x75   : > { %999 = vmatpush.bf16.msra.mxu3 %v1468_v26  ;;  %v1526_v42 = vld [vmem:[%s1897_s5 + $0x144] sm:$0xf0]  ;;  %v1451_v43 = vld [vmem:[%s1897_s5 + $0x1c0] sm:$0xf]  ;;  %v1324_v46 = vor.u32 %v1510_v40, %v1323_v38  ;;  %v1492_v49 = vld [vmem:[%s1897_s5 + $0x34] sm:$0xf0] }
  0x76   : > { %v1542_v44 = vld [vmem:[%s1897_s5 + $0x1c4] sm:$0xf0]  ;;  %961 = vmatpush.bf16.msra.mxu0 %v1268_v30  ;;  %v1388_v47 = vor.u32 %v1526_v42, %v1387_v41  ;;  %v1315_v50 = vld [vmem:[%s1897_s5 + $0xb0] sm:$0xf]  ;;  %v1508_v52 = vld [vmem:[%s1897_s5 + $0xb4] sm:$0xf0]  ;;  %v1252_v57 = vor.u32 %v1492_v49, %v1251_v48 }
  0x77   : > { %974 = vmatpush.bf16.msra.mxu1 %v1332_v34  ;;  %v1452_v51 = vor.u32 %v1542_v44, %v1451_v43  ;;  %v1379_v53 = vld [vmem:[%s1897_s5 + $0x130] sm:$0xf]  ;;  %v1524_v54 = vld [vmem:[%s1897_s5 + $0x134] sm:$0xf0]  ;;  %v1316_v58 = vor.u32 %v1508_v52, %v1315_v50  ;;  %v1243_v60 = vld [vmem:[%s1897_s5 + $0x20] sm:$0xf] }
  0x78   : > { %987 = vmatpush.bf16.msra.mxu2 %v1396_v35  ;;  %v1443_v55 = vld [vmem:[%s1897_s5 + $0x1b0] sm:$0xf]  ;;  %v1540_v56 = vld [vmem:[%s1897_s5 + $0x1b4] sm:$0xf0]  ;;  %v1380_v59 = vor.u32 %v1524_v54, %v1379_v53  ;;  %v1490_v61 = vld [vmem:[%s1897_s5 + $0x24] sm:$0xf0] }
  0x79   : > { %1000 = vmatpush.bf16.msra.mxu3 %v1460_v39  ;;  %v1307_v62 = vld [vmem:[%s1897_s5 + $0xa0] sm:$0xf]  ;;  %v1444_v63 = vor.u32 %v1540_v56, %v1443_v55  ;;  %v1506_v0 = vld [vmem:[%s1897_s5 + $0xa4] sm:$0xf0]  ;;  %v1244_v5 = vor.u32 %v1490_v61, %v1243_v60  ;;  %v1235_v8 = vld [vmem:[%s1897_s5 + $0x10] sm:$0xf] }
  0x7a   : > { %962 = vmatpush.bf16.msra.mxu0 %v1260_v45  ;;  %v1371_v1 = vld [vmem:[%s1897_s5 + $0x120] sm:$0xf]  ;;  %v1522_v2 = vld [vmem:[%s1897_s5 + $0x124] sm:$0xf0]  ;;  %v1308_v6 = vor.u32 %v1506_v0, %v1307_v62  ;;  %v1488_v9 = vld [vmem:[%s1897_s5 + $0x14] sm:$0xf0] }
  0x7b   : > { %975 = vmatpush.bf16.msra.mxu1 %v1324_v46  ;;  %v1435_v3 = vld [vmem:[%s1897_s5 + $0x1a0] sm:$0xf]  ;;  %v1538_v4 = vld [vmem:[%s1897_s5 + $0x1a4] sm:$0xf0]  ;;  %v1372_v7 = vor.u32 %v1522_v2, %v1371_v1  ;;  %v1299_v10 = vld [vmem:[%s1897_s5 + $0x90] sm:$0xf]  ;;  %v1236_v17 = vor.u32 %v1488_v9, %v1235_v8 }
  0x7c   : > { %988 = vmatpush.bf16.msra.mxu2 %v1388_v47  ;;  %v1436_v11 = vor.u32 %v1538_v4, %v1435_v3  ;;  %v1504_v12 = vld [vmem:[%s1897_s5 + $0x94] sm:$0xf0]  ;;  %v1363_v13 = vld [vmem:[%s1897_s5 + $0x110] sm:$0xf]  ;;  %v1227_v18 = vld [vmem:[%s1897_s5] sm:$0xf] }
  0x7d   : > { %1001 = vmatpush.bf16.msra.mxu3 %v1452_v51  ;;  %v1520_v14 = vld [vmem:[%s1897_s5 + $0x114] sm:$0xf0]  ;;  %v1427_v15 = vld [vmem:[%s1897_s5 + $0x190] sm:$0xf]  ;;  %v1486_v19 = vld [vmem:[%s1897_s5 + $0x4] sm:$0xf0]  ;;  %v1300_v21 = vor.u32 %v1504_v12, %v1299_v10 }
  0x7e   : > { %963 = vmatpush.bf16.msra.mxu0 %v1252_v57  ;;  %v1536_v16 = vld [vmem:[%s1897_s5 + $0x194] sm:$0xf0]  ;;  %v1291_v20 = vld [vmem:[%s1897_s5 + $0x80] sm:$0xf]  ;;  %v1364_v22 = vor.u32 %v1520_v14, %v1363_v13  ;;  %v1502_v23 = vld [vmem:[%s1897_s5 + $0x84] sm:$0xf0]  ;;  %v1228_v33 = vor.u32 %v1486_v19, %v1227_v18 }
  0x7f   : > { %976 = vmatpush.bf16.msra.mxu1 %v1316_v58  ;;  %v1355_v24 = vld [vmem:[%s1897_s5 + $0x100] sm:$0xf]  ;;  %v1518_v25 = vld [vmem:[%s1897_s5 + $0x104] sm:$0xf0]  ;;  %v1428_v26 = vor.u32 %v1536_v16, %v1427_v15  ;;  %v1499_v29 = vld [vmem:[%s1897_s5 + $0x74] sm:$0xf]  ;;  %v1292_v38 = vor.u32 %v1502_v23, %v1291_v20 }
  0x80   : > { %989 = vmatpush.bf16.msra.mxu2 %v1380_v59  ;;  %v1419_v27 = vld [vmem:[%s1897_s5 + $0x180] sm:$0xf]  ;;  %v1534_v28 = vld [vmem:[%s1897_s5 + $0x184] sm:$0xf0]  ;;  %v1285_v30 = vld [vmem:[%s1897_s5 + $0x78] sm:$0xf0]  ;;  %v1356_v39 = vor.u32 %v1518_v25, %v1355_v24 }
  0x81   : > { %1002 = vmatpush.bf16.msra.mxu3 %v1444_v63  ;;  %v1515_v31 = vld [vmem:[%s1897_s5 + $0xf4] sm:$0xf]  ;;  %v560_v32 = vld [vmem:[%s1883_s26 + $0x8] sm:$0xff]  ;;  %v1420_v43 = vor.u32 %v1534_v28, %v1419_v27  ;;  %v1288_v44 = vor.u32 %v1499_v29, %v1285_v30  ;;  %v1497_v48 = vld [vmem:[%s1897_s5 + $0x64] sm:$0xf]  ;;  %p1481_p13 = scmp.ne.s32.totalorder %s1644_s14, 1 }
  0x82   : > { %964 = vmatpush.bf16.msra.mxu0 %v1244_v5  ;;  %v1349_v34 = vld [vmem:[%s1897_s5 + $0xf8] sm:$0xf0]  ;;  %v1531_v35 = vld [vmem:[%s1897_s5 + $0x174] sm:$0xf]  ;;  %v629_v37 = vunpack.c.l.b16 %v560_v32  ;;  %v630_v42 = vunpack.c.h.b16 %v560_v32  ;;  %v1277_v49 = vld [vmem:[%s1897_s5 + $0x68] sm:$0xf0] }
  0x83   : > { %977 = vmatpush.bf16.msra.mxu1 %v1308_v6  ;;  %v1413_v36 = vld [vmem:[%s1897_s5 + $0x178] sm:$0xf0]  ;;  %v1547_v40 = vld [vmem:[%s1897_s5 + $0x1f4] sm:$0xf]  ;;  %v1352_v46 = vor.u32 %v1515_v31, %v1349_v34  ;;  %v1513_v50 = vld [vmem:[%s1897_s5 + $0xe4] sm:$0xf]  ;;  %v1280_v62 = vor.u32 %v1497_v48, %v1277_v49 }
  0x84   : > { %990 = vmatpush.bf16.msra.mxu2 %v1372_v7  ;;  %v1477_v41 = vld [vmem:[%s1897_s5 + $0x1f8] sm:$0xf0]  ;;  %v559_v45 = vld [vmem:[%s1883_s26] sm:$0xff]  ;;  %v1416_v47 = vor.u32 %v1531_v35, %v1413_v36  ;;  %v1341_v54 = vld [vmem:[%s1897_s5 + $0xe8] sm:$0xf0]  ;;  %v1980_v57 = vpack.c.b16 %v629_v37, %v629_v37  ;;  %v1984_v60 = vpack.c.b16 %v630_v42, %v630_v42 }
  0x85   : > { %1003 = vmatpush.bf16.msra.mxu3 %v1436_v11  ;;  %v627_v51 = vunpack.c.l.b16 %v559_v45  ;;  %v628_v52 = vunpack.c.h.b16 %v559_v45  ;;  %v1480_v53 = vor.u32 %v1547_v40, %v1477_v41  ;;  %v1529_v55 = vld [vmem:[%s1897_s5 + $0x164] sm:$0xf]  ;;  %v1405_v56 = vld [vmem:[%s1897_s5 + $0x168] sm:$0xf0]  ;;  %v1344_v0 = vor.u32 %v1513_v50, %v1341_v54  ;;  %v1495_v2 = vld [vmem:[%s1897_s5 + $0x54] sm:$0xf] }
  0x86   : > { %965 = vmatpush.bf16.msra.mxu0 %v1236_v17  ;;  %v1545_v58 = vld [vmem:[%s1897_s5 + $0x1e4] sm:$0xf]  ;;  %v1469_v59 = vld [vmem:[%s1897_s5 + $0x1e8] sm:$0xf0]  ;;  %v1408_v1 = vor.u32 %v1529_v55, %v1405_v56  ;;  %v1269_v3 = vld [vmem:[%s1897_s5 + $0x58] sm:$0xf0] }
  0x87   : > { %978 = vmatpush.bf16.msra.mxu1 %v1300_v21  ;;  %v1986_v61 = vpack.c.b16 %v627_v51, %v627_v51  ;;  %v1988_v63 = vpack.c.b16 %v628_v52, %v628_v52  ;;  %v1511_v4 = vld [vmem:[%s1897_s5 + $0xd4] sm:$0xf]  ;;  %v1472_v5 = vor.u32 %v1545_v58, %v1469_v59  ;;  %v1333_v6 = vld [vmem:[%s1897_s5 + $0xd8] sm:$0xf0]  ;;  %v1272_v11 = vor.u32 %v1495_v2, %v1269_v3  ;;  %v1493_v14 = vld [vmem:[%s1897_s5 + $0x44] sm:$0xf] }
  0x88   : > { %991 = vmatpush.bf16.msra.mxu2 %v1364_v22  ;;  %v1527_v7 = vld [vmem:[%s1897_s5 + $0x154] sm:$0xf]  ;;  %v1397_v8 = vld [vmem:[%s1897_s5 + $0x158] sm:$0xf0]  ;;  %v1336_v12 = vor.u32 %v1511_v4, %v1333_v6  ;;  %v1261_v15 = vld [vmem:[%s1897_s5 + $0x48] sm:$0xf0] }
  0x89   : > { %1004 = vmatpush.bf16.msra.mxu3 %v1428_v26  ;;  %v1543_v9 = vld [vmem:[%s1897_s5 + $0x1d4] sm:$0xf]  ;;  %v1461_v10 = vld [vmem:[%s1897_s5 + $0x1d8] sm:$0xf0]  ;;  %v1400_v13 = vor.u32 %v1527_v7, %v1397_v8  ;;  %v1509_v16 = vld [vmem:[%s1897_s5 + $0xc4] sm:$0xf]  ;;  %v1264_v23 = vor.u32 %v1493_v14, %v1261_v15 }
  0x8a   : > { %966 = vmatpush.bf16.msra.mxu0 %v1228_v33  ;;  %v1464_v17 = vor.u32 %v1543_v9, %v1461_v10  ;;  %v1325_v18 = vld [vmem:[%s1897_s5 + $0xc8] sm:$0xf0]  ;;  %v1525_v19 = vld [vmem:[%s1897_s5 + $0x144] sm:$0xf]  ;;  %v1491_v26 = vld [vmem:[%s1897_s5 + $0x34] sm:$0xf] }
  0x8b   : > { %979 = vmatpush.bf16.msra.mxu1 %v1292_v38  ;;  %v1389_v20 = vld [vmem:[%s1897_s5 + $0x148] sm:$0xf0]  ;;  %v1541_v21 = vld [vmem:[%s1897_s5 + $0x1c4] sm:$0xf]  ;;  %v1328_v24 = vor.u32 %v1509_v16, %v1325_v18  ;;  %v1253_v27 = vld [vmem:[%s1897_s5 + $0x38] sm:$0xf0] }
  0x8c   : > { %992 = vmatpush.bf16.msra.mxu2 %v1356_v39  ;;  %v1453_v22 = vld [vmem:[%s1897_s5 + $0x1c8] sm:$0xf0]  ;;  %v1392_v25 = vor.u32 %v1525_v19, %v1389_v20  ;;  %v1507_v28 = vld [vmem:[%s1897_s5 + $0xb4] sm:$0xf]  ;;  %v1317_v30 = vld [vmem:[%s1897_s5 + $0xb8] sm:$0xf0]  ;;  %v1256_v35 = vor.u32 %v1491_v26, %v1253_v27 }
  0x8d   : > { %1005 = vmatpush.bf16.msra.mxu3 %v1420_v43  ;;  %967 = vmatmul.bf16.vlgmr.msra.gmra.mxu0 %v1986_v61  ;;  %v1456_v29 = vor.u32 %v1541_v21, %v1453_v22  ;;  %v1523_v31 = vld [vmem:[%s1897_s5 + $0x134] sm:$0xf]  ;;  %v1381_v32 = vld [vmem:[%s1897_s5 + $0x138] sm:$0xf0]  ;;  %v1320_v36 = vor.u32 %v1507_v28, %v1317_v30  ;;  %v1489_v38 = vld [vmem:[%s1897_s5 + $0x24] sm:$0xf] }
  0x8e   : > { %1011 = vmatpush.bf16.msrb.mxu0 %v1288_v44  ;;  %980 = vmatmul.bf16.vlgmr.msra.gmra.mxu1 %v1988_v63  ;;  %v1539_v33 = vld [vmem:[%s1897_s5 + $0x1b4] sm:$0xf]  ;;  %v1445_v34 = vld [vmem:[%s1897_s5 + $0x1b8] sm:$0xf0]  ;;  %v1384_v37 = vor.u32 %v1523_v31, %v1381_v32  ;;  %v1245_v39 = vld [vmem:[%s1897_s5 + $0x28] sm:$0xf0] }
  0x8f   : > { %1024 = vmatpush.bf16.msrb.mxu1 %v1352_v46  ;;  %993 = vmatmul.bf16.vlgmr.msra.gmra.mxu2 %v1980_v57  ;;  %v1505_v40 = vld [vmem:[%s1897_s5 + $0xa4] sm:$0xf]  ;;  %v1448_v41 = vor.u32 %v1539_v33, %v1445_v34  ;;  %v1309_v42 = vld [vmem:[%s1897_s5 + $0xa8] sm:$0xf0]  ;;  %v1487_v50 = vld [vmem:[%s1897_s5 + $0x14] sm:$0xf] }
  0x90   : > { %1037 = vmatpush.bf16.msrb.mxu2 %v1416_v47  ;;  %1006 = vmatmul.bf16.vlgmr.msra.gmra.mxu3 %v1984_v60  ;;  %v1521_v43 = vld [vmem:[%s1897_s5 + $0x124] sm:$0xf]  ;;  %v1373_v44 = vld [vmem:[%s1897_s5 + $0x128] sm:$0xf0]  ;;  %v1248_v47 = vor.u32 %v1489_v38, %v1245_v39  ;;  %v1312_v48 = vor.u32 %v1505_v40, %v1309_v42  ;;  %v1237_v51 = vld [vmem:[%s1897_s5 + $0x18] sm:$0xf0] }
  0x91   : > { %1050 = vmatpush.bf16.msrb.mxu3 %v1480_v53  ;;  %v1537_v45 = vld [vmem:[%s1897_s5 + $0x1a4] sm:$0xf]  ;;  %v1437_v46 = vld [vmem:[%s1897_s5 + $0x1a8] sm:$0xf0]  ;;  %v1376_v49 = vor.u32 %v1521_v43, %v1373_v44  ;;  %v1503_v52 = vld [vmem:[%s1897_s5 + $0x94] sm:$0xf] }
  0x92   : > { %1012 = vmatpush.bf16.msrb.mxu0 %v1280_v62  ;;  %v1440_v53 = vor.u32 %v1537_v45, %v1437_v46  ;;  %v1301_v54 = vld [vmem:[%s1897_s5 + $0x98] sm:$0xf0]  ;;  %v1519_v55 = vld [vmem:[%s1897_s5 + $0x114] sm:$0xf]  ;;  %v1240_v62 = vor.u32 %v1487_v50, %v1237_v51  ;;  %v1485_v2 = vld [vmem:[%s1897_s5 + $0x4] sm:$0xf] }
  0x93   : > { %1025 = vmatpush.bf16.msrb.mxu1 %v1344_v0  ;;  %v1365_v56 = vld [vmem:[%s1897_s5 + $0x118] sm:$0xf0]  ;;  %v1535_v58 = vld [vmem:[%s1897_s5 + $0x194] sm:$0xf]  ;;  %v1304_v0 = vor.u32 %v1503_v52, %v1301_v54  ;;  %v1229_v3 = vld [vmem:[%s1897_s5 + $0x8] sm:$0xf0] }
  0x94   : > { %1038 = vmatpush.bf16.msrb.mxu2 %v1408_v1  ;;  %v1429_v59 = vld [vmem:[%s1897_s5 + $0x198] sm:$0xf0]  ;;  %v1368_v1 = vor.u32 %v1519_v55, %v1365_v56  ;;  %v1501_v4 = vld [vmem:[%s1897_s5 + $0x84] sm:$0xf]  ;;  %v1293_v6 = vld [vmem:[%s1897_s5 + $0x88] sm:$0xf0] }
  0x95   : > { %1051 = vmatpush.bf16.msrb.mxu3 %v1472_v5  ;;  %v1432_v5 = vor.u32 %v1535_v58, %v1429_v59  ;;  %v1517_v7 = vld [vmem:[%s1897_s5 + $0x104] sm:$0xf]  ;;  %v1357_v8 = vld [vmem:[%s1897_s5 + $0x108] sm:$0xf0]  ;;  %v557_v21 = vld [vmem:[#allocation2] sm:$0xff] }
  0x96   : > { %1013 = vmatpush.bf16.msrb.mxu0 %v1272_v11  ;;  %v1533_v9 = vld [vmem:[%s1897_s5 + $0x184] sm:$0xf]  ;;  %v1421_v10 = vld [vmem:[%s1897_s5 + $0x188] sm:$0xf0]  ;;  %v1232_v11 = vor.u32 %v1485_v2, %v1229_v3  ;;  %v558_v31 = vld [vmem:[#allocation2 + $0x8] sm:$0xff] }
  0x97   : > { %1026 = vmatpush.bf16.msrb.mxu1 %v1336_v12  ;;  %v1296_v12 = vor.u32 %v1501_v4, %v1293_v6  ;;  %v1424_v14 = vor.u32 %v1533_v9, %v1421_v10 }
  0x98   : > { %1039 = vmatpush.bf16.msrb.mxu2 %v1400_v13  ;;  %v1360_v13 = vor.u32 %v1517_v7, %v1357_v8 }
  0x99   : > { %1052 = vmatpush.bf16.msrb.mxu3 %v1464_v17 }
  0x9a   : > { %1014 = vmatpush.bf16.msrb.mxu0 %v1264_v23 }
  0x9b   : > { %1027 = vmatpush.bf16.msrb.mxu1 %v1328_v24 }
  0x9c   : > { %1040 = vmatpush.bf16.msrb.mxu2 %v1392_v25 }
  0x9d   : > { %1053 = vmatpush.bf16.msrb.mxu3 %v1456_v29 }
  0x9e   : > { %1015 = vmatpush.bf16.msrb.mxu0 %v1256_v35 }
  0x9f   : > { %1028 = vmatpush.bf16.msrb.mxu1 %v1320_v36 }
  0xa0   : > { %1041 = vmatpush.bf16.msrb.mxu2 %v1384_v37 }
  0xa1   : > { %1054 = vmatpush.bf16.msrb.mxu3 %v1448_v41 }
  0xa2   : > { %1016 = vmatpush.bf16.msrb.mxu0 %v1248_v47 }
  0xa3   : > { %1029 = vmatpush.bf16.msrb.mxu1 %v1312_v48 }
  0xa4   : > { %1042 = vmatpush.bf16.msrb.mxu2 %v1376_v49 }
  0xa5   : > { %1055 = vmatpush.bf16.msrb.mxu3 %v1440_v53 }
  0xa6   : > { %1017 = vmatpush.bf16.msrb.mxu0 %v1240_v62 }
  0xa7   : > { %1030 = vmatpush.bf16.msrb.mxu1 %v1304_v0 }
  0xa8   : > { %1043 = vmatpush.bf16.msrb.mxu2 %v1368_v1 }
  0xa9   : > { %1056 = vmatpush.bf16.msrb.mxu3 %v1432_v5 }
  0xaa   : > { %1018 = vmatpush.bf16.msrb.mxu0 %v1232_v11 }
  0xab   : > { %1031 = vmatpush.bf16.msrb.mxu1 %v1296_v12 }
  0xac   : > { %1044 = vmatpush.bf16.msrb.mxu2 %v1360_v13 }
  0xad   : > { %1057 = vmatpush.bf16.msrb.mxu3 %v1424_v14  ;;  %1019 = vmatmul.bf16.vlgmr.msrb.gmra.mxu0 %v1986_v61 }
  0xae   : > { %1032 = vmatmul.bf16.vlgmr.msrb.gmra.mxu1 %v1988_v63 }
  0xaf   : > { %1045 = vmatmul.bf16.vlgmr.msrb.gmra.mxu2 %v1980_v57 }
  0xb0   : > { %1058 = vmatmul.bf16.vlgmr.msrb.gmra.mxu3 %v1984_v60 }
 0x10a   : > { %v968_v15 = vpop.f32.mrf.mxu0 }
 0x10b   : > { %v981_v16 = vpop.f32.mrf.mxu1 }
 0x10c   : > { %v982_v17 = vadd.f32 %v981_v16, %v968_v15 }
 0x112   : > { %v994_v18 = vpop.f32.mrf.mxu2  ;;  %v970_v23 = vpop.f32.mrf.mxu0 }
 0x113   : > { %v995_v19 = vadd.f32 %v994_v18, %v982_v17  ;;  %v1007_v20 = vpop.f32.mrf.mxu3  ;;  %v983_v24 = vpop.f32.mrf.mxu1 }
 0x115   : > { %v1008_v22 = vadd.f32 %v1007_v20, %v995_v19 }
 0x117   : > { %v1063_v25 = vadd.f32 %v1008_v22, %v557_v21 }
 0x119   : > { %1065 = vst [vmem:[#allocation2] sm:$0xff] %v1063_v25 }
 0x11a   : > { %v996_v26 = vpop.f32.mrf.mxu2 }
 0x11b   : > { %v1009_v61 = vpop.f32.mrf.mxu3 }
 0x12a   : > { %v1020_v27 = vpop.f32.mrf.mxu0 }
 0x12b   : > { %v1033_v63 = vpop.f32.mrf.mxu1 }
 0x12c   : > { %v1034_v28 = vadd.f32 %v1033_v63, %v1020_v27 }
 0x132   : > { %v1046_v57 = vpop.f32.mrf.mxu2  ;;  %v1022_v30 = vpop.f32.mrf.mxu0 }
 0x133   : > { %v1047_v29 = vadd.f32 %v1046_v57, %v1034_v28  ;;  %v1059_v60 = vpop.f32.mrf.mxu3  ;;  %v1035_v32 = vpop.f32.mrf.mxu1 }
 0x135   : > { %v1060_v33 = vadd.f32 %v1059_v60, %v1047_v29 }
 0x137   : > { %v1064_v34 = vadd.f32 %v1060_v33, %v558_v31  ;;  %1070 = sbr.rel (%p1481_p13) target bundleno = 326 (0x146), region = 78 }
 0x139   : > { %1066 = vst [vmem:[#allocation2 + $0x8] sm:$0xff] %v1064_v34 }
 0x13a   : > { %v1048_v35 = vpop.f32.mrf.mxu2 }
 0x13b   : > { %v1061_v36 = vpop.f32.mrf.mxu3 }
 0x13c   : > { %v1071_v37 = vld [vmem:[#allocation2] sm:$0xff] }
 0x13d   : > { %v1073_v38 = vld [vmem:[%s539_s12] sm:$0x3] }
 0x13e   : > { %v1075_v40 = vperm.slane %v1073_v38, 0  ;;  %v1076_v41 = vperm.slane %v1073_v38, 1 }
 0x140   : > { %v1072_v39 = vld [vmem:[#allocation2 + $0x8] sm:$0xff]  ;;  %v1079_v42 = vadd.f32 %v1075_v40, %v1071_v37 }
 0x141   : > { %v1080_v43 = vadd.f32 %v1076_v41, %v1072_v39 }
 0x142   : > { %v1081_v44 = vmax.f32 %v1079_v42, 0.0 }
 0x143   : > { %v1082_v45 = vmax.f32 %v1080_v43, 0.0 }
 0x144   : > { %1083 = vst [vmem:[%s1895_s15] sm:$0xff] %v1081_v44 }
 0x145   : > { %1084 = vst [vmem:[%s1895_s15 + $0x8] sm:$0xff] %v1082_v45 }
 0x146 PF: > { %s13_s18 = sadd.s32 1, %s1660_s18   ;;  %s2079_s12 = smov %s1640_s13 }
 0x147   : > { %p10_p0 = scmp.ge.s32.totalorder %s13_s18, 10   ;;  %s2080_s13 = smov %s1734_s25 }
 0x148   : > { %s2081_s14 = smov %s1652_s16  ;;  %s2082_s15 = smov %s1656_s17 }
 0x149   : > { %s2083_s16 = smov %s2086_s19  ;;  %s2084_s17 = smov %s2090_s20 }
 0x14a   :  { %12 = sbr.rel (!%p10_p0) target bundleno = 4 (0x4), region = 119 }

// kernel: ge_deform_roi_pool_pack_forward.10
= control target key start
LH: loop header
LB: loop body
LE: loop exit
PB: predicated region body
PF: predicated region fallthrough
CT: control target
= control target key end

     0   :  { %s952_s12 = smov 0   ;;  %s954_s13 = smov 0   ;;  %s1035_s0 = inlined_call_operand.vmem [shape: bf16[8,1024], index: 0, kind: input, shape index: {}]   ;;  %s1036_s1 = inlined_call_operand.vmem [shape: bf16[1024,128], index: 1, kind: input, shape index: {}]   ;;  %s1037_s2 = inlined_call_operand.vmem [shape: f32[1,128], index: 2, kind: input, shape index: {}]   ;;  %s1038_s3 = inlined_call_operand.vmem [shape: f32[8,128], index: 3, kind: output, shape index: {}]  }
   0x1   :  { %s956_s14 = smov 0  }
   0x2 LB: > { %s25_s15 = sadd.s32 1, %s925_s13  ;;  %p711_p0 = scmp.ge.s32.totalorder %s929_s14, 1  ;;  %s929_s14 = sphi %s956_s14, %s13_s14   ;;  %s925_s13 = sphi %s954_s13, %s1040_s13   ;;  %s921_s12 = sphi %s952_s12, %s1039_s12  }
   0x3   : > { %p26_p1 = scmp.ge.s32.totalorder %s25_s15, 2  ;;  %p189_p2 = scmp.lt.s32.totalorder %s929_s14, 3 }
   0x5   : > { %s1042_s15 = smov (%p26_p1, %s25_s15), 0  ;;  %p190_p3 = pnand %p711_p0, %p189_p2 }
   0x6   : > { %s712_s16 = sshll.u32 (!%p190_p3), %s921_s12, 2  ;;  %s714_s17 = sshll.u32 (!%p190_p3), %s921_s12, 6 }
   0x7   : > { %193 = sbr.rel (%p190_p3) target bundleno = 205 (0xcd), region = 32  ;;  %p233_p4 = scmp.lt.s32.totalorder (!%p190_p3), %s712_s16, 7 }
   0x8   : > { %p241_p5 = scmp.lt.s32.totalorder (!%p190_p3), %s714_s17, 127  ;;  %p716_p6 = scmp.ne.s32.totalorder (!%p190_p3), %s921_s12, 0 }
   0xc   : > { %s1044_s16 = smov (!%p233_p4, %s712_s16), 7  ;;  %s1046_s17 = smov (!%p241_p5, %s714_s17), 127 }
   0xd   : > { %s713_s18 = sshll.u32 %s1044_s16, 2  ;;  %s715_s22 = sshll.u32 %s1046_s17, 2 }
   0xe   : > { %s977_s21 = scalar_lea.vmem %s1035_s0, %s713_s18  ;;  %s982_s25 = scalar_lea.vmem %s1036_s1, %s715_s22 }
   0xf   : > { %262 = sbr.rel (%p716_p6) target bundleno = 22 (0x16), region = 36 }
  0x14   : > { %v931_v0 = vmov 0.0  }
  0x15   : > { %263 = vst [vmem:[#allocation2] sm:$0xff] %v931_v0 }
  0x16 PF: > { %v856_v1 = vld [vmem:[%s982_s25 + $0x38] sm:$0xff]  ;;  %v855_v5 = vld [vmem:[%s982_s25 + $0x30] sm:$0xff]  ;;  %v854_v9 = vld [vmem:[%s982_s25 + $0x28] sm:$0xff]  ;;  %p845_p7 = scmp.ne.s32.totalorder %s921_s12, 1 }
  0x17   : > { %v864_v2 = vld [vmem:[%s982_s25 + $0x78] sm:$0xff]  ;;  %537 = vmatpush.bf16.msra.mxu0 %v856_v1  ;;  %v863_v6 = vld [vmem:[%s982_s25 + $0x70] sm:$0xff]  ;;  %v862_v10 = vld [vmem:[%s982_s25 + $0x68] sm:$0xff] }
  0x18   : > { %v872_v3 = vld [vmem:[%s982_s25 + $0xb8] sm:$0xff]  ;;  %550 = vmatpush.bf16.msra.mxu1 %v864_v2  ;;  %v871_v7 = vld [vmem:[%s982_s25 + $0xb0] sm:$0xff]  ;;  %v870_v11 = vld [vmem:[%s982_s25 + $0xa8] sm:$0xff] }
  0x19   : > { %v880_v4 = vld [vmem:[%s982_s25 + $0xf8] sm:$0xff]  ;;  %563 = vmatpush.bf16.msra.mxu2 %v872_v3  ;;  %v879_v8 = vld [vmem:[%s982_s25 + $0xf0] sm:$0xff]  ;;  %v878_v12 = vld [vmem:[%s982_s25 + $0xe8] sm:$0xff] }
  0x1a   : > { %576 = vmatpush.bf16.msra.mxu3 %v880_v4  ;;  %v853_v13 = vld [vmem:[%s982_s25 + $0x20] sm:$0xff]  ;;  %v852_v17 = vld [vmem:[%s982_s25 + $0x18] sm:$0xff]  ;;  %v851_v21 = vld [vmem:[%s982_s25 + $0x10] sm:$0xff] }
  0x1b   : > { %538 = vmatpush.bf16.msra.mxu0 %v855_v5  ;;  %v861_v14 = vld [vmem:[%s982_s25 + $0x60] sm:$0xff]  ;;  %v860_v18 = vld [vmem:[%s982_s25 + $0x58] sm:$0xff]  ;;  %v859_v22 = vld [vmem:[%s982_s25 + $0x50] sm:$0xff] }
  0x1c   : > { %551 = vmatpush.bf16.msra.mxu1 %v863_v6  ;;  %v869_v15 = vld [vmem:[%s982_s25 + $0xa0] sm:$0xff]  ;;  %v868_v19 = vld [vmem:[%s982_s25 + $0x98] sm:$0xff]  ;;  %v867_v23 = vld [vmem:[%s982_s25 + $0x90] sm:$0xff] }
  0x1d   : > { %564 = vmatpush.bf16.msra.mxu2 %v871_v7  ;;  %v877_v16 = vld [vmem:[%s982_s25 + $0xe0] sm:$0xff]  ;;  %v876_v20 = vld [vmem:[%s982_s25 + $0xd8] sm:$0xff]  ;;  %v875_v24 = vld [vmem:[%s982_s25 + $0xd0] sm:$0xff] }
  0x1e   : > { %577 = vmatpush.bf16.msra.mxu3 %v879_v8  ;;  %v850_v25 = vld [vmem:[%s982_s25 + $0x8] sm:$0xff]  ;;  %v265_v27 = vld [vmem:[%s977_s21] sm:$0xff] }
  0x1f   : > { %539 = vmatpush.bf16.msra.mxu0 %v854_v9  ;;  %v858_v26 = vld [vmem:[%s982_s25 + $0x48] sm:$0xff]  ;;  %v333_v31 = vunpack.c.l.b16 %v265_v27  ;;  %v334_v32 = vunpack.c.h.b16 %v265_v27  ;;  %v849_v33 = vld [vmem:[%s982_s25] sm:$0xff] }
  0x20   : > { %552 = vmatpush.bf16.msra.mxu1 %v862_v10  ;;  %v866_v28 = vld [vmem:[%s982_s25 + $0x88] sm:$0xff]  ;;  %v857_v34 = vld [vmem:[%s982_s25 + $0x40] sm:$0xff] }
  0x21   : > { %565 = vmatpush.bf16.msra.mxu2 %v870_v11  ;;  %v874_v29 = vld [vmem:[%s982_s25 + $0xc8] sm:$0xff]  ;;  %v865_v37 = vld [vmem:[%s982_s25 + $0x80] sm:$0xff]  ;;  %v337_v39 = vpack.c.b16 %v333_v31, %v333_v31  ;;  %v338_v40 = vpack.c.b16 %v334_v32, %v334_v32 }
  0x22   : > { %578 = vmatpush.bf16.msra.mxu3 %v878_v12  ;;  %v266_v30 = vld [vmem:[%s977_s21 + $0x8] sm:$0xff]  ;;  %v873_v38 = vld [vmem:[%s982_s25 + $0xc0] sm:$0xff] }
  0x23   : > { %540 = vmatpush.bf16.msra.mxu0 %v853_v13  ;;  %v335_v35 = vunpack.c.l.b16 %v266_v30  ;;  %v336_v36 = vunpack.c.h.b16 %v266_v30  ;;  %v264_v51 = vld [vmem:[#allocation2] sm:$0xff] }
  0x24   : > { %553 = vmatpush.bf16.msra.mxu1 %v861_v14 }
  0x25   : > { %566 = vmatpush.bf16.msra.mxu2 %v869_v15  ;;  %v339_v41 = vpack.c.b16 %v335_v35, %v335_v35  ;;  %v340_v42 = vpack.c.b16 %v336_v36, %v336_v36 }
  0x26   : > { %579 = vmatpush.bf16.msra.mxu3 %v877_v16 }
  0x27   : > { %541 = vmatpush.bf16.msra.mxu0 %v852_v17 }
  0x28   : > { %554 = vmatpush.bf16.msra.mxu1 %v860_v18 }
  0x29   : > { %567 = vmatpush.bf16.msra.mxu2 %v868_v19 }
  0x2a   : > { %580 = vmatpush.bf16.msra.mxu3 %v876_v20 }
  0x2b   : > { %542 = vmatpush.bf16.msra.mxu0 %v851_v21 }
  0x2c   : > { %555 = vmatpush.bf16.msra.mxu1 %v859_v22 }
  0x2d   : > { %568 = vmatpush.bf16.msra.mxu2 %v867_v23 }
  0x2e   : > { %581 = vmatpush.bf16.msra.mxu3 %v875_v24 }
  0x2f   : > { %543 = vmatpush.bf16.msra.mxu0 %v850_v25 }
  0x30   : > { %556 = vmatpush.bf16.msra.mxu1 %v858_v26 }
  0x31   : > { %569 = vmatpush.bf16.msra.mxu2 %v866_v28 }
  0x32   : > { %582 = vmatpush.bf16.msra.mxu3 %v874_v29 }
  0x33   : > { %544 = vmatpush.bf16.msra.mxu0 %v849_v33 }
  0x34   : > { %557 = vmatpush.bf16.msra.mxu1 %v857_v34 }
  0x35   : > { %570 = vmatpush.bf16.msra.mxu2 %v865_v37 }
  0x36   : > { %583 = vmatpush.bf16.msra.mxu3 %v873_v38  ;;  %545 = vmatmul.bf16.vlgmr.msra.gmra.mxu0 %v337_v39 }
  0x37   : > { %558 = vmatmul.bf16.vlgmr.msra.gmra.mxu1 %v338_v40 }
  0x38   : > { %571 = vmatmul.bf16.vlgmr.msra.gmra.mxu2 %v339_v41 }
  0x39   : > { %584 = vmatmul.bf16.vlgmr.msra.gmra.mxu3 %v340_v42 }
  0xb3   : > { %v546_v43 = vpop.f32.mrf.mxu0 }
  0xb4   : > { %v559_v44 = vpop.f32.mrf.mxu1 }
  0xb5   : > { %v560_v45 = vadd.f32 %v559_v44, %v546_v43 }
  0xbb   : > { %v572_v46 = vpop.f32.mrf.mxu2  ;;  %v548_v49 = vpop.f32.mrf.mxu0 }
  0xbc   : > { %v585_v47 = vpop.f32.mrf.mxu3  ;;  %v573_v48 = vadd.f32 %v572_v46, %v560_v45  ;;  %v561_v50 = vpop.f32.mrf.mxu1 }
  0xbe   : > { %v586_v52 = vadd.f32 %v585_v47, %v573_v48 }
  0xc0   : > { %v589_v53 = vadd.f32 %v586_v52, %v264_v51  ;;  %594 = sbr.rel (%p845_p7) target bundleno = 205 (0xcd), region = 40 }
  0xc2   : > { %590 = vst [vmem:[#allocation2] sm:$0xff] %v589_v53 }
  0xc3   : > { %v574_v54 = vpop.f32.mrf.mxu2 }
  0xc4   : > { %v587_v55 = vpop.f32.mrf.mxu3 }
  0xc5   : > { %v906_v57 = vld [vmem:[%s1037_s2] ss:$0 sm:$0xff] }
  0xc9   : > { %v595_v56 = vld [vmem:[#allocation2] sm:$0xff] }
  0xca   : > { %v600_v58 = vadd.f32 %v906_v57, %v595_v56 }
  0xcc   : > { %601 = vst [vmem:[%s1038_s3] sm:$0xff] %v600_v58 }
  0xcd PF: > { %s13_s14 = sadd.s32 1, %s929_s14   ;;  %s1039_s12 = smov %s925_s13 }
  0xce   : > { %p10_p8 = scmp.ge.s32.totalorder %s13_s14, 4   ;;  %s1040_s13 = smov %s1042_s15 }
  0xd0   :  { %12 = sbr.rel (!%p10_p8) target bundleno = 2 (0x2), region = 76 }

// kernel: ge_deform_roi_pool_pack_forward.7
= control target key start
LH: loop header
LB: loop body
LE: loop exit
PB: predicated region body
PF: predicated region fallthrough
CT: control target
= control target key end

     0   :  { %s379_s1 = inlined_call_operand.vmem [shape: bf16[256,128], index: 1, kind: input, shape index: {}]   ;;  %s380_s0 = inlined_call_operand.vmem [shape: bf16[8,256], index: 0, kind: input, shape index: {}]   ;;  %s381_s2 = inlined_call_operand.vmem [shape: f32[1,128], index: 2, kind: input, shape index: {}]   ;;  %s382_s3 = inlined_call_operand.vmem [shape: f32[8,128], index: 3, kind: output, shape index: {}]  }
   0x1   :  { %v288_v0 = vld [vmem:[%s379_s1 + $0x38] sm:$0xff]  ;;  %v287_v2 = vld [vmem:[%s379_s1 + $0x30] sm:$0xff]  ;;  %v286_v4 = vld [vmem:[%s379_s1 + $0x28] sm:$0xff] }
   0x2   :  { %v296_v1 = vld [vmem:[%s379_s1 + $0x78] sm:$0xff]  ;;  %156 = vmatpush.bf16.msra.mxu0 %v288_v0  ;;  %v295_v3 = vld [vmem:[%s379_s1 + $0x70] sm:$0xff]  ;;  %v294_v5 = vld [vmem:[%s379_s1 + $0x68] sm:$0xff] }
   0x3   :  { %169 = vmatpush.bf16.msra.mxu1 %v296_v1  ;;  %v285_v6 = vld [vmem:[%s379_s1 + $0x20] sm:$0xff]  ;;  %v284_v8 = vld [vmem:[%s379_s1 + $0x18] sm:$0xff]  ;;  %v283_v10 = vld [vmem:[%s379_s1 + $0x10] sm:$0xff] }
   0x4   :  { %v293_v7 = vld [vmem:[%s379_s1 + $0x60] sm:$0xff]  ;;  %v292_v9 = vld [vmem:[%s379_s1 + $0x58] sm:$0xff]  ;;  %v291_v11 = vld [vmem:[%s379_s1 + $0x50] sm:$0xff] }
   0x5   :  { %v282_v12 = vld [vmem:[%s379_s1 + $0x8] sm:$0xff]  ;;  %v20_v14 = vld [vmem:[%s380_s0] sm:$0xff] }
   0x6   :  { %157 = vmatpush.bf16.msra.mxu0 %v287_v2  ;;  %v290_v13 = vld [vmem:[%s379_s1 + $0x48] sm:$0xff]  ;;  %v54_v15 = vunpack.c.l.b16 %v20_v14  ;;  %v55_v16 = vunpack.c.h.b16 %v20_v14  ;;  %v281_v17 = vld [vmem:[%s379_s1] sm:$0xff] }
   0x7   :  { %170 = vmatpush.bf16.msra.mxu1 %v295_v3  ;;  %v289_v18 = vld [vmem:[%s379_s1 + $0x40] sm:$0xff] }
   0x8   :  { %v56_v19 = vpack.c.b16 %v54_v15, %v54_v15  ;;  %v57_v20 = vpack.c.b16 %v55_v16, %v55_v16  ;;  %v297_v21 = vld [vmem:[%s381_s2] ss:$0 sm:$0xff] }
   0xa   :  { %158 = vmatpush.bf16.msra.mxu0 %v286_v4 }
   0xb   :  { %171 = vmatpush.bf16.msra.mxu1 %v294_v5 }
   0xe   :  { %159 = vmatpush.bf16.msra.mxu0 %v285_v6 }
   0xf   :  { %172 = vmatpush.bf16.msra.mxu1 %v293_v7 }
  0x12   :  { %160 = vmatpush.bf16.msra.mxu0 %v284_v8 }
  0x13   :  { %173 = vmatpush.bf16.msra.mxu1 %v292_v9 }
  0x16   :  { %161 = vmatpush.bf16.msra.mxu0 %v283_v10 }
  0x17   :  { %174 = vmatpush.bf16.msra.mxu1 %v291_v11 }
  0x1a   :  { %162 = vmatpush.bf16.msra.mxu0 %v282_v12 }
  0x1b   :  { %175 = vmatpush.bf16.msra.mxu1 %v290_v13 }
  0x1e   :  { %163 = vmatpush.bf16.msra.mxu0 %v281_v17 }
  0x1f   :  { %176 = vmatpush.bf16.msra.mxu1 %v289_v18 }
  0x21   :  { %164 = vmatmul.bf16.vlgmr.msra.gmra.mxu0 %v56_v19 }
  0x22   :  { %177 = vmatmul.bf16.vlgmr.msra.gmra.mxu1 %v57_v20 }
  0x9e   :  { %v165_v22 = vpop.f32.mrf.mxu0 }
  0x9f   :  { %v178_v23 = vpop.f32.mrf.mxu1 }
  0xa0   :  { %v179_v24 = vadd.f32 %v178_v23, %v165_v22 }
  0xa2   :  { %v192_v25 = vadd.f32 %v297_v21, %v179_v24 }
  0xa4   :  { %v193_v26 = vsub.f32 0.0, %v192_v25 }
  0xa6   :  { %v194_v27 = vmul.f32 1.442695, %v193_v26  ;;  %v167_v28 = vpop.f32.mrf.mxu0 }
  0xa7   :  { %v180_v29 = vpop.f32.mrf.mxu1 }
  0xa8   :  { %298 = vpow2.f32 %v194_v27 }
  0xae   :  { %v299_v30 = vpop.eup %298 }
  0xaf   :  { %v196_v31 = vadd.f32 1.0, %v299_v30 }
  0xb1   :  { %300 = vrcp.f32 %v196_v31  ;;  %v208_v35 = vand.u32 2147483648, %v196_v31  ;;  %v206_v37 = vand.u32 2147483647, %v196_v31  ;;  %vm202_vm1 = vweird.f32 %v196_v31 }
  0xb3   :  { %v209_v39 = vor.u32 1.1754944e-38, %v208_v35  ;;  %vm207_vm3 = vcmp.eq.f32.partialorder %v206_v37, 8.507059e+37 }
  0xb7   :  { %v301_v32 = vpop.eup %300 }
  0xb8   :  { %v198_v33 = vmul.f32 %v301_v32, %v196_v31  ;;  %vm203_vm0 = vweird.f32 %v301_v32 }
  0xb9   :  { %vm204_vm2 = vmor %vm202_vm1, %vm203_vm0 }
  0xba   :  { %v199_v34 = vsub.f32 1.0, %v198_v33 }
  0xbc   :  { %v200_v36 = vmul.f32 %v301_v32, %v199_v34 }
  0xbe   :  { %v201_v38 = vadd.f32 %v301_v32, %v200_v36 }
  0xc0   :  { %v205_v40 = vsel %vm204_vm2, %v301_v32, %v201_v38 }
  0xc1   :  { %v210_v41 = vsel %vm207_vm3, %v209_v39, %v205_v40 }
  0xc2   :  { %212 = vst [vmem:[%s382_s3] sm:$0xff] %v210_v41 }

// kernel: ge_deform_roi_pool_pack_forward.6
= control target key start
LH: loop header
LB: loop body
LE: loop exit
PB: predicated region body
PF: predicated region fallthrough
CT: control target
= control target key end

     0   :  { %s5807_s27 = smov [#allocation4]   ;;  %s5808_s28 = smov [#allocation5]   ;;  %s10045_s0 = inlined_call_operand.vmem [shape: s32[3], index: 0, kind: input, shape index: {}]   ;;  %s10046_s3 = inlined_call_operand.vmem [shape: f32[3,294,4], index: 3, kind: input, shape index: {}]   ;;  %s10047_s4 = inlined_call_operand.vmem [shape: bf16[2,4,256], index: 4, kind: input, shape index: {}]   ;;  %s10048_s5 = inlined_call_operand.vmem [shape: f32[2,256], index: 5, kind: input, shape index: {}]   ;;  %s10049_s6 = inlined_call_operand.vmem [shape: f32[3,294,4], index: 6, kind: output, shape index: {}]   ;;  %s10050_s1 = inlined_call_operand.vmem [shape: s32[3], index: 1, kind: input, shape index: {}]   ;;  %s10051_s2 = inlined_call_operand.vmem [shape: s32[3], index: 2, kind: input, shape index: {}]  }
   0x1   :  { %s12_s23 = sshll.u32 %s10045_s0, 4  ;;  %s17_s26 = sshll.u32 %s10050_s1, 4  ;;  %s13_s23 = int_to_ptr.vmem [resolvable:$true] %s12_s23  ;;  %s18_s26 = int_to_ptr.vmem [resolvable:$true] %s17_s26 }
   0x2   :  { %15 = dma.vmem_to_smem %s13_s23, 16, %s5807_s27, [#allocation3] }
   0x3   :  { %20 = dma.vmem_to_smem %s18_s26, 16, %s5808_s28, [#allocation3] }
   0x4   :  { %s22_s7 = sshll.u32 %s10051_s2, 4  ;;  %s5809_s8 = smov [#allocation6]   ;;  %s23_s7 = int_to_ptr.vmem [resolvable:$true] %s22_s7 }
   0x5   :  { %25 = dma.vmem_to_smem %s23_s7, 16, %s5809_s8, [#allocation3] }
   0x6   :  { %5793 = dma.done.wait [#allocation3], 48 }
   0x7   :  { %5794 = vsyncadd [#allocation3], 4294967248 }
   0x8   :  { %28 = sfence }
   0x9   :  { %s5859_s0 = smov 0   ;;  %s5861_s9 = smov 0  }
   0xa   :  { %s5863_s1 = smov 0  }
   0xb LB: > { %s46_s2 = sadd.s32 1, %s5801_s9  ;;  %p5218_p0 = scmp.ge.s32.totalorder %s5805_s1, 1  ;;  %s5805_s1 = sphi %s5863_s1, %s34_s1   ;;  %s5801_s9 = sphi %s5861_s9, %s11346_s9   ;;  %s5797_s0 = sphi %s5859_s0, %s11345_s0  }
   0xc   : > { %p48_p1 = scmp.ge.s32.totalorder %s46_s2, 3  ;;  %p250_p2 = scmp.lt.s32.totalorder %s5805_s1, 4 }
   0xe   : > { %s11348_s2 = smov (%p48_p1, %s46_s2), 0  ;;  %p251_p3 = pnand %p5218_p0, %p250_p2 }
   0xf   : > { %p301_p4 = scmp.lt.s32.totalorder (!%p251_p3), %s5797_s0, 2  ;;  %s306_s10 = sld [smem:[#allocation5 + %s5797_s0]] (!%p251_p3) }
  0x10   : > { %254 = sbr.rel (%p251_p3) target bundleno = 1342 (0x53e), region = 32  ;;  %s309_s11 = sld [smem:[#allocation6 + %s5797_s0]] (!%p251_p3) }
  0x11   : > { %s312_s13 = sld [smem:[#allocation4 + %s5797_s0]] (!%p251_p3) }
  0x12   : > { %s5891_s15 = sld [smem:[#allocation5 + %s5797_s0]] (!%p251_p3) }
  0x13   : > { %s5896_s16 = sld [smem:[#allocation6 + %s5797_s0]] (!%p251_p3) }
  0x14   : > { %s397_s23 = sld [smem:[#allocation5 + %s5797_s0]] (!%p251_p3) }
  0x15   : > { %vm358_vm0 = vcmask 31744   ;;  %v5810_v0 = vmov 0.0   ;;  %s302_s12 = scalar_select %p301_p4, %s5797_s0, 2  ;;  %vm395_vm1 = vcmask 29696  }
  0x16   : > { %359 = vst.msk [vmem:[#allocation2] sm:$0xff] %vm358_vm0, %v5810_v0  ;;  %p5220_p5 = scmp.lt.s32.totalorder %s306_s10, 0  ;;  %s399_s24 = sld [smem:[#allocation6 + %s5797_s0]] }
  0x17   : > { %360 = vst.msk [vmem:[#allocation2 + $0x8] sm:$0xff] %vm358_vm0, %v5810_v0  ;;  %s5308_s14 = smul.u32 296, %s302_s12  ;;  %p314_p6 = scmp.lt.s32.totalorder %s312_s13, 1 }
  0x18   : > { %361 = vst.msk [vmem:[#allocation2 + $0x10] sm:$0xff] %vm358_vm0, %v5810_v0  ;;  %s11350_s10 = smov (%p5220_p5, %s306_s10), 0  ;;  %p5224_p8 = scmp.lt.s32.totalorder %s5891_s15, 0 }
  0x19   : > { %362 = vst.msk [vmem:[#allocation2 + $0x18] sm:$0xff] %vm358_vm0, %v5810_v0  ;;  %s5903_s19 = scalar_lea.vmem %s10046_s3, %s5308_s14  ;;  %s5910_s22 = scalar_lea.vmem %s10049_s6, %s5308_s14 }
  0x1a   : > { %363 = vst.msk [vmem:[#allocation2 + $0x20] sm:$0xff] %vm358_vm0, %v5810_v0  ;;  %p310_p7 = scmp.lt.s32.totalorder %s11350_s10, %s309_s11  ;;  %s11352_s13 = smov (!%p314_p6, %s312_s13), 1 }
  0x1b   : > { %364 = vst.msk [vmem:[#allocation2 + $0x28] sm:$0xff] %vm358_vm0, %v5810_v0  ;;  %s5222_s25 = sshll.u32 %s11352_s13, 1  ;;  %p5228_p9 = scmp.le.s32.totalorder %s397_s23, 0 }
  0x1c   : > { %365 = vst.msk [vmem:[#allocation2 + $0x30] sm:$0xff] %vm358_vm0, %v5810_v0  ;;  %s11354_s10 = smov (!%p310_p7, %s11350_s10), %s309_s11  ;;  %p5229_p11 = scmp.ge.s32.totalorder %s399_s24, 0 }
  0x1d   : > { %366 = vst.msk [vmem:[#allocation2 + $0x38] sm:$0xff] %vm358_vm0, %v5810_v0  ;;  %s5221_s26 = sshll.u32 %s11354_s10, 1  ;;  %s11356_s15 = smov (%p5224_p8, %s5891_s15), 0 }
  0x1e   : > { %367 = vst.msk [vmem:[#allocation2 + $0x40] sm:$0xff] %vm358_vm0, %v5810_v0  ;;  %p316_p10 = scmp.lt.s32.totalorder %s5221_s26, 1  ;;  %p334_p12 = scmp.lt.s32.totalorder %s11356_s15, %s5896_s16 }
  0x1f   : > { %368 = vst.msk [vmem:[#allocation2 + $0x48] sm:$0xff] %vm358_vm0, %v5810_v0  ;;  %p5943_p13 = pnand %p5229_p11, %p5228_p9 }
  0x20   : > { %369 = vst.msk [vmem:[#allocation2 + $0x50] sm:$0xff] %vm358_vm0, %v5810_v0  ;;  %s11358_s26 = smov (!%p316_p10, %s5221_s26), 1  ;;  %s11360_s15 = smov (!%p334_p12, %s11356_s15), %s5896_s16 }
  0x21   : > { %370 = vst.msk [vmem:[#allocation2 + $0x58] sm:$0xff] %vm358_vm0, %v5810_v0  ;;  %s319_s28 = sadd.s32 %s5222_s25, %s11358_s26  ;;  %s5225_s0 = sshll.u32 %s11360_s15, 1 }
  0x22   : > { %371 = vst.msk [vmem:[#allocation2 + $0x60] sm:$0xff] %vm358_vm0, %v5810_v0  ;;  %s5223_s29 = sshll.u32 %s319_s28, 1  ;;  %p337_p0 = scmp.lt.s32.totalorder %s5225_s0, 1 }
  0x23   : > { %372 = vst.msk [vmem:[#allocation2 + $0x68] sm:$0xff] %vm358_vm0, %v5810_v0  ;;  %s5954_s8 = scalar_lea.vmem %s10047_s4, %s5223_s29 }
  0x24   : > { %373 = vst.msk [vmem:[#allocation2 + $0x70] sm:$0xff] %vm358_vm0, %v5810_v0  ;;  %s11362_s0 = smov (!%p337_p0, %s5225_s0), 1 }
  0x25   : > { %374 = vst.msk [vmem:[#allocation2 + $0x78] sm:$0xff] %vm358_vm0, %v5810_v0  ;;  %s5226_s10 = sshll.u32 %s11362_s0, 1 }
  0x26   : > { %375 = vst.msk [vmem:[#allocation2 + $0x80] sm:$0xff] %vm358_vm0, %v5810_v0  ;;  %s5978_s13 = scalar_lea.vmem %s10048_s5, %s5226_s10 }
  0x27   : > { %376 = vst.msk [vmem:[#allocation2 + $0x88] sm:$0xff] %vm358_vm0, %v5810_v0 }
  0x28   : > { %377 = vst.msk [vmem:[#allocation2 + $0x90] sm:$0xff] %vm358_vm0, %v5810_v0 }
  0x29   : > { %378 = vst.msk [vmem:[#allocation2 + $0x98] sm:$0xff] %vm358_vm0, %v5810_v0 }
  0x2a   : > { %379 = vst.msk [vmem:[#allocation2 + $0xa0] sm:$0xff] %vm358_vm0, %v5810_v0 }
  0x2b   : > { %380 = vst.msk [vmem:[#allocation2 + $0xa8] sm:$0xff] %vm358_vm0, %v5810_v0 }
  0x2c   : > { %381 = vst.msk [vmem:[#allocation2 + $0xb0] sm:$0xff] %vm358_vm0, %v5810_v0 }
  0x2d   : > { %382 = vst.msk [vmem:[#allocation2 + $0xb8] sm:$0xff] %vm358_vm0, %v5810_v0 }
  0x2e   : > { %383 = vst.msk [vmem:[#allocation2 + $0xc0] sm:$0xff] %vm358_vm0, %v5810_v0 }
  0x2f   : > { %384 = vst.msk [vmem:[#allocation2 + $0xc8] sm:$0xff] %vm358_vm0, %v5810_v0 }
  0x30   : > { %385 = vst.msk [vmem:[#allocation2 + $0xd0] sm:$0xff] %vm358_vm0, %v5810_v0 }
  0x31   : > { %386 = vst.msk [vmem:[#allocation2 + $0xd8] sm:$0xff] %vm358_vm0, %v5810_v0 }
  0x32   : > { %387 = vst.msk [vmem:[#allocation2 + $0xe0] sm:$0xff] %vm358_vm0, %v5810_v0 }
  0x33   : > { %388 = vst.msk [vmem:[#allocation2 + $0xe8] sm:$0xff] %vm358_vm0, %v5810_v0 }
  0x34   : > { %389 = vst.msk [vmem:[#allocation2 + $0xf0] sm:$0xff] %vm358_vm0, %v5810_v0 }
  0x35   : > { %390 = vst.msk [vmem:[#allocation2 + $0xf8] sm:$0xff] %vm358_vm0, %v5810_v0 }
  0x36   : > { %391 = vst.msk [vmem:[#allocation2 + $0x100] sm:$0xff] %vm358_vm0, %v5810_v0  ;;  %404 = sbr.rel (%p5943_p13) target bundleno = 1304 (0x518), region = 40 }
  0x37   : > { %392 = vst.msk [vmem:[#allocation2 + $0x108] sm:$0xff] %vm358_vm0, %v5810_v0 }
  0x38   : > { %393 = vst.msk [vmem:[#allocation2 + $0x110] sm:$0xff] %vm358_vm0, %v5810_v0 }
  0x39   : > { %394 = vst.msk [vmem:[#allocation2 + $0x118] sm:$0xff] %vm358_vm0, %v5810_v0 }
  0x3a   : > { %396 = vst.msk [vmem:[#allocation2 + $0x120] sm:$0x3f] %vm395_vm1, %v5810_v0 }
  0x3b   : > { %v5999_v1 = vld [vmem:[%s5903_s19 + $0x10] sm:$0xff]  ;;  %v6002_v2 = vld [vmem:[%s5903_s19] sm:$0xff]  ;;  %s5811_s14 = smov 126   ;;  %v6013_v7 = vld [vmem:[%s5903_s19 + $0x18] sm:$0xff] }
  0x3c   : > { %v445_v3 = vmul.f32 0.5, %v5999_v1  ;;  %v443_v4 = vmul.f32 0.5, %v6002_v2  ;;  %v6007_v5 = vld [vmem:[%s5903_s19 + $0x20] sm:$0xff]  ;;  %v6016_v8 = vld [vmem:[%s5903_s19 + $0x8] sm:$0xff]  ;;  %v446_v10 = vmul.f32 0.5, %v6013_v7  ;;  %v6028_v13 = vld [vmem:[%s5903_s19 + $0x38] sm:$0xff] }
  0x3d   : > { %v447_v6 = vmul.f32 0.5, %v6007_v5  ;;  %v6020_v9 = vld [vmem:[%s5903_s19 + $0x28] sm:$0xff]  ;;  %v444_v11 = vmul.f32 0.5, %v6016_v8  ;;  %v6031_v14 = vld [vmem:[%s5903_s19 + $0x30] sm:$0xff]  ;;  %v6035_v15 = vld [vmem:[%s5903_s19 + $0x40] sm:$0xff]  ;;  %v450_v16 = vmul.f32 0.5, %v6028_v13 }
  0x3e   : > { %521 = vrot.lane.b32.xlu1 %v445_v3, %s5811_s14  ;;  %517 = vrot.lane.b32.xlu0 %v443_v4, %s5811_s14  ;;  %v448_v12 = vmul.f32 0.5, %v6020_v9  ;;  %v449_v17 = vmul.f32 0.5, %v6031_v14  ;;  %v451_v18 = vmul.f32 0.5, %v6035_v15  ;;  %v6043_v19 = vld [vmem:[%s5903_s19 + $0x50] sm:$0xff]  ;;  %v6046_v20 = vld [vmem:[%s5903_s19 + $0x48] sm:$0xff] }
  0x3f   : > { %525 = vrot.lane.b32.xlu2 %v447_v6, %s5811_s14  ;;  %v6050_v21 = vld [vmem:[%s5903_s19 + $0x58] sm:$0xff]  ;;  %v453_v22 = vmul.f32 0.5, %v6043_v19  ;;  %v452_v23 = vmul.f32 0.5, %v6046_v20  ;;  %v6058_v25 = vld [vmem:[%s5903_s19 + $0x68] sm:$0xff]  ;;  %v6061_v26 = vld [vmem:[%s5903_s19 + $0x60] sm:$0xff] }
  0x40   : > { %v454_v24 = vmul.f32 0.5, %v6050_v21  ;;  %v6065_v27 = vld [vmem:[%s5903_s19 + $0x70] sm:$0xff]  ;;  %v456_v28 = vmul.f32 0.5, %v6058_v25  ;;  %v455_v29 = vmul.f32 0.5, %v6061_v26  ;;  %v6073_v31 = vld [vmem:[%s5903_s19 + $0x80] sm:$0xff]  ;;  %v6076_v32 = vld [vmem:[%s5903_s19 + $0x78] sm:$0xff] }
  0x41   : > { %v457_v30 = vmul.f32 0.5, %v6065_v27  ;;  %v6080_v33 = vld [vmem:[%s5903_s19 + $0x88] sm:$0xff]  ;;  %v459_v34 = vmul.f32 0.5, %v6073_v31  ;;  %v458_v35 = vmul.f32 0.5, %v6076_v32  ;;  %v6088_v37 = vld [vmem:[%s5903_s19 + $0x98] sm:$0xff]  ;;  %v6091_v38 = vld [vmem:[%s5903_s19 + $0x90] sm:$0xff] }
  0x42   : > { %v460_v36 = vmul.f32 0.5, %v6080_v33  ;;  %v6095_v39 = vld [vmem:[%s5903_s19 + $0xa0] sm:$0xff]  ;;  %v462_v40 = vmul.f32 0.5, %v6088_v37  ;;  %v461_v41 = vmul.f32 0.5, %v6091_v38  ;;  %v6103_v43 = vld [vmem:[%s5903_s19 + $0xb0] sm:$0xff]  ;;  %v6106_v44 = vld [vmem:[%s5903_s19 + $0xa8] sm:$0xff] }
  0x43   : > { %v463_v42 = vmul.f32 0.5, %v6095_v39  ;;  %v6110_v45 = vld [vmem:[%s5903_s19 + $0xb8] sm:$0xff]  ;;  %v465_v46 = vmul.f32 0.5, %v6103_v43  ;;  %v464_v47 = vmul.f32 0.5, %v6106_v44  ;;  %v6118_v49 = vld [vmem:[%s5903_s19 + $0xc8] sm:$0xff]  ;;  %v6121_v50 = vld [vmem:[%s5903_s19 + $0xc0] sm:$0xff] }
  0x44   : > { %v466_v48 = vmul.f32 0.5, %v6110_v45  ;;  %v6125_v51 = vld [vmem:[%s5903_s19 + $0xd0] sm:$0xff]  ;;  %v468_v52 = vmul.f32 0.5, %v6118_v49  ;;  %v467_v53 = vmul.f32 0.5, %v6121_v50  ;;  %v6133_v55 = vld [vmem:[%s5903_s19 + $0xe0] sm:$0xff]  ;;  %v6136_v56 = vld [vmem:[%s5903_s19 + $0xd8] sm:$0xff] }
  0x45   : > { %v469_v54 = vmul.f32 0.5, %v6125_v51  ;;  %v6140_v57 = vld [vmem:[%s5903_s19 + $0xe8] sm:$0xff]  ;;  %v471_v58 = vmul.f32 0.5, %v6133_v55  ;;  %v470_v59 = vmul.f32 0.5, %v6136_v56  ;;  %v6148_v61 = vld [vmem:[%s5903_s19 + $0xf8] sm:$0xff]  ;;  %v6151_v62 = vld [vmem:[%s5903_s19 + $0xf0] sm:$0xff] }
  0x46   : > { %523 = vrot.lane.b32.xlu1 %v446_v10, %s5811_s14  ;;  %519 = vrot.lane.b32.xlu0 %v444_v11, %s5811_s14  ;;  %v472_v60 = vmul.f32 0.5, %v6140_v57  ;;  %v6155_v63 = vld [vmem:[%s5903_s19 + $0x100] sm:$0xff]  ;;  %v474_v0 = vmul.f32 0.5, %v6148_v61  ;;  %v473_v3 = vmul.f32 0.5, %v6151_v62  ;;  %v6163_v6 = vld [vmem:[%s5903_s19 + $0x110] sm:$0xff] }
  0x47   : > { %527 = vrot.lane.b32.xlu2 %v448_v12, %s5811_s14  ;;  %v475_v4 = vmul.f32 0.5, %v6155_v63  ;;  %v6166_v10 = vld [vmem:[%s5903_s19 + $0x108] sm:$0xff]  ;;  %v6170_v11 = vld [vmem:[%s5903_s19 + $0x118] sm:$0xff]  ;;  %v477_v12 = vmul.f32 0.5, %v6163_v6 }
  0x4e   : > { %531 = vrot.lane.b32.xlu1 %v450_v16, %s5811_s14  ;;  %529 = vrot.lane.b32.xlu0 %v449_v17, %s5811_s14  ;;  %v476_v16 = vmul.f32 0.5, %v6166_v10  ;;  %v478_v17 = vmul.f32 0.5, %v6170_v11 }
  0x4f   : > { %533 = vrot.lane.b32.xlu2 %v451_v18, %s5811_s14  ;;  %v5812_v18 = vmov 1  }
  0x50   : > { %5343 = vset.pattern.permute.xlu0 %v5812_v18  ;;  %5341 = vset.pattern.permute.xlu1 %v5812_v18 }
  0x51   : > { %5342 = vset.pattern.permute.xlu2 %v5812_v18 }
  0x56   : > { %537 = vrot.lane.b32.xlu1 %v453_v22, %s5811_s14  ;;  %535 = vrot.lane.b32.xlu0 %v452_v23, %s5811_s14  ;;  %v6178_v22 = vld [vmem:[%s5903_s19 + $0x120] sm:$0x3f] }
  0x57   : > { %539 = vrot.lane.b32.xlu2 %v454_v24, %s5811_s14  ;;  %v479_v23 = vmul.f32 0.5, %v6178_v22 }
  0x5e   : > { %543 = vrot.lane.b32.xlu1 %v456_v28, %s5811_s14  ;;  %541 = vrot.lane.b32.xlu0 %v455_v29, %s5811_s14 }
  0x5f   : > { %545 = vrot.lane.b32.xlu2 %v457_v30, %s5811_s14 }
  0x66   : > { %549 = vrot.lane.b32.xlu1 %v459_v34, %s5811_s14  ;;  %547 = vrot.lane.b32.xlu0 %v458_v35, %s5811_s14  ;;  %v10052_v35 = vmov 0.0  }
  0x67   : > { %551 = vrot.lane.b32.xlu2 %v460_v36, %s5811_s14 }
  0x6e   : > { %555 = vrot.lane.b32.xlu1 %v462_v40, %s5811_s14  ;;  %553 = vrot.lane.b32.xlu0 %v461_v41, %s5811_s14 }
  0x6f   : > { %557 = vrot.lane.b32.xlu2 %v463_v42, %s5811_s14 }
  0x76   : > { %561 = vrot.lane.b32.xlu1 %v465_v46, %s5811_s14  ;;  %559 = vrot.lane.b32.xlu0 %v464_v47, %s5811_s14 }
  0x77   : > { %563 = vrot.lane.b32.xlu2 %v466_v48, %s5811_s14 }
  0x7e   : > { %567 = vrot.lane.b32.xlu1 %v468_v52, %s5811_s14  ;;  %565 = vrot.lane.b32.xlu0 %v467_v53, %s5811_s14 }
  0x7f   : > { %569 = vrot.lane.b32.xlu2 %v469_v54, %s5811_s14 }
  0x86   : > { %573 = vrot.lane.b32.xlu1 %v471_v58, %s5811_s14  ;;  %571 = vrot.lane.b32.xlu0 %v470_v59, %s5811_s14 }
  0x87   : > { %575 = vrot.lane.b32.xlu2 %v472_v60, %s5811_s14 }
  0x8e   : > { %579 = vrot.lane.b32.xlu1 %v474_v0, %s5811_s14  ;;  %577 = vrot.lane.b32.xlu0 %v473_v3, %s5811_s14 }
  0x8f   : > { %581 = vrot.lane.b32.xlu2 %v475_v4, %s5811_s14 }
  0x96   : > { %585 = vrot.lane.b32.xlu1 %v477_v12, %s5811_s14  ;;  %583 = vrot.lane.b32.xlu0 %v476_v16, %s5811_s14 }
  0x97   : > { %587 = vrot.lane.b32.xlu2 %v478_v17, %s5811_s14 }
  0x99   : > { %v526_v24 = vpop.permute.xlu2 %525 }
  0x9a   : > { %v6184_v29 = vadd.f32 %v526_v24, %v6007_v5 }
  0x9c   : > { %vm669_vm2 = vcmp.ge.f32.partialorder %v6184_v29, -1.0  ;;  %vm706_vm3 = vcmp.le.f32.partialorder %v6184_v29, 16.0 }
  0x9d   : > { %vm743_vm6 = vmand %vm669_vm2, %vm706_vm3 }
  0x9e   : > { %589 = vrot.lane.b32.xlu0 %v479_v23, %s5811_s14  ;;  %v5234_v36 = vsel %vm743_vm6, 1.0, %v10052_v35 }
  0xa1   : > { %v528_v28 = vpop.permute.xlu2 %527 }
  0xa2   : > { %v6187_v30 = vadd.f32 %v528_v28, %v6020_v9 }
  0xa4   : > { %vm670_vm4 = vcmp.ge.f32.partialorder %v6187_v30, -1.0  ;;  %vm707_vm5 = vcmp.le.f32.partialorder %v6187_v30, 16.0  ;;  %v855_v28 = vmax.f32 %v6187_v30, 0.0 }
  0xa5   : > { %vm744_vm7 = vmand %vm670_vm4, %vm707_vm5 }
  0xa6   : > { %v5235_v5 = vsel %vm744_vm7, 1.0, %v10052_v35 }
  0xa7   : > { %v6195_v9 = vpack.i.bf16 %v5235_v5, %v5234_v36 }
  0xa9   : > { %v534_v34 = vpop.permute.xlu2 %533  ;;  %10274 = vst [vmem:[#allocation8_spill] sm:$0xff] %v6195_v9 }
  0xb0   : > { %v522_v40 = vpop.permute.xlu1 %521  ;;  %v518_v41 = vpop.permute.xlu0 %517 }
  0xb1   : > { %v630_v42 = vadd.f32 %v522_v40, %v5999_v1  ;;  %v628_v46 = vadd.f32 %v518_v41, %v6002_v2  ;;  %v540_v47 = vpop.permute.xlu2 %539  ;;  %v854_v41 = vmax.f32 %v6184_v29, 0.0 }
  0xb2   : > { %v639_v30 = vadd.f32 %v540_v47, %v6050_v21 }
  0xb3   : > { %v852_v48 = vmax.f32 %v630_v42, 0.0  ;;  %v850_v52 = vmax.f32 %v628_v46, 0.0  ;;  %vm665_vm8 = vcmp.ge.f32.partialorder %v628_v46, -1.0  ;;  %vm702_vm9 = vcmp.le.f32.partialorder %v628_v46, 16.0 }
  0xb4   : > { %vm667_vm10 = vcmp.ge.f32.partialorder %v630_v42, -1.0  ;;  %vm704_vm11 = vcmp.le.f32.partialorder %v630_v42, 16.0  ;;  %vm739_vm12 = vmand %vm665_vm8, %vm702_vm9  ;;  %v636_v42 = vadd.f32 %v534_v34, %v6035_v15 }
  0xb5   : > { %v6199_v53 = vmin.f32 %v852_v48, 15.0  ;;  %v6201_v54 = vmin.f32 %v850_v52, 15.0  ;;  %vm741_vm3 = vmand %vm667_vm10, %vm704_vm11  ;;  %v5230_v4 = vsel %vm739_vm12, 1.0, %v10052_v35  ;;  %v6228_v52 = vmin.f32 %v855_v28, 15.0 }
  0xb6   : > { %v5232_v17 = vsel %vm741_vm3, 1.0, %v10052_v35  ;;  %vm673_vm12 = vcmp.ge.f32.partialorder %v636_v42, -1.0  ;;  %v858_v15 = vmax.f32 %v636_v42, 0.0 }
  0xb7   : > { %10275 = vst [vmem:[#allocation9_spill] sm:$0xff] %v6199_v53  ;;  %936 = vperm.xlu0 %5343, %v6199_v53   ;;  %926 = vperm.xlu1 %5341, %v6201_v54   ;;  %v6707_v53 = vld [vmem:[%s5903_s19 + $0x100] sm:$0xff] }
  0xb8   : > { %10276 = vst [vmem:[#allocation10_spill] sm:$0xff] %v6201_v54  ;;  %v524_v58 = vpop.permute.xlu1 %523  ;;  %v520_v59 = vpop.permute.xlu0 %519  ;;  %v6661_v54 = vld [vmem:[%s5903_s19 + $0xc0] sm:$0xff] }
  0xb9   : > { %v631_v1 = vadd.f32 %v524_v58, %v6013_v7  ;;  %v629_v2 = vadd.f32 %v520_v59, %v6016_v8  ;;  %v6207_v60 = vpop.permute.xlu2 %545  ;;  %10281 = vst [vmem:[#allocation15_spill] sm:$0xff] %v6228_v52  ;;  %v6231_v58 = vmin.f32 %v854_v41, 15.0 }
  0xbb   : > { %vm668_vm13 = vcmp.ge.f32.partialorder %v631_v1, -1.0  ;;  %vm705_vm14 = vcmp.le.f32.partialorder %v631_v1, 16.0  ;;  %vm666_vm15 = vcmp.ge.f32.partialorder %v629_v2, -1.0  ;;  %vm703_vm2 = vcmp.le.f32.partialorder %v629_v2, 16.0  ;;  %10282 = vst [vmem:[#allocation16_spill] sm:$0xff] %v6231_v58 }
  0xbc   : > { %v853_v0 = vmax.f32 %v631_v1, 0.0  ;;  %v851_v3 = vmax.f32 %v629_v2, 0.0  ;;  %vm740_vm4 = vmand %vm666_vm15, %vm703_vm2  ;;  %vm713_vm15 = vcmp.le.f32.partialorder %v639_v30, 16.0 }
  0xbd   : > { %v5231_v12 = vsel %vm740_vm4, 1.0, %v10052_v35  ;;  %vm742_vm5 = vmand %vm668_vm13, %vm705_vm14  ;;  %vm710_vm13 = vcmp.le.f32.partialorder %v636_v42, 16.0  ;;  %vm676_vm14 = vcmp.ge.f32.partialorder %v639_v30, -1.0 }
  0xbe   : > { %v6211_v16 = vmin.f32 %v853_v0, 15.0  ;;  %v6213_v7 = vmin.f32 %v851_v3, 15.0  ;;  %v6215_v8 = vpack.i.bf16 %v5231_v12, %v5230_v4  ;;  %v5233_v18 = vsel %vm742_vm5, 1.0, %v10052_v35  ;;  %vm747_vm2 = vmand %vm673_vm12, %vm710_vm13 }
  0xbf   : > { %v6222_v36 = vpack.i.bf16 %v5233_v18, %v5232_v17  ;;  %v6249_v4 = vmin.f32 %v858_v15, 15.0 }
  0xc0   : > { %10277 = vst [vmem:[#allocation11_spill] sm:$0xff] %v6211_v16  ;;  %941 = vperm.xlu1 %5341, %v6211_v16   ;;  %931 = vperm.xlu2 %5342, %v6213_v7   ;;  %v532_v23 = vpop.permute.xlu1 %531  ;;  %v530_v24 = vpop.permute.xlu0 %529 }
  0xc1   : > { %10278 = vst [vmem:[#allocation12_spill] sm:$0xff] %v6213_v7  ;;  %v635_v5 = vadd.f32 %v532_v23, %v6028_v13  ;;  %v634_v40 = vadd.f32 %v530_v24, %v6031_v14  ;;  %v552_v46 = vpop.permute.xlu2 %551 }
  0xc2   : > { %10279 = vst [vmem:[#allocation13_spill] sm:$0xff] %v6215_v8  ;;  %v6269_v15 = vadd.f32 %v552_v46, %v6080_v33 }
  0xc3   : > { %10280 = vst [vmem:[#allocation14_spill] sm:$0xff] %v6222_v36  ;;  %vm672_vm6 = vcmp.ge.f32.partialorder %v635_v5, -1.0  ;;  %vm709_vm7 = vcmp.le.f32.partialorder %v635_v5, 16.0  ;;  %vm671_vm8 = vcmp.ge.f32.partialorder %v634_v40, -1.0  ;;  %vm708_vm9 = vcmp.le.f32.partialorder %v634_v40, 16.0 }
  0xc4   : > { %v857_v48 = vmax.f32 %v635_v5, 0.0  ;;  %vm745_vm10 = vmand %vm671_vm8, %vm708_vm9  ;;  %v856_v2 = vmax.f32 %v634_v40, 0.0  ;;  %10285 = vst [vmem:[#allocation19_spill] sm:$0xff] %v6249_v4  ;;  %v861_v5 = vmax.f32 %v639_v30, 0.0  ;;  %v642_v30 = vadd.f32 %v6207_v60, %v6065_v27 }
  0xc5   : > { %vm746_vm11 = vmand %vm672_vm6, %vm709_vm7  ;;  %v5236_v13 = vsel %vm745_vm10, 1.0, %v10052_v35 }
  0xc6   : > { %v6234_v14 = vmin.f32 %v857_v48, 15.0  ;;  %v5237_v29 = vsel %vm746_vm11, 1.0, %v10052_v35  ;;  %vm750_vm7 = vmand %vm676_vm14, %vm713_vm15  ;;  %v6252_v12 = vmin.f32 %v856_v2, 15.0 }
  0xc7   : > { %v6239_v47 = vpack.i.bf16 %v5237_v29, %v5236_v13  ;;  %v5241_v18 = vsel %vm750_vm7, 1.0, %v10052_v35 }
  0xc8   : > { %10283 = vst [vmem:[#allocation17_spill] sm:$0xff] %v6234_v14  ;;  %961 = vperm.xlu0 %5343, %v6234_v14   ;;  %951 = vperm.xlu1 %5341, %v6228_v52   ;;  %v538_v21 = vpop.permute.xlu1 %537  ;;  %v536_v34 = vpop.permute.xlu0 %535  ;;  %v6619_v52 = vld [vmem:[%s5903_s19 + $0x90] sm:$0xff]  ;;  %v6682_v14 = vld [vmem:[%s5903_s19 + $0xd8] sm:$0xff] }
  0xc9   : > { %10284 = vst [vmem:[#allocation18_spill] sm:$0xff] %v6239_v47  ;;  %946 = vperm.xlu2 %5342, %v6231_v58   ;;  %v638_v59 = vadd.f32 %v538_v21, %v6043_v19  ;;  %v637_v1 = vadd.f32 %v536_v34, %v6046_v20  ;;  %v6246_v0 = vpop.permute.xlu2 %557  ;;  %v5238_v19 = vsel %vm747_vm2, 1.0, %v10052_v35  ;;  %v6273_v21 = vmin.f32 %v861_v5, 15.0 }
  0xca   : > { %10286 = vst [vmem:[#allocation20_spill] sm:$0xff] %v6252_v12  ;;  %vm679_vm2 = vcmp.ge.f32.partialorder %v642_v30, -1.0  ;;  %v1763_v58 = vmul.f32 1.5, %v6619_v52 }
  0xcb   : > { %vm675_vm3 = vcmp.ge.f32.partialorder %v638_v59, -1.0  ;;  %vm712_vm4 = vcmp.le.f32.partialorder %v638_v59, 16.0  ;;  %vm674_vm5 = vcmp.ge.f32.partialorder %v637_v1, -1.0  ;;  %vm711_vm6 = vcmp.le.f32.partialorder %v637_v1, 16.0  ;;  %10290 = vst [vmem:[#allocation24_spill] sm:$0xff] %v6273_v21 }
  0xcc   : > { %v860_v3 = vmax.f32 %v638_v59, 0.0  ;;  %vm748_vm8 = vmand %vm674_vm5, %vm711_vm6  ;;  %v859_v48 = vmax.f32 %v637_v1, 0.0  ;;  %vm719_vm5 = vcmp.le.f32.partialorder %v6269_v15, 16.0  ;;  %v864_v59 = vmax.f32 %v642_v30, 0.0 }
  0xcd   : > { %v5239_v20 = vsel %vm748_vm8, 1.0, %v10052_v35  ;;  %vm749_vm9 = vmand %vm675_vm3, %vm712_vm4  ;;  %vm716_vm3 = vcmp.le.f32.partialorder %v642_v30, 16.0  ;;  %vm682_vm4 = vcmp.ge.f32.partialorder %v6269_v15, -1.0 }
  0xce   : > { %v6255_v17 = vmin.f32 %v860_v3, 15.0  ;;  %v6258_v23 = vpack.i.bf16 %v5239_v20, %v5238_v19  ;;  %v5240_v40 = vsel %vm749_vm9, 1.0, %v10052_v35  ;;  %vm753_vm6 = vmand %vm679_vm2, %vm716_vm3 }
  0xcf   : > { %v6266_v13 = vpack.i.bf16 %v5241_v18, %v5240_v40  ;;  %vm756_vm7 = vmand %vm682_vm4, %vm719_vm5  ;;  %v6292_v18 = vmin.f32 %v864_v59, 15.0 }
  0xd0   : > { %10287 = vst [vmem:[#allocation21_spill] sm:$0xff] %v6255_v17  ;;  %976 = vperm.xlu0 %5343, %v6255_v17   ;;  %966 = vperm.xlu1 %5341, %v6249_v4   ;;  %v544_v24 = vpop.permute.xlu1 %543  ;;  %v542_v28 = vpop.permute.xlu0 %541  ;;  %v6640_v17 = vld [vmem:[%s5903_s19 + $0xa8] sm:$0xff] }
  0xd1   : > { %10288 = vst [vmem:[#allocation22_spill] sm:$0xff] %v6258_v23  ;;  %956 = vperm.xlu2 %5342, %v6252_v12   ;;  %v641_v41 = vadd.f32 %v544_v24, %v6058_v25  ;;  %v640_v42 = vadd.f32 %v542_v28, %v6061_v26  ;;  %v6275_v25 = vmin.f32 %v859_v48, 15.0  ;;  %v564_v26 = vpop.permute.xlu2 %563  ;;  %v5244_v24 = vsel %vm753_vm6, 1.0, %v10052_v35 }
  0xd2   : > { %10289 = vst [vmem:[#allocation23_spill] sm:$0xff] %v6266_v13  ;;  %v6315_v59 = vadd.f32 %v564_v26, %v6110_v45 }
  0xd3   : > { %vm678_vm10 = vcmp.ge.f32.partialorder %v641_v41, -1.0  ;;  %vm715_vm11 = vcmp.le.f32.partialorder %v641_v41, 16.0  ;;  %vm677_vm12 = vcmp.ge.f32.partialorder %v640_v42, -1.0  ;;  %vm714_vm13 = vcmp.le.f32.partialorder %v640_v42, 16.0  ;;  %10291 = vst [vmem:[#allocation25_spill] sm:$0xff] %v6275_v25 }
  0xd4   : > { %v863_v29 = vmax.f32 %v641_v41, 0.0  ;;  %vm751_vm14 = vmand %vm677_vm12, %vm714_vm13  ;;  %v862_v19 = vmax.f32 %v640_v42, 0.0  ;;  %10294 = vst [vmem:[#allocation28_spill] sm:$0xff] %v6292_v18 }
  0xd5   : > { %vm752_vm15 = vmand %vm678_vm10, %vm715_vm11  ;;  %v5242_v34 = vsel %vm751_vm14, 1.0, %v10052_v35 }
  0xd6   : > { %v6278_v33 = vmin.f32 %v863_v29, 15.0  ;;  %v5243_v27 = vsel %vm752_vm15, 1.0, %v10052_v35  ;;  %v6295_v28 = vmin.f32 %v862_v19, 15.0  ;;  %v867_v29 = vmax.f32 %v6269_v15, 0.0 }
  0xd7   : > { %v6285_v1 = vpack.i.bf16 %v5243_v27, %v5242_v34 }
  0xd8   : > { %10292 = vst [vmem:[#allocation26_spill] sm:$0xff] %v6278_v33  ;;  %991 = vperm.xlu0 %5343, %v6278_v33   ;;  %981 = vperm.xlu1 %5341, %v6273_v21   ;;  %v550_v60 = vpop.permute.xlu1 %549  ;;  %v548_v46 = vpop.permute.xlu0 %547  ;;  %v6319_v19 = vmin.f32 %v867_v29, 15.0  ;;  %v6598_v21 = vld [vmem:[%s5903_s19 + $0x78] sm:$0xff]  ;;  %v6623_v33 = vld [vmem:[%s5903_s19 + $0xa0] sm:$0xff] }
  0xd9   : > { %10293 = vst [vmem:[#allocation27_spill] sm:$0xff] %v6285_v1  ;;  %971 = vperm.xlu2 %5342, %v6275_v25   ;;  %v644_v2 = vadd.f32 %v550_v60, %v6073_v31  ;;  %v643_v3 = vadd.f32 %v548_v46, %v6076_v32  ;;  %v5247_v32 = vsel %vm756_vm7, 1.0, %v10052_v35  ;;  %v6301_v40 = vpop.permute.xlu2 %569  ;;  %v1760_v25 = vmul.f32 1.5, %v6598_v21 }
  0xda   : > { %10295 = vst [vmem:[#allocation29_spill] sm:$0xff] %v6295_v28 }
  0xdb   : > { %vm681_vm8 = vcmp.ge.f32.partialorder %v644_v2, -1.0  ;;  %vm718_vm9 = vcmp.le.f32.partialorder %v644_v2, 16.0  ;;  %vm680_vm10 = vcmp.ge.f32.partialorder %v643_v3, -1.0  ;;  %vm717_vm11 = vcmp.le.f32.partialorder %v643_v3, 16.0  ;;  %10299 = vst [vmem:[#allocation33_spill] sm:$0xff] %v6319_v19 }
  0xdc   : > { %v866_v20 = vmax.f32 %v644_v2, 0.0  ;;  %vm754_vm12 = vmand %vm680_vm10, %vm717_vm11  ;;  %v865_v46 = vmax.f32 %v643_v3, 0.0  ;;  %v648_v2 = vadd.f32 %v6246_v0, %v6095_v39 }
  0xdd   : > { %v5245_v31 = vsel %vm754_vm12, 1.0, %v10052_v35  ;;  %vm755_vm13 = vmand %vm681_vm8, %vm718_vm9  ;;  %vm688_vm8 = vcmp.ge.f32.partialorder %v6315_v59, -1.0  ;;  %vm725_vm9 = vcmp.le.f32.partialorder %v6315_v59, 16.0 }
  0xde   : > { %v6299_v5 = vmin.f32 %v866_v20, 15.0  ;;  %v6303_v41 = vpack.i.bf16 %v5245_v31, %v5244_v24  ;;  %v5246_v42 = vsel %vm755_vm13, 1.0, %v10052_v35  ;;  %v6321_v20 = vmin.f32 %v865_v46, 15.0  ;;  %vm762_vm11 = vmand %vm688_vm8, %vm725_vm9 }
  0xdf   : > { %v6309_v34 = vpack.i.bf16 %v5247_v32, %v5246_v42  ;;  %vm685_vm6 = vcmp.ge.f32.partialorder %v648_v2, -1.0  ;;  %vm722_vm7 = vcmp.le.f32.partialorder %v648_v2, 16.0  ;;  %v870_v26 = vmax.f32 %v648_v2, 0.0 }
  0xe0   : > { %10296 = vst [vmem:[#allocation30_spill] sm:$0xff] %v6299_v5  ;;  %1006 = vperm.xlu0 %5343, %v6299_v5   ;;  %996 = vperm.xlu1 %5341, %v6292_v18   ;;  %v556_v48 = vpop.permute.xlu1 %555  ;;  %v554_v30 = vpop.permute.xlu0 %553  ;;  %vm759_vm10 = vmand %vm685_vm6, %vm722_vm7 }
  0xe1   : > { %10297 = vst [vmem:[#allocation31_spill] sm:$0xff] %v6303_v41  ;;  %986 = vperm.xlu2 %5342, %v6295_v28   ;;  %v647_v27 = vadd.f32 %v556_v48, %v6088_v37  ;;  %v646_v60 = vadd.f32 %v554_v30, %v6091_v38  ;;  %v576_v42 = vpop.permute.xlu2 %575  ;;  %v6340_v30 = vmin.f32 %v870_v26, 15.0 }
  0xe2   : > { %10298 = vst [vmem:[#allocation32_spill] sm:$0xff] %v6309_v34 }
  0xe3   : > { %vm684_vm14 = vcmp.ge.f32.partialorder %v647_v27, -1.0  ;;  %vm721_vm15 = vcmp.le.f32.partialorder %v647_v27, 16.0  ;;  %vm683_vm2 = vcmp.ge.f32.partialorder %v646_v60, -1.0  ;;  %vm720_vm3 = vcmp.le.f32.partialorder %v646_v60, 16.0  ;;  %10300 = vst [vmem:[#allocation34_spill] sm:$0xff] %v6321_v20 }
  0xe4   : > { %v869_v15 = vmax.f32 %v647_v27, 0.0  ;;  %vm757_vm4 = vmand %vm683_vm2, %vm720_vm3  ;;  %v868_v32 = vmax.f32 %v646_v60, 0.0  ;;  %10303 = vst [vmem:[#allocation37_spill] sm:$0xff] %v6340_v30  ;;  %v5253_v27 = vsel %vm762_vm11, 1.0, %v10052_v35 }
  0xe5   : > { %vm758_vm5 = vmand %vm684_vm14, %vm721_vm15  ;;  %v5248_v37 = vsel %vm757_vm4, 1.0, %v10052_v35 }
  0xe6   : > { %v6324_v38 = vmin.f32 %v869_v15, 15.0  ;;  %v5249_v45 = vsel %vm758_vm5, 1.0, %v10052_v35  ;;  %v6343_v29 = vmin.f32 %v868_v32, 15.0  ;;  %v654_v32 = vadd.f32 %v6301_v40, %v6125_v51 }
  0xe7   : > { %v6331_v3 = vpack.i.bf16 %v5249_v45, %v5248_v37  ;;  %v873_v45 = vmax.f32 %v6315_v59, 0.0 }
  0xe8   : > { %10301 = vst [vmem:[#allocation35_spill] sm:$0xff] %v6324_v38  ;;  %1021 = vperm.xlu0 %5343, %v6324_v38   ;;  %1011 = vperm.xlu1 %5341, %v6319_v19   ;;  %v562_v39 = vpop.permute.xlu1 %561  ;;  %v560_v0 = vpop.permute.xlu0 %559  ;;  %vm691_vm8 = vcmp.ge.f32.partialorder %v654_v32, -1.0  ;;  %vm728_vm9 = vcmp.le.f32.partialorder %v654_v32, 16.0  ;;  %v6577_v19 = vld [vmem:[%s5903_s19 + $0x60] sm:$0xff]  ;;  %v6602_v38 = vld [vmem:[%s5903_s19 + $0x88] sm:$0xff] }
  0xe9   : > { %10302 = vst [vmem:[#allocation36_spill] sm:$0xff] %v6331_v3  ;;  %1001 = vperm.xlu2 %5342, %v6321_v20   ;;  %v650_v24 = vadd.f32 %v562_v39, %v6103_v43  ;;  %v649_v31 = vadd.f32 %v560_v0, %v6106_v44  ;;  %v5250_v43 = vsel %vm759_vm10, 1.0, %v10052_v35  ;;  %v1757_v20 = vmul.f32 1.5, %v6577_v19 }
  0xea   : > { %10304 = vst [vmem:[#allocation38_spill] sm:$0xff] %v6343_v29 }
  0xeb   : > { %vm687_vm12 = vcmp.ge.f32.partialorder %v650_v24, -1.0  ;;  %vm724_vm13 = vcmp.le.f32.partialorder %v650_v24, 16.0  ;;  %vm686_vm14 = vcmp.ge.f32.partialorder %v649_v31, -1.0  ;;  %vm723_vm15 = vcmp.le.f32.partialorder %v649_v31, 16.0 }
  0xec   : > { %v872_v48 = vmax.f32 %v650_v24, 0.0  ;;  %vm760_vm2 = vmand %vm686_vm14, %vm723_vm15  ;;  %v871_v24 = vmax.f32 %v649_v31, 0.0 }
  0xed   : > { %v5251_v44 = vsel %vm760_vm2, 1.0, %v10052_v35  ;;  %vm761_vm3 = vmand %vm687_vm12, %vm724_vm13 }
  0xee   : > { %v6347_v60 = vmin.f32 %v872_v48, 15.0  ;;  %v6349_v46 = vpack.i.bf16 %v5251_v44, %v5250_v43  ;;  %v5252_v2 = vsel %vm761_vm3, 1.0, %v10052_v35  ;;  %v657_v48 = vadd.f32 %v576_v42, %v6140_v57  ;;  %v582_v43 = vpop.permute.xlu2 %581  ;;  %vm765_vm14 = vmand %vm691_vm8, %vm728_vm9 }
  0xef   : > { %v6355_v39 = vpack.i.bf16 %v5253_v27, %v5252_v2  ;;  %v6363_v44 = vmin.f32 %v873_v45, 15.0  ;;  %v876_v42 = vmax.f32 %v654_v32, 0.0  ;;  %v5256_v45 = vsel %vm765_vm14, 1.0, %v10052_v35 }
  0xf0   : > { %10305 = vst [vmem:[#allocation39_spill] sm:$0xff] %v6347_v60  ;;  %1036 = vperm.xlu0 %5343, %v6347_v60   ;;  %1026 = vperm.xlu1 %5341, %v6340_v30   ;;  %v568_v15 = vpop.permute.xlu1 %567  ;;  %v566_v37 = vpop.permute.xlu0 %565  ;;  %vm694_vm12 = vcmp.ge.f32.partialorder %v657_v48, -1.0  ;;  %vm731_vm13 = vcmp.le.f32.partialorder %v657_v48, 16.0 }
  0xf1   : > { %10306 = vst [vmem:[#allocation40_spill] sm:$0xff] %v6349_v46  ;;  %1016 = vperm.xlu2 %5342, %v6343_v29   ;;  %v653_v0 = vadd.f32 %v568_v15, %v6118_v49  ;;  %v652_v26 = vadd.f32 %v566_v37, %v6121_v50  ;;  %v6365_v49 = vmin.f32 %v871_v24, 15.0  ;;  %vm768_vm15 = vmand %vm694_vm12, %vm731_vm13  ;;  %v6380_v24 = vmin.f32 %v876_v42, 15.0 }
  0xf2   : > { %10307 = vst [vmem:[#allocation41_spill] sm:$0xff] %v6355_v39 }
  0xf3   : > { %vm690_vm4 = vcmp.ge.f32.partialorder %v653_v0, -1.0  ;;  %vm727_vm5 = vcmp.le.f32.partialorder %v653_v0, 16.0  ;;  %vm689_vm6 = vcmp.ge.f32.partialorder %v652_v26, -1.0  ;;  %vm726_vm7 = vcmp.le.f32.partialorder %v652_v26, 16.0  ;;  %10308 = vst [vmem:[#allocation42_spill] sm:$0xff] %v6363_v44 }
  0xf4   : > { %v875_v59 = vmax.f32 %v653_v0, 0.0  ;;  %vm763_vm10 = vmand %vm689_vm6, %vm726_vm7  ;;  %10309 = vst [vmem:[#allocation43_spill] sm:$0xff] %v6365_v49  ;;  %v874_v37 = vmax.f32 %v652_v26, 0.0 }
  0xf5   : > { %vm764_vm11 = vmand %vm690_vm4, %vm727_vm5  ;;  %v5254_v50 = vsel %vm763_vm10, 1.0, %v10052_v35  ;;  %10312 = vst [vmem:[#allocation46_spill] sm:$0xff] %v6380_v24 }
  0xf6   : > { %v6368_v31 = vmin.f32 %v875_v59, 15.0  ;;  %v5255_v51 = vsel %vm764_vm11, 1.0, %v10052_v35  ;;  %v6382_v32 = vmin.f32 %v874_v37, 15.0  ;;  %v588_v59 = vpop.permute.xlu2 %587 }
  0xf7   : > { %v6373_v27 = vpack.i.bf16 %v5255_v51, %v5254_v50  ;;  %v879_v50 = vmax.f32 %v657_v48, 0.0 }
  0xf8   : > { %10310 = vst [vmem:[#allocation44_spill] sm:$0xff] %v6368_v31  ;;  %1051 = vperm.xlu0 %5343, %v6368_v31   ;;  %1041 = vperm.xlu1 %5341, %v6363_v44   ;;  %v574_v57 = vpop.permute.xlu1 %573  ;;  %v572_v40 = vpop.permute.xlu0 %571  ;;  %v6556_v44 = vld [vmem:[%s5903_s19 + $0x48] sm:$0xff]  ;;  %v6581_v31 = vld [vmem:[%s5903_s19 + $0x70] sm:$0xff] }
  0xf9   : > { %10311 = vst [vmem:[#allocation45_spill] sm:$0xff] %v6373_v27  ;;  %1031 = vperm.xlu2 %5342, %v6365_v49   ;;  %v656_v2 = vadd.f32 %v574_v57, %v6133_v55  ;;  %v655_v15 = vadd.f32 %v572_v40, %v6136_v56  ;;  %v5259_v56 = vsel %vm768_vm15, 1.0, %v10052_v35  ;;  %v1754_v49 = vmul.f32 1.5, %v6556_v44 }
  0xfa   : > { %10313 = vst [vmem:[#allocation47_spill] sm:$0xff] %v6382_v32 }
  0xfb   : > { %vm693_vm2 = vcmp.ge.f32.partialorder %v656_v2, -1.0  ;;  %vm730_vm3 = vcmp.le.f32.partialorder %v656_v2, 16.0  ;;  %vm692_vm4 = vcmp.ge.f32.partialorder %v655_v15, -1.0  ;;  %vm729_vm5 = vcmp.le.f32.partialorder %v655_v15, 16.0 }
  0xfc   : > { %v878_v0 = vmax.f32 %v656_v2, 0.0  ;;  %vm766_vm6 = vmand %vm692_vm4, %vm729_vm5  ;;  %v663_v2 = vadd.f32 %v588_v59, %v6170_v11  ;;  %v10319_v59 = vmov 0.0  }
  0xfd   : > { %v5257_v55 = vsel %vm766_vm6, 1.0, %v10052_v35  ;;  %vm767_vm7 = vmand %vm693_vm2, %vm730_vm3 }
  0xfe   : > { %v6386_v26 = vmin.f32 %v878_v0, 15.0  ;;  %v6388_v51 = vpack.i.bf16 %v5257_v55, %v5256_v45  ;;  %v5258_v57 = vsel %vm767_vm7, 1.0, %v10052_v35  ;;  %v877_v45 = vmax.f32 %v655_v15, 0.0 }
  0xff   : > { %v6394_v37 = vpack.i.bf16 %v5259_v56, %v5258_v57  ;;  %v6399_v55 = vmin.f32 %v879_v50, 15.0  ;;  %v660_v35 = vadd.f32 %v582_v43, %v6155_v63  ;;  %vm700_vm12 = vcmp.ge.f32.partialorder %v663_v2, -1.0 }
 0x100   : > { %10314 = vst [vmem:[#allocation48_spill] sm:$0xff] %v6386_v26  ;;  %1066 = vperm.xlu0 %5343, %v6386_v26   ;;  %1056 = vperm.xlu1 %5341, %v6380_v24   ;;  %v580_v40 = vpop.permute.xlu1 %579  ;;  %v578_v42 = vpop.permute.xlu0 %577  ;;  %vm737_vm13 = vcmp.le.f32.partialorder %v663_v2, 16.0  ;;  %v6402_v11 = vmin.f32 %v877_v45, 15.0 }
 0x101   : > { %10315 = vst [vmem:[#allocation49_spill] sm:$0xff] %v6388_v51  ;;  %1046 = vperm.xlu2 %5342, %v6382_v32   ;;  %v659_v0 = vadd.f32 %v580_v40, %v6148_v61  ;;  %v658_v48 = vadd.f32 %v578_v42, %v6151_v62  ;;  %vm697_vm2 = vcmp.ge.f32.partialorder %v660_v35, -1.0  ;;  %vm734_vm3 = vcmp.le.f32.partialorder %v660_v35, 16.0  ;;  %vm774_vm4 = vmand %vm700_vm12, %vm737_vm13 }
 0x102   : > { %10316 = vst [vmem:[#allocation50_spill] sm:$0xff] %v6394_v37  ;;  %v882_v43 = vmax.f32 %v660_v35, 0.0  ;;  %vm771_vm5 = vmand %vm697_vm2, %vm734_vm3  ;;  %v5265_v42 = vsel %vm774_vm4, 1.0, %v10319_v59 }
 0x103   : > { %10317 = vst [vmem:[#allocation51_spill] sm:$0xff] %v6399_v55  ;;  %vm696_vm8 = vcmp.ge.f32.partialorder %v659_v0, -1.0  ;;  %vm733_vm9 = vcmp.le.f32.partialorder %v659_v0, 16.0  ;;  %vm695_vm10 = vcmp.ge.f32.partialorder %v658_v48, -1.0  ;;  %vm732_vm11 = vcmp.le.f32.partialorder %v658_v48, 16.0 }
 0x104   : > { %v881_v24 = vmax.f32 %v659_v0, 0.0  ;;  %vm769_vm14 = vmand %vm695_vm10, %vm732_vm11  ;;  %10318 = vst [vmem:[#allocation52_spill] sm:$0xff] %v6402_v11  ;;  %v880_v40 = vmax.f32 %v658_v48, 0.0  ;;  %v6417_v45 = vmin.f32 %v882_v43, 15.0  ;;  %v885_v43 = vmax.f32 %v663_v2, 0.0 }
 0x105   : > { %vm770_vm15 = vmand %vm696_vm8, %vm733_vm9  ;;  %v5260_v61 = vsel %vm769_vm14, 1.0, %v10319_v59 }
 0x106   : > { %v6405_v62 = vmin.f32 %v881_v24, 15.0  ;;  %v5261_v15 = vsel %vm770_vm15, 1.0, %v10319_v59  ;;  %10322 = vst [vmem:[#allocation55_spill] sm:$0xff] %v6417_v45 }
 0x107   : > { %v6408_v56 = vpack.i.bf16 %v5261_v15, %v5260_v61  ;;  %v5262_v61 = vsel %vm771_vm5, 1.0, %v10319_v59 }
 0x108   : > { %10320 = vst [vmem:[#allocation53_spill] sm:$0xff] %v6405_v62  ;;  %1081 = vperm.xlu0 %5343, %v6405_v62   ;;  %1071 = vperm.xlu1 %5341, %v6399_v55   ;;  %v586_v63 = vpop.permute.xlu1 %585  ;;  %v584_v50 = vpop.permute.xlu0 %583  ;;  %v6560_v62 = vld [vmem:[%s5903_s19 + $0x58] sm:$0xff] }
 0x109   : > { %10321 = vst [vmem:[#allocation54_spill] sm:$0xff] %v6408_v56  ;;  %1061 = vperm.xlu2 %5342, %v6402_v11   ;;  %v662_v57 = vadd.f32 %v586_v63, %v6163_v6  ;;  %v661_v24 = vadd.f32 %v584_v50, %v6166_v10  ;;  %v6422_v6 = vmin.f32 %v880_v40, 15.0  ;;  %v6433_v40 = vmin.f32 %v885_v43, 15.0  ;;  %v6539_v11 = vld [vmem:[%s5903_s19 + $0x40] sm:$0xff] }
 0x10b   : > { %vm699_vm6 = vcmp.ge.f32.partialorder %v662_v57, -1.0  ;;  %vm736_vm7 = vcmp.le.f32.partialorder %v662_v57, 16.0  ;;  %v884_v0 = vmax.f32 %v662_v57, 0.0  ;;  %vm698_vm8 = vcmp.ge.f32.partialorder %v661_v24, -1.0  ;;  %10324 = vst [vmem:[#allocation57_spill] sm:$0xff] %v6422_v6 }
 0x10c   : > { %vm735_vm9 = vcmp.le.f32.partialorder %v661_v24, 16.0  ;;  %vm773_vm10 = vmand %vm699_vm6, %vm736_vm7  ;;  %v883_v50 = vmax.f32 %v661_v24, 0.0  ;;  %10327 = vst [vmem:[#allocation60_spill] sm:$0xff] %v6433_v40 }
 0x10d   : > { %v6420_v15 = vmin.f32 %v884_v0, 15.0  ;;  %vm772_vm11 = vmand %vm698_vm8, %vm735_vm9  ;;  %v5264_v10 = vsel %vm773_vm10, 1.0, %v10319_v59 }
 0x10e   : > { %v5263_v35 = vsel %vm772_vm11, 1.0, %v10319_v59  ;;  %v6426_v48 = vpack.i.bf16 %v5265_v42, %v5264_v10  ;;  %v6435_v0 = vmin.f32 %v883_v50, 15.0 }
 0x10f   : > { %10323 = vst [vmem:[#allocation56_spill] sm:$0xff] %v6420_v15  ;;  %v6428_v63 = vpack.i.bf16 %v5263_v35, %v5262_v61 }
 0x110   : > { %10325 = vst [vmem:[#allocation58_spill] sm:$0xff] %v6426_v48  ;;  %1096 = vperm.xlu0 %5343, %v6420_v15   ;;  %1086 = vperm.xlu1 %5341, %v6417_v45   ;;  %v590_v57 = vpop.permute.xlu0 %589 }
 0x111   : > { %10326 = vst [vmem:[#allocation59_spill] sm:$0xff] %v6428_v63  ;;  %1076 = vperm.xlu2 %5342, %v6422_v6   ;;  %v664_v55 = vadd.f32 %v590_v57, %v6178_v22  ;;  %v6535_v6 = vld [vmem:[%s5903_s19 + $0x30] sm:$0xff] }
 0x112   : > { %10328 = vst [vmem:[#allocation61_spill] sm:$0xff] %v6435_v0 }
 0x113   : > { %v886_v42 = vmax.f32 %v664_v55, 0.0  ;;  %vm701_vm12 = vcmp.ge.f32.partialorder %v664_v55, -1.0  ;;  %vm738_vm13 = vcmp.le.f32.partialorder %v664_v55, 16.0 }
 0x114   : > { %vm775_vm14 = vmand %vm701_vm12, %vm738_vm13 }
 0x115   : > { %v6443_v2 = vmin.f32 %v886_v42, 15.0 }
 0x117   : > { %10329 = vst [vmem:[#allocation62_spill] sm:$0xff] %v6443_v2 }
 0x118   : > { %1101 = vperm.xlu1 %5341, %v6433_v40   ;;  %5345 = vperm.xlu0 %5343, %v6215_v8   ;;  %v6518_v40 = vld [vmem:[%s5903_s19 + $0x28] sm:$0xff] }
 0x119   : > { %1091 = vperm.xlu2 %5342, %v6435_v0  }
 0x11a   : > { %v6441_v61 = vpop.permute.xlu2 %931 }
 0x120   : > { %5350 = vperm.xlu1 %5341, %v6222_v36   ;;  %5360 = vperm.xlu0 %5343, %v6239_v47   ;;  %v1751_v47 = vmul.f32 1.5, %v6535_v6 }
 0x121   : > { %1106 = vperm.xlu2 %5342, %v6443_v2   ;;  %v6514_v2 = vld [vmem:[%s5903_s19 + $0x18] sm:$0xff] }
 0x123   : > { %v6448_v24 = vpop.permute.xlu2 %946 }
 0x128   : > { %5365 = vperm.xlu1 %5341, %v6258_v23   ;;  %5375 = vperm.xlu0 %5343, %v6285_v1   ;;  %v6485_v23 = vsel %vm775_vm14, 1.0, %v10319_v59 }
 0x129   : > { %5355 = vperm.xlu2 %5342, %v6195_v9   ;;  %v6453_v22 = vpop.permute.xlu1 %926  ;;  %v6460_v35 = vpop.permute.xlu0 %936  ;;  %10330 = vst [vmem:[#allocation63_spill] sm:$0xff] %v6485_v23 }
 0x12b   : > { %v6455_v10 = vpop.permute.xlu2 %956 }
 0x130   : > { %5380 = vperm.xlu1 %5341, %v6303_v41   ;;  %5390 = vperm.xlu0 %5343, %v6331_v3   ;;  %v1748_v3 = vmul.f32 1.5, %v6514_v2 }
 0x131   : > { %5370 = vperm.xlu2 %5342, %v6266_v13  }
 0x132   : > { %v6462_v43 = vpop.permute.xlu1 %941 }
 0x133   : > { %v6464_v50 = vpop.permute.xlu2 %971 }
 0x138   : > { %5395 = vperm.xlu1 %5341, %v6349_v46   ;;  %5405 = vperm.xlu0 %5343, %v6373_v27   ;;  %v6501_v27 = vld [vmem:[%s5903_s19 + $0x10] sm:$0xff] }
 0x139   : > { %5385 = vperm.xlu2 %5342, %v6309_v34  }
 0x13a   : > { %v6469_v57 = vpop.permute.xlu1 %951  ;;  %v6471_v42 = vpop.permute.xlu0 %961 }
 0x13b   : > { %v6473_v41 = vpop.permute.xlu2 %986 }
 0x140   : > { %5410 = vperm.xlu1 %5341, %v6388_v51   ;;  %5420 = vperm.xlu0 %5343, %v6408_v56   ;;  %v6497_v56 = vld [vmem:[%s5903_s19] sm:$0xff] }
 0x141   : > { %5400 = vperm.xlu2 %5342, %v6355_v39   ;;  %v1745_v9 = vmul.f32 1.5, %v6497_v56 }
 0x142   : > { %v6478_v46 = vpop.permute.xlu1 %966  ;;  %v6480_v13 = vpop.permute.xlu0 %976 }
 0x143   : > { %v6482_v34 = vpop.permute.xlu2 %1001 }
 0x148   : > { %5425 = vperm.xlu1 %5341, %v6428_v63   ;;  %1594 = vperm.xlu0 %5343, %v6485_v23   ;;  %v1747_v63 = vmul.f32 1.5, %v6501_v27 }
 0x149   : > { %5415 = vperm.xlu2 %5342, %v6394_v37  }
 0x14a   : > { %v6490_v51 = vpop.permute.xlu1 %981  ;;  %v6492_v55 = vpop.permute.xlu0 %991 }
 0x14b   : > { %10331 = vst [vmem:[#allocation64_spill] sm:$0xff] %v6492_v55  ;;  %v6494_v39 = vpop.permute.xlu2 %1016 }
 0x150   : > { %1819 = vrot.lane.b32.xlu1 %v1745_v9, %s5811_s14  ;;  %1823 = vrot.lane.b32.xlu0 %v1747_v63, %s5811_s14  ;;  %v1750_v9 = vmul.f32 1.5, %v6518_v40  ;;  %v6522_v63 = vld [vmem:[%s5903_s19 + $0x8] sm:$0xff] }
 0x151   : > { %5430 = vperm.xlu2 %5342, %v6426_v48   ;;  %v1746_v48 = vmul.f32 1.5, %v6522_v63 }
 0x152   : > { %v6507_v37 = vpop.permute.xlu1 %996  ;;  %v6509_v23 = vpop.permute.xlu0 %1006 }
 0x153   : > { %10332 = vst [vmem:[#allocation65_spill] sm:$0xff] %v6507_v37  ;;  %v6511_v36 = vpop.permute.xlu2 %1031 }
 0x154   : > { %10333 = vst [vmem:[#allocation66_spill] sm:$0xff] %v6509_v23 }
 0x155   : > { %10334 = vst [vmem:[#allocation67_spill] sm:$0xff] %v6511_v36 }
 0x158   : > { %1825 = vrot.lane.b32.xlu1 %v1748_v3, %s5811_s14  ;;  %1829 = vrot.lane.b32.xlu0 %v1750_v9, %s5811_s14  ;;  %v1753_v3 = vmul.f32 1.5, %v6539_v11  ;;  %v6543_v9 = vld [vmem:[%s5903_s19 + $0x20] sm:$0xff] }
 0x159   : > { %1821 = vrot.lane.b32.xlu2 %v1746_v48, %s5811_s14  ;;  %v1749_v48 = vmul.f32 1.5, %v6543_v9 }
 0x15a   : > { %v6528_v0 = vpop.permute.xlu1 %1011  ;;  %v6530_v1 = vpop.permute.xlu0 %1021 }
 0x15b   : > { %10335 = vst [vmem:[#allocation68_spill] sm:$0xff] %v6528_v0  ;;  %v6532_v45 = vpop.permute.xlu2 %1046  ;;  %v6749_v0 = vld [vmem:[%s5903_s19 + $0x110] sm:$0xff] }
 0x15c   : > { %10336 = vst [vmem:[#allocation69_spill] sm:$0xff] %v6530_v1  ;;  %v1779_v36 = vmul.f32 1.5, %v6749_v0 }
 0x15d   : > { %10337 = vst [vmem:[#allocation70_spill] sm:$0xff] %v6532_v45  ;;  %v6732_v45 = vld [vmem:[%s5903_s19 + $0xf8] sm:$0xff] }
 0x160   : > { %1831 = vrot.lane.b32.xlu1 %v1751_v47, %s5811_s14  ;;  %1835 = vrot.lane.b32.xlu0 %v1753_v3, %s5811_s14  ;;  %v1756_v47 = vmul.f32 1.5, %v6560_v62  ;;  %v6564_v3 = vld [vmem:[%s5903_s19 + $0x38] sm:$0xff] }
 0x161   : > { %1827 = vrot.lane.b32.xlu2 %v1749_v48, %s5811_s14  ;;  %v1752_v48 = vmul.f32 1.5, %v6564_v3 }
 0x162   : > { %v6549_v8 = vpop.permute.xlu1 %1026  ;;  %v6551_v32 = vpop.permute.xlu0 %1036 }
 0x163   : > { %10338 = vst [vmem:[#allocation71_spill] sm:$0xff] %v6549_v8  ;;  %v6553_v15 = vpop.permute.xlu2 %1061  ;;  %v6728_v8 = vld [vmem:[%s5903_s19 + $0x118] sm:$0xff] }
 0x164   : > { %10339 = vst [vmem:[#allocation72_spill] sm:$0xff] %v6551_v32 }
 0x165   : > { %10340 = vst [vmem:[#allocation73_spill] sm:$0xff] %v6553_v15  ;;  %v6724_v15 = vld [vmem:[%s5903_s19 + $0x108] sm:$0xff] }
 0x166   : > { %v1778_v32 = vmul.f32 1.5, %v6724_v15 }
 0x168   : > { %1837 = vrot.lane.b32.xlu1 %v1754_v49, %s5811_s14  ;;  %1841 = vrot.lane.b32.xlu0 %v1756_v47, %s5811_s14  ;;  %v1759_v49 = vmul.f32 1.5, %v6581_v31  ;;  %v6585_v47 = vld [vmem:[%s5903_s19 + $0x50] sm:$0xff] }
 0x169   : > { %1833 = vrot.lane.b32.xlu2 %v1752_v48, %s5811_s14  ;;  %v1755_v48 = vmul.f32 1.5, %v6585_v47 }
 0x16a   : > { %v6570_v30 = vpop.permute.xlu1 %1041  ;;  %v6572_v29 = vpop.permute.xlu0 %1051 }
 0x16b   : > { %10341 = vst [vmem:[#allocation74_spill] sm:$0xff] %v6570_v30  ;;  %v6574_v26 = vpop.permute.xlu2 %1076 }
 0x16c   : > { %10342 = vst [vmem:[#allocation75_spill] sm:$0xff] %v6572_v29  ;;  %v6703_v29 = vld [vmem:[%s5903_s19 + $0xf0] sm:$0xff] }
 0x16d   : > { %10343 = vst [vmem:[#allocation76_spill] sm:$0xff] %v6574_v26  ;;  %v6686_v26 = vld [vmem:[%s5903_s19 + $0xe8] sm:$0xff]  ;;  %v1775_v30 = vmul.f32 1.5, %v6703_v29 }
 0x170   : > { %1843 = vrot.lane.b32.xlu1 %v1757_v20, %s5811_s14  ;;  %1847 = vrot.lane.b32.xlu0 %v1759_v49, %s5811_s14  ;;  %v1762_v20 = vmul.f32 1.5, %v6602_v38  ;;  %v6606_v49 = vld [vmem:[%s5903_s19 + $0x68] sm:$0xff] }
 0x171   : > { %1839 = vrot.lane.b32.xlu2 %v1755_v48, %s5811_s14  ;;  %v1758_v48 = vmul.f32 1.5, %v6606_v49 }
 0x172   : > { %v6591_v18 = vpop.permute.xlu1 %1056  ;;  %v6593_v28 = vpop.permute.xlu0 %1066 }
 0x173   : > { %10344 = vst [vmem:[#allocation77_spill] sm:$0xff] %v6591_v18  ;;  %v6595_v60 = vpop.permute.xlu2 %1091  ;;  %v1772_v18 = vmul.f32 1.5, %v6682_v14 }
 0x174   : > { %10345 = vst [vmem:[#allocation78_spill] sm:$0xff] %v6593_v28  ;;  %v1769_v28 = vmul.f32 1.5, %v6661_v54 }
 0x175   : > { %10346 = vst [vmem:[#allocation79_spill] sm:$0xff] %v6595_v60  ;;  %v6665_v60 = vld [vmem:[%s5903_s19 + $0xd0] sm:$0xff] }
 0x178   : > { %1849 = vrot.lane.b32.xlu1 %v1760_v25, %s5811_s14  ;;  %1853 = vrot.lane.b32.xlu0 %v1762_v20, %s5811_s14  ;;  %v1765_v25 = vmul.f32 1.5, %v6623_v33  ;;  %v6627_v20 = vld [vmem:[%s5903_s19 + $0x80] sm:$0xff] }
 0x179   : > { %1845 = vrot.lane.b32.xlu2 %v1758_v48, %s5811_s14  ;;  %v1761_v48 = vmul.f32 1.5, %v6627_v20 }
 0x17a   : > { %v6612_v4 = vpop.permute.xlu1 %1071  ;;  %v6614_v12 = vpop.permute.xlu0 %1081 }
 0x17b   : > { %10347 = vst [vmem:[#allocation80_spill] sm:$0xff] %v6612_v4  ;;  %v6616_v5 = vpop.permute.xlu2 %1106  ;;  %v6644_v4 = vld [vmem:[%s5903_s19 + $0xb8] sm:$0xff] }
 0x17c   : > { %10348 = vst [vmem:[#allocation81_spill] sm:$0xff] %v6614_v12  ;;  %v1766_v12 = vmul.f32 1.5, %v6640_v17 }
 0x17d   : > { %10349 = vst [vmem:[#allocation82_spill] sm:$0xff] %v6616_v5 }
 0x180   : > { %1855 = vrot.lane.b32.xlu1 %v1763_v58, %s5811_s14  ;;  %1859 = vrot.lane.b32.xlu0 %v1765_v25, %s5811_s14  ;;  %v1768_v58 = vmul.f32 1.5, %v6644_v4  ;;  %v6648_v25 = vld [vmem:[%s5903_s19 + $0x98] sm:$0xff] }
 0x181   : > { %1851 = vrot.lane.b32.xlu2 %v1761_v48, %s5811_s14  ;;  %v1764_v48 = vmul.f32 1.5, %v6648_v25 }
 0x182   : > { %v6633_v5 = vpop.permute.xlu1 %1086  ;;  %v6635_v16 = vpop.permute.xlu0 %1096 }
 0x183   : > { %10350 = vst [vmem:[#allocation83_spill] sm:$0xff] %v6633_v5  ;;  %v6637_v7 = vpop.permute.xlu2 %5355 }
 0x184   : > { %10351 = vst [vmem:[#allocation84_spill] sm:$0xff] %v6635_v16 }
 0x185   : > { %10352 = vst [vmem:[#allocation85_spill] sm:$0xff] %v6637_v7 }
 0x188   : > { %1861 = vrot.lane.b32.xlu1 %v1766_v12, %s5811_s14  ;;  %1865 = vrot.lane.b32.xlu0 %v1768_v58, %s5811_s14  ;;  %v1771_v12 = vmul.f32 1.5, %v6665_v60  ;;  %v6669_v58 = vld [vmem:[%s5903_s19 + $0xb0] sm:$0xff] }
 0x189   : > { %1857 = vrot.lane.b32.xlu2 %v1764_v48, %s5811_s14  ;;  %v1767_v48 = vmul.f32 1.5, %v6669_v58 }
 0x18a   : > { %v6654_v7 = vpop.permute.xlu1 %1101  ;;  %v6656_v16 = vpop.permute.xlu0 %5345 }
 0x18b   : > { %10353 = vst [vmem:[#allocation86_spill] sm:$0xff] %v6654_v7  ;;  %v6658_v5 = vpop.permute.xlu2 %5370 }
 0x18c   : > { %10354 = vst [vmem:[#allocation87_spill] sm:$0xff] %v6656_v16 }
 0x18d   : > { %10355 = vst [vmem:[#allocation88_spill] sm:$0xff] %v6658_v5 }
 0x190   : > { %1867 = vrot.lane.b32.xlu1 %v1769_v28, %s5811_s14  ;;  %1871 = vrot.lane.b32.xlu0 %v1771_v12, %s5811_s14  ;;  %v1774_v28 = vmul.f32 1.5, %v6686_v26  ;;  %v6690_v12 = vld [vmem:[%s5903_s19 + $0xc8] sm:$0xff] }
 0x191   : > { %1863 = vrot.lane.b32.xlu2 %v1767_v48, %s5811_s14  ;;  %v1770_v48 = vmul.f32 1.5, %v6690_v12 }
 0x192   : > { %v6675_v5 = vpop.permute.xlu1 %5350  ;;  %v6677_v16 = vpop.permute.xlu0 %5360 }
 0x193   : > { %10356 = vst [vmem:[#allocation89_spill] sm:$0xff] %v6675_v5  ;;  %v6679_v7 = vpop.permute.xlu2 %5385 }
 0x194   : > { %10357 = vst [vmem:[#allocation90_spill] sm:$0xff] %v6677_v16 }
 0x195   : > { %10358 = vst [vmem:[#allocation91_spill] sm:$0xff] %v6679_v7 }
 0x198   : > { %1873 = vrot.lane.b32.xlu1 %v1772_v18, %s5811_s14  ;;  %1877 = vrot.lane.b32.xlu0 %v1774_v28, %s5811_s14  ;;  %v1777_v18 = vmul.f32 1.5, %v6707_v53  ;;  %v6711_v28 = vld [vmem:[%s5903_s19 + $0xe0] sm:$0xff] }
 0x199   : > { %1869 = vrot.lane.b32.xlu2 %v1770_v48, %s5811_s14  ;;  %v1773_v48 = vmul.f32 1.5, %v6711_v28 }
 0x19a   : > { %v6696_v16 = vpop.permute.xlu1 %5365  ;;  %v6698_v7 = vpop.permute.xlu0 %5375 }
 0x19b   : > { %10359 = vst [vmem:[#allocation92_spill] sm:$0xff] %v6696_v16  ;;  %v6700_v5 = vpop.permute.xlu2 %5400 }
 0x19c   : > { %10360 = vst [vmem:[#allocation93_spill] sm:$0xff] %v6698_v7 }
 0x19d   : > { %10361 = vst [vmem:[#allocation94_spill] sm:$0xff] %v6700_v5 }
 0x1a0   : > { %1879 = vrot.lane.b32.xlu1 %v1775_v30, %s5811_s14  ;;  %1883 = vrot.lane.b32.xlu0 %v1777_v18, %s5811_s14  ;;  %v1780_v30 = vmul.f32 1.5, %v6728_v8  ;;  %v1776_v18 = vmul.f32 1.5, %v6732_v45 }
 0x1a1   : > { %1875 = vrot.lane.b32.xlu2 %v1773_v48, %s5811_s14 }
 0x1a2   : > { %v6717_v7 = vpop.permute.xlu1 %5380  ;;  %v6719_v5 = vpop.permute.xlu0 %5390 }
 0x1a3   : > { %10362 = vst [vmem:[#allocation95_spill] sm:$0xff] %v6717_v7  ;;  %v6721_v16 = vpop.permute.xlu2 %5415  ;;  %v6745_v7 = vld [vmem:[%s5903_s19 + $0x120] sm:$0x3f] }
 0x1a4   : > { %10363 = vst [vmem:[#allocation96_spill] sm:$0xff] %v6719_v5  ;;  %v1781_v1 = vmul.f32 1.5, %v6745_v7 }
 0x1a5   : > { %10364 = vst [vmem:[#allocation97_spill] sm:$0xff] %v6721_v16 }
 0x1a8   : > { %1885 = vrot.lane.b32.xlu1 %v1778_v32, %s5811_s14  ;;  %1889 = vrot.lane.b32.xlu0 %v1780_v30, %s5811_s14 }
 0x1a9   : > { %1881 = vrot.lane.b32.xlu2 %v1776_v18, %s5811_s14 }
 0x1aa   : > { %v6738_v48 = vpop.permute.xlu1 %5395  ;;  %v6740_v5 = vpop.permute.xlu0 %5405 }
 0x1ab   : > { %10365 = vst [vmem:[#allocation98_spill] sm:$0xff] %v6738_v48  ;;  %v6742_v16 = vpop.permute.xlu2 %5430 }
 0x1ac   : > { %10366 = vst [vmem:[#allocation99_spill] sm:$0xff] %v6740_v5 }
 0x1ad   : > { %10367 = vst [vmem:[#allocation100_spill] sm:$0xff] %v6742_v16 }
 0x1b0   : > { %1891 = vrot.lane.b32.xlu1 %v1781_v1, %s5811_s14 }
 0x1b1   : > { %1887 = vrot.lane.b32.xlu2 %v1779_v36, %s5811_s14 }
 0x1b2   : > { %v6754_v32 = vpop.permute.xlu1 %5410  ;;  %v6756_v30 = vpop.permute.xlu0 %5420 }
 0x1b3   : > { %10368 = vst [vmem:[#allocation101_spill] sm:$0xff] %v6754_v32  ;;  %v1822_v18 = vpop.permute.xlu2 %1821 }
 0x1b4   : > { %10369 = vst [vmem:[#allocation102_spill] sm:$0xff] %v6756_v30  ;;  %v1931_v5 = vadd.f32 %v6522_v63, %v1822_v18 }
 0x1b6   : > { %v2153_v16 = vmax.f32 %v1931_v5, 0.0  ;;  %vm1968_vm15 = vcmp.ge.f32.partialorder %v1931_v5, -1.0  ;;  %vm2005_vm2 = vcmp.le.f32.partialorder %v1931_v5, 16.0 }
 0x1b7   : > { %vm2042_vm3 = vmand %vm1968_vm15, %vm2005_vm2 }
 0x1b8   : > { %v6759_v48 = vmin.f32 %v2153_v16, 15.0 }
 0x1ba   : > { %10370 = vst [vmem:[#allocation103_spill] sm:$0xff] %v6759_v48  ;;  %v6761_v23 = vpop.permute.xlu1 %5425  ;;  %v6763_v37 = vpop.permute.xlu0 %1594  ;;  %2233 = vperm.xlu0 %5343, %v6759_v48  }
 0x1bb   : > { %10371 = vst [vmem:[#allocation104_spill] sm:$0xff] %v6761_v23  ;;  %v1828_v55 = vpop.permute.xlu2 %1827  ;;  %v6774_v23 = vsel %vm2042_vm3, 1.0, %v10319_v59 }
 0x1bc   : > { %10372 = vst [vmem:[#allocation105_spill] sm:$0xff] %v6763_v37  ;;  %v1934_v1 = vadd.f32 %v6543_v9, %v1828_v55 }
 0x1bd   : > { %10374 = vst [vmem:[#allocation107_spill] sm:$0xff] %v6774_v23 }
 0x1be   : > { %v2156_v36 = vmax.f32 %v1934_v1, 0.0  ;;  %vm1971_vm7 = vcmp.ge.f32.partialorder %v1934_v1, -1.0  ;;  %vm2008_vm8 = vcmp.le.f32.partialorder %v1934_v1, 16.0 }
 0x1bf   : > { %vm2045_vm11 = vmand %vm1971_vm7, %vm2008_vm8 }
 0x1c0   : > { %v6767_v32 = vmin.f32 %v2156_v36, 15.0 }
 0x1c2   : > { %10373 = vst [vmem:[#allocation106_spill] sm:$0xff] %v6767_v32  ;;  %v1820_v30 = vpop.permute.xlu1 %1819  ;;  %v1824_v63 = vpop.permute.xlu0 %1823  ;;  %2248 = vperm.xlu0 %5343, %v6767_v32  }
 0x1c3   : > { %v1930_v16 = vadd.f32 %v6497_v56, %v1820_v30  ;;  %v1834_v18 = vpop.permute.xlu2 %1833  ;;  %v1932_v37 = vadd.f32 %v6501_v27, %v1824_v63 }
 0x1c4   : > { %v1937_v48 = vadd.f32 %v6564_v3, %v1834_v18 }
 0x1c5   : > { %vm1967_vm4 = vcmp.ge.f32.partialorder %v1930_v16, -1.0  ;;  %vm2004_vm5 = vcmp.le.f32.partialorder %v1930_v16, 16.0  ;;  %v2152_v5 = vmax.f32 %v1930_v16, 0.0  ;;  %v2154_v36 = vmax.f32 %v1932_v37, 0.0 }
 0x1c6   : > { %vm2041_vm6 = vmand %vm1967_vm4, %vm2004_vm5  ;;  %v2159_v55 = vmax.f32 %v1937_v48, 0.0  ;;  %vm1969_vm9 = vcmp.ge.f32.partialorder %v1932_v37, -1.0  ;;  %vm2006_vm10 = vcmp.le.f32.partialorder %v1932_v37, 16.0  ;;  %v6796_v37 = vsel %vm2045_vm11, 1.0, %v10319_v59 }
 0x1c7   : > { %v6777_v9 = vsel %vm2041_vm6, 1.0, %v10319_v59  ;;  %v6779_v56 = vmin.f32 %v2152_v5, 15.0  ;;  %v6785_v3 = vmin.f32 %v2154_v36, 15.0  ;;  %vm2043_vm12 = vmand %vm1969_vm9, %vm2006_vm10  ;;  %10379 = vst [vmem:[#allocation112_spill] sm:$0xff] %v6796_v37  ;;  %vm1974_vm3 = vcmp.ge.f32.partialorder %v1937_v48, -1.0 }
 0x1c8   : > { %10375 = vst [vmem:[#allocation108_spill] sm:$0xff] %v6777_v9  ;;  %v6781_v30 = vmin.f32 %v2159_v55, 15.0  ;;  %vm2011_vm5 = vcmp.le.f32.partialorder %v1937_v48, 16.0 }
 0x1c9   : > { %10376 = vst [vmem:[#allocation109_spill] sm:$0xff] %v6779_v56  ;;  %2228 = vperm.xlu2 %5342, %v6779_v56   ;;  %2238 = vperm.xlu1 %5341, %v6785_v3   ;;  %vm2048_vm7 = vmand %vm1974_vm3, %vm2011_vm5 }
 0x1ca   : > { %10377 = vst [vmem:[#allocation110_spill] sm:$0xff] %v6781_v30  ;;  %v1826_v63 = vpop.permute.xlu1 %1825  ;;  %v1830_v16 = vpop.permute.xlu0 %1829  ;;  %2263 = vperm.xlu0 %5343, %v6781_v30   ;;  %v6825_v56 = vsel %vm2048_vm7, 1.0, %v10319_v59 }
 0x1cb   : > { %10378 = vst [vmem:[#allocation111_spill] sm:$0xff] %v6785_v3  ;;  %v1933_v1 = vadd.f32 %v6514_v2, %v1826_v63  ;;  %v1840_v18 = vpop.permute.xlu2 %1839  ;;  %v1935_v5 = vadd.f32 %v6518_v40, %v1830_v16  ;;  %v6800_v2 = vsel %vm2043_vm12, 1.0, %v10319_v59 }
 0x1cc   : > { %v6793_v55 = vadd.f32 %v6585_v47, %v1840_v18  ;;  %10380 = vst [vmem:[#allocation113_spill] sm:$0xff] %v6800_v2 }
 0x1cd   : > { %vm1970_vm13 = vcmp.ge.f32.partialorder %v1933_v1, -1.0  ;;  %vm2007_vm14 = vcmp.le.f32.partialorder %v1933_v1, 16.0  ;;  %vm1972_vm15 = vcmp.ge.f32.partialorder %v1935_v5, -1.0  ;;  %vm2009_vm2 = vcmp.le.f32.partialorder %v1935_v5, 16.0  ;;  %10386 = vst [vmem:[#allocation119_spill] sm:$0xff] %v6825_v56 }
 0x1ce   : > { %vm2044_vm4 = vmand %vm1970_vm13, %vm2007_vm14  ;;  %v2155_v36 = vmax.f32 %v1933_v1, 0.0  ;;  %v2162_v27 = vmax.f32 %v6793_v55, 0.0  ;;  %v2157_v47 = vmax.f32 %v1935_v5, 0.0 }
 0x1cf   : > { %v6803_v40 = vsel %vm2044_vm4, 1.0, %v10319_v59  ;;  %vm2046_vm6 = vmand %vm1972_vm15, %vm2009_vm2 }
 0x1d0   : > { %10381 = vst [vmem:[#allocation114_spill] sm:$0xff] %v6803_v40  ;;  %v6805_v63 = vmin.f32 %v2155_v36, 15.0  ;;  %v6807_v16 = vmin.f32 %v2162_v27, 15.0  ;;  %v6812_v1 = vsel %vm2046_vm6, 1.0, %v10319_v59  ;;  %v6814_v30 = vmin.f32 %v2157_v47, 15.0 }
 0x1d1   : > { %10384 = vst [vmem:[#allocation117_spill] sm:$0xff] %v6812_v1 }
 0x1d2   : > { %10382 = vst [vmem:[#allocation115_spill] sm:$0xff] %v6805_v63  ;;  %2243 = vperm.xlu2 %5342, %v6805_v63   ;;  %v1832_v48 = vpop.permute.xlu1 %1831  ;;  %v1836_v32 = vpop.permute.xlu0 %1835  ;;  %2278 = vperm.xlu0 %5343, %v6807_v16  }
 0x1d3   : > { %10383 = vst [vmem:[#allocation116_spill] sm:$0xff] %v6807_v16  ;;  %2253 = vperm.xlu1 %5341, %v6814_v30   ;;  %v1936_v27 = vadd.f32 %v6535_v6, %v1832_v48  ;;  %v1846_v36 = vpop.permute.xlu2 %1845  ;;  %v1938_v18 = vadd.f32 %v6539_v11, %v1836_v32 }
 0x1d4   : > { %10385 = vst [vmem:[#allocation118_spill] sm:$0xff] %v6814_v30  ;;  %v1943_v47 = vadd.f32 %v6606_v49, %v1846_v36 }
 0x1d5   : > { %vm1973_vm8 = vcmp.ge.f32.partialorder %v1936_v27, -1.0  ;;  %vm2010_vm9 = vcmp.le.f32.partialorder %v1936_v27, 16.0  ;;  %v2158_v63 = vmax.f32 %v1936_v27, 0.0  ;;  %v2160_v16 = vmax.f32 %v1938_v18, 0.0 }
 0x1d6   : > { %vm2047_vm10 = vmand %vm1973_vm8, %vm2010_vm9  ;;  %v2165_v3 = vmax.f32 %v1943_v47, 0.0  ;;  %vm1975_vm11 = vcmp.ge.f32.partialorder %v1938_v18, -1.0  ;;  %vm2012_vm12 = vcmp.le.f32.partialorder %v1938_v18, 16.0  ;;  %vm1980_vm2 = vcmp.ge.f32.partialorder %v1943_v47, -1.0 }
 0x1d7   : > { %v6828_v5 = vsel %vm2047_vm10, 1.0, %v10319_v59  ;;  %v6830_v30 = vmin.f32 %v2158_v63, 15.0  ;;  %v6836_v49 = vmin.f32 %v2160_v16, 15.0  ;;  %vm2049_vm13 = vmand %vm1975_vm11, %vm2012_vm12  ;;  %vm2017_vm4 = vcmp.le.f32.partialorder %v1943_v47, 16.0 }
 0x1d8   : > { %10387 = vst [vmem:[#allocation120_spill] sm:$0xff] %v6828_v5  ;;  %v6832_v6 = vmin.f32 %v2165_v3, 15.0  ;;  %v6847_v11 = vsel %vm2049_vm13, 1.0, %v10319_v59  ;;  %vm2054_vm5 = vmand %vm1980_vm2, %vm2017_vm4 }
 0x1d9   : > { %10388 = vst [vmem:[#allocation121_spill] sm:$0xff] %v6830_v30 }
 0x1da   : > { %10389 = vst [vmem:[#allocation122_spill] sm:$0xff] %v6832_v6  ;;  %2258 = vperm.xlu2 %5342, %v6830_v30   ;;  %v1838_v32 = vpop.permute.xlu1 %1837  ;;  %v1842_v48 = vpop.permute.xlu0 %1841  ;;  %2293 = vperm.xlu0 %5343, %v6832_v6  }
 0x1db   : > { %10390 = vst [vmem:[#allocation123_spill] sm:$0xff] %v6836_v49  ;;  %2268 = vperm.xlu1 %5341, %v6836_v49   ;;  %v1939_v63 = vadd.f32 %v6556_v44, %v1838_v32  ;;  %v1852_v27 = vpop.permute.xlu2 %1851  ;;  %v6843_v3 = vadd.f32 %v6560_v62, %v1842_v48 }
 0x1dc   : > { %v1946_v36 = vadd.f32 %v6627_v20, %v1852_v27  ;;  %10391 = vst [vmem:[#allocation124_spill] sm:$0xff] %v6847_v11 }
 0x1dd   : > { %vm1976_vm14 = vcmp.ge.f32.partialorder %v1939_v63, -1.0  ;;  %vm2013_vm15 = vcmp.le.f32.partialorder %v1939_v63, 16.0  ;;  %v2161_v16 = vmax.f32 %v1939_v63, 0.0  ;;  %v2163_v44 = vmax.f32 %v6843_v3, 0.0 }
 0x1de   : > { %vm2050_vm3 = vmand %vm1976_vm14, %vm2013_vm15  ;;  %v2168_v18 = vmax.f32 %v1946_v36, 0.0  ;;  %vm1983_vm9 = vcmp.ge.f32.partialorder %v1946_v36, -1.0  ;;  %vm2020_vm10 = vcmp.le.f32.partialorder %v1946_v36, 16.0 }
 0x1df   : > { %v6850_v6 = vsel %vm2050_vm3, 1.0, %v10319_v59  ;;  %v6853_v62 = vmin.f32 %v2161_v16, 15.0  ;;  %v6859_v48 = vmin.f32 %v2163_v44, 15.0  ;;  %v5280_v44 = vsel %vm2054_vm5, 1.0, %v10319_v59  ;;  %vm6881_vm13 = vmand %vm1983_vm9, %vm2020_vm10 }
 0x1e0   : > { %10392 = vst [vmem:[#allocation125_spill] sm:$0xff] %v6850_v6  ;;  %v6855_v32 = vmin.f32 %v2168_v18, 15.0 }
 0x1e1   : > { %10393 = vst [vmem:[#allocation126_spill] sm:$0xff] %v6853_v62 }
 0x1e2   : > { %10394 = vst [vmem:[#allocation127_spill] sm:$0xff] %v6855_v32  ;;  %2273 = vperm.xlu2 %5342, %v6853_v62   ;;  %v1844_v47 = vpop.permute.xlu1 %1843  ;;  %v1848_v63 = vpop.permute.xlu0 %1847  ;;  %2308 = vperm.xlu0 %5343, %v6855_v32  }
 0x1e3   : > { %10395 = vst [vmem:[#allocation128_spill] sm:$0xff] %v6859_v48  ;;  %2283 = vperm.xlu1 %5341, %v6859_v48   ;;  %v1942_v27 = vadd.f32 %v6577_v19, %v1844_v47  ;;  %v1858_v16 = vpop.permute.xlu2 %1857  ;;  %v1944_v18 = vadd.f32 %v6581_v31, %v1848_v63 }
 0x1e4   : > { %v6867_v30 = vadd.f32 %v6648_v25, %v1858_v16 }
 0x1e5   : > { %vm1979_vm6 = vcmp.ge.f32.partialorder %v1942_v27, -1.0  ;;  %vm2016_vm7 = vcmp.le.f32.partialorder %v1942_v27, 16.0  ;;  %v2164_v62 = vmax.f32 %v1942_v27, 0.0  ;;  %v2166_v48 = vmax.f32 %v1944_v18, 0.0 }
 0x1e6   : > { %vm2053_vm8 = vmand %vm1979_vm6, %vm2016_vm7  ;;  %v2171_v20 = vmax.f32 %v6867_v30, 0.0  ;;  %vm1981_vm11 = vcmp.ge.f32.partialorder %v1944_v18, -1.0  ;;  %vm2018_vm12 = vcmp.le.f32.partialorder %v1944_v18, 16.0 }
 0x1e7   : > { %v5279_v32 = vsel %vm2053_vm8, 1.0, %v10319_v59  ;;  %v6874_v47 = vmin.f32 %v2164_v62, 15.0  ;;  %v6878_v25 = vmin.f32 %v2166_v48, 15.0  ;;  %vm2055_vm14 = vmand %vm1981_vm11, %vm2018_vm12 }
 0x1e8   : > { %v6872_v19 = vmin.f32 %v2171_v20, 15.0  ;;  %v6876_v31 = vpack.i.bf16 %v5280_v44, %v5279_v32  ;;  %v5283_v44 = vsel %vm6881_vm13, 1.0, %v10319_v59 }
 0x1e9   : > { %10397 = vst [vmem:[#allocation130_spill] sm:$0xff] %v6874_v47 }
 0x1ea   : > { %10396 = vst [vmem:[#allocation129_spill] sm:$0xff] %v6872_v19  ;;  %2288 = vperm.xlu2 %5342, %v6874_v47   ;;  %v1850_v63 = vpop.permute.xlu1 %1849  ;;  %v1854_v16 = vpop.permute.xlu0 %1853  ;;  %2323 = vperm.xlu0 %5343, %v6872_v19  }
 0x1eb   : > { %10398 = vst [vmem:[#allocation131_spill] sm:$0xff] %v6876_v31  ;;  %2298 = vperm.xlu1 %5341, %v6878_v25   ;;  %v1945_v36 = vadd.f32 %v6598_v21, %v1850_v63  ;;  %v1864_v62 = vpop.permute.xlu2 %1863  ;;  %v1947_v32 = vadd.f32 %v6602_v38, %v1854_v16  ;;  %v5281_v21 = vsel %vm2055_vm14, 1.0, %v10319_v59 }
 0x1ec   : > { %10399 = vst [vmem:[#allocation132_spill] sm:$0xff] %v6878_v25  ;;  %v1952_v20 = vadd.f32 %v6669_v58, %v1864_v62 }
 0x1ed   : > { %vm1982_vm15 = vcmp.ge.f32.partialorder %v1945_v36, -1.0  ;;  %vm2019_vm2 = vcmp.le.f32.partialorder %v1945_v36, 16.0  ;;  %vm1984_vm3 = vcmp.ge.f32.partialorder %v1947_v32, -1.0  ;;  %vm2021_vm4 = vcmp.le.f32.partialorder %v1947_v32, 16.0 }
 0x1ee   : > { %vm2056_vm5 = vmand %vm1982_vm15, %vm2019_vm2  ;;  %vm1989_vm6 = vcmp.ge.f32.partialorder %v1952_v20, -1.0  ;;  %vm2026_vm7 = vcmp.le.f32.partialorder %v1952_v20, 16.0  ;;  %v2174_v48 = vmax.f32 %v1952_v20, 0.0  ;;  %v2169_v18 = vmax.f32 %v1947_v32, 0.0 }
 0x1ef   : > { %v5282_v38 = vsel %vm2056_vm5, 1.0, %v10319_v59  ;;  %vm2063_vm8 = vmand %vm1989_vm6, %vm2026_vm7  ;;  %v2167_v63 = vmax.f32 %v1945_v36, 0.0 }
 0x1f0   : > { %v6896_v58 = vsel %vm2063_vm8, 1.0, %v10319_v59  ;;  %v6898_v16 = vmin.f32 %v2174_v48, 15.0  ;;  %vm2058_vm9 = vmand %vm1984_vm3, %vm2021_vm4  ;;  %v6900_v62 = vmin.f32 %v2169_v18, 15.0  ;;  %v6902_v20 = vpack.i.bf16 %v5282_v38, %v5281_v21 }
 0x1f1   : > { %10402 = vst [vmem:[#allocation133_spill] sm:$0xff] %v6896_v58  ;;  %v5284_v32 = vsel %vm2058_vm9, 1.0, %v10319_v59  ;;  %v6905_v27 = vmin.f32 %v2167_v63, 15.0 }
 0x1f2   : > { %10403 = vst [vmem:[#allocation134_spill] sm:$0xff] %v6898_v16  ;;  %v1856_v47 = vpop.permute.xlu1 %1855  ;;  %v1860_v25 = vpop.permute.xlu0 %1859  ;;  %v6909_v36 = vpack.i.bf16 %v5284_v32, %v5283_v44  ;;  %2338 = vperm.xlu0 %5343, %v6898_v16  }
 0x1f3   : > { %10404 = vst [vmem:[#allocation135_spill] sm:$0xff] %v6900_v62  ;;  %2303 = vperm.xlu2 %5342, %v6905_v27   ;;  %v6914_v48 = vadd.f32 %v6619_v52, %v1856_v47  ;;  %v1870_v18 = vpop.permute.xlu2 %1869  ;;  %v1950_v21 = vadd.f32 %v6623_v33, %v1860_v25  ;;  %2313 = vperm.xlu1 %5341, %v6900_v62  }
 0x1f4   : > { %10405 = vst [vmem:[#allocation136_spill] sm:$0xff] %v6902_v20  ;;  %v1955_v38 = vadd.f32 %v6690_v12, %v1870_v18 }
 0x1f5   : > { %10406 = vst [vmem:[#allocation137_spill] sm:$0xff] %v6905_v27  ;;  %v2170_v63 = vmax.f32 %v6914_v48, 0.0  ;;  %vm1987_vm10 = vcmp.ge.f32.partialorder %v1950_v21, -1.0  ;;  %vm2024_vm13 = vcmp.le.f32.partialorder %v1950_v21, 16.0  ;;  %v2172_v19 = vmax.f32 %v1950_v21, 0.0 }
 0x1f6   : > { %10407 = vst [vmem:[#allocation138_spill] sm:$0xff] %v6909_v36  ;;  %vm1992_vm11 = vcmp.ge.f32.partialorder %v1955_v38, -1.0  ;;  %vm2029_vm12 = vcmp.le.f32.partialorder %v1955_v38, 16.0  ;;  %v2177_v44 = vmax.f32 %v1955_v38, 0.0  ;;  %vm2061_vm15 = vmand %vm1987_vm10, %vm2024_vm13 }
 0x1f7   : > { %v6920_v32 = vmin.f32 %v2170_v63, 15.0  ;;  %vm2066_vm14 = vmand %vm1992_vm11, %vm2029_vm12  ;;  %v6928_v33 = vsel %vm2061_vm15, 1.0, %v10319_v59  ;;  %v6930_v12 = vmin.f32 %v2172_v19, 15.0 }
 0x1f8   : > { %v6923_v52 = vsel %vm2066_vm14, 1.0, %v10319_v59  ;;  %v6925_v47 = vmin.f32 %v2177_v44, 15.0  ;;  %10411 = vst [vmem:[#allocation142_spill] sm:$0xff] %v6928_v33 }
 0x1f9   : > { %10408 = vst [vmem:[#allocation139_spill] sm:$0xff] %v6920_v32 }
 0x1fa   : > { %10409 = vst [vmem:[#allocation140_spill] sm:$0xff] %v6923_v52  ;;  %v1862_v18 = vpop.permute.xlu1 %1861  ;;  %v1866_v38 = vpop.permute.xlu0 %1865  ;;  %2353 = vperm.xlu0 %5343, %v6925_v47  }
 0x1fb   : > { %10410 = vst [vmem:[#allocation141_spill] sm:$0xff] %v6925_v47  ;;  %2318 = vperm.xlu2 %5342, %v6920_v32   ;;  %v1951_v21 = vadd.f32 %v6640_v17, %v1862_v18  ;;  %v1876_v44 = vpop.permute.xlu2 %1875  ;;  %v1953_v16 = vadd.f32 %v6644_v4, %v1866_v38  ;;  %2328 = vperm.xlu1 %5341, %v6930_v12  }
 0x1fc   : > { %10412 = vst [vmem:[#allocation143_spill] sm:$0xff] %v6930_v12  ;;  %v1958_v19 = vadd.f32 %v6711_v28, %v1876_v44 }
 0x1fd   : > { %vm1988_vm2 = vcmp.ge.f32.partialorder %v1951_v21, -1.0  ;;  %vm2025_vm3 = vcmp.le.f32.partialorder %v1951_v21, 16.0  ;;  %v2173_v25 = vmax.f32 %v1951_v21, 0.0  ;;  %vm1990_vm4 = vcmp.ge.f32.partialorder %v1953_v16, -1.0 }
 0x1fe   : > { %vm2062_vm5 = vmand %vm1988_vm2, %vm2025_vm3  ;;  %vm1995_vm6 = vcmp.ge.f32.partialorder %v1958_v19, -1.0  ;;  %vm2032_vm7 = vcmp.le.f32.partialorder %v1958_v19, 16.0  ;;  %v2180_v63 = vmax.f32 %v1958_v19, 0.0  ;;  %vm2027_vm8 = vcmp.le.f32.partialorder %v1953_v16, 16.0 }
 0x1ff   : > { %v6943_v47 = vsel %vm2062_vm5, 1.0, %v10319_v59  ;;  %v6945_v17 = vmin.f32 %v2173_v25, 15.0  ;;  %vm2069_vm9 = vmand %vm1995_vm6, %vm2032_vm7  ;;  %v2175_v4 = vmax.f32 %v1953_v16, 0.0  ;;  %vm1977_vm3 = vcmp.ge.f32.partialorder %v6793_v55, -1.0 }
 0x200   : > { %10413 = vst [vmem:[#allocation144_spill] sm:$0xff] %v6943_v47  ;;  %v6948_v18 = vsel %vm2069_vm9, 1.0, %v10319_v59  ;;  %v6950_v28 = vmin.f32 %v2180_v63, 15.0  ;;  %vm2064_vm10 = vmand %vm1990_vm4, %vm2027_vm8  ;;  %vm2014_vm4 = vcmp.le.f32.partialorder %v6793_v55, 16.0 }
 0x201   : > { %10414 = vst [vmem:[#allocation145_spill] sm:$0xff] %v6945_v17  ;;  %v6957_v44 = vsel %vm2064_vm10, 1.0, %v10319_v59  ;;  %v6959_v19 = vmin.f32 %v2175_v4, 15.0  ;;  %vm6997_vm5 = vmand %vm1977_vm3, %vm2014_vm4 }
 0x202   : > { %10415 = vst [vmem:[#allocation146_spill] sm:$0xff] %v6948_v18  ;;  %v1868_v25 = vpop.permute.xlu1 %1867  ;;  %v1872_v32 = vpop.permute.xlu0 %1871  ;;  %2368 = vperm.xlu0 %5343, %v6950_v28  }
 0x203   : > { %10416 = vst [vmem:[#allocation147_spill] sm:$0xff] %v6950_v28  ;;  %2333 = vperm.xlu2 %5342, %v6945_v17   ;;  %v1954_v21 = vadd.f32 %v6661_v54, %v1868_v25  ;;  %v1882_v38 = vpop.permute.xlu2 %1881  ;;  %v1956_v4 = vadd.f32 %v6665_v60, %v1872_v32  ;;  %2343 = vperm.xlu1 %5341, %v6959_v19  }
 0x204   : > { %10417 = vst [vmem:[#allocation148_spill] sm:$0xff] %v6957_v44  ;;  %v1961_v16 = vadd.f32 %v6732_v45, %v1882_v38 }
 0x205   : > { %10418 = vst [vmem:[#allocation149_spill] sm:$0xff] %v6959_v19  ;;  %vm1991_vm11 = vcmp.ge.f32.partialorder %v1954_v21, -1.0  ;;  %vm2028_vm12 = vcmp.le.f32.partialorder %v1954_v21, 16.0  ;;  %v2176_v12 = vmax.f32 %v1954_v21, 0.0  ;;  %vm1993_vm13 = vcmp.ge.f32.partialorder %v1956_v4, -1.0 }
 0x206   : > { %vm2065_vm14 = vmand %vm1991_vm11, %vm2028_vm12  ;;  %v2183_v63 = vmax.f32 %v1961_v16, 0.0  ;;  %vm2030_vm15 = vcmp.le.f32.partialorder %v1956_v4, 16.0  ;;  %v2178_v54 = vmax.f32 %v1956_v4, 0.0  ;;  %vm1998_vm9 = vcmp.ge.f32.partialorder %v1961_v16, -1.0 }
 0x207   : > { %v6974_v27 = vsel %vm2065_vm14, 1.0, %v10319_v59  ;;  %v6976_v28 = vmin.f32 %v2176_v12, 15.0  ;;  %vm2067_vm2 = vmand %vm1993_vm13, %vm2030_vm15  ;;  %vm2035_vm12 = vcmp.le.f32.partialorder %v1961_v16, 16.0 }
 0x208   : > { %10419 = vst [vmem:[#allocation150_spill] sm:$0xff] %v6974_v27  ;;  %v6978_v25 = vmin.f32 %v2183_v63, 15.0  ;;  %v6983_v45 = vsel %vm2067_vm2, 1.0, %v10319_v59  ;;  %v6985_v32 = vmin.f32 %v2178_v54, 15.0  ;;  %vm2072_vm14 = vmand %vm1998_vm9, %vm2035_vm12 }
 0x209   : > { %10420 = vst [vmem:[#allocation151_spill] sm:$0xff] %v6976_v28 }
 0x20a   : > { %10421 = vst [vmem:[#allocation152_spill] sm:$0xff] %v6978_v25  ;;  %v1874_v38 = vpop.permute.xlu1 %1873  ;;  %v1878_v21 = vpop.permute.xlu0 %1877  ;;  %2383 = vperm.xlu0 %5343, %v6978_v25  }
 0x20b   : > { %10422 = vst [vmem:[#allocation153_spill] sm:$0xff] %v6983_v45  ;;  %2348 = vperm.xlu2 %5342, %v6976_v28   ;;  %v1957_v63 = vadd.f32 %v6682_v14, %v1874_v38  ;;  %v1888_v4 = vpop.permute.xlu2 %1887  ;;  %v1959_v60 = vadd.f32 %v6686_v26, %v1878_v21  ;;  %2358 = vperm.xlu1 %5341, %v6985_v32  }
 0x20c   : > { %10423 = vst [vmem:[#allocation154_spill] sm:$0xff] %v6985_v32  ;;  %v1964_v54 = vadd.f32 %v6749_v0, %v1888_v4  ;;  %v442_v0 = vld [vmem:[%s5978_s13] sm:$0xf] }
 0x20d   : > { %vm1994_vm6 = vcmp.ge.f32.partialorder %v1957_v63, -1.0  ;;  %vm2031_vm7 = vcmp.le.f32.partialorder %v1957_v63, 16.0  ;;  %v2179_v12 = vmax.f32 %v1957_v63, 0.0  ;;  %vm1996_vm8 = vcmp.ge.f32.partialorder %v1959_v60, -1.0 }
 0x20e   : > { %vm2068_vm10 = vmand %vm1994_vm6, %vm2031_vm7  ;;  %v2186_v25 = vmax.f32 %v1964_v54, 0.0  ;;  %vm2033_vm11 = vcmp.le.f32.partialorder %v1959_v60, 16.0  ;;  %v2181_v38 = vmax.f32 %v1959_v60, 0.0  ;;  %v7014_v63 = vsel %vm6997_vm5, 1.0, %v10319_v59 }
 0x20f   : > { %v7002_v14 = vsel %vm2068_vm10, 1.0, %v10319_v59  ;;  %v7004_v26 = vmin.f32 %v2179_v12, 15.0  ;;  %vm2070_vm13 = vmand %vm1996_vm8, %vm2033_vm11  ;;  %10429 = vst [vmem:[#allocation158_spill] sm:$0xff] %v7014_v63  ;;  %v1110_v32 = vperm.slane %v442_v0, 0  ;;  %v1111_v17 = vperm.slane %v442_v0, 2 }
 0x210   : > { %10426 = vst [vmem:[#allocation155_spill] sm:$0xff] %v7002_v14  ;;  %v7007_v21 = vmin.f32 %v2186_v25, 15.0  ;;  %v7017_v28 = vsel %vm2070_vm13, 1.0, %v10319_v59  ;;  %v7019_v19 = vmin.f32 %v2181_v38, 15.0  ;;  %v5298_v38 = vsel %vm2072_vm14, 1.0, %v10319_v59 }
 0x211   : > { %10427 = vst [vmem:[#allocation156_spill] sm:$0xff] %v7004_v26  ;;  %v7030_v25 = vperm.slane %v1110_v32, 0  ;;  %vm2001_vm4 = vcmp.ge.f32.partialorder %v1964_v54, -1.0  ;;  %vm2038_vm5 = vcmp.le.f32.partialorder %v1964_v54, 16.0 }
 0x212   : > { %10428 = vst [vmem:[#allocation157_spill] sm:$0xff] %v7007_v21  ;;  %v1880_v60 = vpop.permute.xlu1 %1879  ;;  %v1884_v12 = vpop.permute.xlu0 %1883  ;;  %2398 = vperm.xlu0 %5343, %v7007_v21   ;;  %vm2075_vm8 = vmand %vm2001_vm4, %vm2038_vm5 }
 0x213   : > { %10430 = vst [vmem:[#allocation159_spill] sm:$0xff] %v7017_v28  ;;  %2363 = vperm.xlu2 %5342, %v7004_v26   ;;  %v1960_v55 = vadd.f32 %v6703_v29, %v1880_v60  ;;  %v1962_v4 = vadd.f32 %v6707_v53, %v1884_v12  ;;  %2373 = vperm.xlu1 %5341, %v7019_v19   ;;  %v7039_v60 = vperm.slane %v1111_v17, 0 }
 0x214   : > { %10431 = vst [vmem:[#allocation160_spill] sm:$0xff] %v7019_v19  ;;  %v1118_v0 = vsub.f32 %v6441_v61, %v7030_v25 }
 0x215   : > { %vm1997_vm15 = vcmp.ge.f32.partialorder %v1960_v55, -1.0  ;;  %vm2034_vm2 = vcmp.le.f32.partialorder %v1960_v55, 16.0  ;;  %v2182_v16 = vmax.f32 %v1960_v55, 0.0  ;;  %v2184_v62 = vmax.f32 %v1962_v4, 0.0  ;;  %10432 = vst [vmem:[#allocation161_spill] sm:$0xff] %v7030_v25 }
 0x216   : > { %vm2071_vm3 = vmand %vm1997_vm15, %vm2034_vm2  ;;  %vm1999_vm6 = vcmp.ge.f32.partialorder %v1962_v4, -1.0  ;;  %vm2036_vm7 = vcmp.le.f32.partialorder %v1962_v4, 16.0  ;;  %10436 = vst [vmem:[#allocation165_spill] sm:$0xff] %v7039_v60  ;;  %v10437_v55 = vpack.i.bf16 %v6774_v23, %v6777_v9  ;;  %v1119_v17 = vsub.f32 %v6441_v61, %v7039_v60 }
 0x217   : > { %v5297_v26 = vsel %vm2071_vm3, 1.0, %v10319_v59  ;;  %v7033_v49 = vmin.f32 %v2182_v16, 15.0  ;;  %v7035_v29 = vmin.f32 %v2184_v62, 15.0  ;;  %vm2073_vm9 = vmand %vm1999_vm6, %vm2036_vm7  ;;  %v1192_v4 = vand.u32 2147483647, %v1118_v0 }
 0x218   : > { %v7037_v53 = vpack.i.bf16 %v5298_v38, %v5297_v26  ;;  %v5301_v38 = vsel %vm2075_vm8, 1.0, %v10319_v59  ;;  %vm1985_vm2 = vcmp.ge.f32.partialorder %v6914_v48, -1.0  ;;  %vm2022_vm3 = vcmp.le.f32.partialorder %v6914_v48, 16.0 }
 0x219   : > { %10433 = vst [vmem:[#allocation162_spill] sm:$0xff] %v7033_v49  ;;  %v1116_v48 = vsub.f32 %v6453_v22, %v7030_v25  ;;  %vm2059_vm4 = vmand %vm1985_vm2, %vm2022_vm3  ;;  %vm1986_vm8 = vcmp.ge.f32.partialorder %v6867_v30, -1.0  ;;  %v1127_v23 = vsub.f32 %v6469_v57, %v7039_v60 }
 0x21a   : > { %10434 = vst [vmem:[#allocation163_spill] sm:$0xff] %v7035_v29  ;;  %v1886_v12 = vpop.permute.xlu1 %1885  ;;  %v1890_v32 = vpop.permute.xlu0 %1889  ;;  %5435 = vperm.xlu0 %5343, %v10437_v55  }
 0x21b   : > { %10435 = vst [vmem:[#allocation164_spill] sm:$0xff] %v7037_v53  ;;  %2378 = vperm.xlu2 %5342, %v7033_v49   ;;  %v1963_v62 = vadd.f32 %v6724_v15, %v1886_v12  ;;  %v1965_v54 = vadd.f32 %v6728_v8, %v1890_v32  ;;  %2388 = vperm.xlu1 %5341, %v7035_v29   ;;  %v5299_v8 = vsel %vm2073_vm9, 1.0, %v10319_v59  ;;  %v1193_v32 = vand.u32 2147483647, %v1119_v17 }
 0x21c   : > { %v1124_v15 = vsub.f32 %v6448_v24, %v7030_v25  ;;  %v10442_v17 = vpack.i.bf16 %v6825_v56, %v6828_v5  ;;  %vm2023_vm9 = vcmp.le.f32.partialorder %v6867_v30, 16.0  ;;  %v1122_v56 = vsub.f32 %v6462_v43, %v7030_v25 }
 0x21d   : > { %vm2000_vm10 = vcmp.ge.f32.partialorder %v1963_v62, -1.0  ;;  %vm2037_vm11 = vcmp.le.f32.partialorder %v1963_v62, 16.0  ;;  %v2185_v26 = vmax.f32 %v1963_v62, 0.0  ;;  %vm2002_vm12 = vcmp.ge.f32.partialorder %v1965_v54, -1.0 }
 0x21e   : > { %vm2074_vm13 = vmand %vm2000_vm10, %vm2037_vm11  ;;  %vm2039_vm14 = vcmp.le.f32.partialorder %v1965_v54, 16.0  ;;  %v2187_v16 = vmax.f32 %v1965_v54, 0.0  ;;  %v1125_v54 = vsub.f32 %v6448_v24, %v7039_v60  ;;  %vm1978_vm11 = vcmp.ge.f32.partialorder %v6843_v3, -1.0 }
 0x21f   : > { %v5300_v61 = vsel %vm2074_vm13, 1.0, %v10319_v59  ;;  %v7057_v12 = vmin.f32 %v2185_v26, 15.0  ;;  %vm2076_vm15 = vmand %vm2002_vm12, %vm2039_vm14  ;;  %v1198_v26 = vand.u32 2147483647, %v1124_v15  ;;  %vm2015_vm12 = vcmp.le.f32.partialorder %v6843_v3, 16.0 }
 0x220   : > { %v5302_v55 = vsel %vm2076_vm15, 1.0, %v10319_v59  ;;  %v7060_v62 = vmin.f32 %v2187_v16, 15.0  ;;  %v7062_v0 = vpack.i.bf16 %v5300_v61, %v5299_v8  ;;  %v1266_v8 = vsub.f32 1.0, %v1192_v4  ;;  %vm7104_vm10 = vmand %vm1986_vm8, %vm2023_vm9 }
 0x221   : > { %10438 = vst [vmem:[#allocation166_spill] sm:$0xff] %v7057_v12  ;;  %v7066_v21 = vpack.i.bf16 %v5302_v55, %v5301_v38  ;;  %v1267_v61 = vsub.f32 1.0, %v1193_v32  ;;  %v1199_v38 = vand.u32 2147483647, %v1125_v54  ;;  %v1117_v55 = vsub.f32 %v6453_v22, %v7039_v60  ;;  %vm7158_vm13 = vmand %vm1978_vm11, %vm2015_vm12 }
 0x222   : > { %10439 = vst [vmem:[#allocation167_spill] sm:$0xff] %v7060_v62  ;;  %v1892_v49 = vpop.permute.xlu1 %1891  ;;  %5450 = vperm.xlu0 %5343, %v10442_v17   ;;  %v1128_v17 = vsub.f32 %v6455_v10, %v7030_v25  ;;  %v1129_v4 = vsub.f32 %v6455_v10, %v7039_v60  ;;  %v1121_v32 = vsub.f32 %v6460_v35, %v7039_v60  ;;  %v7095_v22 = vsel %vm2059_vm4, 1.0, %v10319_v59 }
 0x223   : > { %10440 = vst [vmem:[#allocation168_spill] sm:$0xff] %v7062_v0  ;;  %2393 = vperm.xlu2 %5342, %v7057_v12   ;;  %v1966_v16 = vadd.f32 %v6745_v7, %v1892_v49  ;;  %2403 = vperm.xlu1 %5341, %v7060_v62   ;;  %v7076_v24 = vpop.permute.xlu2 %2228  ;;  %v1120_v7 = vsub.f32 %v6460_v35, %v7030_v25  ;;  %v1272_v49 = vsub.f32 1.0, %v1198_v26  ;;  %v1273_v26 = vsub.f32 1.0, %v1199_v38 }
 0x224   : > { %10441 = vst [vmem:[#allocation169_spill] sm:$0xff] %v7066_v21  ;;  %v1191_v12 = vand.u32 2147483647, %v1117_v55  ;;  %v1202_v35 = vand.u32 2147483647, %v1128_v17  ;;  %v7110_v38 = vmax.f32 %v1266_v8, 0.0  ;;  %v10449_v17 = vpack.i.bf16 %v6803_v40, %v6800_v2 }
 0x225   : > { %10443 = vst [vmem:[#allocation170_spill] sm:$0xff] %v7076_v24  ;;  %v2188_v15 = vmax.f32 %v1966_v16, 0.0  ;;  %vm2003_vm5 = vcmp.ge.f32.partialorder %v1966_v16, -1.0  ;;  %vm2040_vm6 = vcmp.le.f32.partialorder %v1966_v16, 16.0  ;;  %v1190_v16 = vand.u32 2147483647, %v1116_v48 }
 0x226   : > { %vm2077_vm7 = vmand %vm2003_vm5, %vm2040_vm6  ;;  %10445 = vst [vmem:[#allocation172_spill] sm:$0xff] %v7095_v22  ;;  %v1203_v19 = vand.u32 2147483647, %v1129_v4  ;;  %v1195_v29 = vand.u32 2147483647, %v1121_v32  ;;  %v7112_v48 = vmax.f32 %v1267_v61, 0.0  ;;  %v1123_v10 = vsub.f32 %v6462_v43, %v7039_v60 }
 0x227   : > { %v7090_v54 = vmin.f32 %v2188_v15, 15.0  ;;  %v7098_v62 = vsel %vm2077_vm7, 1.0, %v10319_v59  ;;  %v1194_v15 = vand.u32 2147483647, %v1120_v7  ;;  %v7114_v55 = vmax.f32 %v1272_v49, 0.0 }
 0x228   : > { %10446 = vst [vmem:[#allocation173_spill] sm:$0xff] %v7098_v62  ;;  %v7121_v4 = vmax.f32 %v1273_v26, 0.0  ;;  %v1264_v32 = vsub.f32 1.0, %v1190_v16  ;;  %v1134_v8 = vsub.f32 %v6464_v50, %v7030_v25  ;;  %v1265_v61 = vsub.f32 1.0, %v1191_v12 }
 0x229   : > { %10444 = vst [vmem:[#allocation171_spill] sm:$0xff] %v7090_v54  ;;  %v1276_v49 = vsub.f32 1.0, %v1202_v35  ;;  %v1277_v5 = vsub.f32 1.0, %v1203_v19  ;;  %v1269_v26 = vsub.f32 1.0, %v1195_v29  ;;  %v1196_v2 = vand.u32 2147483647, %v1122_v56 }
 0x22a   : > { %5465 = vperm.xlu0 %5343, %v6876_v31   ;;  %v1268_v31 = vsub.f32 1.0, %v1194_v15  ;;  %v1135_v16 = vsub.f32 %v6464_v50, %v7039_v60  ;;  %v1126_v43 = vsub.f32 %v6469_v57, %v7030_v25  ;;  %v1197_v12 = vand.u32 2147483647, %v1123_v10 }
 0x22b   : > { %2408 = vperm.xlu2 %5342, %v7090_v54   ;;  %5440 = vperm.xlu1 %5341, %v10449_v17   ;;  %v7132_v17 = vsel %vm7104_vm10, 1.0, %v10319_v59  ;;  %v1208_v35 = vand.u32 2147483647, %v1134_v8  ;;  %v1130_v19 = vsub.f32 %v6471_v42, %v7030_v25  ;;  %v7146_v29 = vmax.f32 %v1264_v32, 0.0 }
 0x22c   : > { %v7119_v7 = vpop.permute.xlu2 %2243  ;;  %v7127_v54 = vpop.permute.xlu0 %2233  ;;  %10452 = vst [vmem:[#allocation176_spill] sm:$0xff] %v7132_v17  ;;  %v5479_v56 = vpack.i.bf16 %v7132_v17, %v7095_v22  ;;  %v7148_v50 = vmax.f32 %v1265_v61, 0.0  ;;  %v7150_v15 = vmax.f32 %v1268_v31, 0.0  ;;  %v1140_v57 = vsub.f32 %v6473_v41, %v7030_v25 }
 0x22d   : > { %10450 = vst [vmem:[#allocation174_spill] sm:$0xff] %v7119_v7  ;;  %v1270_v30 = vsub.f32 1.0, %v1196_v2  ;;  %v1209_v40 = vand.u32 2147483647, %v1135_v16  ;;  %v1141_v3 = vsub.f32 %v6473_v41, %v7039_v60  ;;  %v1131_v10 = vsub.f32 %v6471_v42, %v7039_v60 }
 0x22e   : > { %10451 = vst [vmem:[#allocation175_spill] sm:$0xff] %v7127_v54  ;;  %v10455_v31 = vpack.i.bf16 %v6812_v1, %v6796_v37  ;;  %v7165_v32 = vmax.f32 %v1276_v49, 0.0  ;;  %v7167_v61 = vmax.f32 %v1277_v5, 0.0  ;;  %v1200_v2 = vand.u32 2147483647, %v1126_v43 }
 0x22f   : > { %v1201_v16 = vand.u32 2147483647, %v1127_v23  ;;  %v10456_v41 = vpack.i.bf16 %v6850_v6, %v6847_v11  ;;  %v7174_v17 = vmax.f32 %v1269_v26, 0.0  ;;  %v1271_v22 = vsub.f32 1.0, %v1197_v12 }
 0x230   : > { %v1204_v9 = vand.u32 2147483647, %v1130_v19  ;;  %v1132_v5 = vsub.f32 %v6478_v46, %v7030_v25  ;;  %v1133_v23 = vsub.f32 %v6478_v46, %v7039_v60  ;;  %v7185_v49 = vsel %vm7158_vm13, 1.0, %v10319_v59 }
 0x231   : > { %10459 = vst [vmem:[#allocation179_spill] sm:$0xff] %v7185_v49  ;;  %v7187_v43 = vmax.f32 %v1270_v30, 0.0  ;;  %v1283_v26 = vsub.f32 1.0, %v1209_v40  ;;  %v1215_v12 = vand.u32 2147483647, %v1141_v3  ;;  %v1274_v19 = vsub.f32 1.0, %v1200_v2 }
 0x232   : > { %5480 = vperm.xlu0 %5343, %v5479_v56   ;;  %v1282_v56 = vsub.f32 1.0, %v1208_v35  ;;  %v1205_v35 = vand.u32 2147483647, %v1131_v10  ;;  %v1137_v11 = vsub.f32 %v6480_v13, %v7039_v60  ;;  %v1146_v46 = vsub.f32 %v6482_v34, %v7030_v25 }
 0x233   : > { %5445 = vperm.xlu2 %5342, %v10455_v31   ;;  %5455 = vperm.xlu1 %5341, %v10456_v41   ;;  %v1214_v31 = vand.u32 2147483647, %v1140_v57  ;;  %v1275_v41 = vsub.f32 1.0, %v1201_v16  ;;  %v1136_v57 = vsub.f32 %v6480_v13, %v7030_v25  ;;  %v1147_v59 = vsub.f32 %v6482_v34, %v7039_v60 }
 0x234   : > { %v7172_v42 = vpop.permute.xlu2 %2258  ;;  %v7176_v54 = vpop.permute.xlu0 %2248  ;;  %v5494_v30 = vpack.i.bf16 %v6923_v52, %v6974_v27  ;;  %v5459_v40 = vpack.i.bf16 %v7185_v49, %v7014_v63  ;;  %v1278_v10 = vsub.f32 1.0, %v1204_v9  ;;  %v1206_v8 = vand.u32 2147483647, %v1132_v5 }
 0x235   : > { %10457 = vst [vmem:[#allocation177_spill] sm:$0xff] %v7172_v42  ;;  %v1288_v3 = vsub.f32 1.0, %v1214_v31  ;;  %v1207_v2 = vand.u32 2147483647, %v1133_v23  ;;  %v7201_v16 = vmax.f32 %v1271_v22, 0.0  ;;  %v7203_v1 = vmax.f32 %v1282_v56, 0.0 }
 0x236   : > { %10458 = vst [vmem:[#allocation178_spill] sm:$0xff] %v7176_v54  ;;  %v1289_v13 = vsub.f32 1.0, %v1215_v12  ;;  %v1279_v6 = vsub.f32 1.0, %v1205_v35  ;;  %v7205_v37 = vmax.f32 %v1283_v26, 0.0  ;;  %v7207_v34 = vmax.f32 %v1274_v19, 0.0 }
 0x237   : > { %v7209_v52 = vmax.f32 %v1275_v41, 0.0  ;;  %v1210_v27 = vand.u32 2147483647, %v1136_v57  ;;  %v1220_v31 = vand.u32 2147483647, %v1146_v46  ;;  %v7218_v12 = vmax.f32 %v1288_v3, 0.0 }
 0x238   : > { %v1221_v22 = vand.u32 2147483647, %v1147_v59  ;;  %v1211_v5 = vand.u32 2147483647, %v1137_v11  ;;  %v7220_v26 = vmax.f32 %v1278_v10, 0.0  ;;  %v1280_v35 = vsub.f32 1.0, %v1206_v8 }
 0x239   : > { %v1281_v19 = vsub.f32 1.0, %v1207_v2  ;;  %v7222_v41 = vmax.f32 %v1289_v13, 0.0  ;;  %v7224_v57 = vmax.f32 %v1279_v6, 0.0  ;;  %v1139_v11 = vsub.f32 %v6490_v51, %v7039_v60 }
 0x23a   : > { %5495 = vperm.xlu0 %5343, %v5494_v30   ;;  %v1138_v30 = vsub.f32 %v6490_v51, %v7030_v25  ;;  %v1284_v46 = vsub.f32 1.0, %v1210_v27  ;;  %v1152_v59 = vsub.f32 %v6494_v39, %v7030_v25  ;;  %v1294_v8 = vsub.f32 1.0, %v1220_v31  ;;  %v10464_v27 = vld [vmem:[#allocation65_spill] sm:$0xff] }
 0x23b   : > { %5460 = vperm.xlu2 %5342, %v5459_v40   ;;  %5470 = vperm.xlu1 %5341, %v6902_v20   ;;  %v7214_v56 = vpop.permute.xlu1 %2238  ;;  %v10463_v40 = vld [vmem:[#allocation64_spill] sm:$0xff]  ;;  %v1295_v2 = vsub.f32 1.0, %v1221_v22  ;;  %v1285_v6 = vsub.f32 1.0, %v1211_v5  ;;  %v7236_v13 = vmax.f32 %v1280_v35, 0.0  ;;  %v7238_v49 = vmax.f32 %v1281_v19, 0.0 }
 0x23c   : > { %v7212_v9 = vpop.permute.xlu2 %2273  ;;  %10461 = vst [vmem:[#allocation181_spill] sm:$0xff] %v7214_v56  ;;  %v7216_v23 = vpop.permute.xlu0 %2263  ;;  %v1142_v3 = vsub.f32 %v10463_v40, %v7030_v25  ;;  %v1143_v10 = vsub.f32 %v10463_v40, %v7039_v60  ;;  %v1153_v51 = vsub.f32 %v6494_v39, %v7039_v60  ;;  %v1144_v20 = vsub.f32 %v10464_v27, %v7030_v25  ;;  %v10465_v40 = vld [vmem:[#allocation66_spill] sm:$0xff] }
 0x23d   : > { %10460 = vst [vmem:[#allocation180_spill] sm:$0xff] %v7212_v9  ;;  %v1212_v63 = vand.u32 2147483647, %v1138_v30  ;;  %v1145_v56 = vsub.f32 %v10464_v27, %v7039_v60  ;;  %v1148_v31 = vsub.f32 %v10465_v40, %v7030_v25  ;;  %v7250_v22 = vand.u32 2147483647, %v1152_v59  ;;  %v10470_v27 = vld [vmem:[#allocation67_spill] sm:$0xff] }
 0x23e   : > { %10462 = vst [vmem:[#allocation182_spill] sm:$0xff] %v7216_v23  ;;  %v1213_v23 = vand.u32 2147483647, %v1139_v11  ;;  %v1216_v5 = vand.u32 2147483647, %v1142_v3  ;;  %v10467_v39 = vpack.i.bf16 %v6943_v47, %v6928_v33  ;;  %v7257_v30 = vmax.f32 %v1294_v8, 0.0 }
 0x23f   : > { %10466 = vst [vmem:[#allocation64_spill] sm:$0xff] %v7250_v22  ;;  %v1217_v35 = vand.u32 2147483647, %v1143_v10  ;;  %v7259_v11 = vmax.f32 %v1284_v46, 0.0  ;;  %v1158_v9 = vsub.f32 %v10470_v27, %v7030_v25  ;;  %v7269_v10 = vmax.f32 %v1295_v2, 0.0  ;;  %v10475_v2 = vld [vmem:[#allocation68_spill] sm:$0xff] }
 0x240   : > { %10469 = vst [vmem:[#allocation66_spill] sm:$0xff] %v7257_v30  ;;  %v1149_v8 = vsub.f32 %v10465_v40, %v7039_v60  ;;  %v7275_v46 = vmax.f32 %v1285_v6, 0.0  ;;  %v1286_v47 = vsub.f32 1.0, %v1212_v63  ;;  %v1219_v33 = vand.u32 2147483647, %v1145_v56  ;;  %v10476_v6 = vld [vmem:[#allocation69_spill] sm:$0xff] }
 0x241   : > { %10473 = vst [vmem:[#allocation184_spill] sm:$0xff] %v7269_v10  ;;  %v1287_v54 = vsub.f32 1.0, %v1213_v23  ;;  %v1290_v42 = vsub.f32 1.0, %v1216_v5  ;;  %v1232_v7 = vand.u32 2147483647, %v1158_v9  ;;  %v1154_v63 = vsub.f32 %v10476_v6, %v7030_v25 }
 0x242   : > { %5510 = vperm.xlu0 %5343, %v7037_v53   ;;  %v7271_v53 = vand.u32 2147483647, %v1153_v51  ;;  %v1150_v51 = vsub.f32 %v10475_v2, %v7030_v25  ;;  %v1223_v40 = vand.u32 2147483647, %v1149_v8  ;;  %v5499_v56 = vpack.i.bf16 %v7002_v14, %v6983_v45 }
 0x243   : > { %5475 = vperm.xlu2 %5342, %v6909_v36   ;;  %5485 = vperm.xlu1 %5341, %v10467_v39   ;;  %v1159_v36 = vsub.f32 %v10470_v27, %v7039_v60  ;;  %v1218_v39 = vand.u32 2147483647, %v1144_v20  ;;  %v1151_v20 = vsub.f32 %v10475_v2, %v7039_v60  ;;  %v7286_v23 = vmax.f32 %v1286_v47, 0.0 }
 0x244   : > { %v7255_v19 = vpop.permute.xlu2 %2288  ;;  %v7267_v3 = vpop.permute.xlu0 %2278  ;;  %10474 = vst [vmem:[#allocation185_spill] sm:$0xff] %v7271_v53  ;;  %v7296_v8 = vmax.f32 %v1290_v42, 0.0  ;;  %v1155_v47 = vsub.f32 %v10476_v6, %v7039_v60  ;;  %v1224_v27 = vand.u32 2147483647, %v1150_v51  ;;  %v1228_v45 = vand.u32 2147483647, %v1154_v63 }
 0x245   : > { %10468 = vst [vmem:[#allocation65_spill] sm:$0xff] %v7255_v19  ;;  %v7265_v59 = vpop.permute.xlu1 %2253  ;;  %v1222_v19 = vand.u32 2147483647, %v1148_v31  ;;  %v1292_v53 = vsub.f32 1.0, %v1218_v39  ;;  %v1293_v31 = vsub.f32 1.0, %v1219_v33  ;;  %v7294_v39 = vmax.f32 %v1287_v54, 0.0 }
 0x246   : > { %10471 = vst [vmem:[#allocation67_spill] sm:$0xff] %v7265_v59  ;;  %v1291_v59 = vsub.f32 1.0, %v1217_v35  ;;  %v10478_v35 = vpack.i.bf16 %v6957_v44, %v6896_v58  ;;  %v1225_v22 = vand.u32 2147483647, %v1151_v20  ;;  %v5504_v63 = vpack.i.bf16 %v7017_v28, %v6948_v18 }
 0x247   : > { %10472 = vst [vmem:[#allocation183_spill] sm:$0xff] %v7267_v3  ;;  %v1233_v3 = vand.u32 2147483647, %v1159_v36  ;;  %v1296_v5 = vsub.f32 1.0, %v1222_v19  ;;  %v10477_v36 = vld [vmem:[#allocation70_spill] sm:$0xff]  ;;  %v1306_v19 = vsub.f32 1.0, %v1232_v7 }
 0x248   : > { %v1164_v9 = vsub.f32 %v10477_v36, %v7030_v25  ;;  %v1165_v2 = vsub.f32 %v10477_v36, %v7039_v60  ;;  %v7302_v33 = vmax.f32 %v1291_v59, 0.0  ;;  %v7308_v54 = vmax.f32 %v1292_v53, 0.0  ;;  %v10484_v7 = vld [vmem:[#allocation71_spill] sm:$0xff] }
 0x249   : > { %v1307_v42 = vsub.f32 1.0, %v1233_v3  ;;  %v7312_v36 = vmax.f32 %v1293_v31, 0.0  ;;  %v7314_v6 = vmax.f32 %v1296_v5, 0.0  ;;  %v1156_v51 = vsub.f32 %v10484_v7, %v7030_v25  ;;  %v10485_v3 = vld [vmem:[#allocation72_spill] sm:$0xff]  ;;  %v10486_v5 = vld [vmem:[#allocation73_spill] sm:$0xff] }
 0x24a   : > { %2889 = vperm.xlu0 %5343, %v7098_v62   ;;  %10481 = vst [vmem:[#allocation70_spill] sm:$0xff] %v7308_v54  ;;  %v1238_v59 = vand.u32 2147483647, %v1164_v9  ;;  %v1239_v20 = vand.u32 2147483647, %v1165_v2  ;;  %v1157_v58 = vsub.f32 %v10484_v7, %v7039_v60  ;;  %v1298_v53 = vsub.f32 1.0, %v1224_v27 }
 0x24b   : > { %5490 = vperm.xlu2 %5342, %v10478_v35   ;;  %5500 = vperm.xlu1 %5341, %v5499_v56   ;;  %v1297_v35 = vsub.f32 1.0, %v1223_v40  ;;  %10483 = vst [vmem:[#allocation187_spill] sm:$0xff] %v7312_v36  ;;  %v1229_v56 = vand.u32 2147483647, %v1155_v47  ;;  %v1160_v40 = vsub.f32 %v10485_v3, %v7030_v25  ;;  %v1302_v31 = vsub.f32 1.0, %v1228_v45 }
 0x24c   : > { %v7310_v44 = vpop.permute.xlu0 %2293  ;;  %v1170_v9 = vsub.f32 %v10486_v5, %v7030_v25  ;;  %v7328_v2 = vmax.f32 %v1306_v19, 0.0  ;;  %v7330_v47 = vmax.f32 %v1307_v42, 0.0  ;;  %v1230_v7 = vand.u32 2147483647, %v1156_v51 }
 0x24d   : > { %v7304_v62 = vpop.permute.xlu2 %2303  ;;  %v7306_v14 = vpop.permute.xlu1 %2268  ;;  %10482 = vst [vmem:[#allocation186_spill] sm:$0xff] %v7310_v44  ;;  %v1171_v44 = vsub.f32 %v10486_v5, %v7039_v60  ;;  %v10232_v27 = vmov 0   ;;  %v7335_v28 = vmax.f32 %v1297_v35, 0.0  ;;  %v1312_v45 = vsub.f32 1.0, %v1238_v59  ;;  %v10489_v5 = vld [vmem:[#allocation9_spill] sm:$0xff] }
 0x24e   : > { %10479 = vst [vmem:[#allocation68_spill] sm:$0xff] %v7304_v62  ;;  %v1313_v18 = vsub.f32 1.0, %v1239_v20  ;;  %v1231_v62 = vand.u32 2147483647, %v1157_v58  ;;  %v7339_v19 = vmax.f32 %v1298_v53, 0.0  ;;  %v1303_v51 = vsub.f32 1.0, %v1229_v56 }
 0x24f   : > { %10480 = vst [vmem:[#allocation69_spill] sm:$0xff] %v7306_v14  ;;  %v1299_v14 = vsub.f32 1.0, %v1225_v22  ;;  %v1161_v22 = vsub.f32 %v10485_v3, %v7039_v60  ;;  %v1234_v24 = vand.u32 2147483647, %v1160_v40  ;;  %v1244_v35 = vand.u32 2147483647, %v1170_v9 }
 0x250   : > { %10487 = vst [vmem:[#allocation71_spill] sm:$0xff] %v7328_v2  ;;  %v1245_v59 = vand.u32 2147483647, %v1171_v44  ;;  %v10493_v58 = vld [vmem:[#allocation74_spill] sm:$0xff]  ;;  %v10495_v56 = vld [vmem:[#allocation75_spill] sm:$0xff] }
 0x251   : > { %10488 = vst [vmem:[#allocation72_spill] sm:$0xff] %v7330_v47  ;;  %v7341_v42 = vmax.f32 %v1299_v14, 0.0  ;;  %v1162_v20 = vsub.f32 %v10493_v58, %v7030_v25  ;;  %v1235_v53 = vand.u32 2147483647, %v1161_v22  ;;  %v1163_v14 = vsub.f32 %v10493_v58, %v7039_v60 }
 0x252   : > { %5526 = vset.pattern.permute.xlu0 %v10232_v27  ;;  %v1166_v40 = vsub.f32 %v10495_v56, %v7030_v25  ;;  %v1318_v22 = vsub.f32 1.0, %v1244_v35  ;;  %v1319_v2 = vsub.f32 1.0, %v1245_v59  ;;  %v10503_v35 = vmov 0   ;;  %v10504_v59 = vld [vmem:[#allocation17_spill] sm:$0xff] }
 0x253   : > { %5505 = vperm.xlu2 %5342, %v5504_v63   ;;  %5515 = vperm.xlu1 %5341, %v7062_v0   ;;  %v7347_v63 = vmax.f32 %v1302_v31, 0.0  ;;  %v7357_v0 = vmax.f32 %v1312_v45, 0.0  ;;  %v10497_v31 = vld [vmem:[#allocation76_spill] sm:$0xff]  ;;  %v1236_v58 = vand.u32 2147483647, %v1162_v20 }
 0x254   : > { %3049 = vperm.xlu0 %5526, %v10489_v5   ;;  %v7351_v27 = vpop.permute.xlu0 %2308  ;;  %v1304_v5 = vsub.f32 1.0, %v1230_v7  ;;  %v1176_v9 = vsub.f32 %v10497_v31, %v7030_v25  ;;  %v1177_v44 = vsub.f32 %v10497_v31, %v7039_v60  ;;  %v1308_v7 = vsub.f32 1.0, %v1234_v24 }
 0x255   : > { %v7343_v3 = vpop.permute.xlu2 %2318  ;;  %v7345_v47 = vpop.permute.xlu1 %2283  ;;  %10492 = vst [vmem:[#allocation188_spill] sm:$0xff] %v7347_v63  ;;  %v1167_v63 = vsub.f32 %v10495_v56, %v7039_v60  ;;  %v1240_v36 = vand.u32 2147483647, %v1166_v40  ;;  %v10507_v40 = vld [vmem:[#allocation10_spill] sm:$0xff] }
 0x256   : > { %10490 = vst [vmem:[#allocation73_spill] sm:$0xff] %v7343_v3  ;;  %v7363_v3 = vmax.f32 %v1313_v18, 0.0  ;;  %v7369_v45 = vmax.f32 %v1304_v5, 0.0  ;;  %v1250_v18 = vand.u32 2147483647, %v1176_v9  ;;  %v7378_v20 = vmax.f32 %v1308_v7, 0.0 }
 0x257   : > { %10491 = vst [vmem:[#allocation9_spill] sm:$0xff] %v7345_v47  ;;  %v1305_v47 = vsub.f32 1.0, %v1231_v62  ;;  %v1309_v62 = vsub.f32 1.0, %v1235_v53  ;;  %v1251_v31 = vand.u32 2147483647, %v1177_v44  ;;  %v10505_v53 = vld [vmem:[#allocation79_spill] sm:$0xff] }
 0x258   : > { %10494 = vst [vmem:[#allocation74_spill] sm:$0xff] %v7351_v27  ;;  %v7365_v27 = vmax.f32 %v1303_v51, 0.0  ;;  %v10502_v51 = vld [vmem:[#allocation77_spill] sm:$0xff]  ;;  %v1310_v7 = vsub.f32 1.0, %v1236_v58 }
 0x259   : > { %10496 = vst [vmem:[#allocation75_spill] sm:$0xff] %v7357_v0  ;;  %v1237_v0 = vand.u32 2147483647, %v1163_v14  ;;  %v7372_v54 = vmax.f32 %v1305_v47, 0.0  ;;  %v1168_v24 = vsub.f32 %v10502_v51, %v7030_v25  ;;  %v1169_v5 = vsub.f32 %v10502_v51, %v7039_v60  ;;  %v10506_v47 = vld [vmem:[#allocation78_spill] sm:$0xff] }
 0x25a   : > { %10498 = vst [vmem:[#allocation76_spill] sm:$0xff] %v7363_v3  ;;  %v1182_v14 = vsub.f32 %v10505_v53, %v7030_v25  ;;  %v1172_v56 = vsub.f32 %v10506_v47, %v7030_v25  ;;  %v1241_v3 = vand.u32 2147483647, %v1167_v63  ;;  %v7401_v10 = vmax.f32 %v1309_v62, 0.0 }
 0x25b   : > { %10499 = vst [vmem:[#allocation189_spill] sm:$0xff] %v7365_v27  ;;  %5520 = vperm.xlu2 %5342, %v7066_v21   ;;  %5524 = vset.pattern.permute.xlu1 %v10503_v35  ;;  %v7391_v21 = vmax.f32 %v1318_v22, 0.0  ;;  %v1311_v51 = vsub.f32 1.0, %v1237_v0  ;;  %v1183_v27 = vsub.f32 %v10505_v53, %v7039_v60  ;;  %v1242_v22 = vand.u32 2147483647, %v1168_v24  ;;  %v10513_v0 = vld [vmem:[#allocation80_spill] sm:$0xff] }
 0x25c   : > { %10500 = vst [vmem:[#allocation190_spill] sm:$0xff] %v7369_v45  ;;  %3069 = vperm.xlu0 %5526, %v10504_v59   ;;  %3041 = vperm.xlu1 %5524, %v10507_v40   ;;  %v7393_v59 = vmax.f32 %v1319_v2, 0.0  ;;  %v1314_v45 = vsub.f32 1.0, %v1240_v36  ;;  %v1173_v40 = vsub.f32 %v10506_v47, %v7039_v60  ;;  %v1256_v2 = vand.u32 2147483647, %v1182_v14 }
 0x25d   : > { %10501 = vst [vmem:[#allocation191_spill] sm:$0xff] %v7372_v54  ;;  %v7387_v9 = vpop.permute.xlu2 %2333  ;;  %v7389_v44 = vpop.permute.xlu1 %2298  ;;  %v7403_v58 = vmax.f32 %v1310_v7, 0.0  ;;  %v1315_v63 = vsub.f32 1.0, %v1241_v3  ;;  %v1174_v36 = vsub.f32 %v10513_v0, %v7030_v25  ;;  %v1175_v53 = vsub.f32 %v10513_v0, %v7039_v60  ;;  %v10518_v7 = vld [vmem:[#allocation12_spill] sm:$0xff]  ;;  %v10520_v0 = vld [vmem:[#allocation11_spill] sm:$0xff] }
 0x25e   : > { %10508 = vst [vmem:[#allocation77_spill] sm:$0xff] %v7387_v9  ;;  %v7395_v54 = vpop.permute.xlu0 %2323  ;;  %v1324_v9 = vsub.f32 1.0, %v1250_v18  ;;  %v7411_v47 = vmax.f32 %v1314_v45, 0.0  ;;  %v1257_v62 = vand.u32 2147483647, %v1183_v27  ;;  %v1316_v24 = vsub.f32 1.0, %v1242_v22 }
 0x25f   : > { %10509 = vst [vmem:[#allocation17_spill] sm:$0xff] %v7389_v44  ;;  %v1325_v44 = vsub.f32 1.0, %v1251_v31  ;;  %v1247_v18 = vand.u32 2147483647, %v1173_v40  ;;  %v1330_v27 = vsub.f32 1.0, %v1256_v2 }
 0x260   : > { %10510 = vst [vmem:[#allocation79_spill] sm:$0xff] %v7391_v21  ;;  %v1243_v21 = vand.u32 2147483647, %v1169_v5  ;;  %v7414_v31 = vmax.f32 %v1324_v9, 0.0  ;;  %v10516_v5 = vld [vmem:[#allocation81_spill] sm:$0xff]  ;;  %v7427_v9 = vmax.f32 %v1315_v63, 0.0 }
 0x261   : > { %10511 = vst [vmem:[#allocation78_spill] sm:$0xff] %v7393_v59  ;;  %v1246_v59 = vand.u32 2147483647, %v1172_v56  ;;  %v1178_v3 = vsub.f32 %v10516_v5, %v7030_v25  ;;  %v1179_v14 = vsub.f32 %v10516_v5, %v7039_v60  ;;  %v10517_v56 = vld [vmem:[#allocation21_spill] sm:$0xff]  ;;  %v1248_v22 = vand.u32 2147483647, %v1174_v36 }
 0x262   : > { %10512 = vst [vmem:[#allocation10_spill] sm:$0xff] %v7395_v54  ;;  %v7409_v54 = vmax.f32 %v1311_v51, 0.0  ;;  %v7422_v51 = vmax.f32 %v1325_v44, 0.0  ;;  %v1317_v45 = vsub.f32 1.0, %v1243_v21  ;;  %v1331_v44 = vsub.f32 1.0, %v1257_v62  ;;  %v10531_v62 = vld [vmem:[#allocation82_spill] sm:$0xff] }
 0x263   : > { %10514 = vst [vmem:[#allocation80_spill] sm:$0xff] %v7411_v47  ;;  %5525 = vset.pattern.permute.xlu2 %v10503_v35  ;;  %v1320_v40 = vsub.f32 1.0, %v1246_v59  ;;  %v10523_v47 = vld [vmem:[#allocation83_spill] sm:$0xff]  ;;  %v10526_v59 = vld [vmem:[#allocation84_spill] sm:$0xff]  ;;  %v1252_v63 = vand.u32 2147483647, %v1178_v3 }
 0x264   : > { %10515 = vst [vmem:[#allocation192_spill] sm:$0xff] %v7414_v31  ;;  %3081 = vperm.xlu0 %5526, %v10517_v56   ;;  %3045 = vperm.xlu2 %5525, %v10518_v7   ;;  %v1249_v31 = vand.u32 2147483647, %v1175_v53  ;;  %v1180_v5 = vsub.f32 %v10523_v47, %v7030_v25  ;;  %v1321_v7 = vsub.f32 1.0, %v1247_v18  ;;  %v1181_v21 = vsub.f32 %v10523_v47, %v7039_v60 }
 0x265   : > { %10519 = vst [vmem:[#allocation81_spill] sm:$0xff] %v7422_v51  ;;  %3053 = vperm.xlu1 %5524, %v10520_v0   ;;  %v7425_v35 = vpop.permute.xlu2 %2348  ;;  %v7431_v30 = vpop.permute.xlu1 %2313  ;;  %v1184_v2 = vsub.f32 %v10526_v59, %v7030_v25  ;;  %v7439_v0 = vmax.f32 %v1316_v24, 0.0  ;;  %v1253_v36 = vand.u32 2147483647, %v1179_v14  ;;  %v1185_v53 = vsub.f32 %v10526_v59, %v7039_v60 }
 0x266   : > { %10521 = vst [vmem:[#allocation21_spill] sm:$0xff] %v7425_v35  ;;  %v7433_v56 = vpop.permute.xlu0 %2338  ;;  %v7443_v35 = vmax.f32 %v1317_v45, 0.0  ;;  %v1188_v18 = vsub.f32 %v10531_v62, %v7030_v25  ;;  %v1322_v47 = vsub.f32 1.0, %v1248_v22  ;;  %v1323_v51 = vsub.f32 1.0, %v1249_v31  ;;  %v10535_v31 = vld [vmem:[#allocation16_spill] sm:$0xff] }
 0x267   : > { %10522 = vst [vmem:[#allocation12_spill] sm:$0xff] %v7427_v9  ;;  %v1189_v24 = vsub.f32 %v10531_v62, %v7039_v60  ;;  %v1255_v3 = vand.u32 2147483647, %v1181_v21  ;;  %v1258_v14 = vand.u32 2147483647, %v1184_v2  ;;  %v10532_v9 = vld [vmem:[#allocation86_spill] sm:$0xff] }
 0x268   : > { %10524 = vst [vmem:[#allocation11_spill] sm:$0xff] %v7431_v30  ;;  %v7445_v30 = vmax.f32 %v1330_v27, 0.0  ;;  %v1186_v59 = vsub.f32 %v10532_v9, %v7030_v25  ;;  %v1187_v45 = vsub.f32 %v10532_v9, %v7039_v60  ;;  %v7457_v27 = vmax.f32 %v1331_v44, 0.0  ;;  %v10537_v21 = vld [vmem:[#allocation85_spill] sm:$0xff]  ;;  %v10538_v25 = vld [vmem:[#allocation15_spill] sm:$0xff] }
 0x269   : > { %10525 = vst [vmem:[#allocation83_spill] sm:$0xff] %v7433_v56  ;;  %v7447_v56 = vmax.f32 %v1320_v40, 0.0  ;;  %v1326_v40 = vsub.f32 1.0, %v1252_v63  ;;  %v7461_v22 = vmax.f32 %v1321_v7, 0.0  ;;  %v5358_v2 = vunpack.i.h.bf16 %v10537_v21 }
 0x26a   : > { %10527 = vst [vmem:[#allocation84_spill] sm:$0xff] %v7439_v0  ;;  %v1254_v0 = vand.u32 2147483647, %v1180_v5  ;;  %v7463_v5 = vand.u32 2147483647, %v1188_v18  ;;  %v5357_v62 = vunpack.i.l.bf16 %v10537_v21  ;;  %v7470_v44 = vmax.f32 %v1322_v47, 0.0 }
 0x26b   : > { %10528 = vst [vmem:[#allocation193_spill] sm:$0xff] %v7443_v35  ;;  %v1259_v35 = vand.u32 2147483647, %v1185_v53  ;;  %v7472_v63 = vmax.f32 %v1323_v51, 0.0  ;;  %v1329_v18 = vsub.f32 1.0, %v1255_v3  ;;  %v7480_v21 = vmax.f32 %v1326_v40, 0.0 }
 0x26c   : > { %10529 = vst [vmem:[#allocation194_spill] sm:$0xff] %v7445_v30  ;;  %v1327_v30 = vsub.f32 1.0, %v1253_v36  ;;  %3057 = vperm.xlu2 %5525, %v10535_v31   ;;  %v7474_v36 = vand.u32 2147483647, %v1189_v24  ;;  %v1332_v31 = vsub.f32 1.0, %v1258_v14  ;;  %v10541_v47 = vld [vmem:[#allocation87_spill] sm:$0xff]  ;;  %v7486_v51 = vmul.f32 %v5358_v2, %v7207_v34 }
 0x26d   : > { %10530 = vst [vmem:[#allocation195_spill] sm:$0xff] %v7447_v56  ;;  %v10534_v56 = vld [vmem:[#allocation26_spill] sm:$0xff]  ;;  %3061 = vperm.xlu1 %5524, %v10538_v25   ;;  %v7468_v9 = vpop.permute.xlu2 %2363  ;;  %v7476_v53 = vpop.permute.xlu1 %2328  ;;  %v5348_v60 = vunpack.i.h.bf16 %v10541_v47  ;;  %v7492_v24 = vmul.f32 %v5357_v62, %v7114_v55  ;;  %v10543_v3 = vld [vmem:[#allocation88_spill] sm:$0xff]  ;;  %v7502_v40 = vmax.f32 %v1329_v18, 0.0 }
 0x26e   : > { %10533 = vst [vmem:[#allocation82_spill] sm:$0xff] %v7457_v27  ;;  %3093 = vperm.xlu0 %5526, %v10534_v56   ;;  %v1328_v56 = vsub.f32 1.0, %v1254_v0  ;;  %v7478_v7 = vpop.permute.xlu0 %2353  ;;  %v1261_v27 = vand.u32 2147483647, %v1187_v45  ;;  %v7482_v25 = vmax.f32 %v1327_v30, 0.0  ;;  %v7489_v0 = vmul.f32 %v5358_v2, %v7209_v52 }
 0x26f   : > { %10536 = vst [vmem:[#allocation86_spill] sm:$0xff] %v7463_v5  ;;  %v1260_v5 = vand.u32 2147483647, %v1186_v59  ;;  %v5373_v14 = vunpack.i.h.bf16 %v10543_v3  ;;  %v7498_v45 = vmul.f32 %v5357_v62, %v7121_v4  ;;  %v5372_v30 = vunpack.i.l.bf16 %v10543_v3  ;;  %v10545_v4 = vld [vmem:[#allocation89_spill] sm:$0xff]  ;;  %v10547_v3 = vld [vmem:[#allocation20_spill] sm:$0xff] }
 0x270   : > { %10539 = vst [vmem:[#allocation26_spill] sm:$0xff] %v7468_v9  ;;  %v1333_v9 = vsub.f32 1.0, %v1259_v35  ;;  %v7495_v59 = vmax.f32 %v1328_v56, 0.0  ;;  %v5347_v35 = vunpack.i.l.bf16 %v10541_v47  ;;  %v7504_v34 = vmax.f32 %v1332_v31, 0.0  ;;  %v10551_v31 = vld [vmem:[#allocation19_spill] sm:$0xff] }
 0x271   : > { %10540 = vst [vmem:[#allocation16_spill] sm:$0xff] %v7474_v36  ;;  %v1334_v52 = vsub.f32 1.0, %v1260_v5  ;;  %v1335_v2 = vsub.f32 1.0, %v1261_v27  ;;  %v7509_v55 = vmul.f32 %v5348_v60, %v7110_v38  ;;  %v7512_v56 = vmul.f32 %v5348_v60, %v7112_v48 }
 0x272   : > { %10542 = vst [vmem:[#allocation85_spill] sm:$0xff] %v7489_v0  ;;  %v7506_v36 = vmax.f32 %v1333_v9, 0.0  ;;  %v5353_v62 = vunpack.i.h.bf16 %v10545_v4  ;;  %v10546_v0 = vld [vmem:[#allocation30_spill] sm:$0xff]  ;;  %v7518_v18 = vmul.f32 %v5373_v14, %v7286_v23  ;;  %v7521_v5 = vmul.f32 %v5373_v14, %v7294_v39  ;;  %v10550_v9 = vld [vmem:[#allocation91_spill] sm:$0xff] }
 0x273   : > { %10544 = vst [vmem:[#allocation15_spill] sm:$0xff] %v7498_v45  ;;  %v5352_v27 = vunpack.i.l.bf16 %v10545_v4  ;;  %v5388_v38 = vunpack.i.h.bf16 %v10550_v9  ;;  %v7529_v48 = vmul.f32 %v5372_v30, %v7259_v11  ;;  %v7532_v47 = vmul.f32 %v5372_v30, %v7275_v46  ;;  %v10554_v11 = vld [vmem:[#allocation90_spill] sm:$0xff] }
 0x274   : > { %3065 = vperm.xlu2 %5525, %v10547_v3   ;;  %10548 = vst [vmem:[#allocation87_spill] sm:$0xff] %v7518_v18  ;;  %v7535_v23 = vmul.f32 %v5347_v35, %v7146_v29  ;;  %v5387_v39 = vunpack.i.l.bf16 %v10550_v9  ;;  %v7542_v4 = vmax.f32 %v1334_v52, 0.0  ;;  %v7544_v3 = vmax.f32 %v1335_v2, 0.0  ;;  %v10557_v9 = vld [vmem:[#allocation92_spill] sm:$0xff] }
 0x275   : > { %10549 = vst [vmem:[#allocation88_spill] sm:$0xff] %v7521_v5  ;;  %3073 = vperm.xlu1 %5524, %v10551_v31   ;;  %v7526_v60 = vpop.permute.xlu2 %2378  ;;  %v7547_v31 = vmul.f32 %v5347_v35, %v7148_v50  ;;  %v5363_v5 = vunpack.i.h.bf16 %v10554_v11  ;;  %v7551_v46 = vmul.f32 %v5353_v62, %v7187_v43  ;;  %v7554_v29 = vmul.f32 %v5353_v62, %v7201_v16  ;;  %v10563_v62 = vld [vmem:[#allocation94_spill] sm:$0xff] }
 0x276   : > { %3105 = vperm.xlu0 %5526, %v10546_v0   ;;  %10552 = vst [vmem:[#allocation89_spill] sm:$0xff] %v7529_v48  ;;  %v7538_v0 = vpop.permute.xlu1 %2343  ;;  %v7540_v14 = vpop.permute.xlu0 %2368  ;;  %v5362_v30 = vunpack.i.l.bf16 %v10554_v11  ;;  %v7559_v52 = vmul.f32 %v5352_v27, %v7150_v15  ;;  %v7562_v2 = vmul.f32 %v5352_v27, %v7174_v17  ;;  %v7565_v50 = vmul.f32 %v5388_v38, %v7339_v19  ;;  %v10567_v27 = vld [vmem:[#allocation93_spill] sm:$0xff] }
 0x277   : > { %10553 = vst [vmem:[#allocation30_spill] sm:$0xff] %v7532_v47  ;;  %v5368_v47 = vunpack.i.h.bf16 %v10557_v9  ;;  %v5367_v35 = vunpack.i.l.bf16 %v10557_v9  ;;  %v7569_v43 = vmul.f32 %v5388_v38, %v7341_v42  ;;  %v7572_v16 = vmul.f32 %v5387_v39, %v7314_v6 }
 0x278   : > { %10555 = vst [vmem:[#allocation20_spill] sm:$0xff] %v7551_v46  ;;  %v5403_v11 = vunpack.i.h.bf16 %v10563_v62  ;;  %v5402_v18 = vunpack.i.l.bf16 %v10563_v62  ;;  %v7577_v15 = vmul.f32 %v5387_v39, %v7335_v28  ;;  %v7580_v17 = vmul.f32 %v5363_v5, %v7220_v26  ;;  %v10571_v39 = vld [vmem:[#allocation35_spill] sm:$0xff]  ;;  %v10572_v26 = vld [vmem:[#allocation25_spill] sm:$0xff]  ;;  %v10577_v62 = vld [vmem:[#allocation24_spill] sm:$0xff] }
 0x279   : > { %10556 = vst [vmem:[#allocation91_spill] sm:$0xff] %v7554_v29  ;;  %v7583_v19 = vmul.f32 %v5363_v5, %v7224_v57  ;;  %v5378_v9 = vunpack.i.h.bf16 %v10567_v27  ;;  %v7587_v42 = vmul.f32 %v5362_v30, %v7165_v32  ;;  %v7590_v6 = vmul.f32 %v5362_v30, %v7167_v61  ;;  %v10576_v61 = vld [vmem:[#allocation95_spill] sm:$0xff] }
 0x27a   : > { %10558 = vst [vmem:[#allocation19_spill] sm:$0xff] %v7559_v52  ;;  %v7593_v38 = vmul.f32 %v5368_v47, %v7203_v1  ;;  %v5377_v28 = vunpack.i.l.bf16 %v10567_v27  ;;  %v7599_v57 = vmul.f32 %v5368_v47, %v7205_v37  ;;  %v7602_v5 = vmul.f32 %v5367_v35, %v7236_v13 }
 0x27b   : > { %10559 = vst [vmem:[#allocation90_spill] sm:$0xff] %v7562_v2  ;;  %v7605_v32 = vmul.f32 %v5367_v35, %v7238_v49  ;;  %v5383_v30 = vunpack.i.h.bf16 %v10576_v61  ;;  %v7612_v27 = vmul.f32 %v5403_v11, %v7403_v58  ;;  %v7618_v37 = vmul.f32 %v5402_v18, %v7378_v20  ;;  %v10583_v58 = vld [vmem:[#allocation97_spill] sm:$0xff] }
 0x27c   : > { %10560 = vst [vmem:[#allocation92_spill] sm:$0xff] %v7565_v50  ;;  %3077 = vperm.xlu2 %5525, %v10572_v26   ;;  %v5382_v13 = vunpack.i.l.bf16 %v10576_v61  ;;  %v7626_v35 = vmul.f32 %v5402_v18, %v7401_v10  ;;  %v7629_v26 = vmul.f32 %v5378_v9, %v7296_v8  ;;  %v7637_v20 = vmul.f32 %v5377_v28, %v7218_v12  ;;  %v10588_v10 = vld [vmem:[#allocation66_spill] sm:$0xff] }
 0x27d   : > { %10561 = vst [vmem:[#allocation196_spill] sm:$0xff] %v7569_v43  ;;  %3085 = vperm.xlu1 %5524, %v10577_v62   ;;  %v7609_v1 = vpop.permute.xlu2 %2393  ;;  %v5418_v62 = vunpack.i.h.bf16 %v10583_v58  ;;  %v7640_v61 = vmul.f32 %v5377_v28, %v7222_v41  ;;  %v10587_v43 = vld [vmem:[#allocation96_spill] sm:$0xff]  ;;  %v7644_v18 = vmul.f32 %v5383_v30, %v10588_v10  ;;  %v10590_v50 = vld [vmem:[#allocation98_spill] sm:$0xff] }
 0x27e   : > { %10562 = vst [vmem:[#allocation197_spill] sm:$0xff] %v7572_v16  ;;  %3117 = vperm.xlu0 %5526, %v10571_v39   ;;  %v7615_v39 = vmul.f32 %v5403_v11, %v7409_v54  ;;  %v7621_v47 = vpop.permute.xlu1 %2358  ;;  %v7623_v49 = vpop.permute.xlu0 %2383  ;;  %v5417_v54 = vunpack.i.l.bf16 %v10583_v58  ;;  %v7634_v11 = vmul.f32 %v5378_v9, %v7302_v33  ;;  %v5398_v16 = vunpack.i.h.bf16 %v10590_v50  ;;  %v10593_v9 = vld [vmem:[#allocation70_spill] sm:$0xff]  ;;  %v10597_v28 = vld [vmem:[#allocation100_spill] sm:$0xff] }
 0x27f   : > { %10564 = vst [vmem:[#allocation94_spill] sm:$0xff] %v7577_v15  ;;  %v5393_v15 = vunpack.i.h.bf16 %v10587_v43  ;;  %v5397_v58 = vunpack.i.l.bf16 %v10590_v50  ;;  %v7653_v12 = vmul.f32 %v5382_v13, %v10593_v9  ;;  %v7660_v10 = vmul.f32 %v5418_v62, %v7470_v44  ;;  %v10600_v43 = vld [vmem:[#allocation195_spill] sm:$0xff]  ;;  %v10605_v9 = vld [vmem:[#allocation189_spill] sm:$0xff] }
 0x280   : > { %10565 = vst [vmem:[#allocation198_spill] sm:$0xff] %v7580_v17  ;;  %v7663_v8 = vmul.f32 %v5418_v62, %v7472_v63  ;;  %v7669_v50 = vmul.f32 %v5417_v54, %v7461_v22  ;;  %v10609_v63 = vld [vmem:[#allocation29_spill] sm:$0xff]  ;;  %v10610_v62 = vld [vmem:[#allocation71_spill] sm:$0xff] }
 0x281   : > { %10566 = vst [vmem:[#allocation199_spill] sm:$0xff] %v7583_v19 }
 0x282   : > { %10568 = vst [vmem:[#allocation93_spill] sm:$0xff] %v7587_v42 }
 0x283   : > { %10569 = vst [vmem:[#allocation200_spill] sm:$0xff] %v7590_v6 }
 0x284   : > { %10570 = vst [vmem:[#allocation201_spill] sm:$0xff] %v7593_v38  ;;  %3089 = vperm.xlu2 %5525, %v10609_v63   ;;  %v10620_v63 = vld [vmem:[#allocation101_spill] sm:$0xff] }
 0x285   : > { %10573 = vst [vmem:[#allocation35_spill] sm:$0xff] %v7599_v57 }
 0x286   : > { %10574 = vst [vmem:[#allocation25_spill] sm:$0xff] %v7602_v5 }
 0x287   : > { %10575 = vst [vmem:[#allocation202_spill] sm:$0xff] %v7605_v32 }
 0x288   : > { %10578 = vst [vmem:[#allocation95_spill] sm:$0xff] %v7612_v27 }
 0x289   : > { %10579 = vst [vmem:[#allocation24_spill] sm:$0xff] %v7615_v39 }
 0x28a   : > { %10580 = vst [vmem:[#allocation203_spill] sm:$0xff] %v7618_v37 }
 0x28b   : > { %10581 = vst [vmem:[#allocation204_spill] sm:$0xff] %v7626_v35 }
 0x28c   : > { %10582 = vst [vmem:[#allocation205_spill] sm:$0xff] %v7629_v26  ;;  %v10591_v26 = vld [vmem:[#allocation184_spill] sm:$0xff] }
 0x28d   : > { %10584 = vst [vmem:[#allocation97_spill] sm:$0xff] %v7634_v11  ;;  %v7650_v33 = vmul.f32 %v5383_v30, %v10591_v26  ;;  %v10595_v11 = vld [vmem:[#allocation187_spill] sm:$0xff]  ;;  %v10603_v30 = vld [vmem:[#allocation188_spill] sm:$0xff] }
 0x28e   : > { %10585 = vst [vmem:[#allocation206_spill] sm:$0xff] %v7637_v20  ;;  %v7656_v41 = vmul.f32 %v5382_v13, %v10595_v11  ;;  %v7672_v26 = vmul.f32 %v5393_v15, %v10603_v30  ;;  %v7675_v13 = vmul.f32 %v5393_v15, %v10605_v9  ;;  %v5432_v11 = vunpack.i.l.bf16 %v10597_v28  ;;  %v10616_v9 = vld [vmem:[#allocation28_spill] sm:$0xff] }
 0x28f   : > { %10586 = vst [vmem:[#allocation207_spill] sm:$0xff] %v7640_v61  ;;  %v5433_v61 = vunpack.i.h.bf16 %v10597_v28  ;;  %3097 = vperm.xlu1 %5524, %v10616_v9   ;;  %v7692_v28 = vpop.permute.xlu2 %2408  ;;  %v5412_v9 = vunpack.i.l.bf16 %v10620_v63  ;;  %v10628_v20 = vld [vmem:[#allocation80_spill] sm:$0xff] }
 0x290   : > { %10589 = vst [vmem:[#allocation66_spill] sm:$0xff] %v7644_v18  ;;  %v7666_v18 = vmul.f32 %v5417_v54, %v10600_v43  ;;  %v7682_v43 = vmul.f32 %v5398_v16, %v10610_v62  ;;  %v10614_v54 = vld [vmem:[#allocation190_spill] sm:$0xff]  ;;  %v5413_v62 = vunpack.i.h.bf16 %v10620_v63 }
 0x291   : > { %10592 = vst [vmem:[#allocation98_spill] sm:$0xff] %v7650_v33  ;;  %v10607_v33 = vld [vmem:[#allocation99_spill] sm:$0xff]  ;;  %v7688_v30 = vmul.f32 %v5397_v58, %v10614_v54  ;;  %v7705_v54 = vpop.permute.xlu0 %2398 }
 0x292   : > { %10594 = vst [vmem:[#allocation184_spill] sm:$0xff] %v7653_v12  ;;  %v5408_v44 = vunpack.i.h.bf16 %v10607_v33  ;;  %v10612_v12 = vld [vmem:[#allocation72_spill] sm:$0xff]  ;;  %v5407_v15 = vunpack.i.l.bf16 %v10607_v33  ;;  %v7708_v33 = vmul.f32 %v5433_v61, %v7544_v3 }
 0x293   : > { %10596 = vst [vmem:[#allocation70_spill] sm:$0xff] %v7656_v41  ;;  %v10608_v41 = vld [vmem:[#allocation39_spill] sm:$0xff]  ;;  %v7685_v22 = vmul.f32 %v5398_v16, %v10612_v12  ;;  %v10622_v16 = vld [vmem:[#allocation170_spill] sm:$0xff] }
 0x294   : > { %10598 = vst [vmem:[#allocation187_spill] sm:$0xff] %v7660_v10  ;;  %3129 = vperm.xlu0 %5526, %v10608_v41   ;;  %v7698_v41 = vmul.f32 %v5433_v61, %v7542_v4  ;;  %v10621_v10 = vld [vmem:[#allocation161_spill] sm:$0xff]  ;;  %v10625_v4 = vld [vmem:[#allocation174_spill] sm:$0xff]  ;;  %v10632_v61 = vld [vmem:[#allocation75_spill] sm:$0xff] }
 0x295   : > { %10599 = vst [vmem:[#allocation100_spill] sm:$0xff] %v7663_v8  ;;  %v10617_v8 = vld [vmem:[#allocation191_spill] sm:$0xff]  ;;  %v2411_v12 = vsub.f32 %v10622_v16, %v10621_v10  ;;  %v7728_v63 = vmul.f32 %v5407_v15, %v10632_v61  ;;  %v10642_v61 = vld [vmem:[#allocation84_spill] sm:$0xff] }
 0x296   : > { %10601 = vst [vmem:[#allocation195_spill] sm:$0xff] %v7666_v18  ;;  %v7719_v18 = vmul.f32 %v5432_v11, %v7506_v36  ;;  %v10637_v36 = vld [vmem:[#allocation79_spill] sm:$0xff] }
 0x297   : > { %10602 = vst [vmem:[#allocation208_spill] sm:$0xff] %v7669_v50  ;;  %v7695_v50 = vmul.f32 %v5397_v58, %v10617_v8  ;;  %v2417_v58 = vsub.f32 %v10625_v4, %v10621_v10  ;;  %v7763_v48 = vpop.permute.xlu2 %5445 }
 0x298   : > { %10604 = vst [vmem:[#allocation188_spill] sm:$0xff] %v7672_v26  ;;  %v10624_v26 = vld [vmem:[#allocation165_spill] sm:$0xff] }
 0x299   : > { %10606 = vst [vmem:[#allocation189_spill] sm:$0xff] %v7675_v13  ;;  %v7703_v13 = vpop.permute.xlu1 %2373  ;;  %v2412_v8 = vsub.f32 %v10622_v16, %v10624_v26 }
 0x29a   : > { %10611 = vst [vmem:[#allocation99_spill] sm:$0xff] %v7682_v43  ;;  %v2418_v43 = vsub.f32 %v10625_v4, %v10624_v26 }
 0x29b   : > { %10613 = vst [vmem:[#allocation39_spill] sm:$0xff] %v7685_v22  ;;  %v7722_v22 = vmul.f32 %v5408_v44, %v10628_v20  ;;  %v10639_v20 = vld [vmem:[#allocation78_spill] sm:$0xff] }
 0x29c   : > { %10615 = vst [vmem:[#allocation29_spill] sm:$0xff] %v7688_v30  ;;  %v2485_v30 = vand.u32 2147483647, %v2411_v12  ;;  %v10646_v12 = vld [vmem:[#allocation44_spill] sm:$0xff] }
 0x29d   : > { %10618 = vst [vmem:[#allocation71_spill] sm:$0xff] %v7695_v50  ;;  %v10630_v50 = vld [vmem:[#allocation12_spill] sm:$0xff]  ;;  %3141 = vperm.xlu0 %5526, %v10646_v12  }
 0x29e   : > { %10619 = vst [vmem:[#allocation72_spill] sm:$0xff] %v7698_v41  ;;  %v7716_v41 = vmul.f32 %v5432_v11, %v7504_v34  ;;  %v7725_v3 = vmul.f32 %v5408_v44, %v10630_v50  ;;  %v10636_v34 = vld [vmem:[#allocation175_spill] sm:$0xff]  ;;  %v7738_v11 = vmul.f32 %v5413_v62, %v10637_v36  ;;  %v10641_v50 = vld [vmem:[#allocation102_spill] sm:$0xff] }
 0x29f   : > { %10623 = vst [vmem:[#allocation190_spill] sm:$0xff] %v7708_v33  ;;  %v10634_v33 = vld [vmem:[#allocation76_spill] sm:$0xff]  ;;  %v5423_v44 = vunpack.i.h.bf16 %v10641_v50  ;;  %v2414_v4 = vsub.f32 %v10636_v34, %v10624_v26 }
 0x2a0   : > { %10626 = vst [vmem:[#allocation28_spill] sm:$0xff] %v7716_v41  ;;  %v7731_v16 = vmul.f32 %v5407_v15, %v10634_v33  ;;  %v2413_v41 = vsub.f32 %v10636_v34, %v10621_v10  ;;  %v2486_v15 = vand.u32 2147483647, %v2412_v8  ;;  %v2491_v33 = vand.u32 2147483647, %v2417_v58  ;;  %v10648_v8 = vld [vmem:[#allocation193_spill] sm:$0xff] }
 0x2a1   : > { %10627 = vst [vmem:[#allocation191_spill] sm:$0xff] %v7719_v18  ;;  %v7741_v18 = vmul.f32 %v5413_v62, %v10639_v20  ;;  %v10645_v20 = vld [vmem:[#allocation178_spill] sm:$0xff]  ;;  %v7759_v58 = vmul.f32 %v5412_v9, %v10648_v8  ;;  %v7769_v57 = vmul.f32 %v5423_v44, %v7482_v25  ;;  %v7772_v32 = vpop.permute.xlu1 %2388 }
 0x2a2   : > { %10629 = vst [vmem:[#allocation101_spill] sm:$0xff] %v7722_v22  ;;  %v10644_v22 = vld [vmem:[#allocation177_spill] sm:$0xff]  ;;  %v2560_v8 = vsub.f32 1.0, %v2486_v15  ;;  %v10660_v15 = vld [vmem:[#allocation82_spill] sm:$0xff] }
 0x2a3   : > { %10631 = vst [vmem:[#allocation161_spill] sm:$0xff] %v7725_v3  ;;  %v7745_v3 = vmul.f32 %v5412_v9, %v10642_v61  ;;  %v2423_v36 = vsub.f32 %v10644_v22, %v10621_v10  ;;  %v2424_v62 = vsub.f32 %v10644_v22, %v10624_v26  ;;  %v10647_v61 = vld [vmem:[#allocation34_spill] sm:$0xff]  ;;  %v7766_v22 = vmul.f32 %v5423_v44, %v7480_v21  ;;  %v7774_v9 = vpop.permute.xlu0 %5435  ;;  %v10656_v44 = vld [vmem:[#allocation81_spill] sm:$0xff] }
 0x2a4   : > { %10633 = vst [vmem:[#allocation170_spill] sm:$0xff] %v7728_v63  ;;  %3101 = vperm.xlu2 %5525, %v10647_v61   ;;  %v10651_v63 = vld [vmem:[#allocation33_spill] sm:$0xff]  ;;  %v2559_v61 = vsub.f32 1.0, %v2485_v30  ;;  %v10658_v30 = vld [vmem:[#allocation194_spill] sm:$0xff] }
 0x2a5   : > { %10635 = vst [vmem:[#allocation165_spill] sm:$0xff] %v7731_v16  ;;  %v5422_v16 = vunpack.i.l.bf16 %v10641_v50  ;;  %v2487_v50 = vand.u32 2147483647, %v2413_v41  ;;  %3109 = vperm.xlu1 %5524, %v10651_v63   ;;  %v2488_v41 = vand.u32 2147483647, %v2414_v4  ;;  %v2420_v63 = vsub.f32 %v10645_v20, %v10624_v26 }
 0x2a6   : > { %10638 = vst [vmem:[#allocation174_spill] sm:$0xff] %v7738_v11  ;;  %v10650_v11 = vld [vmem:[#allocation104_spill] sm:$0xff]  ;;  %v2497_v21 = vand.u32 2147483647, %v2423_v36  ;;  %v10664_v36 = vld [vmem:[#allocation10_spill] sm:$0xff] }
 0x2a7   : > { %10640 = vst [vmem:[#allocation80_spill] sm:$0xff] %v7741_v18  ;;  %v2419_v18 = vsub.f32 %v10645_v20, %v10621_v10  ;;  %v5428_v34 = vunpack.i.h.bf16 %v10650_v11  ;;  %v2561_v39 = vsub.f32 1.0, %v2487_v50  ;;  %v10662_v4 = vunpack.i.l.bf16 %v10650_v11 }
 0x2a8   : > { %10643 = vst [vmem:[#allocation12_spill] sm:$0xff] %v7745_v3  ;;  %v2492_v3 = vand.u32 2147483647, %v2418_v43  ;;  %v2565_v43 = vsub.f32 1.0, %v2491_v33  ;;  %v2494_v50 = vand.u32 2147483647, %v2420_v63 }
 0x2a9   : > { %10649 = vst [vmem:[#allocation75_spill] sm:$0xff] %v7759_v58  ;;  %v10654_v58 = vld [vmem:[#allocation192_spill] sm:$0xff]  ;;  %v2493_v25 = vand.u32 2147483647, %v2419_v18  ;;  %v7785_v12 = vmul.f32 %v5428_v34, %v10658_v30  ;;  %v7788_v33 = vmul.f32 %v5428_v34, %v10660_v15  ;;  %v7793_v20 = vmul.f32 %v10662_v4, %v7495_v59  ;;  %v10667_v59 = vld [vmem:[#allocation38_spill] sm:$0xff] }
 0x2aa   : > { %10652 = vst [vmem:[#allocation76_spill] sm:$0xff] %v7766_v22  ;;  %v7779_v38 = vmul.f32 %v5422_v16, %v10654_v58  ;;  %v2498_v22 = vand.u32 2147483647, %v2424_v62  ;;  %v2566_v5 = vsub.f32 1.0, %v2492_v3  ;;  %v2449_v62 = vsub.f32 %v10664_v36, %v10621_v10 }
 0x2ab   : > { %10653 = vst [vmem:[#allocation175_spill] sm:$0xff] %v7769_v57  ;;  %v7782_v57 = vmul.f32 %v5422_v16, %v10656_v44  ;;  %v2450_v18 = vsub.f32 %v10664_v36, %v10624_v26  ;;  %v7799_v16 = vmax.f32 %v2559_v61, 0.0  ;;  %v7801_v58 = vmax.f32 %v2560_v8, 0.0  ;;  %v10669_v61 = vld [vmem:[#allocation21_spill] sm:$0xff] }
 0x2ac   : > { %10655 = vst [vmem:[#allocation79_spill] sm:$0xff] %v7779_v38  ;;  %v2562_v3 = vsub.f32 1.0, %v2488_v41  ;;  %v7803_v44 = vmax.f32 %v2565_v43, 0.0  ;;  %v2571_v34 = vsub.f32 1.0, %v2497_v21  ;;  %v2572_v30 = vsub.f32 1.0, %v2498_v22  ;;  %3113 = vperm.xlu2 %5525, %v10667_v59   ;;  %v10670_v41 = vld [vmem:[#allocation37_spill] sm:$0xff]  ;;  %v7816_v43 = vpop.permute.xlu2 %5460 }
 0x2ad   : > { %10657 = vst [vmem:[#allocation78_spill] sm:$0xff] %v7782_v57  ;;  %v2567_v15 = vsub.f32 1.0, %v2493_v25  ;;  %v7807_v4 = vmax.f32 %v2566_v5, 0.0  ;;  %v2459_v36 = vsub.f32 %v10669_v61, %v10621_v10  ;;  %v2460_v8 = vsub.f32 %v10669_v61, %v10624_v26  ;;  %3121 = vperm.xlu1 %5524, %v10670_v41   ;;  %v10671_v21 = vld [vmem:[#allocation83_spill] sm:$0xff] }
 0x2ae   : > { %10659 = vst [vmem:[#allocation102_spill] sm:$0xff] %v7785_v12  ;;  %v7809_v12 = vmax.f32 %v2561_v39, 0.0  ;;  %v2523_v22 = vand.u32 2147483647, %v2449_v62  ;;  %v2524_v63 = vand.u32 2147483647, %v2450_v18  ;;  %v2455_v25 = vsub.f32 %v10671_v21, %v10621_v10  ;;  %v7822_v39 = vpop.permute.xlu1 %2403 }
 0x2af   : > { %10661 = vst [vmem:[#allocation84_spill] sm:$0xff] %v7788_v33  ;;  %v10666_v33 = vld [vmem:[#allocation48_spill] sm:$0xff]  ;;  %v2456_v5 = vsub.f32 %v10671_v21, %v10624_v26  ;;  %v7826_v59 = vmax.f32 %v2562_v3, 0.0  ;;  %v2461_v61 = vsub.f32 %v7478_v7, %v10621_v10  ;;  %v2462_v62 = vsub.f32 %v7478_v7, %v10624_v26 }
 0x2b0   : > { %10663 = vst [vmem:[#allocation177_spill] sm:$0xff] %v7793_v20  ;;  %3153 = vperm.xlu0 %5526, %v10666_v33   ;;  %v7824_v33 = vpop.permute.xlu0 %5450  ;;  %v2568_v20 = vsub.f32 1.0, %v2494_v50  ;;  %v7832_v18 = vmax.f32 %v2571_v34, 0.0  ;;  %v7834_v41 = vmax.f32 %v2572_v30, 0.0  ;;  %v7836_v57 = vmax.f32 %v2567_v15, 0.0  ;;  %v10673_v21 = vld [vmem:[#allocation180_spill] sm:$0xff] }
 0x2b1   : > { %10665 = vst [vmem:[#allocation178_spill] sm:$0xff] %v7803_v44  ;;  %v2533_v35 = vand.u32 2147483647, %v2459_v36  ;;  %v2534_v27 = vand.u32 2147483647, %v2460_v8  ;;  %v2457_v3 = vsub.f32 %v7538_v0, %v10621_v10  ;;  %v2458_v50 = vsub.f32 %v7538_v0, %v10624_v26  ;;  %v10674_v30 = vld [vmem:[#allocation26_spill] sm:$0xff] }
 0x2b2   : > { %10668 = vst [vmem:[#allocation44_spill] sm:$0xff] %v7807_v4  ;;  %v2597_v37 = vsub.f32 1.0, %v2523_v22  ;;  %v2598_v29 = vsub.f32 1.0, %v2524_v63  ;;  %v2529_v7 = vand.u32 2147483647, %v2455_v25  ;;  %v2465_v2 = vsub.f32 %v10674_v30, %v10621_v10  ;;  %v10675_v63 = vld [vmem:[#allocation53_spill] sm:$0xff] }
 0x2b3   : > { %10672 = vst [vmem:[#allocation34_spill] sm:$0xff] %v7834_v41  ;;  %v2530_v34 = vand.u32 2147483647, %v2456_v5  ;;  %v2466_v15 = vsub.f32 %v10674_v30, %v10624_v26  ;;  %v2535_v46 = vand.u32 2147483647, %v2461_v61  ;;  %v7848_v36 = vmax.f32 %v2568_v20, 0.0 }
 0x2b4   : > { %v2536_v38 = vand.u32 2147483647, %v2462_v62  ;;  %v2471_v8 = vsub.f32 %v7526_v60, %v10621_v10  ;;  %v2467_v0 = vsub.f32 %v7540_v14, %v10621_v10  ;;  %v2468_v22 = vsub.f32 %v7540_v14, %v10624_v26  ;;  %v10676_v25 = vld [vmem:[#allocation43_spill] sm:$0xff]  ;;  %v10677_v62 = vld [vmem:[#allocation42_spill] sm:$0xff]  ;;  %v7859_v20 = vpop.permute.xlu2 %5475 }
 0x2b5   : > { %3125 = vperm.xlu2 %5525, %v10676_v25   ;;  %v2607_v5 = vsub.f32 1.0, %v2533_v35  ;;  %v2608_v52 = vsub.f32 1.0, %v2534_v27  ;;  %v2531_v30 = vand.u32 2147483647, %v2457_v3  ;;  %v2532_v61 = vand.u32 2147483647, %v2458_v50  ;;  %3133 = vperm.xlu1 %5524, %v10677_v62  }
 0x2b6   : > { %10678 = vst [vmem:[#allocation193_spill] sm:$0xff] %v7859_v20  ;;  %v2671_v4 = vmax.f32 %v2597_v37, 0.0  ;;  %v2672_v6 = vmax.f32 %v2598_v29, 0.0  ;;  %v2603_v44 = vsub.f32 1.0, %v2529_v7  ;;  %v2604_v19 = vsub.f32 1.0, %v2530_v34  ;;  %v7861_v42 = vpop.permute.xlu1 %5440 }
 0x2b7   : > { %10679 = vst [vmem:[#allocation104_spill] sm:$0xff] %v7861_v42  ;;  %v7865_v14 = vand.u32 2147483647, %v2465_v2  ;;  %v2609_v35 = vsub.f32 1.0, %v2535_v46  ;;  %v2610_v27 = vsub.f32 1.0, %v2536_v38  ;;  %v2472_v3 = vsub.f32 %v7526_v60, %v10624_v26 }
 0x2b8   : > { %3165 = vperm.xlu0 %5526, %v10675_v63   ;;  %v7863_v17 = vpop.permute.xlu0 %5465  ;;  %v7867_v63 = vand.u32 2147483647, %v2466_v15  ;;  %v7871_v50 = vand.u32 2147483647, %v2471_v8  ;;  %v2541_v25 = vand.u32 2147483647, %v2467_v0  ;;  %v2469_v15 = vsub.f32 %v7703_v13, %v10621_v10 }
 0x2b9   : > { %10680 = vst [vmem:[#allocation33_spill] sm:$0xff] %v7863_v17  ;;  %v2542_v37 = vand.u32 2147483647, %v2468_v22  ;;  %v7873_v29 = vmax.f32 %v2607_v5, 0.0  ;;  %v7875_v7 = vmax.f32 %v2608_v52, 0.0  ;;  %v2605_v34 = vsub.f32 1.0, %v2531_v30 }
 0x2ba   : > { %v2606_v62 = vsub.f32 1.0, %v2532_v61  ;;  %v2677_v17 = vmax.f32 %v2603_v44, 0.0  ;;  %v2678_v2 = vmax.f32 %v2604_v19, 0.0  ;;  %v2470_v46 = vsub.f32 %v7703_v13, %v10624_v26  ;;  %v10681_v5 = vld [vmem:[#allocation56_spill] sm:$0xff]  ;;  %v10682_v30 = vld [vmem:[#allocation47_spill] sm:$0xff] }
 0x2bb   : > { %v7883_v8 = vmax.f32 %v2609_v35, 0.0  ;;  %v7885_v0 = vmax.f32 %v2610_v27, 0.0  ;;  %v7887_v52 = vand.u32 2147483647, %v2472_v3  ;;  %v2615_v44 = vsub.f32 1.0, %v2541_v25  ;;  %v10683_v27 = vld [vmem:[#allocation46_spill] sm:$0xff] }
 0x2bc   : > { %v2616_v19 = vsub.f32 1.0, %v2542_v37  ;;  %v2679_v61 = vmax.f32 %v2605_v34, 0.0  ;;  %v2680_v13 = vmax.f32 %v2606_v62, 0.0  ;;  %v2463_v60 = vsub.f32 %v7621_v47, %v10621_v10  ;;  %v5491_v3 = vpop.permute.xlu2 %5490 }
 0x2bd   : > { %3137 = vperm.xlu2 %5525, %v10682_v30   ;;  %v2464_v35 = vsub.f32 %v7621_v47, %v10624_v26  ;;  %3145 = vperm.xlu1 %5524, %v10683_v27   ;;  %v2543_v38 = vand.u32 2147483647, %v2469_v15  ;;  %v2544_v20 = vand.u32 2147483647, %v2470_v46  ;;  %v5493_v22 = vunpack.i.h.bf16 %v5491_v3 }
 0x2be   : > { %v5492_v25 = vunpack.i.l.bf16 %v5491_v3  ;;  %v7897_v37 = vpop.permute.xlu1 %5455  ;;  %v2473_v34 = vsub.f32 %v7623_v49, %v10621_v10  ;;  %v2474_v62 = vsub.f32 %v7623_v49, %v10624_v26  ;;  %v2479_v47 = vsub.f32 %v7705_v54, %v10621_v10 }
 0x2bf   : > { %10684 = vst [vmem:[#allocation192_spill] sm:$0xff] %v7897_v37  ;;  %v7908_v27 = vmul.f32 %v5493_v22, %v2679_v61  ;;  %v7910_v15 = vmul.f32 %v5493_v22, %v2680_v13  ;;  %v2620_v37 = vsub.f32 1.0, %v7887_v52  ;;  %v2480_v42 = vsub.f32 %v7705_v54, %v10624_v26 }
 0x2c0   : > { %3177 = vperm.xlu0 %5526, %v10681_v5   ;;  %v7899_v5 = vpop.permute.xlu0 %5480  ;;  %v7912_v46 = vmul.f32 %v5492_v25, %v2677_v17  ;;  %v7914_v3 = vmul.f32 %v5492_v25, %v2678_v2  ;;  %v2481_v49 = vsub.f32 %v7822_v39, %v10621_v10  ;;  %v2482_v41 = vsub.f32 %v7822_v39, %v10624_v26  ;;  %v10693_v39 = vld [vmem:[#allocation52_spill] sm:$0xff] }
 0x2c1   : > { %10685 = vst [vmem:[#allocation81_spill] sm:$0xff] %v7899_v5  ;;  %v5483_v30 = vunpack.i.h.bf16 %v7899_v5  ;;  %v2617_v5 = vsub.f32 1.0, %v2543_v38  ;;  %v2618_v61 = vsub.f32 1.0, %v2544_v20  ;;  %v2689_v17 = vmax.f32 %v2615_v44, 0.0 }
 0x2c2   : > { %10686 = vst [vmem:[#allocation194_spill] sm:$0xff] %v7908_v27  ;;  %v2690_v2 = vmax.f32 %v2616_v19, 0.0  ;;  %v7927_v13 = vand.u32 2147483647, %v2463_v60  ;;  %v7929_v52 = vand.u32 2147483647, %v2464_v35 }
 0x2c3   : > { %10687 = vst [vmem:[#allocation82_spill] sm:$0xff] %v7910_v15  ;;  %v7923_v27 = vmul.f32 %v5483_v30, %v2671_v4  ;;  %v7925_v22 = vmul.f32 %v5483_v30, %v2672_v6  ;;  %v2547_v25 = vand.u32 2147483647, %v2473_v34  ;;  %v2548_v15 = vand.u32 2147483647, %v2474_v62  ;;  %v10694_v4 = vld [vmem:[#allocation181_spill] sm:$0xff] }
 0x2c4   : > { %10688 = vst [vmem:[#allocation10_spill] sm:$0xff] %v7912_v46  ;;  %v10692_v46 = vld [vmem:[#allocation13_spill] sm:$0xff]  ;;  %v2554_v20 = vand.u32 2147483647, %v2480_v42  ;;  %v2555_v38 = vand.u32 2147483647, %v2481_v49  ;;  %v5506_v19 = vpop.permute.xlu2 %5505 }
 0x2c5   : > { %10689 = vst [vmem:[#allocation48_spill] sm:$0xff] %v7914_v3  ;;  %v2553_v3 = vand.u32 2147483647, %v2479_v47  ;;  %3149 = vperm.xlu2 %5525, %v10693_v39   ;;  %v2556_v44 = vand.u32 2147483647, %v2482_v41  ;;  %v10695_v60 = vld [vmem:[#allocation51_spill] sm:$0xff]  ;;  %v5507_v54 = vunpack.i.l.bf16 %v5506_v19  ;;  %v2483_v47 = vsub.f32 %v7692_v28, %v10621_v10 }
 0x2c6   : > { %10690 = vst [vmem:[#allocation38_spill] sm:$0xff] %v7923_v27  ;;  %3157 = vperm.xlu1 %5524, %v10695_v60   ;;  %v2691_v35 = vmax.f32 %v2617_v5, 0.0  ;;  %v2692_v30 = vmax.f32 %v2618_v61, 0.0  ;;  %v7938_v34 = vpop.permute.xlu1 %5470  ;;  %v2629_v6 = vsub.f32 1.0, %v2555_v38  ;;  %v2477_v38 = vsub.f32 %v7609_v1, %v10621_v10 }
 0x2c7   : > { %10691 = vst [vmem:[#allocation21_spill] sm:$0xff] %v7925_v22  ;;  %v5508_v22 = vunpack.i.h.bf16 %v5506_v19  ;;  %v7948_v60 = vmul.f32 %v5507_v54, %v2689_v17  ;;  %v7950_v5 = vmul.f32 %v5507_v54, %v2690_v2  ;;  %v2627_v61 = vsub.f32 1.0, %v2553_v3 }
 0x2c8   : > { %5528 = vperm.xlu0 %5526, %v10692_v46   ;;  %10696 = vst [vmem:[#allocation37_spill] sm:$0xff] %v7938_v34  ;;  %v5496_v62 = vpop.permute.xlu0 %5495  ;;  %v2484_v46 = vsub.f32 %v7692_v28, %v10624_v26  ;;  %v2628_v19 = vsub.f32 1.0, %v2554_v20  ;;  %v2630_v27 = vsub.f32 1.0, %v2556_v44  ;;  %v10705_v17 = vsub.f32 1.0, %v7871_v50  ;;  %v10706_v44 = vld [vmem:[#allocation18_spill] sm:$0xff] }
 0x2c9   : > { %v5498_v39 = vunpack.i.h.bf16 %v5496_v62  ;;  %v5497_v42 = vunpack.i.l.bf16 %v5496_v62  ;;  %v7944_v49 = vmul.f32 %v5508_v22, %v2691_v35  ;;  %v7946_v41 = vmul.f32 %v5508_v22, %v2692_v30  ;;  %10699 = vst [vmem:[#allocation26_spill] sm:$0xff] %v7948_v60 }
 0x2ca   : > { %10700 = vst [vmem:[#allocation53_spill] sm:$0xff] %v7950_v5  ;;  %v2693_v2 = vmax.f32 %v10705_v17, 0.0  ;;  %v2694_v54 = vmax.f32 %v2620_v37, 0.0  ;;  %v2621_v3 = vsub.f32 1.0, %v2547_v25  ;;  %v2622_v20 = vsub.f32 1.0, %v2548_v15  ;;  %v10708_v25 = vld [vmem:[#allocation55_spill] sm:$0xff] }
 0x2cb   : > { %10697 = vst [vmem:[#allocation83_spill] sm:$0xff] %v7944_v49  ;;  %v7953_v34 = vmul.f32 %v5498_v39, %v7883_v8  ;;  %v7956_v45 = vmul.f32 %v5498_v39, %v7885_v0  ;;  %v7959_v28 = vmul.f32 %v5497_v42, %v7873_v29  ;;  %v7962_v22 = vmul.f32 %v5497_v42, %v7875_v7  ;;  %v10707_v7 = vld [vmem:[#allocation57_spill] sm:$0xff] }
 0x2cc   : > { %10698 = vst [vmem:[#allocation180_spill] sm:$0xff] %v7946_v41  ;;  %v2478_v8 = vsub.f32 %v7609_v1, %v10624_v26  ;;  %v2611_v0 = vsub.f32 1.0, %v7927_v13  ;;  %v2612_v29 = vsub.f32 1.0, %v7929_v52  ;;  %v2557_v35 = vand.u32 2147483647, %v2483_v47  ;;  %v5521_v15 = vpop.permute.xlu2 %5520 }
 0x2cd   : > { %10701 = vst [vmem:[#allocation43_spill] sm:$0xff] %v7953_v34  ;;  %3161 = vperm.xlu2 %5525, %v10707_v7   ;;  %v2558_v50 = vand.u32 2147483647, %v2484_v46  ;;  %v2701_v30 = vmax.f32 %v2627_v61, 0.0  ;;  %v2702_v37 = vmax.f32 %v2628_v19, 0.0  ;;  %v2703_v62 = vmax.f32 %v2629_v6, 0.0 }
 0x2ce   : > { %10702 = vst [vmem:[#allocation42_spill] sm:$0xff] %v7956_v45  ;;  %3169 = vperm.xlu1 %5524, %v10708_v25   ;;  %v2704_v39 = vmax.f32 %v2630_v27, 0.0  ;;  %v7975_v42 = vpop.permute.xlu1 %5485  ;;  %v5523_v1 = vunpack.i.h.bf16 %v5521_v15  ;;  %v5522_v17 = vunpack.i.l.bf16 %v5521_v15  ;;  %v2695_v41 = vmax.f32 %v2621_v3, 0.0 }
 0x2cf   : > { %10703 = vst [vmem:[#allocation56_spill] sm:$0xff] %v7959_v28  ;;  %v2696_v52 = vmax.f32 %v2622_v20, 0.0  ;;  %v2631_v19 = vsub.f32 1.0, %v2557_v35  ;;  %v2632_v6 = vsub.f32 1.0, %v2558_v50  ;;  %v2475_v27 = vsub.f32 %v7772_v32, %v10621_v10  ;;  %v10719_v50 = vld [vmem:[#allocation182_spill] sm:$0xff] }
 0x2d0   : > { %10704 = vst [vmem:[#allocation47_spill] sm:$0xff] %v7962_v22  ;;  %5543 = vperm.xlu0 %5526, %v10706_v44   ;;  %v5511_v13 = vpop.permute.xlu0 %5510  ;;  %v7977_v49 = vmul.f32 %v5523_v1, %v2703_v62  ;;  %v7979_v47 = vmul.f32 %v5523_v1, %v2704_v39  ;;  %v7981_v46 = vmul.f32 %v5522_v17, %v2701_v30  ;;  %v10722_v39 = vsub.f32 1.0, %v7865_v14 }
 0x2d1   : > { %10709 = vst [vmem:[#allocation46_spill] sm:$0xff] %v7975_v42  ;;  %v5513_v5 = vunpack.i.h.bf16 %v5511_v13  ;;  %v5512_v44 = vunpack.i.l.bf16 %v5511_v13  ;;  %v7983_v61 = vmul.f32 %v5522_v17, %v2702_v37  ;;  %v2476_v7 = vsub.f32 %v7772_v32, %v10624_v26 }
 0x2d2   : > { %10710 = vst [vmem:[#allocation13_spill] sm:$0xff] %v7977_v49  ;;  %v10718_v30 = vsub.f32 %v10673_v21, %v10621_v10  ;;  %v2416_v35 = vsub.f32 %v10694_v4, %v10624_v26  ;;  %v2425_v62 = vsub.f32 %v10719_v50, %v10621_v10  ;;  %v2426_v32 = vsub.f32 %v10719_v50, %v10624_v26 }
 0x2d3   : > { %10711 = vst [vmem:[#allocation52_spill] sm:$0xff] %v7979_v47  ;;  %v7989_v3 = vmul.f32 %v5513_v5, %v2695_v41  ;;  %v7991_v20 = vmul.f32 %v5513_v5, %v2696_v52  ;;  %v7993_v25 = vmul.f32 %v5512_v44, %v2693_v2  ;;  %v7995_v15 = vmul.f32 %v5512_v44, %v2694_v54  ;;  %v10724_v52 = vld [vmem:[#allocation27_spill] sm:$0xff]  ;;  %v10725_v44 = vld [vmem:[#allocation61_spill] sm:$0xff] }
 0x2d4   : > { %10712 = vst [vmem:[#allocation181_spill] sm:$0xff] %v7981_v46  ;;  %v8000_v37 = vand.u32 2147483647, %v10718_v30  ;;  %v10720_v41 = vsub.f32 %v10673_v21, %v10624_v26  ;;  %v10721_v2 = vsub.f32 %v10694_v4, %v10621_v10  ;;  %v2687_v1 = vmax.f32 %v10722_v39, 0.0 }
 0x2d5   : > { %10713 = vst [vmem:[#allocation51_spill] sm:$0xff] %v7983_v61  ;;  %v10723_v17 = vsub.f32 1.0, %v7867_v63  ;;  %3173 = vperm.xlu2 %5525, %v10725_v44   ;;  %v2551_v30 = vand.u32 2147483647, %v2477_v38  ;;  %v2552_v50 = vand.u32 2147483647, %v2478_v8 }
 0x2d6   : > { %10714 = vst [vmem:[#allocation18_spill] sm:$0xff] %v7989_v3  ;;  %v8011_v5 = vand.u32 2147483647, %v10720_v41  ;;  %v8016_v54 = vand.u32 2147483647, %v10721_v2  ;;  %v2705_v21 = vmax.f32 %v2631_v19, 0.0  ;;  %v5501_v49 = vpop.permute.xlu1 %5500 }
 0x2d7   : > { %10715 = vst [vmem:[#allocation57_spill] sm:$0xff] %v7991_v20  ;;  %v2688_v13 = vmax.f32 %v10723_v17, 0.0  ;;  %v2706_v41 = vmax.f32 %v2632_v6, 0.0  ;;  %v10726_v61 = vld [vmem:[#allocation60_spill] sm:$0xff]  ;;  %v2685_v46 = vmax.f32 %v2611_v0, 0.0  ;;  %v2686_v4 = vmax.f32 %v2612_v29, 0.0 }
 0x2d8   : > { %10716 = vst [vmem:[#allocation55_spill] sm:$0xff] %v7993_v25  ;;  %5558 = vperm.xlu0 %5526, %v10724_v52   ;;  %3181 = vperm.xlu1 %5524, %v10726_v61   ;;  %v2549_v2 = vand.u32 2147483647, %v2475_v27  ;;  %v2550_v47 = vand.u32 2147483647, %v2476_v7  ;;  %v2890_v14 = vpop.permute.xlu0 %2889  ;;  %v5503_v39 = vunpack.i.h.bf16 %v5501_v49  ;;  %v5502_v20 = vunpack.i.l.bf16 %v5501_v49  ;;  %v8029_v52 = vpop.permute.xlu2 %3045  ;;  %v10729_v61 = vld [vmem:[#allocation65_spill] sm:$0xff] }
 0x2d9   : > { %10717 = vst [vmem:[#allocation209_spill] sm:$0xff] %v7995_v15  ;;  %v8025_v63 = vmul.f32 %v2890_v14, %v2705_v21  ;;  %v8027_v17 = vmul.f32 %v2890_v14, %v2706_v41  ;;  %v8031_v38 = vand.u32 2147483647, %v2416_v35  ;;  %v8033_v8 = vand.u32 2147483647, %v2425_v62  ;;  %v10734_v7 = vld [vmem:[#allocation67_spill] sm:$0xff] }
 0x2da   : > { %v2435_v0 = vsub.f32 %v10729_v61, %v10621_v10  ;;  %v2436_v29 = vsub.f32 %v10729_v61, %v10624_v26  ;;  %v8039_v19 = vmul.f32 %v5503_v39, %v2687_v1  ;;  %v8041_v6 = vmul.f32 %v5503_v39, %v2688_v13 }
 0x2db   : > { %10727 = vst [vmem:[#allocation182_spill] sm:$0xff] %v8025_v63  ;;  %v8043_v49 = vmul.f32 %v5502_v20, %v2685_v46  ;;  %v8045_v27 = vmul.f32 %v5502_v20, %v2686_v4  ;;  %v2421_v35 = vsub.f32 %v10734_v7, %v10621_v10  ;;  %v2422_v62 = vsub.f32 %v10734_v7, %v10624_v26  ;;  %v10735_v4 = vld [vmem:[#allocation183_spill] sm:$0xff]  ;;  %v10737_v63 = vld [vmem:[#allocation62_spill] sm:$0xff] }
 0x2dc   : > { %10728 = vst [vmem:[#allocation27_spill] sm:$0xff] %v8027_v17  ;;  %v2625_v44 = vsub.f32 1.0, %v2551_v30  ;;  %v2626_v21 = vsub.f32 1.0, %v2552_v50  ;;  %v2577_v41 = vsub.f32 1.0, %v8000_v37  ;;  %v2578_v14 = vsub.f32 1.0, %v8011_v5  ;;  %v10736_v17 = vld [vmem:[#allocation36_spill] sm:$0xff] }
 0x2dd   : > { %10730 = vst [vmem:[#allocation61_spill] sm:$0xff] %v8039_v19  ;;  %v2623_v1 = vsub.f32 1.0, %v2549_v2  ;;  %v2624_v61 = vsub.f32 1.0, %v2550_v47  ;;  %v2563_v13 = vsub.f32 1.0, %v8016_v54  ;;  %v2564_v46 = vsub.f32 1.0, %v8031_v38  ;;  %3185 = vperm.xlu2 %5525, %v10737_v63   ;;  %v10738_v47 = vld [vmem:[#allocation14_spill] sm:$0xff] }
 0x2de   : > { %10731 = vst [vmem:[#allocation60_spill] sm:$0xff] %v8041_v6  ;;  %v2500_v20 = vand.u32 2147483647, %v2426_v32  ;;  %v2431_v39 = vsub.f32 %v10735_v4, %v10621_v10  ;;  %v2573_v30 = vsub.f32 1.0, %v8033_v8  ;;  %v2509_v50 = vand.u32 2147483647, %v2435_v0  ;;  %v5516_v7 = vpop.permute.xlu1 %5515 }
 0x2df   : > { %10732 = vst [vmem:[#allocation65_spill] sm:$0xff] %v8043_v49  ;;  %v2510_v37 = vand.u32 2147483647, %v2436_v29  ;;  %v2432_v5 = vsub.f32 %v10735_v4, %v10624_v26  ;;  %v2495_v54 = vand.u32 2147483647, %v2421_v35  ;;  %v2699_v38 = vmax.f32 %v2625_v44, 0.0 }
 0x2e0   : > { %10733 = vst [vmem:[#allocation210_spill] sm:$0xff] %v8045_v27  ;;  %5573 = vperm.xlu0 %5526, %v10736_v17   ;;  %5533 = vperm.xlu1 %5524, %v10738_v47   ;;  %v2496_v2 = vand.u32 2147483647, %v2422_v62  ;;  %v2700_v32 = vmax.f32 %v2626_v21, 0.0  ;;  %v8063_v15 = vpop.permute.xlu0 %3049  ;;  %v2697_v6 = vmax.f32 %v2623_v1, 0.0  ;;  %v2698_v17 = vmax.f32 %v2624_v61, 0.0  ;;  %v8065_v27 = vpop.permute.xlu2 %3057 }
 0x2e1   : > { %10739 = vst [vmem:[#allocation67_spill] sm:$0xff] %v8063_v15  ;;  %v5518_v3 = vunpack.i.h.bf16 %v5516_v7  ;;  %v5517_v63 = vunpack.i.l.bf16 %v5516_v7  ;;  %v2505_v8 = vand.u32 2147483647, %v2431_v39  ;;  %v10741_v0 = vld [vmem:[#allocation68_spill] sm:$0xff]  ;;  %v10742_v35 = vld [vmem:[#allocation69_spill] sm:$0xff]  ;;  %v8081_v47 = vmax.f32 %v2577_v41, 0.0 }
 0x2e2   : > { %10740 = vst [vmem:[#allocation183_spill] sm:$0xff] %v8065_v27  ;;  %v2441_v29 = vsub.f32 %v10741_v0, %v10621_v10  ;;  %v2442_v4 = vsub.f32 %v10741_v0, %v10624_v26  ;;  %v2427_v62 = vsub.f32 %v10742_v35, %v10621_v10  ;;  %v8083_v39 = vmax.f32 %v2578_v14, 0.0  ;;  %v10749_v41 = vld [vmem:[#allocation45_spill] sm:$0xff]  ;;  %v10750_v14 = vld [vmem:[#allocation8_spill] sm:$0xff]  ;;  %v10762_v49 = vld [vmem:[#allocation23_spill] sm:$0xff] }
 0x2e3   : > { %v8073_v44 = vmul.f32 %v5518_v3, %v2699_v38  ;;  %v8075_v21 = vmul.f32 %v5518_v3, %v2700_v32  ;;  %v8077_v1 = vmul.f32 %v5517_v63, %v2697_v6  ;;  %v8079_v61 = vmul.f32 %v5517_v63, %v2698_v17  ;;  %v10748_v38 = vld [vmem:[#allocation186_spill] sm:$0xff] }
 0x2e4   : > { %10747 = vst [vmem:[#allocation69_spill] sm:$0xff] %v8083_v39  ;;  %v2506_v7 = vand.u32 2147483647, %v2432_v5  ;;  %v2428_v25 = vsub.f32 %v10742_v35, %v10624_v26  ;;  %v2574_v0 = vsub.f32 1.0, %v2500_v20  ;;  %v2583_v19 = vsub.f32 1.0, %v2509_v50  ;;  %v10753_v35 = vld [vmem:[#allocation22_spill] sm:$0xff] }
 0x2e5   : > { %10743 = vst [vmem:[#allocation36_spill] sm:$0xff] %v8073_v44  ;;  %v2584_v60 = vsub.f32 1.0, %v2510_v37  ;;  %v2437_v44 = vsub.f32 %v10748_v38, %v10621_v10  ;;  %v2569_v3 = vsub.f32 1.0, %v2495_v54  ;;  %v2570_v32 = vsub.f32 1.0, %v2496_v2  ;;  %5538 = vperm.xlu2 %5525, %v10750_v14  }
 0x2e6   : > { %10744 = vst [vmem:[#allocation62_spill] sm:$0xff] %v8075_v21  ;;  %v2579_v6 = vsub.f32 1.0, %v2505_v8  ;;  %v2438_v17 = vsub.f32 %v10748_v38, %v10624_v26  ;;  %v10751_v5 = vunpack.i.l.bf16 %v10650_v11  ;;  %v2515_v20 = vand.u32 2147483647, %v2441_v29  ;;  %v8111_v29 = vpop.permute.xlu1 %3041 }
 0x2e7   : > { %10745 = vst [vmem:[#allocation14_spill] sm:$0xff] %v8077_v1  ;;  %v2516_v50 = vand.u32 2147483647, %v2442_v4  ;;  %v2501_v37 = vand.u32 2147483647, %v2427_v62  ;;  %v8099_v54 = vmax.f32 %v2563_v13, 0.0 }
 0x2e8   : > { %10746 = vst [vmem:[#allocation68_spill] sm:$0xff] %v8079_v61  ;;  %5588 = vperm.xlu0 %5526, %v10749_v41   ;;  %v8096_v63 = vmul.f32 %v10751_v5, %v7502_v40  ;;  %5548 = vperm.xlu1 %5524, %v10753_v35   ;;  %v8101_v2 = vmax.f32 %v2564_v46, 0.0  ;;  %v2580_v8 = vsub.f32 1.0, %v2506_v7  ;;  %v2502_v38 = vand.u32 2147483647, %v2428_v25  ;;  %v8103_v21 = vpop.permute.xlu0 %3069  ;;  %v8113_v4 = vpop.permute.xlu2 %3065 }
 0x2e9   : > { %10754 = vst [vmem:[#allocation45_spill] sm:$0xff] %v8103_v21  ;;  %v8105_v41 = vmax.f32 %v2573_v30, 0.0  ;;  %v8107_v14 = vmax.f32 %v2574_v0, 0.0  ;;  %v8109_v11 = vmax.f32 %v2583_v19, 0.0  ;;  %v2511_v40 = vand.u32 2147483647, %v2437_v44 }
 0x2ea   : > { %10752 = vst [vmem:[#allocation186_spill] sm:$0xff] %v8096_v63  ;;  %v8115_v62 = vmax.f32 %v2584_v60, 0.0  ;;  %v8117_v13 = vmax.f32 %v2569_v3, 0.0  ;;  %v8119_v46 = vmax.f32 %v2570_v32, 0.0  ;;  %v2512_v25 = vand.u32 2147483647, %v2438_v17 }
 0x2eb   : > { %10755 = vst [vmem:[#allocation8_spill] sm:$0xff] %v8111_v29  ;;  %v8121_v7 = vmax.f32 %v2579_v6, 0.0  ;;  %v2589_v30 = vsub.f32 1.0, %v2515_v20  ;;  %v2590_v5 = vsub.f32 1.0, %v2516_v50  ;;  %v2575_v0 = vsub.f32 1.0, %v2501_v37  ;;  %v10757_v44 = vld [vmem:[#allocation73_spill] sm:$0xff] }
 0x2ec   : > { %10756 = vst [vmem:[#allocation22_spill] sm:$0xff] %v8113_v4  ;;  %v8123_v35 = vmax.f32 %v2580_v8, 0.0  ;;  %v2576_v19 = vsub.f32 1.0, %v2502_v38  ;;  %v2447_v61 = vsub.f32 %v10757_v44, %v10621_v10  ;;  %v10758_v63 = vld [vmem:[#allocation9_spill] sm:$0xff]  ;;  %v2585_v1 = vsub.f32 1.0, %v2511_v40  ;;  %v10759_v6 = vld [vmem:[#allocation74_spill] sm:$0xff] }
 0x2ed   : > { %v2433_v60 = vsub.f32 %v10758_v63, %v10621_v10  ;;  %v2448_v3 = vsub.f32 %v10757_v44, %v10624_v26  ;;  %v2434_v32 = vsub.f32 %v10758_v63, %v10624_v26  ;;  %v2443_v17 = vsub.f32 %v10759_v6, %v10621_v10  ;;  %v10760_v37 = vld [vmem:[#allocation77_spill] sm:$0xff]  ;;  %v10761_v40 = vld [vmem:[#allocation54_spill] sm:$0xff]  ;;  %5553 = vperm.xlu2 %5525, %v10762_v49   ;;  %v10775_v29 = vld [vmem:[#allocation108_spill] sm:$0xff] }
 0x2ee   : > { %v2586_v20 = vsub.f32 1.0, %v2512_v25  ;;  %v2444_v50 = vsub.f32 %v10759_v6, %v10624_v26  ;;  %v2453_v8 = vsub.f32 %v10760_v37, %v10621_v10  ;;  %v2454_v38 = vsub.f32 %v10760_v37, %v10624_v26  ;;  %v10766_v25 = vld [vmem:[#allocation17_spill] sm:$0xff]  ;;  %v10767_v6 = vld [vmem:[#allocation31_spill] sm:$0xff] }
 0x2ef   : > { %v8143_v44 = vmax.f32 %v2589_v30, 0.0  ;;  %v8145_v63 = vmax.f32 %v2590_v5, 0.0  ;;  %v8147_v45 = vmax.f32 %v2575_v0, 0.0  ;;  %v2439_v22 = vsub.f32 %v10766_v25, %v10621_v10 }
 0x2f0   : > { %5603 = vperm.xlu0 %5526, %v10761_v40   ;;  %5563 = vperm.xlu1 %5524, %v10767_v6   ;;  %v8152_v34 = vand.u32 2147483647, %v2447_v61  ;;  %v2507_v28 = vand.u32 2147483647, %v2433_v60  ;;  %v2440_v37 = vsub.f32 %v10766_v25, %v10624_v26  ;;  %v10769_v40 = vld [vmem:[#allocation11_spill] sm:$0xff]  ;;  %v8158_v30 = vpop.permute.xlu0 %3081  ;;  %v8166_v61 = vpop.permute.xlu2 %3077 }
 0x2f1   : > { %10763 = vst [vmem:[#allocation73_spill] sm:$0xff] %v8143_v44  ;;  %v2445_v49 = vsub.f32 %v10769_v40, %v10621_v10  ;;  %v8160_v5 = vand.u32 2147483647, %v2448_v3  ;;  %v2508_v0 = vand.u32 2147483647, %v2434_v32  ;;  %v8164_v44 = vpop.permute.xlu1 %3053  ;;  %v10774_v25 = vld [vmem:[#allocation63_spill] sm:$0xff] }
 0x2f2   : > { %10764 = vst [vmem:[#allocation9_spill] sm:$0xff] %v8145_v63  ;;  %v2517_v42 = vand.u32 2147483647, %v2443_v17  ;;  %v2446_v63 = vsub.f32 %v10769_v40, %v10624_v26  ;;  %v2518_v60 = vand.u32 2147483647, %v2444_v50  ;;  %v5617_v21 = vpack.i.bf16 %v10775_v29, %v10774_v25  ;;  %v10797_v17 = vld [vmem:[#allocation104_spill] sm:$0xff] }
 0x2f3   : > { %10765 = vst [vmem:[#allocation74_spill] sm:$0xff] %v8147_v45  ;;  %v2527_v6 = vand.u32 2147483647, %v2453_v8  ;;  %v2528_v4 = vand.u32 2147483647, %v2454_v38  ;;  %v8170_v45 = vmax.f32 %v2576_v19, 0.0  ;;  %v5437_v25 = vunpack.i.l.bf16 %v7774_v9 }
 0x2f4   : > { %10768 = vst [vmem:[#allocation77_spill] sm:$0xff] %v8152_v34  ;;  %v8174_v3 = vmax.f32 %v2586_v20, 0.0  ;;  %v2513_v32 = vand.u32 2147483647, %v2439_v22  ;;  %v2581_v40 = vsub.f32 1.0, %v2507_v28  ;;  %v2582_v50 = vsub.f32 1.0, %v2508_v0 }
 0x2f5   : > { %10770 = vst [vmem:[#allocation54_spill] sm:$0xff] %v8158_v30  ;;  %v8172_v30 = vmax.f32 %v2585_v1, 0.0  ;;  %v2514_v15 = vand.u32 2147483647, %v2440_v37  ;;  %v2591_v8 = vsub.f32 1.0, %v2517_v42  ;;  %v2592_v39 = vsub.f32 1.0, %v2518_v60 }
 0x2f6   : > { %10771 = vst [vmem:[#allocation23_spill] sm:$0xff] %v8160_v5  ;;  %v2520_v38 = vand.u32 2147483647, %v2446_v63  ;;  %v2601_v27 = vsub.f32 1.0, %v2527_v6  ;;  %v2602_v29 = vsub.f32 1.0, %v2528_v4  ;;  %v2451_v1 = vsub.f32 %v7476_v53, %v10621_v10  ;;  %v10776_v19 = vld [vmem:[#allocation32_spill] sm:$0xff] }
 0x2f7   : > { %10772 = vst [vmem:[#allocation17_spill] sm:$0xff] %v8164_v44  ;;  %v2519_v44 = vand.u32 2147483647, %v2445_v49  ;;  %5568 = vperm.xlu2 %5525, %v10776_v19   ;;  %v2587_v22 = vsub.f32 1.0, %v2513_v32  ;;  %v2452_v28 = vsub.f32 %v7476_v53, %v10624_v26  ;;  %v5448_v20 = vunpack.i.h.bf16 %v7763_v48  ;;  %v10777_v49 = vld [vmem:[#allocation40_spill] sm:$0xff] }
 0x2f8   : > { %10773 = vst [vmem:[#allocation31_spill] sm:$0xff] %v8166_v61  ;;  %5618 = vperm.xlu0 %5526, %v5617_v21   ;;  %v5447_v37 = vunpack.i.l.bf16 %v7763_v48  ;;  %5578 = vperm.xlu1 %5524, %v10777_v49   ;;  %v2655_v42 = vmax.f32 %v2581_v40, 0.0  ;;  %v2588_v63 = vsub.f32 1.0, %v2514_v15  ;;  %v5438_v4 = vunpack.i.h.bf16 %v7774_v9  ;;  %v8187_v60 = vpop.permute.xlu0 %3093  ;;  %v8194_v26 = vpop.permute.xlu2 %3089 }
 0x2f9   : > { %v2593_v0 = vsub.f32 1.0, %v2519_v44  ;;  %v2656_v10 = vmax.f32 %v2582_v50, 0.0  ;;  %v8189_v21 = vmax.f32 %v2591_v8, 0.0  ;;  %v2594_v6 = vsub.f32 1.0, %v2520_v38  ;;  %v8192_v53 = vpop.permute.xlu1 %3061 }
 0x2fa   : > { %v8196_v48 = vmax.f32 %v2592_v39, 0.0  ;;  %v8198_v32 = vmax.f32 %v2601_v27, 0.0  ;;  %v8200_v15 = vmax.f32 %v2602_v29, 0.0  ;;  %v8202_v44 = vand.u32 2147483647, %v2451_v1 }
 0x2fb   : > { %v8204_v40 = vmax.f32 %v2587_v22, 0.0  ;;  %v8206_v50 = vand.u32 2147483647, %v2452_v28  ;;  %v2902_v8 = vmul.f32 %v5448_v20, %v8117_v13  ;;  %v2900_v9 = vmul.f32 %v5447_v37, %v7836_v57  ;;  %v10813_v28 = vld [vmem:[#allocation200_spill] sm:$0xff] }
 0x2fc   : > { %10778 = vst [vmem:[#allocation11_spill] sm:$0xff] %v8198_v32  ;;  %v8210_v38 = vmax.f32 %v2588_v63, 0.0  ;;  %v2667_v19 = vmax.f32 %v2593_v0, 0.0  ;;  %v2894_v39 = vmul.f32 %v5438_v4, %v7809_v12  ;;  %v2895_v27 = vmul.f32 %v5438_v4, %v7826_v59  ;;  %v10782_v0 = vld [vmem:[#allocation111_spill] sm:$0xff]  ;;  %v10783_v12 = vld [vmem:[#allocation41_spill] sm:$0xff] }
 0x2fd   : > { %10779 = vst [vmem:[#allocation63_spill] sm:$0xff] %v8200_v15  ;;  %v2668_v49 = vmax.f32 %v2594_v6, 0.0  ;;  %v2892_v29 = vmul.f32 %v5437_v25, %v7799_v16  ;;  %v2893_v1 = vmul.f32 %v5437_v25, %v7801_v58  ;;  %v5453_v22 = vunpack.i.h.bf16 %v7824_v33  ;;  %v10784_v4 = vld [vmem:[#allocation49_spill] sm:$0xff] }
 0x2fe   : > { %10780 = vst [vmem:[#allocation108_spill] sm:$0xff] %v8206_v50  ;;  %v2903_v13 = vmul.f32 %v5448_v20, %v8119_v46  ;;  %v2901_v57 = vmul.f32 %v5447_v37, %v7848_v36  ;;  %v5452_v63 = vunpack.i.l.bf16 %v7824_v33  ;;  %v5463_v16 = vunpack.i.h.bf16 %v7816_v43  ;;  %v5744_v46 = vld [vmem:[%s5978_s13] sm:$0xf] }
 0x2ff   : > { %10781 = vst [vmem:[#allocation32_spill] sm:$0xff] %v8210_v38  ;;  %5583 = vperm.xlu2 %5525, %v10783_v12   ;;  %v8227_v58 = vadd.f32 %v2900_v9, %v7492_v24  ;;  %v8230_v6 = vadd.f32 %v2902_v8, %v7486_v51  ;;  %v5462_v36 = vunpack.i.l.bf16 %v7816_v43  ;;  %v3188_v33 = vperm.slane %v5744_v46, 1 }
 0x300   : > { %3795 = vperm.xlu0 %5526, %v10782_v0   ;;  %5593 = vperm.xlu1 %5524, %v10784_v4   ;;  %v8234_v20 = vpop.permute.xlu0 %3105  ;;  %v8237_v37 = vadd.f32 %v2894_v39, %v7509_v55  ;;  %v8240_v25 = vadd.f32 %v2895_v27, %v7512_v56  ;;  %v2906_v0 = vmul.f32 %v5453_v22, %v8105_v41  ;;  %v3189_v12 = vperm.slane %v5744_v46, 3  ;;  %v8245_v9 = vpop.permute.xlu2 %3101  ;;  %v10791_v39 = vld [vmem:[#allocation15_spill] sm:$0xff]  ;;  %v10793_v27 = vld [vmem:[#allocation85_spill] sm:$0xff]  ;;  %v10796_v46 = vld [vmem:[#allocation34_spill] sm:$0xff] }
 0x301   : > { %10785 = vst [vmem:[#allocation40_spill] sm:$0xff] %v8227_v58  ;;  %v8243_v24 = vpop.permute.xlu1 %3073  ;;  %v8248_v51 = vadd.f32 %v2892_v29, %v7535_v23  ;;  %v8251_v43 = vadd.f32 %v2893_v1, %v7547_v31  ;;  %v2907_v8 = vmul.f32 %v5453_v22, %v8107_v14  ;;  %v2904_v55 = vmul.f32 %v5452_v63, %v7832_v18  ;;  %v10800_v18 = vld [vmem:[#allocation193_spill] sm:$0xff] }
 0x302   : > { %10786 = vst [vmem:[#allocation111_spill] sm:$0xff] %v8230_v6  ;;  %v8256_v56 = vadd.f32 %v2901_v57, %v10791_v39  ;;  %v8259_v41 = vadd.f32 %v2903_v13, %v10793_v27  ;;  %v8261_v4 = vmul.f32 %v5463_v16, %v2655_v42  ;;  %v2905_v61 = vmul.f32 %v5452_v63, %v10796_v46  ;;  %v10802_v63 = vld [vmem:[#allocation198_spill] sm:$0xff] }
 0x303   : > { %10787 = vst [vmem:[#allocation41_spill] sm:$0xff] %v8237_v37  ;;  %v5443_v23 = vunpack.i.h.bf16 %v10797_v17  ;;  %v5442_v29 = vunpack.i.l.bf16 %v10797_v17  ;;  %v8266_v31 = vmul.f32 %v5463_v16, %v2656_v10  ;;  %v8269_v14 = vmul.f32 %v5462_v36, %v8121_v7  ;;  %v10804_v17 = vld [vmem:[#allocation33_spill] sm:$0xff]  ;;  %v10805_v7 = vld [vmem:[#allocation118_spill] sm:$0xff] }
 0x304   : > { %10788 = vst [vmem:[#allocation49_spill] sm:$0xff] %v8240_v25  ;;  %v5478_v1 = vunpack.i.h.bf16 %v10800_v18  ;;  %v8272_v22 = vperm.slane %v3188_v33, 1  ;;  %v8275_v13 = vmul.f32 %v5462_v36, %v8123_v35  ;;  %v5477_v42 = vunpack.i.l.bf16 %v10800_v18  ;;  %v10806_v27 = vld [vmem:[#allocation50_spill] sm:$0xff]  ;;  %v10807_v33 = vld [vmem:[#allocation93_spill] sm:$0xff]  ;;  %v10809_v35 = vld [vmem:[#allocation199_spill] sm:$0xff] }
 0x305   : > { %10789 = vst [vmem:[#allocation211_spill] sm:$0xff] %v8248_v51  ;;  %v8278_v57 = vperm.slane %v3189_v12, 1  ;;  %v8281_v39 = vadd.f32 %v2906_v0, %v10802_v63  ;;  %v5468_v10 = vunpack.i.h.bf16 %v10804_v17  ;;  %v5467_v16 = vunpack.i.l.bf16 %v10804_v17  ;;  %v10811_v18 = vld [vmem:[#allocation178_spill] sm:$0xff]  ;;  %v10812_v63 = vld [vmem:[#allocation59_spill] sm:$0xff] }
 0x306   : > { %10790 = vst [vmem:[#allocation212_spill] sm:$0xff] %v8251_v43  ;;  %v8288_v46 = vadd.f32 %v2904_v55, %v10807_v33  ;;  %v8291_v36 = vadd.f32 %v2907_v8, %v10809_v35  ;;  %v2898_v12 = vmul.f32 %v5443_v23, %v10811_v18  ;;  %v2896_v59 = vmul.f32 %v5442_v29, %v8099_v54  ;;  %v10817_v55 = vld [vmem:[#allocation192_spill] sm:$0xff] }
 0x307   : > { %10792 = vst [vmem:[#allocation15_spill] sm:$0xff] %v8256_v56  ;;  %5598 = vperm.xlu2 %5525, %v10806_v27   ;;  %v2897_v0 = vmul.f32 %v5442_v29, %v8101_v2  ;;  %v8298_v17 = vadd.f32 %v2905_v61, %v10813_v28  ;;  %v10816_v27 = vld [vmem:[#allocation44_spill] sm:$0xff]  ;;  %v5458_v33 = vunpack.i.h.bf16 %v10817_v55  ;;  %v3196_v8 = vsub.f32 %v8029_v52, %v8272_v22 }
 0x308   : > { %10794 = vst [vmem:[#allocation85_spill] sm:$0xff] %v8259_v41  ;;  %3807 = vperm.xlu0 %5526, %v10805_v7   ;;  %5608 = vperm.xlu1 %5524, %v10812_v63   ;;  %v8300_v7 = vmul.f32 %v5478_v1, %v2667_v19  ;;  %v2899_v5 = vmul.f32 %v5443_v23, %v10816_v27  ;;  %v8306_v35 = vpop.permute.xlu0 %3117  ;;  %v8320_v28 = vpop.permute.xlu2 %3113  ;;  %v10829_v27 = vld [vmem:[#allocation90_spill] sm:$0xff] }
 0x309   : > { %10795 = vst [vmem:[#allocation213_spill] sm:$0xff] %v8261_v4  ;;  %v8308_v18 = vmul.f32 %v5478_v1, %v2668_v49  ;;  %v8311_v54 = vmul.f32 %v5477_v42, %v8189_v21  ;;  %v8314_v2 = vmul.f32 %v5477_v42, %v8196_v48  ;;  %v3197_v61 = vsub.f32 %v8029_v52, %v8278_v57  ;;  %v8318_v19 = vpop.permute.xlu1 %3085  ;;  %v10825_v1 = vld [vmem:[#allocation19_spill] sm:$0xff]  ;;  %v10827_v42 = vld [vmem:[#allocation20_spill] sm:$0xff]  ;;  %v10854_v41 = vld [vmem:[#allocation82_spill] sm:$0xff] }
 0x30a   : > { %10798 = vst [vmem:[#allocation34_spill] sm:$0xff] %v8266_v31  ;;  %v8323_v23 = vmul.f32 %v5468_v10, %v8172_v30  ;;  %v8326_v29 = vmul.f32 %v5468_v10, %v8174_v3  ;;  %v8329_v49 = vmul.f32 %v5467_v16, %v8109_v11  ;;  %v5457_v21 = vunpack.i.l.bf16 %v10817_v55  ;;  %v10831_v11 = vld [vmem:[#allocation183_spill] sm:$0xff] }
 0x30b   : > { %10799 = vst [vmem:[#allocation104_spill] sm:$0xff] %v8269_v14  ;;  %v8333_v48 = vmul.f32 %v5467_v16, %v8115_v62  ;;  %v8336_v52 = vadd.f32 %v2896_v59, %v10825_v1  ;;  %v8339_v63 = vadd.f32 %v2898_v12, %v10827_v42  ;;  %v8342_v30 = vadd.f32 %v2897_v0, %v10829_v27  ;;  %v10834_v62 = vld [vmem:[#allocation69_spill] sm:$0xff]  ;;  %v10836_v1 = vld [vmem:[#allocation67_spill] sm:$0xff] }
 0x30c   : > { %10801 = vst [vmem:[#allocation193_spill] sm:$0xff] %v8275_v13  ;;  %v2910_v3 = vmul.f32 %v5458_v33, %v8081_v47  ;;  %v3270_v10 = vand.u32 2147483647, %v3196_v8  ;;  %v3202_v34 = vsub.f32 %v10831_v11, %v8272_v22  ;;  %v8351_v16 = vmul.f32 %v5458_v33, %v10834_v62  ;;  %v10839_v8 = vld [vmem:[#allocation74_spill] sm:$0xff]  ;;  %v10843_v33 = vld [vmem:[#allocation203_spill] sm:$0xff] }
 0x30d   : > { %10803 = vst [vmem:[#allocation198_spill] sm:$0xff] %v8281_v39  ;;  %v3271_v59 = vand.u32 2147483647, %v3197_v61  ;;  %v3203_v12 = vsub.f32 %v10831_v11, %v8278_v57  ;;  %v3198_v0 = vsub.f32 %v10836_v1, %v8272_v22  ;;  %v10837_v42 = vsub.f32 1.0, %v8202_v44  ;;  %v10844_v61 = vld [vmem:[#allocation10_spill] sm:$0xff]  ;;  %v10846_v39 = vld [vmem:[#allocation109_spill] sm:$0xff] }
 0x30e   : > { %10808 = vst [vmem:[#allocation33_spill] sm:$0xff] %v8288_v46  ;;  %v2908_v27 = vmul.f32 %v5457_v21, %v10839_v8  ;;  %v8369_v62 = vadd.f32 %v10844_v61, %v10843_v33  ;;  %v3199_v11 = vsub.f32 %v10836_v1, %v8278_v57  ;;  %v10847_v44 = vld [vmem:[#allocation95_spill] sm:$0xff]  ;;  %v10850_v8 = vld [vmem:[#allocation204_spill] sm:$0xff]  ;;  %v3344_v6 = vsub.f32 1.0, %v3270_v10  ;;  %v10856_v61 = vld [vmem:[#allocation45_spill] sm:$0xff] }
 0x30f   : > { %10810 = vst [vmem:[#allocation118_spill] sm:$0xff] %v8291_v36  ;;  %v10832_v36 = vld [vmem:[#allocation91_spill] sm:$0xff]  ;;  %v8359_v47 = vmax.f32 %v10837_v42, 0.0  ;;  %v10848_v42 = vld [vmem:[#allocation194_spill] sm:$0xff]  ;;  %v3276_v33 = vand.u32 2147483647, %v3202_v34  ;;  %v3225_v13 = vsub.f32 %v8245_v9, %v8278_v57 }
 0x310   : > { %10814 = vst [vmem:[#allocation50_spill] sm:$0xff] %v8298_v17  ;;  %v8348_v55 = vadd.f32 %v2899_v5, %v10832_v36  ;;  %v8363_v17 = vmul.f32 %v5457_v21, %v8170_v45  ;;  %v10841_v5 = vld [vmem:[#allocation123_spill] sm:$0xff]  ;;  %v10842_v36 = vld [vmem:[#allocation58_spill] sm:$0xff]  ;;  %3787 = vperm.xlu1 %5524, %v10846_v39   ;;  %v8376_v46 = vadd.f32 %v10848_v42, %v10847_v44  ;;  %v10851_v45 = vld [vmem:[#allocation48_spill] sm:$0xff]  ;;  %v8390_v1 = vpop.permute.xlu0 %3129  ;;  %v3345_v44 = vsub.f32 1.0, %v3271_v59 }
 0x311   : > { %10815 = vst [vmem:[#allocation93_spill] sm:$0xff] %v8300_v7  ;;  %3819 = vperm.xlu0 %5526, %v10841_v5   ;;  %5613 = vperm.xlu2 %5525, %v10842_v36   ;;  %v8380_v21 = vadd.f32 %v10851_v45, %v10850_v8  ;;  %v10853_v5 = vld [vmem:[#allocation24_spill] sm:$0xff]  ;;  %v3209_v39 = vsub.f32 %v10856_v61, %v8278_v57  ;;  %v3277_v42 = vand.u32 2147483647, %v3203_v12  ;;  %v10858_v10 = vld [vmem:[#allocation22_spill] sm:$0xff]  ;;  %v10861_v12 = vld [vmem:[#allocation37_spill] sm:$0xff] }
 0x312   : > { %10818 = vst [vmem:[#allocation199_spill] sm:$0xff] %v8308_v18  ;;  %v8384_v36 = vadd.f32 %v10854_v41, %v10853_v5  ;;  %v10857_v8 = vld [vmem:[#allocation8_spill] sm:$0xff]  ;;  %v8396_v41 = vpop.permute.xlu2 %3125  ;;  %v3206_v5 = vsub.f32 %v10858_v10, %v8272_v22  ;;  %v3273_v58 = vand.u32 2147483647, %v3199_v11  ;;  %v8414_v37 = vmax.f32 %v3345_v44, 0.0  ;;  %v10871_v18 = vld [vmem:[#allocation73_spill] sm:$0xff] }
 0x313   : > { %10819 = vst [vmem:[#allocation178_spill] sm:$0xff] %v8311_v54  ;;  %v3194_v45 = vsub.f32 %v10857_v8, %v8272_v22  ;;  %v3195_v34 = vsub.f32 %v10857_v8, %v8278_v57  ;;  %v3350_v8 = vsub.f32 1.0, %v3276_v33  ;;  %v3283_v25 = vand.u32 2147483647, %v3209_v39  ;;  %v10865_v11 = vld [vmem:[#allocation128_spill] sm:$0xff]  ;;  %v10868_v39 = vld [vmem:[#allocation115_spill] sm:$0xff] }
 0x314   : > { %10820 = vst [vmem:[#allocation59_spill] sm:$0xff] %v8314_v2  ;;  %v3351_v43 = vsub.f32 1.0, %v3277_v42  ;;  %v10872_v2 = vunpack.i.h.bf16 %v10861_v12  ;;  %v3238_v50 = vsub.f32 %v8390_v1, %v8272_v22 }
 0x315   : > { %10821 = vst [vmem:[#allocation200_spill] sm:$0xff] %v8323_v23  ;;  %v3268_v51 = vand.u32 2147483647, %v3194_v45  ;;  %v8427_v44 = vmax.f32 %v3350_v8, 0.0  ;;  %v3357_v45 = vsub.f32 1.0, %v3283_v25 }
 0x316   : > { %10822 = vst [vmem:[#allocation44_spill] sm:$0xff] %v8326_v29  ;;  %v8446_v7 = vmul.f32 %v10872_v2, %v10871_v18  ;;  %v3221_v18 = vsub.f32 %v8187_v60, %v8278_v57 }
 0x317   : > { %10823 = vst [vmem:[#allocation192_spill] sm:$0xff] %v8329_v49 }
 0x318   : > { %10824 = vst [vmem:[#allocation214_spill] sm:$0xff] %v8333_v48  ;;  %3799 = vperm.xlu1 %5524, %v10868_v39  }
 0x319   : > { %10826 = vst [vmem:[#allocation19_spill] sm:$0xff] %v8336_v52  ;;  %3831 = vperm.xlu0 %5526, %v10865_v11  }
 0x31a   : > { %10828 = vst [vmem:[#allocation20_spill] sm:$0xff] %v8339_v63  ;;  %v8441_v39 = vpop.permute.xlu2 %3137 }
 0x31b   : > { %10830 = vst [vmem:[#allocation90_spill] sm:$0xff] %v8342_v30  ;;  %v10862_v30 = vld [vmem:[#allocation201_spill] sm:$0xff] }
 0x31c   : > { %10833 = vst [vmem:[#allocation183_spill] sm:$0xff] %v8348_v55  ;;  %v8410_v52 = vadd.f32 %v2910_v3, %v10862_v30  ;;  %v8412_v55 = vmax.f32 %v3344_v6, 0.0  ;;  %v10866_v30 = vld [vmem:[#allocation103_spill] sm:$0xff]  ;;  %v3347_v6 = vsub.f32 1.0, %v3273_v58  ;;  %v10867_v3 = vld [vmem:[#allocation17_spill] sm:$0xff]  ;;  %v8433_v58 = vmax.f32 %v3351_v43, 0.0 }
 0x31d   : > { %10835 = vst [vmem:[#allocation91_spill] sm:$0xff] %v8351_v16  ;;  %3791 = vperm.xlu2 %5525, %v10866_v30   ;;  %v3201_v33 = vsub.f32 %v10867_v3, %v8278_v57  ;;  %v3342_v30 = vsub.f32 1.0, %v3268_v51  ;;  %v10883_v16 = vld [vmem:[#allocation135_spill] sm:$0xff] }
 0x31e   : > { %10838 = vst [vmem:[#allocation69_spill] sm:$0xff] %v8359_v47  ;;  %v8448_v51 = vmax.f32 %v3347_v6, 0.0 }
 0x31f   : > { %10840 = vst [vmem:[#allocation67_spill] sm:$0xff] %v8363_v17  ;;  %v8454_v23 = vmax.f32 %v3342_v30, 0.0  ;;  %v10877_v30 = vld [vmem:[#allocation121_spill] sm:$0xff] }
 0x320   : > { %10845 = vst [vmem:[#allocation74_spill] sm:$0xff] %v8369_v62  ;;  %v3208_v62 = vsub.f32 %v10856_v61, %v8272_v22  ;;  %v3207_v61 = vsub.f32 %v10858_v10, %v8278_v57  ;;  %3811 = vperm.xlu1 %5524, %v10877_v30  }
 0x321   : > { %10849 = vst [vmem:[#allocation123_spill] sm:$0xff] %v8376_v46  ;;  %v3272_v46 = vand.u32 2147483647, %v3198_v0  ;;  %v10864_v0 = vld [vmem:[#allocation54_spill] sm:$0xff] }
 0x322   : > { %10852 = vst [vmem:[#allocation58_spill] sm:$0xff] %v8380_v21  ;;  %v8394_v21 = vpop.permute.xlu1 %3097  ;;  %v3282_v63 = vand.u32 2147483647, %v3208_v62  ;;  %v3214_v56 = vsub.f32 %v10864_v0, %v8272_v22  ;;  %v3200_v62 = vsub.f32 %v10867_v3, %v8272_v22 }
 0x323   : > { %10855 = vst [vmem:[#allocation203_spill] sm:$0xff] %v8384_v36  ;;  %v10859_v36 = vld [vmem:[#allocation25_spill] sm:$0xff]  ;;  %v3346_v10 = vsub.f32 1.0, %v3272_v46  ;;  %v3215_v46 = vsub.f32 %v10864_v0, %v8278_v57 }
 0x324   : > { %v8405_v59 = vadd.f32 %v2908_v27, %v10859_v36  ;;  %10863 = vst [vmem:[#allocation109_spill] sm:$0xff] %v8410_v52  ;;  %v3269_v27 = vand.u32 2147483647, %v3195_v34  ;;  %v3280_v36 = vand.u32 2147483647, %v3206_v5  ;;  %v3356_v42 = vsub.f32 1.0, %v3282_v63 }
 0x325   : > { %v10869_v34 = vld [vmem:[#allocation31_spill] sm:$0xff]  ;;  %v8435_v11 = vmax.f32 %v3346_v10, 0.0  ;;  %v3288_v52 = vand.u32 2147483647, %v3214_v56  ;;  %10873 = vst [vmem:[#allocation194_spill] sm:$0xff] %v8446_v7  ;;  %v3220_v56 = vsub.f32 %v8187_v60, %v8272_v22  ;;  %v3224_v7 = vsub.f32 %v8245_v9, %v8272_v22 }
 0x326   : > { %10860 = vst [vmem:[#allocation10_spill] sm:$0xff] %v8405_v59  ;;  %v3281_v59 = vand.u32 2147483647, %v3207_v61  ;;  %v3212_v5 = vsub.f32 %v10869_v34, %v8272_v22  ;;  %v8431_v61 = vpop.permute.xlu0 %3141  ;;  %v3213_v3 = vsub.f32 %v10869_v34, %v8278_v57  ;;  %v3343_v8 = vsub.f32 1.0, %v3269_v27 }
 0x327   : > { %10870 = vst [vmem:[#allocation95_spill] sm:$0xff] %v8435_v11  ;;  %v3354_v63 = vsub.f32 1.0, %v3280_v36  ;;  %v3274_v43 = vand.u32 2147483647, %v3200_v62  ;;  %v3275_v10 = vand.u32 2147483647, %v3201_v33 }
 0x328   : > { %v3355_v25 = vsub.f32 1.0, %v3281_v59  ;;  %v3289_v54 = vand.u32 2147483647, %v3215_v46  ;;  %10874 = vst [vmem:[#allocation204_spill] sm:$0xff] %v8448_v51  ;;  %v8450_v29 = vmax.f32 %v3356_v42, 0.0  ;;  %v8452_v34 = vmax.f32 %v3357_v45, 0.0 }
 0x329   : > { %v3286_v48 = vand.u32 2147483647, %v3212_v5  ;;  %v3287_v27 = vand.u32 2147483647, %v3213_v3  ;;  %v8460_v2 = vmax.f32 %v3343_v8, 0.0  ;;  %v8462_v59 = vmax.f32 %v3354_v63, 0.0 }
 0x32a   : > { %v8439_v0 = vpop.permute.xlu1 %3109  ;;  %v8464_v36 = vmax.f32 %v3355_v25, 0.0  ;;  %v3362_v6 = vsub.f32 1.0, %v3288_v52  ;;  %v10875_v62 = vld [vmem:[#allocation132_spill] sm:$0xff]  ;;  %v10876_v33 = vld [vmem:[#allocation106_spill] sm:$0xff]  ;;  %v3348_v46 = vsub.f32 1.0, %v3274_v43  ;;  %v3349_v42 = vsub.f32 1.0, %v3275_v10 }
 0x32b   : > { %3843 = vperm.xlu0 %5526, %v10875_v62   ;;  %3803 = vperm.xlu2 %5525, %v10876_v33   ;;  %v3363_v45 = vsub.f32 1.0, %v3289_v54  ;;  %v3204_v5 = vsub.f32 %v8192_v53, %v8272_v22  ;;  %v3360_v60 = vsub.f32 1.0, %v3286_v48  ;;  %v3205_v3 = vsub.f32 %v8192_v53, %v8278_v57  ;;  %v8483_v48 = vpop.permute.xlu2 %3149 }
 0x32c   : > { %v3218_v8 = vsub.f32 %v8194_v26, %v8272_v22  ;;  %v3219_v52 = vsub.f32 %v8194_v26, %v8278_v57  ;;  %v3361_v25 = vsub.f32 1.0, %v3287_v27  ;;  %v3294_v43 = vand.u32 2147483647, %v3220_v56 }
 0x32d   : > { %v3295_v54 = vand.u32 2147483647, %v3221_v18  ;;  %v3226_v10 = vsub.f32 %v8234_v20, %v8272_v22  ;;  %v8485_v33 = vmax.f32 %v3362_v6, 0.0  ;;  %v3210_v53 = vsub.f32 %v8243_v24, %v8272_v22 }
 0x32e   : > { %v8477_v63 = vpop.permute.xlu0 %3153  ;;  %v3211_v26 = vsub.f32 %v8243_v24, %v8278_v57  ;;  %v3227_v27 = vsub.f32 %v8234_v20, %v8278_v57  ;;  %v8493_v56 = vmax.f32 %v3348_v46, 0.0  ;;  %v8495_v18 = vmax.f32 %v3363_v45, 0.0  ;;  %v10880_v20 = vld [vmem:[#allocation9_spill] sm:$0xff] }
 0x32f   : > { %v3278_v30 = vand.u32 2147483647, %v3204_v5  ;;  %v3279_v49 = vand.u32 2147483647, %v3205_v3  ;;  %v3292_v6 = vand.u32 2147483647, %v3218_v8  ;;  %v10881_v46 = vunpack.i.h.bf16 %v10861_v12 }
 0x330   : > { %10878 = vst [vmem:[#allocation48_spill] sm:$0xff] %v8493_v56  ;;  %v3293_v31 = vand.u32 2147483647, %v3219_v52  ;;  %v8501_v47 = vmax.f32 %v3349_v42, 0.0  ;;  %v3368_v24 = vsub.f32 1.0, %v3294_v43  ;;  %v3369_v15 = vsub.f32 1.0, %v3295_v54 }
 0x331   : > { %v3300_v32 = vand.u32 2147483647, %v3226_v10  ;;  %v8506_v45 = vmul.f32 %v10881_v46, %v10880_v20  ;;  %v3284_v5 = vand.u32 2147483647, %v3210_v53  ;;  %v3285_v4 = vand.u32 2147483647, %v3211_v26 }
 0x332   : > { %v8481_v62 = vpop.permute.xlu1 %3121  ;;  %10879 = vst [vmem:[#allocation24_spill] sm:$0xff] %v8501_v47  ;;  %v3301_v14 = vand.u32 2147483647, %v3227_v27  ;;  %v10884_v3 = vld [vmem:[#allocation110_spill] sm:$0xff]  ;;  %v8510_v8 = vmax.f32 %v3360_v60, 0.0  ;;  %v8512_v9 = vmax.f32 %v3361_v25, 0.0  ;;  %v3232_v60 = vsub.f32 %v8306_v35, %v8272_v22 }
 0x333   : > { %10882 = vst [vmem:[#allocation82_spill] sm:$0xff] %v8506_v45  ;;  %3855 = vperm.xlu0 %5526, %v10883_v16   ;;  %3815 = vperm.xlu2 %5525, %v10884_v3   ;;  %v3352_v42 = vsub.f32 1.0, %v3278_v30  ;;  %v3298_v52 = vand.u32 2147483647, %v3224_v7  ;;  %v10887_v43 = vld [vmem:[#allocation126_spill] sm:$0xff]  ;;  %v3353_v54 = vsub.f32 1.0, %v3279_v49  ;;  %v8525_v27 = vpop.permute.xlu2 %3161 }
 0x334   : > { %10885 = vst [vmem:[#allocation45_spill] sm:$0xff] %v8510_v8  ;;  %3823 = vperm.xlu1 %5524, %v10887_v43   ;;  %v3366_v10 = vsub.f32 1.0, %v3292_v6  ;;  %v3367_v17 = vsub.f32 1.0, %v3293_v31  ;;  %v3299_v20 = vand.u32 2147483647, %v3225_v13  ;;  %v8517_v53 = vmax.f32 %v3368_v24, 0.0 }
 0x335   : > { %10886 = vst [vmem:[#allocation8_spill] sm:$0xff] %v8512_v9  ;;  %v8519_v26 = vmax.f32 %v3369_v15, 0.0  ;;  %v3374_v16 = vsub.f32 1.0, %v3300_v32  ;;  %v3358_v7 = vsub.f32 1.0, %v3284_v5  ;;  %v3359_v30 = vsub.f32 1.0, %v3285_v4 }
 0x336   : > { %v8515_v46 = vpop.permute.xlu0 %3165  ;;  %v3375_v49 = vsub.f32 1.0, %v3301_v14  ;;  %v3233_v31 = vsub.f32 %v8306_v35, %v8278_v57  ;;  %v8529_v13 = vmax.f32 %v3352_v42, 0.0  ;;  %v3372_v6 = vsub.f32 1.0, %v3298_v52 }
 0x337   : > { %v3216_v15 = vsub.f32 %v8318_v19, %v8272_v22  ;;  %v3217_v32 = vsub.f32 %v8318_v19, %v8278_v57  ;;  %v8535_v24 = vmax.f32 %v3353_v54, 0.0  ;;  %v8537_v3 = vmax.f32 %v3366_v10, 0.0  ;;  %v10892_v10 = vld [vmem:[#allocation143_spill] sm:$0xff] }
 0x338   : > { %v3373_v43 = vsub.f32 1.0, %v3299_v20  ;;  %v3230_v4 = vsub.f32 %v8320_v28, %v8272_v22  ;;  %v8541_v14 = vmax.f32 %v3367_v17, 0.0  ;;  %v8543_v35 = vmax.f32 %v3374_v16, 0.0  ;;  %v10893_v20 = vld [vmem:[#allocation116_spill] sm:$0xff] }
 0x339   : > { %v3231_v5 = vsub.f32 %v8320_v28, %v8278_v57  ;;  %v3306_v42 = vand.u32 2147483647, %v3232_v60  ;;  %v8547_v52 = vmax.f32 %v3358_v7, 0.0  ;;  %v8549_v45 = vmax.f32 %v3359_v30, 0.0  ;;  %v10895_v28 = vld [vmem:[#allocation130_spill] sm:$0xff] }
 0x33a   : > { %v8523_v25 = vpop.permute.xlu1 %3133  ;;  %10888 = vst [vmem:[#allocation22_spill] sm:$0xff] %v8543_v35  ;;  %v8551_v19 = vmax.f32 %v3375_v49, 0.0  ;;  %v3307_v54 = vand.u32 2147483647, %v3233_v31  ;;  %v8555_v38 = vmax.f32 %v3372_v6, 0.0  ;;  %v8560_v60 = vmax.f32 %v3373_v43, 0.0 }
 0x33b   : > { %10889 = vst [vmem:[#allocation25_spill] sm:$0xff] %v8547_v52  ;;  %3867 = vperm.xlu0 %5526, %v10892_v10   ;;  %3827 = vperm.xlu2 %5525, %v10893_v20   ;;  %v3290_v17 = vand.u32 2147483647, %v3216_v15  ;;  %v3291_v16 = vand.u32 2147483647, %v3217_v32  ;;  %v3222_v30 = vsub.f32 %v8394_v21, %v8272_v22  ;;  %v3239_v49 = vsub.f32 %v8390_v1, %v8278_v57  ;;  %v8574_v43 = vpop.permute.xlu2 %3173 }
 0x33c   : > { %10890 = vst [vmem:[#allocation37_spill] sm:$0xff] %v8549_v45  ;;  %3835 = vperm.xlu1 %5524, %v10895_v28   ;;  %v3304_v7 = vand.u32 2147483647, %v3230_v4  ;;  %v3305_v6 = vand.u32 2147483647, %v3231_v5  ;;  %v3380_v10 = vsub.f32 1.0, %v3306_v42  ;;  %v3223_v15 = vsub.f32 %v8394_v21, %v8278_v57 }
 0x33d   : > { %10891 = vst [vmem:[#allocation201_spill] sm:$0xff] %v8551_v19  ;;  %v3236_v32 = vsub.f32 %v8396_v41, %v8272_v22  ;;  %v3381_v4 = vsub.f32 1.0, %v3307_v54  ;;  %v3228_v28 = vsub.f32 %v8439_v0, %v8272_v22  ;;  %v3244_v1 = vsub.f32 %v8431_v61, %v8272_v22 }
 0x33e   : > { %10894 = vst [vmem:[#allocation54_spill] sm:$0xff] %v8555_v38  ;;  %v8566_v31 = vpop.permute.xlu0 %3177  ;;  %v3245_v5 = vsub.f32 %v8431_v61, %v8278_v57  ;;  %v3364_v42 = vsub.f32 1.0, %v3290_v17  ;;  %v3237_v21 = vsub.f32 %v8396_v41, %v8278_v57  ;;  %v3312_v38 = vand.u32 2147483647, %v3238_v50  ;;  %v10899_v41 = vld [vmem:[#allocation133_spill] sm:$0xff]  ;;  %v10900_v50 = vld [vmem:[#allocation114_spill] sm:$0xff] }
 0x33f   : > { %10896 = vst [vmem:[#allocation128_spill] sm:$0xff] %v8560_v60  ;;  %v3365_v60 = vsub.f32 1.0, %v3291_v16  ;;  %v3296_v9 = vand.u32 2147483647, %v3222_v30  ;;  %v3313_v8 = vand.u32 2147483647, %v3239_v49  ;;  %v3229_v54 = vsub.f32 %v8439_v0, %v8278_v57 }
 0x340   : > { %10898 = vst [vmem:[#allocation17_spill] sm:$0xff] %v8574_v43  ;;  %v3242_v43 = vsub.f32 %v8441_v39, %v8272_v22  ;;  %v3378_v45 = vsub.f32 1.0, %v3304_v7  ;;  %v3379_v52 = vsub.f32 1.0, %v3305_v6  ;;  %v3310_v19 = vand.u32 2147483647, %v3236_v32  ;;  %v10902_v49 = vld [vmem:[#allocation122_spill] sm:$0xff] }
 0x341   : > { %v3302_v35 = vand.u32 2147483647, %v3228_v28  ;;  %v3243_v61 = vsub.f32 %v8441_v39, %v8278_v57  ;;  %v3318_v17 = vand.u32 2147483647, %v3244_v1  ;;  %v3319_v16 = vand.u32 2147483647, %v3245_v5 }
 0x342   : > { %v8572_v20 = vpop.permute.xlu1 %3145  ;;  %v10901_v30 = vpack.i.bf16 %v10899_v41, %v10900_v50  ;;  %v8594_v0 = vmax.f32 %v3380_v10, 0.0  ;;  %v8596_v51 = vmax.f32 %v3381_v4, 0.0  ;;  %v8598_v7 = vand.u32 2147483647, %v3237_v21 }
 0x343   : > { %10897 = vst [vmem:[#allocation103_spill] sm:$0xff] %v8572_v20  ;;  %v3297_v20 = vand.u32 2147483647, %v3223_v15  ;;  %3839 = vperm.xlu2 %5525, %v10902_v49   ;;  %v3386_v6 = vsub.f32 1.0, %v3312_v38  ;;  %v10903_v15 = vld [vmem:[#allocation137_spill] sm:$0xff]  ;;  %v3370_v32 = vsub.f32 1.0, %v3296_v9  ;;  %v8603_v50 = vpop.permute.xlu2 %3185 }
 0x344   : > { %5633 = vperm.xlu0 %5526, %v10901_v30   ;;  %3847 = vperm.xlu1 %5524, %v10903_v15   ;;  %v3387_v28 = vsub.f32 1.0, %v3313_v8  ;;  %v3303_v39 = vand.u32 2147483647, %v3229_v54  ;;  %v3316_v1 = vand.u32 2147483647, %v3242_v43  ;;  %v3384_v47 = vsub.f32 1.0, %v3310_v19 }
 0x345   : > { %v3371_v11 = vsub.f32 1.0, %v3297_v20  ;;  %v3376_v4 = vsub.f32 1.0, %v3302_v35  ;;  %v3317_v49 = vand.u32 2147483647, %v3243_v61  ;;  %v3392_v21 = vsub.f32 1.0, %v3318_v17  ;;  %v10907_v15 = vld [vmem:[#allocation148_spill] sm:$0xff] }
 0x346   : > { %v5529_v5 = vpop.permute.xlu0 %5528  ;;  %v3393_v56 = vsub.f32 1.0, %v3319_v16  ;;  %v8617_v20 = vmax.f32 %v3364_v42, 0.0  ;;  %v8619_v43 = vmax.f32 %v3365_v60, 0.0  ;;  %v3377_v35 = vsub.f32 1.0, %v3303_v39  ;;  %v10906_v60 = vld [vmem:[#allocation112_spill] sm:$0xff] }
 0x347   : > { %v5531_v10 = vunpack.i.h.bf16 %v5529_v5  ;;  %v5530_v30 = vunpack.i.l.bf16 %v5529_v5  ;;  %v3390_v54 = vsub.f32 1.0, %v3316_v1  ;;  %v8621_v61 = vmax.f32 %v3378_v45, 0.0  ;;  %v10909_v45 = vld [vmem:[#allocation127_spill] sm:$0xff] }
 0x348   : > { %v8623_v17 = vmax.f32 %v3379_v52, 0.0  ;;  %v8628_v16 = vmax.f32 %v3370_v32, 0.0  ;;  %v8634_v42 = vmax.f32 %v3387_v28, 0.0  ;;  %v10908_v39 = vpack.i.bf16 %v10906_v60, %v10907_v15  ;;  %v10910_v32 = vld [vmem:[#allocation139_spill] sm:$0xff] }
 0x349   : > { %v8606_v38 = vmul.f32 %v5531_v10, %v8412_v55  ;;  %v8609_v8 = vmul.f32 %v5531_v10, %v8414_v37  ;;  %v8612_v9 = vmul.f32 %v5530_v30, %v8454_v23  ;;  %v8615_v19 = vmul.f32 %v5530_v30, %v8460_v2 }
 0x34a   : > { %v8601_v41 = vpop.permute.xlu1 %3157  ;;  %v8626_v37 = vmax.f32 %v3386_v6, 0.0  ;;  %v8630_v23 = vmax.f32 %v3371_v11, 0.0  ;;  %v8632_v2 = vmax.f32 %v3384_v47, 0.0  ;;  %v8640_v52 = vmax.f32 %v3376_v4, 0.0 }
 0x34b   : > { %10904 = vst [vmem:[#allocation115_spill] sm:$0xff] %v8606_v38  ;;  %3851 = vperm.xlu2 %5525, %v10909_v45   ;;  %v3391_v1 = vsub.f32 1.0, %v3317_v49  ;;  %v8642_v5 = vmax.f32 %v3392_v21, 0.0  ;;  %v8644_v6 = vmax.f32 %v3393_v56, 0.0  ;;  %v8647_v11 = vmax.f32 %v3377_v35, 0.0  ;;  %v5539_v21 = vpop.permute.xlu2 %5538 }
 0x34c   : > { %10905 = vst [vmem:[#allocation31_spill] sm:$0xff] %v8609_v8  ;;  %5638 = vperm.xlu0 %5526, %v10908_v39   ;;  %3859 = vperm.xlu1 %5524, %v10910_v32   ;;  %v8649_v47 = vmax.f32 %v3390_v54, 0.0  ;;  %v3250_v28 = vsub.f32 %v8477_v63, %v8272_v22  ;;  %v3251_v10 = vsub.f32 %v8477_v63, %v8278_v57  ;;  %v5541_v39 = vunpack.i.h.bf16 %v5539_v21 }
 0x34d   : > { %v3234_v4 = vsub.f32 %v8481_v62, %v8272_v22  ;;  %v3235_v56 = vsub.f32 %v8481_v62, %v8278_v57  ;;  %v3248_v54 = vsub.f32 %v8483_v48, %v8272_v22  ;;  %v3249_v15 = vsub.f32 %v8483_v48, %v8278_v57 }
 0x34e   : > { %v5544_v30 = vpop.permute.xlu0 %5543  ;;  %v5540_v63 = vunpack.i.l.bf16 %v5539_v21  ;;  %v3325_v8 = vand.u32 2147483647, %v3251_v10  ;;  %v8678_v38 = vmul.f32 %v5541_v39, %v8529_v13  ;;  %v8681_v48 = vmul.f32 %v5541_v39, %v8535_v24  ;;  %v10915_v21 = vld [vmem:[#allocation141_spill] sm:$0xff] }
 0x34f   : > { %v5546_v35 = vunpack.i.h.bf16 %v5544_v30  ;;  %v5545_v60 = vunpack.i.l.bf16 %v5544_v30  ;;  %v3324_v30 = vand.u32 2147483647, %v3250_v28  ;;  %v8693_v28 = vmax.f32 %v3391_v1, 0.0 }
 0x350   : > { %10913 = vst [vmem:[#allocation106_spill] sm:$0xff] %v8678_v38  ;;  %v8695_v10 = vand.u32 2147483647, %v3234_v4  ;;  %v3240_v13 = vsub.f32 %v8523_v25, %v8272_v22  ;;  %v3241_v24 = vsub.f32 %v8523_v25, %v8278_v57  ;;  %v8710_v1 = vand.u32 2147483647, %v3235_v56 }
 0x351   : > { %v8666_v45 = vmul.f32 %v5546_v35, %v8450_v29  ;;  %v8669_v32 = vmul.f32 %v5546_v35, %v8452_v34  ;;  %v8672_v62 = vmul.f32 %v5545_v60, %v8462_v59  ;;  %v8675_v55 = vmul.f32 %v5545_v60, %v8464_v36  ;;  %10914 = vst [vmem:[#allocation121_spill] sm:$0xff] %v8681_v48  ;;  %v10916_v35 = vld [vmem:[#allocation142_spill] sm:$0xff] }
 0x352   : > { %v8659_v49 = vpop.permute.xlu1 %3169  ;;  %v3256_v29 = vsub.f32 %v8515_v46, %v8272_v22  ;;  %v3257_v34 = vsub.f32 %v8515_v46, %v8278_v57  ;;  %v8688_v59 = vmul.f32 %v5540_v63, %v8427_v44  ;;  %v8691_v36 = vmul.f32 %v5540_v63, %v8433_v58  ;;  %v10917_v46 = vld [vmem:[#allocation107_spill] sm:$0xff]  ;;  %v10920_v63 = vld [vmem:[#allocation145_spill] sm:$0xff] }
 0x353   : > { %10911 = vst [vmem:[#allocation73_spill] sm:$0xff] %v8672_v62  ;;  %v10918_v60 = vpack.i.bf16 %v10916_v35, %v10917_v46  ;;  %v10919_v44 = vunpack.i.l.bf16 %v10861_v12  ;;  %v8712_v4 = vand.u32 2147483647, %v3248_v54  ;;  %v8714_v39 = vand.u32 2147483647, %v3249_v15  ;;  %v5554_v54 = vpop.permute.xlu2 %5553 }
 0x354   : > { %10912 = vst [vmem:[#allocation132_spill] sm:$0xff] %v8675_v55  ;;  %3887 = vperm.xlu0 %5526, %v10915_v21   ;;  %3871 = vperm.xlu1 %5524, %v10920_v63   ;;  %v3398_v25 = vsub.f32 1.0, %v3324_v30  ;;  %v3399_v55 = vsub.f32 1.0, %v3325_v8  ;;  %v3254_v21 = vsub.f32 %v8525_v27, %v8272_v22  ;;  %v3255_v35 = vsub.f32 %v8525_v27, %v8278_v57 }
 0x355   : > { %5623 = vperm.xlu2 %5525, %v10918_v60   ;;  %v8708_v58 = vmul.f32 %v10919_v44, %v8204_v40  ;;  %v8721_v60 = vand.u32 2147483647, %v3256_v29  ;;  %v8723_v40 = vand.u32 2147483647, %v3257_v34  ;;  %v3314_v62 = vand.u32 2147483647, %v3240_v13 }
 0x356   : > { %v5559_v46 = vpop.permute.xlu0 %5558  ;;  %v3315_v63 = vand.u32 2147483647, %v3241_v24  ;;  %v5556_v30 = vunpack.i.h.bf16 %v5554_v54  ;;  %v5555_v8 = vunpack.i.l.bf16 %v5554_v54  ;;  %v8757_v54 = vmax.f32 %v3398_v25, 0.0  ;;  %v10933_v25 = vld [vmem:[#allocation134_spill] sm:$0xff] }
 0x357   : > { %v5561_v15 = vunpack.i.h.bf16 %v5559_v46  ;;  %v5560_v44 = vunpack.i.l.bf16 %v5559_v46  ;;  %v10931_v46 = vld [vmem:[#allocation144_spill] sm:$0xff] }
 0x358   : > { %v8742_v13 = vmul.f32 %v5556_v30, %v8617_v20  ;;  %v8745_v24 = vmul.f32 %v5556_v30, %v8619_v43  ;;  %v8761_v20 = vand.u32 2147483647, %v3254_v21  ;;  %v8763_v43 = vand.u32 2147483647, %v3255_v35  ;;  %v10930_v30 = vld [vmem:[#allocation113_spill] sm:$0xff] }
 0x359   : > { %v8728_v48 = vmul.f32 %v5561_v15, %v8517_v53  ;;  %v8731_v38 = vmul.f32 %v5561_v15, %v8519_v26  ;;  %v8734_v27 = vmul.f32 %v5560_v44, %v8537_v3  ;;  %v8737_v29 = vmul.f32 %v5560_v44, %v8541_v14  ;;  %v10929_v44 = vld [vmem:[#allocation154_spill] sm:$0xff] }
 0x35a   : > { %v8725_v56 = vpop.permute.xlu1 %3181  ;;  %10925 = vst [vmem:[#allocation143_spill] sm:$0xff] %v8742_v13  ;;  %v3252_v53 = vsub.f32 %v8601_v41, %v8272_v22  ;;  %v3253_v26 = vsub.f32 %v8601_v41, %v8278_v57  ;;  %v8752_v3 = vmul.f32 %v5555_v8, %v8485_v33  ;;  %v8755_v14 = vmul.f32 %v5555_v8, %v8495_v18 }
 0x35b   : > { %10921 = vst [vmem:[#allocation9_spill] sm:$0xff] %v8728_v48  ;;  %v8759_v15 = vmax.f32 %v3399_v55, 0.0  ;;  %v10932_v34 = vpack.i.bf16 %v10930_v30, %v10931_v46  ;;  %v3388_v41 = vsub.f32 1.0, %v3314_v62  ;;  %v3389_v33 = vsub.f32 1.0, %v3315_v63 }
 0x35c   : > { %10922 = vst [vmem:[#allocation135_spill] sm:$0xff] %v8731_v38  ;;  %3891 = vperm.xlu0 %5526, %v10929_v44   ;;  %3875 = vperm.xlu1 %5524, %v10933_v25   ;;  %v3262_v55 = vsub.f32 %v8566_v31, %v8272_v22  ;;  %v3263_v21 = vsub.f32 %v8566_v31, %v8278_v57  ;;  %v8780_v63 = vand.u32 2147483647, %v3252_v53  ;;  %v5569_v44 = vpop.permute.xlu2 %5568 }
 0x35d   : > { %10923 = vst [vmem:[#allocation110_spill] sm:$0xff] %v8734_v27  ;;  %5628 = vperm.xlu2 %5525, %v10932_v34   ;;  %v3266_v35 = vsub.f32 %v8603_v50, %v8272_v22  ;;  %v3267_v8 = vsub.f32 %v8603_v50, %v8278_v57  ;;  %v8782_v34 = vand.u32 2147483647, %v3253_v26  ;;  %v5571_v13 = vunpack.i.h.bf16 %v5569_v44  ;;  %v10938_v26 = vld [vmem:[#allocation48_spill] sm:$0xff] }
 0x35e   : > { %10924 = vst [vmem:[#allocation126_spill] sm:$0xff] %v8737_v29  ;;  %v5574_v62 = vpop.permute.xlu0 %5573  ;;  %v5570_v38 = vunpack.i.l.bf16 %v5569_v44 }
 0x35f   : > { %10926 = vst [vmem:[#allocation116_spill] sm:$0xff] %v8745_v24  ;;  %v5576_v30 = vunpack.i.h.bf16 %v5574_v62  ;;  %v5575_v25 = vunpack.i.l.bf16 %v5574_v62  ;;  %v10939_v62 = vld [vmem:[#allocation24_spill] sm:$0xff] }
 0x360   : > { %10927 = vst [vmem:[#allocation130_spill] sm:$0xff] %v8752_v3 }
 0x361   : > { %10928 = vst [vmem:[#allocation133_spill] sm:$0xff] %v8755_v14  ;;  %v8785_v31 = vmul.f32 %v5576_v30, %v8594_v0  ;;  %v8788_v48 = vmul.f32 %v5576_v30, %v8596_v51  ;;  %v8791_v50 = vmul.f32 %v5575_v25, %v8621_v61  ;;  %v8794_v53 = vmul.f32 %v5575_v25, %v8623_v17  ;;  %v10941_v0 = vld [vmem:[#allocation204_spill] sm:$0xff]  ;;  %v10944_v17 = vld [vmem:[#allocation22_spill] sm:$0xff]  ;;  %v10946_v25 = vld [vmem:[#allocation201_spill] sm:$0xff] }
 0x362   : > { %v5534_v46 = vpop.permute.xlu1 %5533  ;;  %v8809_v51 = vmul.f32 %v5571_v13, %v8640_v52  ;;  %v8812_v61 = vmul.f32 %v5571_v13, %v8647_v11  ;;  %v8815_v30 = vmul.f32 %v5570_v38, %v10944_v17  ;;  %v10950_v52 = vld [vmem:[#allocation125_spill] sm:$0xff]  ;;  %v10952_v11 = vld [vmem:[#allocation103_spill] sm:$0xff] }
 0x363   : > { %v5536_v18 = vunpack.i.h.bf16 %v5534_v46  ;;  %v5535_v24 = vunpack.i.l.bf16 %v5534_v46  ;;  %10934 = vst [vmem:[#allocation114_spill] sm:$0xff] %v8785_v31  ;;  %v10940_v46 = vld [vmem:[#allocation95_spill] sm:$0xff]  ;;  %v3246_v13 = vsub.f32 %v10952_v11, %v8272_v22  ;;  %v3247_v17 = vsub.f32 %v10952_v11, %v8278_v57 }
 0x364   : > { %10935 = vst [vmem:[#allocation122_spill] sm:$0xff] %v8788_v48  ;;  %v3264_v11 = vsub.f32 %v8725_v56, %v8272_v22 }
 0x365   : > { %10936 = vst [vmem:[#allocation137_spill] sm:$0xff] %v8791_v50  ;;  %v8797_v29 = vmul.f32 %v5536_v18, %v10938_v26  ;;  %v8800_v27 = vmul.f32 %v5536_v18, %v10939_v62  ;;  %v8803_v44 = vmul.f32 %v5535_v24, %v10940_v46  ;;  %v8806_v31 = vmul.f32 %v5535_v24, %v10941_v0  ;;  %v10948_v24 = vld [vmem:[#allocation149_spill] sm:$0xff]  ;;  %v10949_v0 = vld [vmem:[#allocation146_spill] sm:$0xff] }
 0x366   : > { %10937 = vst [vmem:[#allocation112_spill] sm:$0xff] %v8794_v53  ;;  %v8818_v26 = vmul.f32 %v5570_v38, %v10946_v25  ;;  %v3462_v18 = vmax.f32 %v3388_v41, 0.0  ;;  %v3463_v62 = vmax.f32 %v3389_v33, 0.0  ;;  %v3402_v46 = vsub.f32 1.0, %v8761_v20  ;;  %3879 = vperm.xlu2 %5525, %v10948_v24   ;;  %v10953_v33 = vld [vmem:[#allocation150_spill] sm:$0xff]  ;;  %v10954_v20 = vld [vmem:[#allocation117_spill] sm:$0xff] }
 0x367   : > { %10942 = vst [vmem:[#allocation148_spill] sm:$0xff] %v8809_v51  ;;  %v3403_v53 = vsub.f32 1.0, %v8763_v43  ;;  %v10951_v50 = vpack.i.bf16 %v10949_v0, %v10950_v52  ;;  %v8830_v38 = vand.u32 2147483647, %v3262_v55  ;;  %v8832_v41 = vand.u32 2147483647, %v3263_v21  ;;  %v5589_v52 = vpop.permute.xlu0 %5588 }
 0x368   : > { %10943 = vst [vmem:[#allocation127_spill] sm:$0xff] %v8812_v61  ;;  %v10955_v25 = vpack.i.bf16 %v10953_v33, %v10954_v20  ;;  %v3400_v43 = vsub.f32 1.0, %v8780_v63  ;;  %v3401_v24 = vsub.f32 1.0, %v8782_v34  ;;  %v8839_v0 = vand.u32 2147483647, %v3266_v35 }
 0x369   : > { %10945 = vst [vmem:[#allocation139_spill] sm:$0xff] %v8815_v30  ;;  %5663 = vperm.xlu0 %5526, %v10951_v50   ;;  %v8841_v50 = vand.u32 2147483647, %v3267_v8  ;;  %v3265_v55 = vsub.f32 %v8725_v56, %v8278_v57  ;;  %v5591_v30 = vunpack.i.h.bf16 %v5589_v52  ;;  %v5590_v33 = vunpack.i.l.bf16 %v5589_v52  ;;  %v10960_v56 = vld [vmem:[#allocation25_spill] sm:$0xff] }
 0x36a   : > { %10947 = vst [vmem:[#allocation141_spill] sm:$0xff] %v8818_v26  ;;  %5643 = vperm.xlu1 %5524, %v10955_v25   ;;  %v5549_v21 = vpop.permute.xlu1 %5548  ;;  %v5584_v26 = vpop.permute.xlu2 %5583  ;;  %v10962_v52 = vld [vmem:[#allocation37_spill] sm:$0xff] }
 0x36b   : > { %v5551_v20 = vunpack.i.h.bf16 %v5549_v21  ;;  %v5550_v25 = vunpack.i.l.bf16 %v5549_v21  ;;  %v5586_v63 = vunpack.i.h.bf16 %v5584_v26  ;;  %v5585_v61 = vunpack.i.l.bf16 %v5584_v26  ;;  %v10964_v21 = vld [vmem:[#allocation45_spill] sm:$0xff] }
 0x36c   : > { %v8848_v35 = vmul.f32 %v5591_v30, %v8642_v5  ;;  %v8851_v8 = vmul.f32 %v5591_v30, %v8644_v6  ;;  %v8854_v34 = vmul.f32 %v5590_v33, %v8649_v47  ;;  %v8857_v51 = vmul.f32 %v5590_v33, %v8693_v28  ;;  %v10966_v5 = vld [vmem:[#allocation8_spill] sm:$0xff] }
 0x36d   : > { %v8860_v48 = vmul.f32 %v5550_v25, %v10960_v56  ;;  %v8863_v14 = vmul.f32 %v5550_v25, %v10962_v52  ;;  %v8866_v26 = vmul.f32 %v5551_v20, %v10964_v21  ;;  %v8871_v6 = vmul.f32 %v5586_v63, %v3462_v18  ;;  %v10973_v18 = vld [vmem:[#allocation158_spill] sm:$0xff] }
 0x36e   : > { %10956 = vst [vmem:[#allocation142_spill] sm:$0xff] %v8848_v35  ;;  %v8869_v35 = vmul.f32 %v5551_v20, %v10966_v5  ;;  %v8873_v30 = vmul.f32 %v5586_v63, %v3463_v62  ;;  %v8876_v47 = vmul.f32 %v5585_v61, %v8626_v37  ;;  %v8879_v28 = vmul.f32 %v5585_v61, %v8634_v42  ;;  %v10972_v20 = vld [vmem:[#allocation151_spill] sm:$0xff]  ;;  %v10976_v61 = vld [vmem:[#allocation120_spill] sm:$0xff] }
 0x36f   : > { %10957 = vst [vmem:[#allocation107_spill] sm:$0xff] %v8851_v8  ;;  %v3476_v33 = vmax.f32 %v3402_v46, 0.0  ;;  %v3477_v56 = vmax.f32 %v3403_v53, 0.0  ;;  %v10970_v25 = vsub.f32 1.0, %v8721_v60  ;;  %v10971_v21 = vsub.f32 1.0, %v8723_v40  ;;  %3883 = vperm.xlu2 %5525, %v10972_v20   ;;  %v10974_v5 = vld [vmem:[#allocation159_spill] sm:$0xff] }
 0x370   : > { %10958 = vst [vmem:[#allocation145_spill] sm:$0xff] %v8854_v34  ;;  %v10975_v62 = vpack.i.bf16 %v10973_v18, %v10974_v5  ;;  %v8889_v63 = vand.u32 2147483647, %v3246_v13  ;;  %v8891_v37 = vand.u32 2147483647, %v3247_v17  ;;  %v3410_v42 = vsub.f32 1.0, %v8830_v38  ;;  %v5604_v18 = vpop.permute.xlu0 %5603 }
 0x371   : > { %10959 = vst [vmem:[#allocation154_spill] sm:$0xff] %v8857_v51  ;;  %v3478_v52 = vmax.f32 %v10970_v25, 0.0  ;;  %v3479_v8 = vmax.f32 %v10971_v21, 0.0  ;;  %v3411_v53 = vsub.f32 1.0, %v8832_v41  ;;  %v10977_v60 = vld [vmem:[#allocation140_spill] sm:$0xff]  ;;  %v3474_v40 = vmax.f32 %v3400_v43, 0.0 }
 0x372   : > { %10961 = vst [vmem:[#allocation113_spill] sm:$0xff] %v8860_v48  ;;  %5668 = vperm.xlu0 %5526, %v10975_v62   ;;  %v10978_v46 = vpack.i.bf16 %v10976_v61, %v10977_v60  ;;  %v3475_v25 = vmax.f32 %v3401_v24, 0.0  ;;  %v3414_v21 = vsub.f32 1.0, %v8839_v0  ;;  %v3415_v20 = vsub.f32 1.0, %v8841_v50  ;;  %v5564_v62 = vpop.permute.xlu1 %5563  ;;  %v5599_v17 = vpop.permute.xlu2 %5598  ;;  %v10987_v60 = vld [vmem:[#allocation128_spill] sm:$0xff] }
 0x373   : > { %10963 = vst [vmem:[#allocation144_spill] sm:$0xff] %v8863_v14  ;;  %v3338_v5 = vand.u32 2147483647, %v3264_v11  ;;  %v3339_v13 = vand.u32 2147483647, %v3265_v55  ;;  %v5606_v51 = vunpack.i.h.bf16 %v5604_v18  ;;  %v5605_v34 = vunpack.i.l.bf16 %v5604_v18  ;;  %v10985_v11 = vld [vmem:[#allocation54_spill] sm:$0xff] }
 0x374   : > { %10965 = vst [vmem:[#allocation134_spill] sm:$0xff] %v8866_v26  ;;  %5648 = vperm.xlu1 %5524, %v10978_v46   ;;  %v5566_v38 = vunpack.i.h.bf16 %v5564_v62  ;;  %v5601_v41 = vunpack.i.h.bf16 %v5599_v17  ;;  %v5600_v3 = vunpack.i.l.bf16 %v5599_v17  ;;  %v3397_v18 = vsub.f32 1.0, %v8714_v39  ;;  %v10998_v17 = vld [vmem:[#allocation152_spill] sm:$0xff] }
 0x375   : > { %10967 = vst [vmem:[#allocation48_spill] sm:$0xff] %v8869_v35  ;;  %v8902_v61 = vmul.f32 %v5606_v51, %v3479_v8  ;;  %v8904_v43 = vmul.f32 %v5605_v34, %v3476_v33  ;;  %v8906_v24 = vmul.f32 %v5605_v34, %v3477_v56  ;;  %v3396_v56 = vsub.f32 1.0, %v8712_v4 }
 0x376   : > { %10968 = vst [vmem:[#allocation24_spill] sm:$0xff] %v8876_v47  ;;  %v8900_v47 = vmul.f32 %v5606_v51, %v3478_v52  ;;  %v8915_v55 = vmul.f32 %v5566_v38, %v10985_v11  ;;  %v8918_v46 = vmul.f32 %v5566_v38, %v10987_v60  ;;  %v8920_v52 = vmul.f32 %v5601_v41, %v3474_v40  ;;  %v10995_v40 = vld [vmem:[#allocation153_spill] sm:$0xff] }
 0x377   : > { %10969 = vst [vmem:[#allocation95_spill] sm:$0xff] %v8879_v28  ;;  %v5565_v28 = vunpack.i.l.bf16 %v5564_v62  ;;  %v8922_v51 = vmul.f32 %v5601_v41, %v3475_v25  ;;  %v8925_v8 = vmul.f32 %v5600_v3, %v8757_v54  ;;  %v8928_v34 = vmul.f32 %v5600_v3, %v8759_v15  ;;  %v10996_v62 = vld [vmem:[#allocation119_spill] sm:$0xff]  ;;  %v11000_v15 = vld [vmem:[#allocation17_spill] sm:$0xff] }
 0x378   : > { %10979 = vst [vmem:[#allocation204_spill] sm:$0xff] %v8900_v47  ;;  %v10997_v25 = vpack.i.bf16 %v10995_v40, %v10996_v62  ;;  %v10999_v54 = vsub.f32 1.0, %v8710_v1  ;;  %v3412_v38 = vsub.f32 1.0, %v3338_v5  ;;  %v3413_v41 = vsub.f32 1.0, %v3339_v13  ;;  %v11030_v47 = vld [vmem:[#allocation11_spill] sm:$0xff] }
 0x379   : > { %10980 = vst [vmem:[#allocation22_spill] sm:$0xff] %v8902_v61  ;;  %v8909_v0 = vmul.f32 %v5565_v28, %v8628_v16  ;;  %v8912_v50 = vmul.f32 %v5565_v28, %v8630_v23  ;;  %v10993_v16 = vsub.f32 1.0, %v8598_v7  ;;  %v10994_v28 = vsub.f32 1.0, %v8695_v10  ;;  %v11001_v10 = vld [vmem:[#allocation156_spill] sm:$0xff] }
 0x37a   : > { %10981 = vst [vmem:[#allocation201_spill] sm:$0xff] %v8904_v43  ;;  %5653 = vperm.xlu2 %5525, %v10997_v25   ;;  %3911 = vperm.xlu0 %5526, %v10998_v17   ;;  %v3457_v3 = vmax.f32 %v10999_v54, 0.0  ;;  %v3260_v7 = vsub.f32 %v11000_v15, %v8272_v22  ;;  %v3394_v4 = vsub.f32 1.0, %v8889_v63  ;;  %v3395_v39 = vsub.f32 1.0, %v8891_v37  ;;  %v5579_v62 = vpop.permute.xlu1 %5578  ;;  %v5614_v25 = vpop.permute.xlu2 %5613  ;;  %v11031_v43 = vld [vmem:[#allocation63_spill] sm:$0xff] }
 0x37b   : > { %10982 = vst [vmem:[#allocation149_spill] sm:$0xff] %v8906_v24  ;;  %v3459_v23 = vmax.f32 %v10993_v16, 0.0  ;;  %v3456_v33 = vmax.f32 %v10994_v28, 0.0  ;;  %v3261_v11 = vsub.f32 %v11000_v15, %v8278_v57  ;;  %v3484_v60 = vmax.f32 %v3410_v42, 0.0  ;;  %v8949_v16 = vpop.permute.xlu0 %5618 }
 0x37c   : > { %10983 = vst [vmem:[#allocation146_spill] sm:$0xff] %v8909_v0  ;;  %3895 = vperm.xlu1 %5524, %v11001_v10   ;;  %v3485_v28 = vmax.f32 %v3411_v53, 0.0  ;;  %v3488_v1 = vmax.f32 %v3414_v21, 0.0  ;;  %v3489_v40 = vmax.f32 %v3415_v20, 0.0  ;;  %v5620_v5 = vunpack.i.l.bf16 %v8949_v16 }
 0x37d   : > { %10984 = vst [vmem:[#allocation125_spill] sm:$0xff] %v8912_v50  ;;  %v5581_v13 = vunpack.i.h.bf16 %v5579_v62  ;;  %v5580_v17 = vunpack.i.l.bf16 %v5579_v62  ;;  %v5616_v54 = vunpack.i.h.bf16 %v5614_v25  ;;  %v5615_v10 = vunpack.i.l.bf16 %v5614_v25 }
 0x37e   : > { %10986 = vst [vmem:[#allocation103_spill] sm:$0xff] %v8915_v55  ;;  %v3486_v63 = vmax.f32 %v3412_v38, 0.0  ;;  %v8952_v37 = vmul.f32 %v5620_v5, %v3488_v1  ;;  %v11166_v55 = vld [vmem:[#allocation68_spill] sm:$0xff] }
 0x37f   : > { %10988 = vst [vmem:[#allocation150_spill] sm:$0xff] %v8918_v46  ;;  %v8956_v42 = vmul.f32 %v5580_v17, %v3456_v33  ;;  %v8958_v15 = vmul.f32 %v5580_v17, %v3457_v3  ;;  %v8961_v53 = vmul.f32 %v5581_v13, %v8632_v2  ;;  %v8963_v21 = vmul.f32 %v5581_v13, %v3459_v23  ;;  %v11010_v33 = vld [vmem:[#allocation32_spill] sm:$0xff]  ;;  %v11013_v13 = vld [vmem:[#allocation155_spill] sm:$0xff]  ;;  %v11016_v17 = vld [vmem:[#allocation46_spill] sm:$0xff] }
 0x380   : > { %10989 = vst [vmem:[#allocation117_spill] sm:$0xff] %v8920_v52  ;;  %v8965_v20 = vmul.f32 %v5616_v54, %v3486_v63  ;;  %v8969_v25 = vmul.f32 %v5615_v10, %v3484_v60  ;;  %v8971_v38 = vmul.f32 %v5615_v10, %v3485_v28  ;;  %v11011_v3 = vunpack.i.l.bf16 %v10861_v12  ;;  %v11015_v28 = vld [vmem:[#allocation163_spill] sm:$0xff]  ;;  %v11018_v12 = vld [vmem:[#allocation202_spill] sm:$0xff] }
 0x381   : > { %10990 = vst [vmem:[#allocation25_spill] sm:$0xff] %v8922_v51  ;;  %v3258_v2 = vsub.f32 %v8659_v49, %v8272_v22  ;;  %v3259_v23 = vsub.f32 %v8659_v49, %v8278_v57  ;;  %v5487_v10 = vunpack.i.l.bf16 %v11016_v17  ;;  %v11017_v63 = vld [vmem:[#allocation147_spill] sm:$0xff]  ;;  %v3470_v49 = vmax.f32 %v3396_v56, 0.0 }
 0x382   : > { %10991 = vst [vmem:[#allocation37_spill] sm:$0xff] %v8925_v8  ;;  %v8954_v8 = vmul.f32 %v5620_v5, %v3489_v40  ;;  %v8978_v5 = vmul.f32 %v11011_v3, %v11010_v33  ;;  %3915 = vperm.xlu0 %5526, %v11015_v28   ;;  %v11021_v33 = vld [vmem:[#allocation35_spill] sm:$0xff]  ;;  %v9009_v61 = vpop.permute.xlu2 %3791 }
 0x383   : > { %10992 = vst [vmem:[#allocation45_spill] sm:$0xff] %v8928_v34  ;;  %v3487_v34 = vmax.f32 %v3413_v41, 0.0  ;;  %v11008_v41 = vld [vmem:[#allocation108_spill] sm:$0xff]  ;;  %v11022_v3 = vld [vmem:[#allocation91_spill] sm:$0xff]  ;;  %v3333_v56 = vand.u32 2147483647, %v3259_v23 }
 0x384   : > { %11002 = vst [vmem:[#allocation8_spill] sm:$0xff] %v8952_v37  ;;  %v11009_v1 = vsub.f32 1.0, %v11008_v41  ;;  %3899 = vperm.xlu1 %5524, %v11017_v63   ;;  %v11019_v41 = vld [vmem:[#allocation67_spill] sm:$0xff]  ;;  %v3471_v37 = vmax.f32 %v3397_v18, 0.0  ;;  %v3468_v63 = vmax.f32 %v3394_v4, 0.0  ;;  %v11037_v23 = vld [vmem:[#allocation170_spill] sm:$0xff] }
 0x385   : > { %11003 = vst [vmem:[#allocation151_spill] sm:$0xff] %v8954_v8  ;;  %v8967_v62 = vmul.f32 %v5616_v54, %v3487_v34  ;;  %v11012_v34 = vld [vmem:[#allocation124_spill] sm:$0xff]  ;;  %v5488_v54 = vunpack.i.h.bf16 %v11016_v17  ;;  %v8997_v8 = vadd.f32 %v11022_v3, %v11021_v33  ;;  %v11028_v17 = vld [vmem:[#allocation213_spill] sm:$0xff]  ;;  %v3332_v33 = vand.u32 2147483647, %v3258_v2 }
 0x386   : > { %11004 = vst [vmem:[#allocation158_spill] sm:$0xff] %v8965_v20  ;;  %v2674_v40 = vmax.f32 %v11009_v1, 0.0  ;;  %v11014_v60 = vpack.i.bf16 %v11012_v34, %v11013_v13  ;;  %v8993_v1 = vadd.f32 %v11019_v41, %v11018_v12  ;;  %v8999_v34 = vpop.permute.xlu0 %3795  ;;  %v11024_v13 = vld [vmem:[#allocation89_spill] sm:$0xff]  ;;  %v3334_v12 = vand.u32 2147483647, %v3260_v7  ;;  %v5594_v20 = vpop.permute.xlu1 %5593 }
 0x387   : > { %11005 = vst [vmem:[#allocation159_spill] sm:$0xff] %v8967_v62  ;;  %v3469_v62 = vmax.f32 %v3395_v39, 0.0  ;;  %v3335_v41 = vand.u32 2147483647, %v3261_v11  ;;  %v5596_v18 = vunpack.i.h.bf16 %v5594_v20  ;;  %v5595_v3 = vunpack.i.l.bf16 %v5594_v20 }
 0x388   : > { %11006 = vst [vmem:[#allocation120_spill] sm:$0xff] %v8969_v25  ;;  %5658 = vperm.xlu2 %5525, %v11014_v60   ;;  %v11025_v60 = vld [vmem:[#allocation104_spill] sm:$0xff]  ;;  %v2934_v24 = vmul.f32 %v5488_v54, %v11030_v47  ;;  %v3408_v11 = vsub.f32 1.0, %v3334_v12  ;;  %v11040_v47 = vld [vmem:[#allocation101_spill] sm:$0xff] }
 0x389   : > { %11007 = vst [vmem:[#allocation140_spill] sm:$0xff] %v8971_v38  ;;  %v9003_v28 = vadd.f32 %v11025_v60, %v11024_v13  ;;  %v11027_v38 = vld [vmem:[#allocation87_spill] sm:$0xff]  ;;  %v2935_v13 = vmul.f32 %v5488_v54, %v11031_v43  ;;  %v11032_v60 = vld [vmem:[#allocation69_spill] sm:$0xff]  ;;  %v9016_v4 = vmul.f32 %v5595_v3, %v3469_v62  ;;  %v9018_v7 = vmul.f32 %v5596_v18, %v3470_v49  ;;  %v11044_v62 = vld [vmem:[#allocation136_spill] sm:$0xff] }
 0x38a   : > { %11020 = vst [vmem:[#allocation54_spill] sm:$0xff] %v8993_v1  ;;  %v9007_v25 = vadd.f32 %v11028_v17, %v11027_v38  ;;  %v9014_v38 = vmul.f32 %v5595_v3, %v3468_v63  ;;  %v9020_v39 = vmul.f32 %v5596_v18, %v3471_v37  ;;  %v3409_v2 = vsub.f32 1.0, %v3335_v41  ;;  %v11038_v17 = vld [vmem:[#allocation56_spill] sm:$0xff]  ;;  %5688 = vperm.xlu0 %5526, %v11044_v62   ;;  %v11045_v49 = vld [vmem:[#allocation165_spill] sm:$0xff]  ;;  %v11046_v63 = vld [vmem:[#allocation47_spill] sm:$0xff] }
 0x38b   : > { %11023 = vst [vmem:[#allocation128_spill] sm:$0xff] %v8997_v8  ;;  %v2933_v8 = vmul.f32 %v5487_v10, %v2674_v40  ;;  %v9024_v20 = vadd.f32 %v11038_v17, %v11037_v23  ;;  %v3406_v54 = vsub.f32 1.0, %v3332_v33  ;;  %v3407_v40 = vsub.f32 1.0, %v3333_v56  ;;  %v11048_v12 = vld [vmem:[#allocation161_spill] sm:$0xff]  ;;  %v11049_v41 = vld [vmem:[#allocation42_spill] sm:$0xff]  ;;  %v11051_v3 = vld [vmem:[#allocation179_spill] sm:$0xff] }
 0x38c   : > { %11026 = vst [vmem:[#allocation153_spill] sm:$0xff] %v9003_v28  ;;  %v2932_v28 = vmul.f32 %v5487_v10, %v11032_v60  ;;  %v11043_v10 = vld [vmem:[#allocation160_spill] sm:$0xff]  ;;  %v9034_v37 = vadd.f32 %v11046_v63, %v11045_v49  ;;  %v9038_v18 = vadd.f32 %v11049_v41, %v11048_v12  ;;  %4275 = vperm.xlu1 %5524, %v11051_v3   ;;  %v11052_v60 = vld [vmem:[#allocation29_spill] sm:$0xff]  ;;  %v11054_v56 = vld [vmem:[#allocation30_spill] sm:$0xff] }
 0x38d   : > { %11029 = vst [vmem:[#allocation119_spill] sm:$0xff] %v9007_v25  ;;  %v11041_v25 = vld [vmem:[#allocation43_spill] sm:$0xff]  ;;  %v11055_v17 = vld [vmem:[#allocation193_spill] sm:$0xff]  ;;  %v11058_v62 = vld [vmem:[#allocation34_spill] sm:$0xff] }
 0x38e   : > { %11033 = vst [vmem:[#allocation152_spill] sm:$0xff] %v9014_v38  ;;  %v9028_v43 = vadd.f32 %v11041_v25, %v11040_v47  ;;  %v9042_v23 = vadd.f32 %v2932_v28, %v11052_v60  ;;  %v11053_v25 = vld [vmem:[#allocation99_spill] sm:$0xff]  ;;  %v9049_v47 = vadd.f32 %v11055_v17, %v11054_v56  ;;  %v9055_v63 = vpop.permute.xlu0 %3807  ;;  %v11062_v28 = vld [vmem:[#allocation206_spill] sm:$0xff]  ;;  %v11063_v60 = vld [vmem:[#allocation192_spill] sm:$0xff]  ;;  %v3482_v17 = vmax.f32 %v3408_v11, 0.0 }
 0x38f   : > { %11034 = vst [vmem:[#allocation17_spill] sm:$0xff] %v9016_v4  ;;  %v9045_v33 = vadd.f32 %v2934_v24, %v11053_v25  ;;  %v11060_v12 = vld [vmem:[#allocation71_spill] sm:$0xff]  ;;  %v9065_v24 = vadd.f32 %v11063_v60, %v11062_v28  ;;  %v11065_v25 = vld [vmem:[#allocation205_spill] sm:$0xff]  ;;  %v11066_v4 = vld [vmem:[#allocation200_spill] sm:$0xff]  ;;  %v3480_v38 = vmax.f32 %v3406_v54, 0.0  ;;  %v3481_v28 = vmax.f32 %v3407_v40, 0.0 }
 0x390   : > { %11035 = vst [vmem:[#allocation156_spill] sm:$0xff] %v9018_v7  ;;  %3903 = vperm.xlu2 %5525, %v11043_v10   ;;  %v11057_v10 = vld [vmem:[#allocation88_spill] sm:$0xff]  ;;  %v9058_v41 = vadd.f32 %v2933_v8, %v11060_v12  ;;  %v11061_v3 = vld [vmem:[#allocation39_spill] sm:$0xff]  ;;  %v9069_v56 = vadd.f32 %v11066_v4, %v11065_v25  ;;  %v11069_v7 = vld [vmem:[#allocation214_spill] sm:$0xff] }
 0x391   : > { %11036 = vst [vmem:[#allocation108_spill] sm:$0xff] %v9020_v39  ;;  %v9053_v49 = vadd.f32 %v11058_v62, %v11057_v10  ;;  %v9061_v39 = vadd.f32 %v2935_v13, %v11061_v3  ;;  %v5609_v10 = vpop.permute.xlu1 %5608  ;;  %v9071_v62 = vpop.permute.xlu2 %3803  ;;  %v11071_v12 = vld [vmem:[#allocation97_spill] sm:$0xff]  ;;  %v11072_v13 = vld [vmem:[#allocation44_spill] sm:$0xff]  ;;  %v11075_v4 = vld [vmem:[#allocation178_spill] sm:$0xff] }
 0x392   : > { %11039 = vst [vmem:[#allocation32_spill] sm:$0xff] %v9024_v20  ;;  %v9079_v3 = vadd.f32 %v11072_v13, %v11071_v12  ;;  %v5611_v60 = vunpack.i.h.bf16 %v5609_v10  ;;  %v11074_v1 = vld [vmem:[#allocation197_spill] sm:$0xff]  ;;  %v11077_v11 = vld [vmem:[#allocation92_spill] sm:$0xff] }
 0x393   : > { %11042 = vst [vmem:[#allocation124_spill] sm:$0xff] %v9028_v43  ;;  %v9083_v25 = vadd.f32 %v11075_v4, %v11074_v1  ;;  %v11090_v13 = vld [vmem:[#allocation12_spill] sm:$0xff]  ;;  %v11091_v4 = vld [vmem:[#allocation65_spill] sm:$0xff] }
 0x394   : > { %11047 = vst [vmem:[#allocation155_spill] sm:$0xff] %v9034_v37  ;;  %v11081_v37 = vld [vmem:[#allocation59_spill] sm:$0xff] }
 0x395   : > { %11050 = vst [vmem:[#allocation163_spill] sm:$0xff] %v9038_v18  ;;  %v11080_v18 = vld [vmem:[#allocation94_spill] sm:$0xff] }
 0x396   : > { %11056 = vst [vmem:[#allocation46_spill] sm:$0xff] %v9049_v47  ;;  %v3483_v47 = vmax.f32 %v3409_v2, 0.0  ;;  %v11078_v2 = vld [vmem:[#allocation93_spill] sm:$0xff] }
 0x397   : > { %11059 = vst [vmem:[#allocation147_spill] sm:$0xff] %v9053_v49  ;;  %v11068_v49 = vld [vmem:[#allocation207_spill] sm:$0xff] }
 0x398   : > { %11064 = vst [vmem:[#allocation202_spill] sm:$0xff] %v9065_v24  ;;  %v9075_v8 = vadd.f32 %v11069_v7, %v11068_v49  ;;  %v5610_v24 = vunpack.i.l.bf16 %v5609_v10  ;;  %v9091_v7 = vadd.f32 %v11081_v37, %v11080_v18  ;;  %v11083_v49 = vld [vmem:[#allocation196_spill] sm:$0xff]  ;;  %v9101_v10 = vmul.f32 %v5611_v60, %v3482_v17  ;;  %v11094_v37 = vld [vmem:[#allocation26_spill] sm:$0xff] }
 0x399   : > { %11067 = vst [vmem:[#allocation67_spill] sm:$0xff] %v9069_v56  ;;  %v9087_v56 = vadd.f32 %v11078_v2, %v11077_v11  ;;  %v9103_v1 = vmul.f32 %v5611_v60, %v3483_v47  ;;  %v9107_v11 = vadd.f32 %v11091_v4, %v11090_v13  ;;  %v11093_v2 = vld [vmem:[#allocation195_spill] sm:$0xff]  ;;  %v3938_v47 = vsub.f32 %v8999_v34, %v8272_v22  ;;  %v11103_v60 = vld [vmem:[#allocation162_spill] sm:$0xff]  ;;  %v11104_v13 = vld [vmem:[#allocation169_spill] sm:$0xff] }
 0x39a   : > { %11070 = vst [vmem:[#allocation35_spill] sm:$0xff] %v9075_v8  ;;  %v11084_v8 = vld [vmem:[#allocation199_spill] sm:$0xff]  ;;  %v9097_v54 = vmul.f32 %v5610_v24, %v3480_v38  ;;  %v9099_v40 = vmul.f32 %v5610_v24, %v3481_v28  ;;  %v9111_v18 = vadd.f32 %v11094_v37, %v11093_v2  ;;  %v11099_v38 = vld [vmem:[#allocation189_spill] sm:$0xff]  ;;  %3907 = vperm.xlu2 %5525, %v11103_v60   ;;  %v11105_v4 = vld [vmem:[#allocation174_spill] sm:$0xff] }
 0x39b   : > { %11073 = vst [vmem:[#allocation91_spill] sm:$0xff] %v9079_v3  ;;  %v9095_v12 = vadd.f32 %v11084_v8, %v11083_v49  ;;  %v11097_v8 = vld [vmem:[#allocation38_spill] sm:$0xff]  ;;  %5693 = vperm.xlu0 %5526, %v11104_v13   ;;  %v11106_v2 = vld [vmem:[#allocation61_spill] sm:$0xff]  ;;  %v11112_v17 = vld [vmem:[#allocation208_spill] sm:$0xff] }
 0x39c   : > { %11076 = vst [vmem:[#allocation89_spill] sm:$0xff] %v9083_v25  ;;  %v9128_v37 = vadd.f32 %v11106_v2, %v11105_v4  ;;  %v4712_v28 = vld [vmem:[%s5954_s8] sm:$0xf]  ;;  %v11115_v60 = vld [vmem:[#allocation100_spill] sm:$0xff] }
 0x39d   : > { %11079 = vst [vmem:[#allocation104_spill] sm:$0xff] %v9087_v56  ;;  %v11108_v56 = vld [vmem:[#allocation187_spill] sm:$0xff]  ;;  %v11116_v13 = vld [vmem:[#allocation180_spill] sm:$0xff] }
 0x39e   : > { %11082 = vst [vmem:[#allocation87_spill] sm:$0xff] %v9091_v7  ;;  %v11096_v7 = vld [vmem:[#allocation188_spill] sm:$0xff]  ;;  %v9144_v25 = vadd.f32 %v11116_v13, %v11115_v60  ;;  %v11128_v60 = vld [vmem:[#allocation98_spill] sm:$0xff] }
 0x39f   : > { %11085 = vst [vmem:[#allocation213_spill] sm:$0xff] %v9095_v12  ;;  %v9115_v49 = vadd.f32 %v11097_v8, %v11096_v7  ;;  %v11100_v12 = vld [vmem:[#allocation21_spill] sm:$0xff]  ;;  %v11109_v7 = vld [vmem:[#allocation83_spill] sm:$0xff]  ;;  %v11118_v4 = vld [vmem:[#allocation184_spill] sm:$0xff] }
 0x3a0   : > { %11086 = vst [vmem:[#allocation11_spill] sm:$0xff] %v9097_v54  ;;  %v9119_v24 = vadd.f32 %v11100_v12, %v11099_v38  ;;  %v9132_v8 = vadd.f32 %v11109_v7, %v11108_v56  ;;  %v3939_v12 = vsub.f32 %v8999_v34, %v8278_v57  ;;  %v11111_v38 = vld [vmem:[#allocation164_spill] sm:$0xff]  ;;  %v9148_v2 = vadd.f32 %v8708_v58, %v11118_v4  ;;  %v9150_v56 = vpop.permute.xlu0 %3819  ;;  %v11120_v7 = vld [vmem:[#allocation79_spill] sm:$0xff]  ;;  %v11129_v13 = vld [vmem:[#allocation82_spill] sm:$0xff]  ;;  %v3788_v4 = vpop.permute.xlu1 %3787 }
 0x3a1   : > { %11087 = vst [vmem:[#allocation63_spill] sm:$0xff] %v9099_v40  ;;  %5673 = vperm.xlu1 %5524, %v11111_v38   ;;  %v11121_v34 = vld [vmem:[#allocation55_spill] sm:$0xff]  ;;  %v11123_v38 = vld [vmem:[#allocation66_spill] sm:$0xff]  ;;  %v3936_v58 = vsub.f32 %v9009_v61, %v8272_v22  ;;  %v11161_v54 = vld [vmem:[#allocation168_spill] sm:$0xff] }
 0x3a2   : > { %11088 = vst [vmem:[#allocation69_spill] sm:$0xff] %v9101_v10  ;;  %v11124_v10 = vld [vmem:[#allocation194_spill] sm:$0xff] }
 0x3a3   : > { %11089 = vst [vmem:[#allocation170_spill] sm:$0xff] %v9103_v1  ;;  %v9154_v1 = vadd.f32 %v11121_v34, %v11120_v7  ;;  %v9158_v3 = vadd.f32 %v11124_v10, %v11123_v38  ;;  %v9172_v7 = vpop.permute.xlu2 %3815  ;;  %v11131_v34 = vld [vmem:[#allocation75_spill] sm:$0xff]  ;;  %v11132_v10 = vld [vmem:[#allocation210_spill] sm:$0xff] }
 0x3a4   : > { %11092 = vst [vmem:[#allocation56_spill] sm:$0xff] %v9107_v11  ;;  %v9176_v38 = vadd.f32 %v11132_v10, %v11131_v34  ;;  %v11141_v34 = vld [vmem:[#allocation209_spill] sm:$0xff] }
 0x3a5   : > { %11095 = vst [vmem:[#allocation101_spill] sm:$0xff] %v9111_v18  ;;  %v11140_v18 = vld [vmem:[#allocation78_spill] sm:$0xff] }
 0x3a6   : > { %11098 = vst [vmem:[#allocation43_spill] sm:$0xff] %v9115_v49  ;;  %v9192_v10 = vadd.f32 %v11141_v34, %v11140_v18  ;;  %v3942_v18 = vsub.f32 %v9071_v62, %v8272_v22  ;;  %v3945_v34 = vsub.f32 %v9055_v63, %v8278_v57 }
 0x3a7   : > { %11101 = vst [vmem:[#allocation160_spill] sm:$0xff] %v9119_v24  ;;  %v11113_v24 = vld [vmem:[#allocation53_spill] sm:$0xff] }
 0x3a8   : > { %11107 = vst [vmem:[#allocation136_spill] sm:$0xff] %v9128_v37  ;;  %v9140_v49 = vadd.f32 %v11113_v24, %v11112_v17  ;;  %v11126_v24 = vld [vmem:[#allocation70_spill] sm:$0xff]  ;;  %v4016_v40 = vand.u32 2147483647, %v3942_v18 }
 0x3a9   : > { %11110 = vst [vmem:[#allocation165_spill] sm:$0xff] %v9132_v8  ;;  %v9162_v17 = vadd.f32 %v8978_v5, %v11126_v24  ;;  %v11135_v5 = vld [vmem:[#allocation18_spill] sm:$0xff]  ;;  %v11143_v8 = vld [vmem:[#allocation175_spill] sm:$0xff] }
 0x3aa   : > { %11114 = vst [vmem:[#allocation47_spill] sm:$0xff] %v9140_v49  ;;  %v9166_v49 = vadd.f32 %v11129_v13, %v11128_v60  ;;  %v3934_v60 = vsub.f32 %v3788_v4, %v8272_v22  ;;  %v3935_v13 = vsub.f32 %v3788_v4, %v8278_v57  ;;  %v11147_v4 = vld [vmem:[#allocation13_spill] sm:$0xff] }
 0x3ab   : > { %11117 = vst [vmem:[#allocation161_spill] sm:$0xff] %v9144_v25  ;;  %v3944_v25 = vsub.f32 %v9055_v63, %v8272_v22  ;;  %v11158_v63 = vld [vmem:[#allocation102_spill] sm:$0xff] }
 0x3ac   : > { %11119 = vst [vmem:[#allocation42_spill] sm:$0xff] %v9148_v2  ;;  %v11138_v2 = vld [vmem:[#allocation60_spill] sm:$0xff] }
 0x3ad   : > { %4751 = vst [vmem:[#allocation1] ss:$4 sm:$0xff] %v4712_v28  ;;  %v3937_v28 = vsub.f32 %v9009_v61, %v8278_v57  ;;  %v4013_v61 = vand.u32 2147483647, %v3939_v12 }
 0x3ae   : > { %11122 = vst [vmem:[#allocation179_spill] sm:$0xff] %v9154_v1 }
 0x3af   : > { %11125 = vst [vmem:[#allocation29_spill] sm:$0xff] %v9158_v3  ;;  %v11134_v3 = vld [vmem:[#allocation76_spill] sm:$0xff]  ;;  %v4011_v11 = vand.u32 2147483647, %v3937_v28 }
 0x3b0   : > { %11127 = vst [vmem:[#allocation99_spill] sm:$0xff] %v9162_v17  ;;  %v9180_v24 = vadd.f32 %v11135_v5, %v11134_v3  ;;  %v4012_v17 = vand.u32 2147483647, %v3938_v47  ;;  %v11144_v3 = vld [vmem:[#allocation57_spill] sm:$0xff]  ;;  %v4008_v47 = vand.u32 2147483647, %v3934_v60  ;;  %v3943_v60 = vsub.f32 %v9071_v62, %v8278_v57 }
 0x3b1   : > { %11130 = vst [vmem:[#allocation30_spill] sm:$0xff] %v9166_v49  ;;  %v11137_v49 = vld [vmem:[#allocation80_spill] sm:$0xff]  ;;  %v9196_v5 = vadd.f32 %v11144_v3, %v11143_v8  ;;  %v5621_v62 = vunpack.i.h.bf16 %v8949_v16 }
 0x3b2   : > { %11133 = vst [vmem:[#allocation193_spill] sm:$0xff] %v9176_v38  ;;  %v9186_v1 = vadd.f32 %v11138_v2, %v11137_v49  ;;  %v11146_v38 = vld [vmem:[#allocation72_spill] sm:$0xff]  ;;  %v11149_v49 = vld [vmem:[#allocation190_spill] sm:$0xff]  ;;  %v4086_v8 = vsub.f32 1.0, %v4012_v17  ;;  %v4017_v16 = vand.u32 2147483647, %v3943_v60 }
 0x3b3   : > { %11136 = vst [vmem:[#allocation88_spill] sm:$0xff] %v9180_v24  ;;  %v4009_v24 = vand.u32 2147483647, %v3935_v13  ;;  %v9200_v37 = vadd.f32 %v11147_v4, %v11146_v38  ;;  %v11150_v2 = vld [vmem:[#allocation52_spill] sm:$0xff]  ;;  %v4082_v13 = vsub.f32 1.0, %v4008_v47  ;;  %v11152_v38 = vld [vmem:[#allocation131_spill] sm:$0xff] }
 0x3b4   : > { %11139 = vst [vmem:[#allocation34_spill] sm:$0xff] %v9186_v1  ;;  %v9204_v12 = vadd.f32 %v11150_v2, %v11149_v49  ;;  %v4010_v1 = vand.u32 2147483647, %v3936_v58  ;;  %5678 = vperm.xlu2 %5525, %v11152_v38   ;;  %v11153_v4 = vld [vmem:[#allocation129_spill] sm:$0xff]  ;;  %v4087_v49 = vsub.f32 1.0, %v4013_v61  ;;  %v11154_v58 = vld [vmem:[#allocation166_spill] sm:$0xff]  ;;  %v3950_v38 = vsub.f32 %v9150_v56, %v8272_v22  ;;  %v3832_v61 = vpop.permute.xlu0 %3831 }
 0x3b5   : > { %11142 = vst [vmem:[#allocation71_spill] sm:$0xff] %v9192_v10  ;;  %v4083_v3 = vsub.f32 1.0, %v4009_v24  ;;  %3863 = vperm.xlu0 %5526, %v11153_v4   ;;  %v4018_v2 = vand.u32 2147483647, %v3944_v25  ;;  %3919 = vperm.xlu1 %5524, %v11154_v58   ;;  %v11159_v17 = vld [vmem:[#allocation36_spill] sm:$0xff]  ;;  %v4156_v24 = vmax.f32 %v4082_v13, 0.0 }
 0x3b6   : > { %11145 = vst [vmem:[#allocation39_spill] sm:$0xff] %v9196_v5  ;;  %v4752_v28 = vld.sshfl [vmem:[#allocation1] sm:$0xff pattern:$0x73625140]  ;;  %v9221_v10 = vadd.f32 %v11159_v17, %v11158_v63  ;;  %v4084_v4 = vsub.f32 1.0, %v4010_v1  ;;  %v4085_v58 = vsub.f32 1.0, %v4011_v11  ;;  %v3949_v1 = vsub.f32 %v9172_v7, %v8278_v57 }
 0x3b7   : > { %11148 = vst [vmem:[#allocation206_spill] sm:$0xff] %v9200_v37  ;;  %v11156_v37 = vld [vmem:[#allocation14_spill] sm:$0xff]  ;;  %v4157_v47 = vmax.f32 %v4083_v3, 0.0  ;;  %4763 = vmatpush.bf16.xpose.msra.mxu0 %v4752_v28  ;;  %v4753_v25 = vld.sshfl [vmem:[#allocation1 + $0x8] sm:$0xff pattern:$0x73625140]  ;;  %5306 = vmatpush.bf16.xpose.msra.mxu2 %v4752_v28  ;;  %v4378_v13 = vmul.f32 %v5621_v62, %v4156_v24  ;;  %v3951_v11 = vsub.f32 %v9150_v56, %v8278_v57 }
 0x3b8   : > { %11151 = vst [vmem:[#allocation192_spill] sm:$0xff] %v9204_v12  ;;  %v11155_v12 = vld [vmem:[#allocation177_spill] sm:$0xff]  ;;  %4866 = vmatpush.bf16.xpose.msra.mxu1 %v4753_v25  ;;  %5307 = vmatpush.bf16.xpose.msra.mxu3 %v4753_v25  ;;  %v9226_v63 = vmax.f32 %v4086_v8, 0.0  ;;  %v9228_v17 = vmax.f32 %v4087_v49, 0.0  ;;  %v4092_v18 = vsub.f32 1.0, %v4018_v2  ;;  %v9238_v60 = vmax.f32 %v4084_v4, 0.0 }
 0x3b9   : > { %v9217_v5 = vadd.f32 %v11156_v37, %v11155_v12  ;;  %11160 = vst [vmem:[#allocation200_spill] sm:$0xff] %v9221_v10  ;;  %v4019_v37 = vand.u32 2147483647, %v3945_v34  ;;  %v3800_v12 = vpop.permute.xlu1 %3799  ;;  %v4379_v3 = vmul.f32 %v5621_v62, %v4157_v47  ;;  %v3948_v10 = vsub.f32 %v9172_v7, %v8272_v22 }
 0x3ba   : > { %v4024_v34 = vand.u32 2147483647, %v3950_v38  ;;  %v4452_v28 = vadd.f32 %v4378_v13, %v8612_v9  ;;  %v9240_v62 = vmax.f32 %v4085_v58, 0.0  ;;  %v4090_v49 = vsub.f32 1.0, %v4016_v40  ;;  %v11162_v13 = vld [vmem:[#allocation157_spill] sm:$0xff]  ;;  %v11163_v40 = vld [vmem:[#allocation211_spill] sm:$0xff] }
 0x3bb   : > { %11157 = vst [vmem:[#allocation205_spill] sm:$0xff] %v9217_v5  ;;  %v3828_v5 = vpop.permute.xlu2 %3827  ;;  %v4453_v8 = vadd.f32 %v4379_v3, %v8615_v19  ;;  %v4093_v24 = vsub.f32 1.0, %v4019_v37  ;;  %v4091_v47 = vsub.f32 1.0, %v4017_v16  ;;  %v3956_v25 = vsub.f32 %v3832_v61, %v8272_v22  ;;  %v11164_v16 = vld [vmem:[#allocation212_spill] sm:$0xff] }
 0x3bc   : > { %5683 = vperm.xlu2 %5525, %v11161_v54   ;;  %v4526_v7 = vmul.f32 0.25, %v4452_v28  ;;  %v4022_v56 = vand.u32 2147483647, %v3948_v10  ;;  %v4023_v2 = vand.u32 2147483647, %v3949_v1  ;;  %v3957_v9 = vsub.f32 %v3832_v61, %v8278_v57  ;;  %v3844_v58 = vpop.permute.xlu0 %3843 }
 0x3bd   : > { %v4527_v43 = vmul.f32 0.25, %v4453_v8  ;;  %v4025_v38 = vand.u32 2147483647, %v3951_v11  ;;  %3923 = vperm.xlu1 %5524, %v11162_v13   ;;  %v9246_v19 = vmax.f32 %v4092_v18, 0.0  ;;  %v4098_v4 = vsub.f32 1.0, %v4024_v34 }
 0x3be   : > { %v9249_v37 = vmul.f32 %v4526_v7, %v11163_v40  ;;  %v9254_v54 = vmax.f32 %v4093_v24, 0.0  ;;  %v3940_v10 = vsub.f32 %v3800_v12, %v8272_v22  ;;  %v3941_v1 = vsub.f32 %v3800_v12, %v8278_v57 }
 0x3bf   : > { %v9252_v3 = vmul.f32 %v4527_v43, %v11164_v16  ;;  %v3954_v61 = vsub.f32 %v3828_v5, %v8272_v22  ;;  %v9259_v18 = vmax.f32 %v4090_v49, 0.0  ;;  %v9261_v34 = vmax.f32 %v4091_v47, 0.0  ;;  %v11165_v47 = vld [vmem:[#allocation186_spill] sm:$0xff] }
 0x3c0   : > { %v3955_v8 = vsub.f32 %v3828_v5, %v8278_v57  ;;  %v4030_v7 = vand.u32 2147483647, %v3956_v25  ;;  %v4096_v13 = vsub.f32 1.0, %v4022_v56  ;;  %v4097_v43 = vsub.f32 1.0, %v4023_v2 }
 0x3c1   : > { %v3812_v11 = vpop.permute.xlu1 %3811  ;;  %v4099_v40 = vsub.f32 1.0, %v4025_v38  ;;  %v4031_v24 = vand.u32 2147483647, %v3957_v9  ;;  %v9264_v16 = vmax.f32 %v4098_v4, 0.0  ;;  %v3962_v12 = vsub.f32 %v3844_v58, %v8272_v22  ;;  %v11168_v38 = vld [vmem:[#allocation167_spill] sm:$0xff] }
 0x3c2   : > { %v3946_v50 = vsub.f32 %v3812_v11, %v8272_v22  ;;  %v3963_v0 = vsub.f32 %v3844_v58, %v8278_v57  ;;  %v4014_v20 = vand.u32 2147483647, %v3940_v10  ;;  %v4015_v49 = vand.u32 2147483647, %v3941_v1  ;;  %v11169_v1 = vld [vmem:[#allocation138_spill] sm:$0xff] }
 0x3c3   : > { %v3840_v28 = vpop.permute.xlu2 %3839  ;;  %v4028_v46 = vand.u32 2147483647, %v3954_v61  ;;  %v9271_v51 = vadd.f32 %v11166_v55, %v11165_v47  ;;  %v4029_v5 = vand.u32 2147483647, %v3955_v8  ;;  %v4104_v25 = vsub.f32 1.0, %v4030_v7  ;;  %v11170_v7 = vld [vmem:[#allocation84_spill] sm:$0xff] }
 0x3c4   : > { %v3947_v56 = vsub.f32 %v3812_v11, %v8278_v57  ;;  %v3960_v2 = vsub.f32 %v3840_v28, %v8272_v22  ;;  %3927 = vperm.xlu2 %5525, %v11168_v38   ;;  %v9276_v9 = vmax.f32 %v4096_v13, 0.0  ;;  %v9278_v4 = vmax.f32 %v4099_v40, 0.0  ;;  %v3856_v8 = vpop.permute.xlu0 %3855 }
 0x3c5   : > { %11167 = vst [vmem:[#allocation207_spill] sm:$0xff] %v9271_v51  ;;  %v4105_v58 = vsub.f32 1.0, %v4031_v24  ;;  %v3961_v10 = vsub.f32 %v3840_v28, %v8278_v57  ;;  %5698 = vperm.xlu1 %5524, %v11169_v1   ;;  %v4020_v61 = vand.u32 2147483647, %v3946_v50  ;;  %v4036_v55 = vand.u32 2147483647, %v3962_v12 }
 0x3c6   : > { %v4037_v47 = vand.u32 2147483647, %v3963_v0  ;;  %v11171_v51 = vld [vmem:[#allocation62_spill] sm:$0xff]  ;;  %v9286_v52 = vmax.f32 %v4097_v43, 0.0  ;;  %v4088_v38 = vsub.f32 1.0, %v4014_v20  ;;  %v4089_v13 = vsub.f32 1.0, %v4015_v49 }
 0x3c7   : > { %v9284_v11 = vadd.f32 %v11171_v51, %v11170_v7  ;;  %v4102_v14 = vsub.f32 1.0, %v4028_v46  ;;  %v4103_v24 = vsub.f32 1.0, %v4029_v5  ;;  %v9288_v35 = vmax.f32 %v4104_v25, 0.0 }
 0x3c8   : > { %v4021_v28 = vand.u32 2147483647, %v3947_v56  ;;  %v4034_v1 = vand.u32 2147483647, %v3960_v2  ;;  %v9290_v50 = vmax.f32 %v4105_v58, 0.0  ;;  %v3968_v12 = vsub.f32 %v3856_v8, %v8272_v22 }
 0x3c9   : > { %11172 = vst [vmem:[#allocation214_spill] sm:$0xff] %v9284_v11  ;;  %v3824_v40 = vpop.permute.xlu1 %3823  ;;  %v4035_v0 = vand.u32 2147483647, %v3961_v10  ;;  %v3969_v51 = vsub.f32 %v3856_v8, %v8278_v57  ;;  %v4094_v7 = vsub.f32 1.0, %v4020_v61  ;;  %v4110_v43 = vsub.f32 1.0, %v4036_v55  ;;  %v11176_v8 = vld [vmem:[#allocation171_spill] sm:$0xff] }
 0x3ca   : > { %11173 = vst [vmem:[#allocation97_spill] sm:$0xff] %v9288_v35  ;;  %v4111_v11 = vsub.f32 1.0, %v4037_v47  ;;  %v3952_v20 = vsub.f32 %v3824_v40, %v8272_v22  ;;  %v9295_v46 = vmax.f32 %v4088_v38, 0.0  ;;  %v9297_v49 = vmax.f32 %v4089_v13, 0.0  ;;  %v11179_v13 = vld [vmem:[#allocation173_spill] sm:$0xff] }
 0x3cb   : > { %v3852_v48 = vpop.permute.xlu2 %3851  ;;  %11174 = vst [vmem:[#allocation44_spill] sm:$0xff] %v9290_v50  ;;  %v3953_v5 = vsub.f32 %v3824_v40, %v8278_v57  ;;  %v9301_v56 = vmax.f32 %v4102_v14, 0.0  ;;  %v4095_v2 = vsub.f32 1.0, %v4021_v28  ;;  %v4108_v58 = vsub.f32 1.0, %v4034_v1  ;;  %v11178_v50 = vld [vmem:[#allocation172_spill] sm:$0xff] }
 0x3cc   : > { %v3966_v25 = vsub.f32 %v3852_v48, %v8272_v22  ;;  %v3967_v10 = vsub.f32 %v3852_v48, %v8278_v57  ;;  %3931 = vperm.xlu2 %5525, %v11176_v8   ;;  %v9305_v61 = vmax.f32 %v4103_v24, 0.0  ;;  %v4109_v55 = vsub.f32 1.0, %v4035_v0  ;;  %v3868_v1 = vpop.permute.xlu0 %3867 }
 0x3cd   : > { %11175 = vst [vmem:[#allocation197_spill] sm:$0xff] %v9301_v56  ;;  %v4042_v47 = vand.u32 2147483647, %v3968_v12  ;;  %v4043_v38 = vand.u32 2147483647, %v3969_v51  ;;  %v11180_v35 = vpack.i.bf16 %v11178_v50, %v11179_v13  ;;  %v9310_v40 = vmax.f32 %v4094_v7, 0.0 }
 0x3ce   : > { %11177 = vst [vmem:[#allocation178_spill] sm:$0xff] %v9305_v61  ;;  %v9312_v26 = vmax.f32 %v4110_v43, 0.0  ;;  %v9314_v14 = vmax.f32 %v4111_v11, 0.0  ;;  %v4026_v28 = vand.u32 2147483647, %v3952_v20  ;;  %v3974_v0 = vsub.f32 %v3868_v1, %v8272_v22 }
 0x3cf   : > { %5703 = vperm.xlu1 %5524, %v11180_v35   ;;  %11181 = vst [vmem:[#allocation92_spill] sm:$0xff] %v9310_v40  ;;  %v4027_v48 = vand.u32 2147483647, %v3953_v5  ;;  %v4040_v56 = vand.u32 2147483647, %v3966_v25  ;;  %v3975_v12 = vsub.f32 %v3868_v1, %v8278_v57  ;;  %v9318_v51 = vmax.f32 %v4095_v2, 0.0 }
 0x3d0   : > { %11182 = vst [vmem:[#allocation93_spill] sm:$0xff] %v9312_v26  ;;  %v9320_v50 = vmax.f32 %v4108_v58, 0.0  ;;  %v4041_v35 = vand.u32 2147483647, %v3967_v10  ;;  %v4116_v43 = vsub.f32 1.0, %v4042_v47  ;;  %v4117_v13 = vsub.f32 1.0, %v4043_v38 }
 0x3d1   : > { %11183 = vst [vmem:[#allocation94_spill] sm:$0xff] %v9314_v14  ;;  %v3836_v8 = vpop.permute.xlu1 %3835  ;;  %v4048_v11 = vand.u32 2147483647, %v3974_v0  ;;  %v4049_v14 = vand.u32 2147483647, %v3975_v12  ;;  %v9322_v20 = vmax.f32 %v4109_v55, 0.0 }
 0x3d2   : > { %11184 = vst [vmem:[#allocation59_spill] sm:$0xff] %v9320_v50  ;;  %v4100_v5 = vsub.f32 1.0, %v4026_v28  ;;  %v4101_v40 = vsub.f32 1.0, %v4027_v48  ;;  %v4114_v61 = vsub.f32 1.0, %v4040_v56  ;;  %v3958_v2 = vsub.f32 %v3836_v8, %v8272_v22  ;;  %v11186_v10 = vld [vmem:[#allocation115_spill] sm:$0xff]  ;;  %v11188_v12 = vld [vmem:[#allocation176_spill] sm:$0xff] }
 0x3d3   : > { %v5624_v24 = vpop.permute.xlu2 %5623  ;;  %11185 = vst [vmem:[#allocation196_spill] sm:$0xff] %v9322_v20  ;;  %v4122_v1 = vsub.f32 1.0, %v4048_v11  ;;  %v3959_v58 = vsub.f32 %v3836_v8, %v8278_v57  ;;  %v11187_v47 = vld [vmem:[#allocation31_spill] sm:$0xff]  ;;  %v4123_v0 = vsub.f32 1.0, %v4049_v14  ;;  %v4115_v55 = vsub.f32 1.0, %v4041_v35 }
 0x3d4   : > { %v5625_v7 = vunpack.i.l.bf16 %v5624_v24  ;;  %4307 = vperm.xlu2 %5525, %v11188_v12   ;;  %v9331_v28 = vmax.f32 %v4116_v43, 0.0  ;;  %v9335_v48 = vmax.f32 %v4100_v5, 0.0  ;;  %v5626_v56 = vunpack.i.h.bf16 %v5624_v24 }
 0x3d5   : > { %v9339_v20 = vmax.f32 %v4101_v40, 0.0  ;;  %v4033_v43 = vand.u32 2147483647, %v3959_v58 }
 0x3d6   : > { %v4380_v25 = vmul.f32 %v5625_v7, %v9238_v60  ;;  %v4381_v26 = vmul.f32 %v5625_v7, %v9240_v62  ;;  %v9333_v60 = vmax.f32 %v4117_v13, 0.0  ;;  %v4196_v62 = vmax.f32 %v4122_v1, 0.0  ;;  %v9337_v7 = vpop.permute.xlu0 %5633 }
 0x3d7   : > { %v5635_v35 = vunpack.i.l.bf16 %v9337_v7  ;;  %v4197_v13 = vmax.f32 %v4123_v0, 0.0 }
 0x3d8   : > { %v4454_v50 = vadd.f32 %v4380_v25, %v11186_v10  ;;  %v4455_v38 = vadd.f32 %v4381_v26, %v11187_v47  ;;  %v9341_v25 = vmax.f32 %v4114_v61, 0.0  ;;  %v4032_v26 = vand.u32 2147483647, %v3958_v2  ;;  %v11190_v47 = vld [vmem:[#allocation41_spill] sm:$0xff] }
 0x3d9   : > { %v3848_v14 = vpop.permute.xlu1 %3847  ;;  %v4418_v1 = vmul.f32 %v5626_v56, %v4196_v62  ;;  %v4384_v24 = vmul.f32 %v5635_v35, %v9295_v46 }
 0x3da   : > { %v4528_v11 = vmul.f32 0.25, %v4454_v50  ;;  %v4529_v8 = vmul.f32 0.25, %v4455_v38  ;;  %11189 = vst [vmem:[#allocation199_spill] sm:$0xff] %v9341_v25  ;;  %v4385_v50 = vmul.f32 %v5635_v35, %v9297_v49  ;;  %v11191_v38 = vld [vmem:[#allocation49_spill] sm:$0xff]  ;;  %v3964_v2 = vsub.f32 %v3848_v14, %v8272_v22 }
 0x3db   : > { %v9343_v10 = vpop.permute.xlu2 %5628  ;;  %v3965_v12 = vsub.f32 %v3848_v14, %v8278_v57  ;;  %v4458_v0 = vadd.f32 %v4384_v24, %v8797_v29  ;;  %v9359_v35 = vmax.f32 %v4115_v55, 0.0  ;;  %v4107_v14 = vsub.f32 1.0, %v4033_v43 }
 0x3dc   : > { %v5631_v5 = vunpack.i.h.bf16 %v9343_v10  ;;  %v4602_v40 = vmul.f32 %v4528_v11, %v11190_v47  ;;  %v4603_v61 = vmul.f32 %v4529_v8, %v11191_v38  ;;  %v4459_v62 = vadd.f32 %v4385_v50, %v8800_v27  ;;  %v11192_v50 = vld [vmem:[#allocation20_spill] sm:$0xff] }
 0x3dd   : > { %v4106_v11 = vsub.f32 1.0, %v4032_v26  ;;  %v4419_v38 = vmul.f32 %v5626_v56, %v4197_v13  ;;  %v4038_v29 = vand.u32 2147483647, %v3964_v2  ;;  %v4492_v56 = vadd.f32 %v4418_v1, %v8956_v42 }
 0x3de   : > { %v4382_v25 = vmul.f32 %v5631_v5, %v9226_v63  ;;  %v4383_v58 = vmul.f32 %v5631_v5, %v9228_v17  ;;  %v4674_v46 = vpack.c.bf16 %v4602_v40, %v9249_v37  ;;  %v4675_v49 = vpack.c.bf16 %v4603_v61, %v9252_v3  ;;  %v9363_v27 = vpop.permute.xlu0 %5638 }
 0x3df   : > { %v4532_v63 = vmul.f32 0.25, %v4458_v0  ;;  %v4533_v17 = vmul.f32 0.25, %v4459_v62  ;;  %v4039_v5 = vand.u32 2147483647, %v3965_v12  ;;  %v5641_v26 = vunpack.i.h.bf16 %v9363_v27  ;;  %v11195_v62 = vld [vmem:[#allocation90_spill] sm:$0xff] }
 0x3e0   : > { %v4456_v8 = vadd.f32 %v4382_v25, %v8803_v44  ;;  %v4457_v47 = vadd.f32 %v4383_v58, %v8806_v31  ;;  %4764 = vmatmul.bf16.vlgmr.msra.gmra.mxu0 %v4674_v46  ;;  %4867 = vmatmul.bf16.vlgmr.msra.gmra.mxu1 %v4675_v49  ;;  %v11193_v25 = vld [vmem:[#allocation183_spill] sm:$0xff]  ;;  %v9377_v49 = vmax.f32 %v4106_v11, 0.0 }
 0x3e1   : > { %v3860_v3 = vpop.permute.xlu1 %3859  ;;  %v4606_v44 = vmul.f32 %v4532_v63, %v11192_v50  ;;  %v4607_v31 = vmul.f32 %v4533_v17, %v11193_v25  ;;  %v4386_v2 = vmul.f32 %v5641_v26, %v9259_v18  ;;  %v4387_v12 = vmul.f32 %v5641_v26, %v9261_v34  ;;  %v11194_v58 = vld [vmem:[#allocation19_spill] sm:$0xff] }
 0x3e2   : > { %v4530_v37 = vmul.f32 0.25, %v4456_v8  ;;  %v4531_v24 = vmul.f32 0.25, %v4457_v47  ;;  %v3970_v43 = vsub.f32 %v3860_v3, %v8272_v22  ;;  %v3971_v13 = vsub.f32 %v3860_v3, %v8278_v57 }
 0x3e3   : > { %v3880_v55 = vpop.permute.xlu2 %3879  ;;  %v4112_v8 = vsub.f32 1.0, %v4038_v29  ;;  %v4460_v63 = vadd.f32 %v4386_v2, %v8688_v59  ;;  %v4461_v17 = vadd.f32 %v4387_v12, %v8691_v36  ;;  %v4493_v34 = vadd.f32 %v4419_v38, %v8958_v15 }
 0x3e4   : > { %v3980_v40 = vsub.f32 %v3880_v55, %v8272_v22  ;;  %v3981_v61 = vsub.f32 %v3880_v55, %v8278_v57  ;;  %v4604_v0 = vmul.f32 %v4530_v37, %v11194_v58  ;;  %v4605_v46 = vmul.f32 %v4531_v24, %v11195_v62 }
 0x3e5   : > { %v4044_v42 = vand.u32 2147483647, %v3970_v43  ;;  %v4045_v55 = vand.u32 2147483647, %v3971_v13  ;;  %v9382_v26 = vmax.f32 %v4107_v14, 0.0  ;;  %v5636_v37 = vunpack.i.h.bf16 %v9337_v7 }
 0x3e6   : > { %v4054_v1 = vand.u32 2147483647, %v3980_v40  ;;  %v4055_v47 = vand.u32 2147483647, %v3981_v61  ;;  %v4676_v3 = vpack.c.bf16 %v4606_v44, %v4604_v0  ;;  %v4677_v18 = vpack.c.bf16 %v4607_v31, %v4605_v46  ;;  %v3888_v40 = vpop.permute.xlu0 %3887 }
 0x3e7   : > { %v4566_v24 = vmul.f32 0.25, %v4492_v56  ;;  %v4113_v29 = vsub.f32 1.0, %v4039_v5  ;;  %v9385_v25 = vmax.f32 %v4112_v8, 0.0  ;;  %v5630_v43 = vunpack.i.l.bf16 %v9343_v10 }
 0x3e8   : > { %v4128_v50 = vsub.f32 1.0, %v4054_v1  ;;  %v4129_v11 = vsub.f32 1.0, %v4055_v47  ;;  %v4118_v36 = vsub.f32 1.0, %v4044_v42  ;;  %v5640_v44 = vunpack.i.l.bf16 %v9363_v27 }
 0x3e9   : > { %v3872_v13 = vpop.permute.xlu1 %3871  ;;  %v3984_v15 = vsub.f32 %v3888_v40, %v8272_v22  ;;  %v9391_v14 = vmul.f32 %v4566_v24, %v9042_v23  ;;  %v4119_v38 = vsub.f32 1.0, %v4045_v55  ;;  %v4567_v61 = vmul.f32 0.25, %v4493_v34 }
 0x3ea   : > { %v4202_v59 = vmax.f32 %v4128_v50, 0.0  ;;  %v3976_v56 = vsub.f32 %v3872_v13, %v8272_v22  ;;  %v3977_v5 = vsub.f32 %v3872_v13, %v8278_v57  ;;  %v4203_v2 = vmax.f32 %v4129_v11, 0.0 }
 0x3eb   : > { %v3884_v31 = vpop.permute.xlu2 %3883  ;;  %v3985_v12 = vsub.f32 %v3888_v40, %v8278_v57  ;;  %v4534_v58 = vmul.f32 0.25, %v4460_v63  ;;  %v4535_v46 = vmul.f32 0.25, %v4461_v17  ;;  %v9397_v8 = vmax.f32 %v4113_v29, 0.0  ;;  %v11197_v17 = vld [vmem:[#allocation40_spill] sm:$0xff] }
 0x3ec   : > { %v4424_v10 = vmul.f32 %v5640_v44, %v4202_v59  ;;  %v4050_v0 = vand.u32 2147483647, %v3976_v56  ;;  %v4051_v27 = vand.u32 2147483647, %v3977_v5  ;;  %v3982_v62 = vsub.f32 %v3884_v31, %v8272_v22 }
 0x3ed   : > { %v9399_v23 = vmax.f32 %v4118_v36, 0.0  ;;  %v3983_v42 = vsub.f32 %v3884_v31, %v8278_v57  ;;  %v4058_v1 = vand.u32 2147483647, %v3984_v15  ;;  %v9402_v47 = vmax.f32 %v4119_v38, 0.0  ;;  %v11198_v31 = vld [vmem:[#allocation15_spill] sm:$0xff] }
 0x3ee   : > { %v4124_v55 = vsub.f32 1.0, %v4050_v0  ;;  %v4125_v50 = vsub.f32 1.0, %v4051_v27  ;;  %v9405_v34 = vmul.f32 %v4567_v61, %v9058_v41  ;;  %v4425_v63 = vmul.f32 %v5640_v44, %v4203_v2  ;;  %v3892_v13 = vpop.permute.xlu0 %3891 }
 0x3ef   : > { %11196 = vst [vmem:[#allocation12_spill] sm:$0xff] %v9402_v47  ;;  %v4498_v11 = vadd.f32 %v4424_v10, %v8871_v6  ;;  %v4059_v24 = vand.u32 2147483647, %v3985_v12  ;;  %v9409_v29 = vmul.f32 %v4534_v58, %v11197_v17  ;;  %v4056_v36 = vand.u32 2147483647, %v3982_v62 }
 0x3f0   : > { %4769 = vmatmul.bf16.gmra.mxu0 %v4676_v3  ;;  %4872 = vmatmul.bf16.gmra.mxu1 %v4677_v18  ;;  %v4198_v59 = vmax.f32 %v4124_v55, 0.0  ;;  %v4199_v40 = vmax.f32 %v4125_v50, 0.0  ;;  %v9412_v15 = vmul.f32 %v4535_v46, %v11198_v31  ;;  %v4057_v38 = vand.u32 2147483647, %v3983_v42 }
 0x3f1   : > { %v4132_v56 = vsub.f32 1.0, %v4058_v1  ;;  %v3876_v41 = vpop.permute.xlu1 %3875  ;;  %v3986_v6 = vsub.f32 %v3892_v13, %v8272_v22  ;;  %v3987_v3 = vsub.f32 %v3892_v13, %v8278_v57  ;;  %v4133_v10 = vsub.f32 1.0, %v4059_v24 }
 0x3f2   : > { %v4420_v18 = vmul.f32 %v5630_v43, %v4198_v59  ;;  %v4421_v44 = vmul.f32 %v5630_v43, %v4199_v40  ;;  %v3978_v61 = vsub.f32 %v3876_v41, %v8272_v22  ;;  %v3979_v2 = vsub.f32 %v3876_v41, %v8278_v57 }
 0x3f3   : > { %v9414_v5 = vpop.permute.xlu2 %5653  ;;  %v4060_v58 = vand.u32 2147483647, %v3986_v6  ;;  %v4061_v0 = vand.u32 2147483647, %v3987_v3  ;;  %v4130_v1 = vsub.f32 1.0, %v4056_v36  ;;  %v4131_v55 = vsub.f32 1.0, %v4057_v38 }
 0x3f4   : > { %v5655_v12 = vunpack.i.l.bf16 %v9414_v5  ;;  %v4052_v27 = vand.u32 2147483647, %v3978_v61  ;;  %v4053_v62 = vand.u32 2147483647, %v3979_v2  ;;  %v4494_v46 = vadd.f32 %v4420_v18, %v8961_v53 }
 0x3f5   : > { %v4495_v42 = vadd.f32 %v4421_v44, %v8963_v21  ;;  %v4134_v59 = vsub.f32 1.0, %v4060_v58  ;;  %v4499_v13 = vadd.f32 %v4425_v63, %v8873_v30  ;;  %v9426_v31 = vmax.f32 %v4132_v56, 0.0 }
 0x3f6   : > { %v4392_v50 = vmul.f32 %v5655_v12, %v9276_v9  ;;  %v4393_v43 = vmul.f32 %v5655_v12, %v9286_v52  ;;  %v4126_v17 = vsub.f32 1.0, %v4052_v27  ;;  %v4568_v40 = vmul.f32 0.25, %v4494_v46  ;;  %v9434_v38 = vpop.permute.xlu0 %5663 }
 0x3f7   : > { %v4569_v24 = vmul.f32 0.25, %v4495_v42  ;;  %v4127_v21 = vsub.f32 1.0, %v4053_v62  ;;  %v4135_v36 = vsub.f32 1.0, %v4061_v0  ;;  %v4204_v6 = vmax.f32 %v4130_v1, 0.0  ;;  %v11199_v42 = vld [vmem:[#allocation134_spill] sm:$0xff] }
 0x3f8   : > { %v9429_v41 = vadd.f32 %v4392_v50, %v8666_v45  ;;  %v9432_v53 = vadd.f32 %v4393_v43, %v8669_v32  ;;  %v4642_v52 = vmul.f32 %v4568_v40, %v9045_v33  ;;  %v9438_v3 = vmax.f32 %v4131_v55, 0.0  ;;  %v11201_v55 = vld [vmem:[#allocation106_spill] sm:$0xff] }
 0x3f9   : > { %v4643_v9 = vmul.f32 %v4569_v24, %v9061_v39  ;;  %v9440_v30 = vmax.f32 %v4133_v10, 0.0  ;;  %v9442_v63 = vpop.permute.xlu1 %5643  ;;  %v5665_v32 = vunpack.i.l.bf16 %v9434_v38  ;;  %v4200_v56 = vmax.f32 %v4126_v17, 0.0 }
 0x3fa   : > { %v4208_v18 = vmax.f32 %v4134_v59, 0.0  ;;  %v5645_v44 = vunpack.i.l.bf16 %v9442_v63  ;;  %v4572_v61 = vmul.f32 0.25, %v4498_v11  ;;  %v5656_v33 = vunpack.i.h.bf16 %v9414_v5  ;;  %v11200_v5 = vld [vmem:[#allocation48_spill] sm:$0xff] }
 0x3fb   : > { %v9444_v45 = vpop.permute.xlu2 %5658  ;;  %v4396_v2 = vmul.f32 %v5665_v32, %v9335_v48  ;;  %v4397_v10 = vmul.f32 %v5665_v32, %v9339_v20  ;;  %v4201_v12 = vmax.f32 %v4127_v21, 0.0  ;;  %v4209_v58 = vmax.f32 %v4135_v36, 0.0 }
 0x3fc   : > { %v5661_v39 = vunpack.i.h.bf16 %v9444_v45  ;;  %v4388_v0 = vmul.f32 %v5645_v44, %v9246_v19  ;;  %v4389_v27 = vmul.f32 %v5645_v44, %v9254_v54  ;;  %v4422_v48 = vmul.f32 %v5636_v37, %v4200_v56  ;;  %v11202_v19 = vld [vmem:[#allocation121_spill] sm:$0xff]  ;;  %v11205_v56 = vld [vmem:[#allocation123_spill] sm:$0xff] }
 0x3fd   : > { %v9457_v11 = vadd.f32 %v4396_v2, %v11199_v42  ;;  %v9460_v1 = vadd.f32 %v4397_v10, %v11200_v5  ;;  %v9464_v20 = vmul.f32 %v5656_v33, %v4208_v18  ;;  %v11203_v54 = vld [vmem:[#allocation113_spill] sm:$0xff]  ;;  %v4694_v59 = vpack.c.bf16 %v4642_v52, %v9391_v14  ;;  %v11211_v42 = vld [vmem:[#allocation92_spill] sm:$0xff] }
 0x3fe   : > { %v4394_v62 = vmul.f32 %v5661_v39, %v9264_v16  ;;  %v4395_v46 = vmul.f32 %v5661_v39, %v9278_v4  ;;  %v4462_v50 = vadd.f32 %v4388_v0, %v11201_v55  ;;  %v4463_v43 = vadd.f32 %v4389_v27, %v11202_v19  ;;  %v11204_v16 = vld [vmem:[#allocation144_spill] sm:$0xff]  ;;  %v9478_v21 = vpop.permute.xlu0 %5668  ;;  %v11207_v0 = vld [vmem:[#allocation197_spill] sm:$0xff] }
 0x3ff   : > { %v4695_v40 = vpack.c.bf16 %v4643_v9, %v9405_v34  ;;  %v9476_v24 = vmul.f32 %v5656_v33, %v4209_v58  ;;  %v9481_v18 = vmul.f32 %v4572_v61, %v11205_v56  ;;  %v4423_v44 = vmul.f32 %v5636_v37, %v4201_v12  ;;  %4814 = vmatmul.bf16.vlgmr.msra.gmra.mxu2 %v4694_v59  ;;  %v11206_v61 = vld [vmem:[#allocation24_spill] sm:$0xff]  ;;  %v11208_v37 = vld [vmem:[#allocation178_spill] sm:$0xff] }
 0x400   : > { %v9469_v17 = vadd.f32 %v4394_v62, %v11203_v54  ;;  %v9472_v4 = vadd.f32 %v4395_v46, %v11204_v16  ;;  %v4536_v36 = vmul.f32 0.25, %v4462_v50  ;;  %v4537_v32 = vmul.f32 0.25, %v4463_v43  ;;  %v11210_v62 = vld [vmem:[#allocation85_spill] sm:$0xff]  ;;  %v11212_v16 = vld [vmem:[#allocation130_spill] sm:$0xff] }
 0x401   : > { %v5646_v39 = vunpack.i.h.bf16 %v9442_v63  ;;  %4917 = vmatmul.bf16.vlgmr.msra.gmra.mxu3 %v4695_v40  ;;  %v5649_v14 = vpop.permute.xlu1 %5648  ;;  %v5671_v52 = vunpack.i.h.bf16 %v9478_v21  ;;  %v4496_v58 = vadd.f32 %v4422_v48, %v11206_v61  ;;  %v11209_v63 = vld [vmem:[#allocation111_spill] sm:$0xff]  ;;  %v4573_v19 = vmul.f32 0.25, %v4499_v13  ;;  %v11213_v48 = vld [vmem:[#allocation133_spill] sm:$0xff] }
 0x402   : > { %v5651_v9 = vunpack.i.h.bf16 %v5649_v14  ;;  %v4610_v27 = vmul.f32 %v4536_v36, %v11209_v63  ;;  %v4611_v46 = vmul.f32 %v4537_v32, %v11210_v62  ;;  %v5650_v50 = vunpack.i.l.bf16 %v5649_v14  ;;  %v11215_v36 = vld [vmem:[#allocation132_spill] sm:$0xff]  ;;  %v11216_v32 = vld [vmem:[#allocation95_spill] sm:$0xff] }
 0x403   : > { %v3904_v34 = vpop.permute.xlu2 %3903  ;;  %v4398_v7 = vmul.f32 %v5671_v52, %v11207_v0  ;;  %v4399_v12 = vmul.f32 %v5671_v52, %v11208_v37  ;;  %v4426_v56 = vmul.f32 %v5646_v39, %v4204_v6  ;;  %v4497_v0 = vadd.f32 %v4423_v44, %v11216_v32  ;;  %v11217_v6 = vld [vmem:[#allocation203_spill] sm:$0xff] }
 0x404   : > { %v3992_v33 = vsub.f32 %v3904_v34, %v8272_v22  ;;  %v3993_v10 = vsub.f32 %v3904_v34, %v8278_v57  ;;  %v4390_v5 = vmul.f32 %v5651_v9, %v11211_v42  ;;  %v4391_v55 = vmul.f32 %v5651_v9, %v9318_v51  ;;  %v11214_v34 = vld [vmem:[#allocation73_spill] sm:$0xff] }
 0x405   : > { %v9498_v59 = vadd.f32 %v4398_v7, %v11212_v16  ;;  %v9501_v40 = vadd.f32 %v4399_v12, %v11213_v48  ;;  %v4678_v13 = vpack.c.bf16 %v4610_v27, %v9409_v29  ;;  %v4679_v14 = vpack.c.bf16 %v4611_v46, %v9412_v15 }
 0x406   : > { %v4066_v43 = vand.u32 2147483647, %v3992_v33  ;;  %v4067_v54 = vand.u32 2147483647, %v3993_v10  ;;  %v4464_v52 = vadd.f32 %v4390_v5, %v11214_v34  ;;  %v9505_v61 = vadd.f32 %v4391_v55, %v11215_v36  ;;  %v3912_v10 = vpop.permute.xlu0 %3911 }
 0x407   : > { %v4427_v9 = vmul.f32 %v5646_v39, %v9438_v3  ;;  %v5670_v33 = vunpack.i.l.bf16 %v9478_v21  ;;  %v4570_v7 = vmul.f32 0.25, %v4496_v58  ;;  %v4647_v12 = vmul.f32 %v4573_v19, %v11217_v6  ;;  %4774 = vmatmul.bf16.gmra.mxu0 %v4678_v13  ;;  %4877 = vmatmul.bf16.gmra.mxu1 %v4679_v14  ;;  %v11220_v14 = vld [vmem:[#allocation154_spill] sm:$0xff] }
 0x408   : > { %v4140_v37 = vsub.f32 1.0, %v4066_v43  ;;  %v4141_v51 = vsub.f32 1.0, %v4067_v54  ;;  %v4428_v63 = vmul.f32 %v5650_v50, %v9426_v31  ;;  %v3996_v5 = vsub.f32 %v3912_v10, %v8272_v22  ;;  %v11218_v54 = vld [vmem:[#allocation74_spill] sm:$0xff] }
 0x409   : > { %v3896_v44 = vpop.permute.xlu1 %3895  ;;  %v3997_v29 = vsub.f32 %v3912_v10, %v8278_v57  ;;  %v4429_v58 = vmul.f32 %v5650_v50, %v9440_v30  ;;  %v4571_v46 = vmul.f32 0.25, %v4497_v0  ;;  %v4644_v16 = vmul.f32 %v4570_v7, %v11218_v54  ;;  %v11221_v30 = vld [vmem:[#allocation142_spill] sm:$0xff] }
 0x40a   : > { %v4214_v62 = vmax.f32 %v4140_v37, 0.0  ;;  %v3988_v15 = vsub.f32 %v3896_v44, %v8272_v22  ;;  %v3989_v3 = vsub.f32 %v3896_v44, %v8278_v57  ;;  %v4215_v31 = vmax.f32 %v4141_v51, 0.0  ;;  %v11219_v37 = vld [vmem:[#allocation145_spill] sm:$0xff]  ;;  %v11222_v7 = vld [vmem:[#allocation58_spill] sm:$0xff] }
 0x40b   : > { %v3908_v42 = vpop.permute.xlu2 %3907  ;;  %v4070_v27 = vand.u32 2147483647, %v3996_v5  ;;  %v10272_v48 = vunpack.i.l.bf16 %v9444_v45  ;;  %v4071_v32 = vand.u32 2147483647, %v3997_v29  ;;  %v9524_v13 = vadd.f32 %v4426_v56, %v11219_v37  ;;  %v11223_v5 = vld [vmem:[#allocation107_spill] sm:$0xff] }
 0x40c   : > { %v3994_v21 = vsub.f32 %v3908_v42, %v8272_v22  ;;  %v3995_v39 = vsub.f32 %v3908_v42, %v8278_v57  ;;  %v4062_v55 = vand.u32 2147483647, %v3988_v15  ;;  %v4063_v19 = vand.u32 2147483647, %v3989_v3  ;;  %v11226_v37 = vld [vmem:[#allocation59_spill] sm:$0xff] }
 0x40d   : > { %v4436_v34 = vmul.f32 %v5670_v33, %v4214_v62  ;;  %v9527_v10 = vadd.f32 %v4427_v9, %v11220_v14  ;;  %v9530_v50 = vadd.f32 %v4428_v63, %v11221_v30  ;;  %v4144_v0 = vsub.f32 1.0, %v4070_v27  ;;  %v11227_v30 = vld [vmem:[#allocation196_spill] sm:$0xff] }
 0x40e   : > { %v4068_v43 = vand.u32 2147483647, %v3994_v21  ;;  %v4069_v36 = vand.u32 2147483647, %v3995_v39  ;;  %v4136_v51 = vsub.f32 1.0, %v4062_v55  ;;  %v4137_v6 = vsub.f32 1.0, %v4063_v19  ;;  %v3916_v56 = vpop.permute.xlu0 %3915 }
 0x40f   : > { %v4696_v44 = vpack.c.bf16 %v9481_v18, %v4644_v16  ;;  %v4645_v42 = vmul.f32 %v4571_v46, %v11222_v7  ;;  %v9535_v62 = vadd.f32 %v4429_v58, %v11223_v5  ;;  %v4437_v29 = vmul.f32 %v5670_v33, %v4215_v31  ;;  %v11224_v21 = vld [vmem:[#allocation117_spill] sm:$0xff] }
 0x410   : > { %v4142_v15 = vsub.f32 1.0, %v4068_v43  ;;  %v4538_v3 = vmul.f32 0.25, %v4464_v52  ;;  %v9538_v9 = vadd.f32 %v4436_v34, %v11224_v21  ;;  %v4143_v39 = vsub.f32 1.0, %v4069_v36  ;;  %v11225_v36 = vld [vmem:[#allocation33_spill] sm:$0xff]  ;;  %v11229_v21 = vld [vmem:[#allocation110_spill] sm:$0xff] }
 0x411   : > { %v4145_v63 = vsub.f32 1.0, %v4071_v32  ;;  %4819 = vmatmul.bf16.gmra.mxu2 %v4696_v44  ;;  %v4697_v27 = vpack.c.bf16 %v4647_v12, %v4645_v42  ;;  %v3900_v55 = vpop.permute.xlu1 %3899  ;;  %v9540_v54 = vmax.f32 %v4144_v0, 0.0  ;;  %v3998_v33 = vsub.f32 %v3916_v56, %v8272_v22 }
 0x412   : > { %v3990_v18 = vsub.f32 %v3900_v55, %v8272_v22  ;;  %v3991_v58 = vsub.f32 %v3900_v55, %v8278_v57  ;;  %v4210_v31 = vmax.f32 %v4136_v51, 0.0  ;;  %v4211_v46 = vmax.f32 %v4137_v6, 0.0  ;;  %v11228_v6 = vld [vmem:[#allocation25_spill] sm:$0xff] }
 0x413   : > { %v5679_v19 = vpop.permute.xlu2 %5678  ;;  %4922 = vmatmul.bf16.gmra.mxu3 %v4697_v27  ;;  %v9545_v16 = vmax.f32 %v4142_v15, 0.0  ;;  %v3999_v34 = vsub.f32 %v3916_v56, %v8278_v57  ;;  %v4540_v12 = vmul.f32 0.25, %v9429_v41  ;;  %v4612_v32 = vmul.f32 %v4538_v3, %v11225_v36  ;;  %v11230_v41 = vld [vmem:[#allocation126_spill] sm:$0xff]  ;;  %v11231_v3 = vld [vmem:[#allocation9_spill] sm:$0xff] }
 0x414   : > { %v5681_v52 = vunpack.i.h.bf16 %v5679_v19  ;;  %v5680_v43 = vunpack.i.l.bf16 %v5679_v19  ;;  %v9555_v7 = vadd.f32 %v4437_v29, %v11228_v6  ;;  %v4064_v42 = vand.u32 2147483647, %v3990_v18  ;;  %v11232_v19 = vld [vmem:[#allocation135_spill] sm:$0xff] }
 0x415   : > { %v4065_v5 = vand.u32 2147483647, %v3991_v58  ;;  %v4072_v15 = vand.u32 2147483647, %v3998_v33  ;;  %v9575_v29 = vmax.f32 %v4145_v63, 0.0  ;;  %v11233_v33 = vld [vmem:[#allocation198_spill] sm:$0xff] }
 0x416   : > { %v4404_v14 = vmul.f32 %v5681_v52, %v11226_v37  ;;  %v4405_v0 = vmul.f32 %v5681_v52, %v11227_v30  ;;  %v4402_v44 = vmul.f32 %v5680_v43, %v9377_v49  ;;  %v4403_v51 = vmul.f32 %v5680_v43, %v9382_v26  ;;  %v5689_v58 = vpop.permute.xlu0 %5688 }
 0x417   : > { %v9571_v49 = vmul.f32 %v10272_v48, %v4210_v31  ;;  %v9573_v26 = vmax.f32 %v4143_v39, 0.0  ;;  %v4073_v18 = vand.u32 2147483647, %v3999_v34  ;;  %v4614_v43 = vmul.f32 %v4540_v12, %v11233_v33  ;;  %v11234_v31 = vld [vmem:[#allocation97_spill] sm:$0xff]  ;;  %v11235_v39 = vld [vmem:[#allocation44_spill] sm:$0xff]  ;;  %v11236_v34 = vld [vmem:[#allocation50_spill] sm:$0xff] }
 0x418   : > { %v9558_v56 = vadd.f32 %v4402_v44, %v11229_v21  ;;  %v9561_v27 = vadd.f32 %v4403_v51, %v11230_v41  ;;  %v9564_v55 = vadd.f32 %v4404_v14, %v11231_v3  ;;  %v9567_v52 = vadd.f32 %v4405_v0, %v11232_v19  ;;  %v11237_v19 = vld [vmem:[#allocation118_spill] sm:$0xff] }
 0x419   : > { %v4539_v36 = vmul.f32 0.25, %v9505_v61  ;;  %v4541_v37 = vmul.f32 0.25, %v9432_v53  ;;  %v4276_v14 = vpop.permute.xlu1 %4275  ;;  %v5691_v0 = vunpack.i.h.bf16 %v5689_v58  ;;  %v4138_v44 = vsub.f32 1.0, %v4064_v42  ;;  %v11238_v61 = vld [vmem:[#allocation143_spill] sm:$0xff]  ;;  %v11239_v53 = vld [vmem:[#allocation116_spill] sm:$0xff] }
 0x41a   : > { %v4139_v51 = vsub.f32 1.0, %v4065_v5  ;;  %v4400_v6 = vmul.f32 %v4276_v14, %v11234_v31  ;;  %v4401_v21 = vmul.f32 %v4276_v14, %v11235_v39  ;;  %v4146_v63 = vsub.f32 1.0, %v4072_v15 }
 0x41b   : > { %v9580_v30 = vpop.permute.xlu2 %5683  ;;  %v4680_v41 = vpack.c.bf16 %v4614_v43, %v4612_v32  ;;  %v4613_v3 = vmul.f32 %v4539_v36, %v11236_v34  ;;  %v4615_v12 = vmul.f32 %v4541_v37, %v11237_v19  ;;  %v4147_v33 = vsub.f32 1.0, %v4073_v18  ;;  %v11241_v37 = vld [vmem:[#allocation103_spill] sm:$0xff]  ;;  %v11246_v34 = vld [vmem:[#allocation146_spill] sm:$0xff] }
 0x41c   : > { %v4474_v2 = vadd.f32 %v4400_v6, %v11238_v61  ;;  %v4475_v48 = vadd.f32 %v4401_v21, %v11239_v53  ;;  %v4408_v47 = vmul.f32 %v5691_v0, %v9385_v25  ;;  %v4409_v5 = vmul.f32 %v5691_v0, %v9397_v8  ;;  %v11242_v25 = vld [vmem:[#allocation150_spill] sm:$0xff]  ;;  %v11243_v21 = vld [vmem:[#allocation93_spill] sm:$0xff] }
 0x41d   : > { %4779 = vmatmul.bf16.gmra.mxu0 %v4680_v41  ;;  %v4681_v42 = vpack.c.bf16 %v4615_v12, %v4613_v3  ;;  %v5690_v31 = vunpack.i.l.bf16 %v5689_v58  ;;  %v4574_v14 = vmul.f32 0.25, %v9524_v13  ;;  %v11240_v32 = vunpack.i.l.bf16 %v9444_v45  ;;  %v11244_v58 = vld [vmem:[#allocation94_spill] sm:$0xff] }
 0x41e   : > { %v4212_v43 = vmax.f32 %v4138_v44, 0.0  ;;  %v4213_v36 = vmax.f32 %v4139_v51, 0.0  ;;  %v5685_v18 = vunpack.i.l.bf16 %v9580_v30  ;;  %v9597_v6 = vadd.f32 %v4408_v47, %v11241_v37  ;;  %v9606_v51 = vpop.permute.xlu0 %5693  ;;  %v11247_v47 = vld [vmem:[#allocation125_spill] sm:$0xff]  ;;  %v11250_v37 = vld [vmem:[#allocation163_spill] sm:$0xff] }
 0x41f   : > { %v9593_v15 = vmul.f32 %v11240_v32, %v4211_v46  ;;  %4882 = vmatmul.bf16.gmra.mxu1 %v4681_v42  ;;  %v9600_v39 = vadd.f32 %v4409_v5, %v11242_v25  ;;  %v4406_v8 = vmul.f32 %v5690_v31, %v11243_v21  ;;  %v4407_v0 = vmul.f32 %v5690_v31, %v11244_v58  ;;  %v11245_v46 = vld [vmem:[#allocation32_spill] sm:$0xff] }
 0x420   : > { %v4220_v13 = vmax.f32 %v4146_v63, 0.0  ;;  %v4221_v41 = vmax.f32 %v4147_v33, 0.0  ;;  %v4576_v45 = vmul.f32 0.25, %v9530_v50  ;;  %v4648_v44 = vmul.f32 %v4574_v14, %v11245_v46  ;;  %v11248_v5 = vld [vmem:[#allocation124_spill] sm:$0xff]  ;;  %v11249_v14 = vld [vmem:[#allocation155_spill] sm:$0xff] }
 0x421   : > { %v9609_v3 = vadd.f32 %v4406_v8, %v11246_v34  ;;  %v9612_v19 = vadd.f32 %v4407_v0, %v11247_v47  ;;  %v4575_v12 = vmul.f32 0.25, %v9527_v10  ;;  %v4577_v61 = vmul.f32 0.25, %v9535_v62  ;;  %v5674_v53 = vpop.permute.xlu1 %5673 }
 0x422   : > { %v4442_v63 = vmul.f32 %v5685_v18, %v4220_v13  ;;  %v4443_v33 = vmul.f32 %v5685_v18, %v4221_v41  ;;  %v4650_v50 = vmul.f32 %v4576_v45, %v11248_v5  ;;  %v5675_v21 = vunpack.i.l.bf16 %v5674_v53 }
 0x423   : > { %v3928_v42 = vpop.permute.xlu2 %3927  ;;  %v4649_v32 = vmul.f32 %v4575_v12, %v11249_v14  ;;  %v4651_v25 = vmul.f32 %v4577_v61, %v11250_v37  ;;  %v11251_v58 = vunpack.i.h.bf16 %v9434_v38  ;;  %v5686_v18 = vunpack.i.h.bf16 %v9580_v30  ;;  %v11253_v61 = vld [vmem:[#allocation11_spill] sm:$0xff] }
 0x424   : > { %v4004_v31 = vsub.f32 %v3928_v42, %v8272_v22  ;;  %v4005_v8 = vsub.f32 %v3928_v42, %v8278_v57  ;;  %v4698_v13 = vpack.c.bf16 %v4650_v50, %v4648_v44  ;;  %v5676_v45 = vunpack.i.h.bf16 %v5674_v53 }
 0x425   : > { %v9623_v10 = vmul.f32 %v11251_v58, %v4212_v43  ;;  %v11252_v62 = vmov %v11251_v58  ;;  %v4699_v41 = vpack.c.bf16 %v4651_v25, %v4649_v32  ;;  %v9630_v47 = vmul.f32 0.25, %v4474_v2  ;;  %v11254_v43 = vld [vmem:[#allocation63_spill] sm:$0xff]  ;;  %v11255_v32 = vld [vmem:[#allocation10_spill] sm:$0xff] }
 0x426   : > { %v9627_v0 = vmul.f32 %v11252_v62, %v4213_v36  ;;  %v4078_v46 = vand.u32 2147483647, %v4004_v31  ;;  %v4079_v34 = vand.u32 2147483647, %v4005_v8  ;;  %v9632_v12 = vmul.f32 0.25, %v4475_v48  ;;  %4824 = vmatmul.bf16.gmra.mxu2 %v4698_v13  ;;  %v11257_v8 = vld [vmem:[#allocation54_spill] sm:$0xff] }
 0x427   : > { %v9635_v42 = vadd.f32 %v4442_v63, %v11253_v61  ;;  %v9638_v5 = vadd.f32 %v4443_v33, %v11254_v43  ;;  %4927 = vmatmul.bf16.gmra.mxu3 %v4699_v41  ;;  %v4438_v38 = vmul.f32 %v5675_v21, %v9545_v16  ;;  %v4439_v36 = vmul.f32 %v5675_v21, %v9573_v26  ;;  %v3864_v31 = vpop.permute.xlu0 %3863  ;;  %v11256_v21 = vld [vmem:[#allocation109_spill] sm:$0xff]  ;;  %v11259_v41 = vld [vmem:[#allocation152_spill] sm:$0xff] }
 0x428   : > { %v4152_v44 = vsub.f32 1.0, %v4078_v46  ;;  %v4542_v53 = vmul.f32 0.25, %v9469_v17  ;;  %v4153_v50 = vsub.f32 1.0, %v4079_v34  ;;  %v4544_v2 = vmul.f32 0.25, %v9457_v11  ;;  %v11258_v11 = vld [vmem:[#allocation128_spill] sm:$0xff] }
 0x429   : > { %v4543_v48 = vmul.f32 0.25, %v9472_v4  ;;  %v4545_v63 = vmul.f32 0.25, %v9460_v1  ;;  %v4440_v33 = vmul.f32 %v5676_v45, %v9540_v54  ;;  %v3920_v25 = vpop.permute.xlu1 %3919  ;;  %v3972_v26 = vsub.f32 %v3864_v31, %v8272_v22 }
 0x42a   : > { %v4226_v14 = vmax.f32 %v4152_v44, 0.0  ;;  %v4616_v37 = vmul.f32 %v4542_v53, %v11255_v32  ;;  %v4618_v17 = vmul.f32 %v4544_v2, %v11256_v21  ;;  %v4000_v4 = vsub.f32 %v3920_v25, %v8272_v22  ;;  %v11260_v53 = vld [vmem:[#allocation201_spill] sm:$0xff]  ;;  %v11262_v32 = vld [vmem:[#allocation204_spill] sm:$0xff] }
 0x42b   : > { %v9648_v16 = vpop.permute.xlu2 %3931  ;;  %v4617_v58 = vmul.f32 %v4543_v48, %v11257_v8  ;;  %v4619_v62 = vmul.f32 %v4545_v63, %v11258_v11  ;;  %v4441_v1 = vmul.f32 %v5676_v45, %v9575_v29  ;;  %v5696_v54 = vunpack.i.h.bf16 %v9606_v51  ;;  %v11261_v48 = vld [vmem:[#allocation149_spill] sm:$0xff] }
 0x42c   : > { %v4001_v13 = vsub.f32 %v3920_v25, %v8278_v57  ;;  %v4504_v46 = vadd.f32 %v9464_v20, %v11259_v41  ;;  %v4227_v34 = vmax.f32 %v4153_v50, 0.0  ;;  %v4682_v61 = vpack.c.bf16 %v4618_v17, %v4616_v37  ;;  %v11263_v17 = vld [vmem:[#allocation156_spill] sm:$0xff] }
 0x42d   : > { %v4683_v43 = vpack.c.bf16 %v4619_v62, %v4617_v58  ;;  %v4074_v44 = vand.u32 2147483647, %v4000_v4  ;;  %v9661_v2 = vadd.f32 %v4438_v38, %v11260_v53  ;;  %v9664_v63 = vadd.f32 %v4439_v36, %v11261_v48  ;;  %v11264_v58 = vld [vmem:[#allocation22_spill] sm:$0xff]  ;;  %v11266_v41 = vld [vmem:[#allocation56_spill] sm:$0xff] }
 0x42e   : > { %v9667_v21 = vadd.f32 %v4440_v33, %v11262_v32  ;;  %v4448_v29 = vmul.f32 %v5696_v54, %v4226_v14  ;;  %4784 = vmatmul.bf16.gmra.mxu0 %v4682_v61  ;;  %v4075_v45 = vand.u32 2147483647, %v4001_v13  ;;  %v4006_v25 = vsub.f32 %v9648_v16, %v8272_v22  ;;  %v11265_v4 = vld [vmem:[#allocation158_spill] sm:$0xff]  ;;  %v11268_v32 = vld [vmem:[#allocation17_spill] sm:$0xff] }
 0x42f   : > { %v3973_v20 = vsub.f32 %v3864_v31, %v8278_v57  ;;  %v4046_v50 = vand.u32 2147483647, %v3972_v26  ;;  %v5695_v37 = vunpack.i.l.bf16 %v9606_v51  ;;  %4887 = vmatmul.bf16.gmra.mxu1 %v4683_v43  ;;  %v4148_v38 = vsub.f32 1.0, %v4074_v44 }
 0x430   : > { %v4506_v36 = vadd.f32 %v9571_v49, %v11263_v17  ;;  %v4578_v8 = vmul.f32 0.25, %v4504_v46  ;;  %v9676_v33 = vadd.f32 %v4441_v1, %v11264_v58  ;;  %v4449_v14 = vmul.f32 %v5696_v54, %v4227_v34  ;;  %v11267_v54 = vld [vmem:[#allocation136_spill] sm:$0xff] }
 0x431   : > { %v4047_v11 = vand.u32 2147483647, %v3973_v20  ;;  %v4120_v62 = vsub.f32 1.0, %v4046_v50  ;;  %v9679_v13 = vadd.f32 %v4448_v29, %v11265_v4  ;;  %v4007_v31 = vsub.f32 %v9648_v16, %v8278_v57  ;;  %v3924_v43 = vpop.permute.xlu1 %3923  ;;  %v11269_v20 = vld [vmem:[#allocation108_spill] sm:$0xff] }
 0x432   : > { %v4580_v26 = vmul.f32 0.25, %v4506_v36  ;;  %v4652_v61 = vmul.f32 %v4578_v8, %v11266_v41  ;;  %v4149_v53 = vsub.f32 1.0, %v4075_v45  ;;  %v9684_v49 = vand.u32 2147483647, %v4006_v25  ;;  %v11271_v41 = vld [vmem:[#allocation193_spill] sm:$0xff] }
 0x433   : > { %v4308_v44 = vpop.permute.xlu2 %4307  ;;  %v4121_v46 = vsub.f32 1.0, %v4047_v11  ;;  %v4194_v1 = vmax.f32 %v4120_v62, 0.0  ;;  %v4222_v48 = vmax.f32 %v4148_v38, 0.0  ;;  %v4505_v29 = vadd.f32 %v9476_v24, %v11268_v32  ;;  %v11270_v38 = vld [vmem:[#allocation159_spill] sm:$0xff] }
 0x434   : > { %v4654_v34 = vmul.f32 %v4580_v26, %v11267_v54  ;;  %v4507_v50 = vadd.f32 %v9593_v15, %v11269_v20  ;;  %v4002_v17 = vsub.f32 %v3924_v43, %v8272_v22  ;;  %v4003_v36 = vsub.f32 %v3924_v43, %v8278_v57  ;;  %v11273_v22 = vld [vmem:[#allocation153_spill] sm:$0xff]  ;;  %v11274_v57 = vld [vmem:[#allocation119_spill] sm:$0xff] }
 0x435   : > { %v4195_v16 = vmax.f32 %v4121_v46, 0.0  ;;  %v4416_v8 = vmul.f32 %v4308_v44, %v4194_v1  ;;  %v4579_v25 = vmul.f32 0.25, %v4505_v29  ;;  %v4546_v11 = vmul.f32 0.25, %v9498_v59  ;;  %v11272_v46 = vld [vmem:[#allocation34_spill] sm:$0xff] }
 0x436   : > { %v4700_v45 = vpack.c.bf16 %v4654_v34, %v4652_v61  ;;  %v4581_v58 = vmul.f32 0.25, %v4507_v50  ;;  %v9695_v62 = vadd.f32 %v4449_v14, %v11270_v38  ;;  %v4223_v4 = vmax.f32 %v4149_v53, 0.0  ;;  %v11275_v53 = vld [vmem:[#allocation114_spill] sm:$0xff]  ;;  %v11276_v50 = vld [vmem:[#allocation147_spill] sm:$0xff] }
 0x437   : > { %v4076_v26 = vand.u32 2147483647, %v4002_v17  ;;  %v4077_v24 = vand.u32 2147483647, %v4003_v36  ;;  %v4653_v15 = vmul.f32 %v4579_v25, %v11271_v41  ;;  %v4620_v32 = vmul.f32 %v4546_v11, %v11273_v22  ;;  %v11279_v11 = vld [vmem:[#allocation122_spill] sm:$0xff]  ;;  %v11283_v22 = vld [vmem:[#allocation165_spill] sm:$0xff] }
 0x438   : > { %4829 = vmatmul.bf16.gmra.mxu2 %v4700_v45  ;;  %v4655_v54 = vmul.f32 %v4581_v58, %v11272_v46  ;;  %v4622_v61 = vmul.f32 %v9630_v47, %v11274_v57  ;;  %v9704_v43 = vmul.f32 %v5686_v18, %v4222_v48  ;;  %v9706_v59 = vand.u32 2147483647, %v4007_v31  ;;  %v11277_v31 = vld [vmem:[#allocation46_spill] sm:$0xff]  ;;  %v11281_v46 = vld [vmem:[#allocation148_spill] sm:$0xff]  ;;  %v11284_v57 = vld [vmem:[#allocation45_spill] sm:$0xff] }
 0x439   : > { %v4417_v14 = vmul.f32 %v4308_v44, %v4195_v16  ;;  %v4490_v1 = vadd.f32 %v4416_v8, %v11275_v53  ;;  %v4547_v20 = vmul.f32 0.25, %v9501_v40  ;;  %v4623_v17 = vmul.f32 %v9632_v12, %v11276_v50  ;;  %v5699_v36 = vpop.permute.xlu1 %5698  ;;  %v11278_v8 = vld [vmem:[#allocation37_spill] sm:$0xff] }
 0x43a   : > { %v4701_v34 = vpack.c.bf16 %v4655_v54, %v4653_v15  ;;  %v4684_v29 = vpack.c.bf16 %v4622_v61, %v4620_v32  ;;  %v9714_v47 = vmul.f32 %v5686_v18, %v4223_v4  ;;  %v4150_v45 = vsub.f32 1.0, %v4076_v26  ;;  %v11280_v26 = vld [vmem:[#allocation199_spill] sm:$0xff] }
 0x43b   : > { %v4151_v48 = vsub.f32 1.0, %v4077_v24  ;;  %v5701_v25 = vunpack.i.h.bf16 %v5699_v36  ;;  %v4621_v44 = vmul.f32 %v4547_v20, %v11277_v31  ;;  %v5700_v16 = vunpack.i.l.bf16 %v5699_v36 }
 0x43c   : > { %4932 = vmatmul.bf16.gmra.mxu3 %v4701_v34  ;;  %v4508_v58 = vadd.f32 %v9623_v10, %v11278_v8  ;;  %v4584_v40 = vmul.f32 0.25, %v9538_v9  ;;  %v4491_v38 = vadd.f32 %v4417_v14, %v11279_v11  ;;  %v9721_v12 = vmul.f32 0.25, %v4490_v1  ;;  %v11282_v10 = vld [vmem:[#allocation127_spill] sm:$0xff]  ;;  %v11286_v14 = vld [vmem:[#allocation141_spill] sm:$0xff]  ;;  %v11290_v11 = vld [vmem:[#allocation202_spill] sm:$0xff] }
 0x43d   : > { %v4412_v30 = vmul.f32 %v5701_v25, %v9331_v28  ;;  %v4413_v18 = vmul.f32 %v5701_v25, %v9333_v60  ;;  %v4685_v4 = vpack.c.bf16 %v4623_v17, %v4621_v44  ;;  %v4410_v24 = vmul.f32 %v5700_v16, %v11280_v26  ;;  %v11285_v60 = vld [vmem:[#allocation139_spill] sm:$0xff]  ;;  %v11288_v25 = vld [vmem:[#allocation161_spill] sm:$0xff] }
 0x43e   : > { %v4411_v41 = vmul.f32 %v5700_v16, %v9359_v35  ;;  %v4582_v15 = vmul.f32 0.25, %v4508_v58  ;;  %4789 = vmatmul.bf16.gmra.mxu0 %v4684_v29  ;;  %v4658_v32 = vmul.f32 %v4584_v40, %v11283_v22  ;;  %v4509_v28 = vadd.f32 %v9627_v0, %v11284_v57  ;;  %v11287_v35 = vld [vmem:[#allocation101_spill] sm:$0xff]  ;;  %v11289_v58 = vld [vmem:[#allocation47_spill] sm:$0xff] }
 0x43f   : > { %v9728_v54 = vadd.f32 %v4412_v30, %v11281_v46  ;;  %v9731_v9 = vadd.f32 %v4413_v18, %v11282_v10  ;;  %4892 = vmatmul.bf16.gmra.mxu1 %v4685_v4  ;;  %v4484_v61 = vadd.f32 %v4410_v24, %v11285_v60  ;;  %v4585_v34 = vmul.f32 0.25, %v9555_v7  ;;  %v11291_v30 = vld [vmem:[#allocation67_spill] sm:$0xff] }
 0x440   : > { %v9738_v53 = vadd.f32 %v4411_v41, %v11286_v14  ;;  %v4656_v1 = vmul.f32 %v4582_v15, %v11287_v35  ;;  %v4583_v29 = vmul.f32 0.25, %v4509_v28  ;;  %v4550_v20 = vmul.f32 0.25, %v9558_v56  ;;  %v11292_v18 = vld [vmem:[#allocation35_spill] sm:$0xff]  ;;  %v11296_v28 = vld [vmem:[#allocation137_spill] sm:$0xff]  ;;  %v11297_v14 = vld [vmem:[#allocation112_spill] sm:$0xff] }
 0x441   : > { %v4552_v50 = vmul.f32 0.25, %v9564_v55  ;;  %v4551_v17 = vmul.f32 0.25, %v9561_v27  ;;  %v4659_v0 = vmul.f32 %v4585_v34, %v11288_v25  ;;  %v9746_v31 = vpop.permute.xlu1 %5703  ;;  %v4553_v44 = vmul.f32 0.25, %v9567_v52  ;;  %v11293_v4 = vld [vmem:[#allocation91_spill] sm:$0xff] }
 0x442   : > { %v4702_v36 = vpack.c.bf16 %v4658_v32, %v4656_v1  ;;  %v4586_v16 = vmul.f32 0.25, %v9661_v2  ;;  %v4224_v8 = vmax.f32 %v4150_v45, 0.0  ;;  %v4657_v40 = vmul.f32 %v4583_v29, %v11289_v58  ;;  %v11294_v2 = vld [vmem:[#allocation12_spill] sm:$0xff]  ;;  %v11295_v32 = vld [vmem:[#allocation179_spill] sm:$0xff] }
 0x443   : > { %v5706_v7 = vunpack.i.h.bf16 %v9746_v31  ;;  %v4624_v56 = vmul.f32 %v4550_v20, %v11290_v11  ;;  %v4626_v55 = vmul.f32 %v4552_v50, %v11291_v30  ;;  %v4625_v27 = vmul.f32 %v4551_v17, %v11292_v18  ;;  %v11298_v1 = vld [vmem:[#allocation88_spill] sm:$0xff]  ;;  %v11299_v25 = vld [vmem:[#allocation71_spill] sm:$0xff]  ;;  %v11306_v30 = vld [vmem:[#allocation30_spill] sm:$0xff] }
 0x444   : > { %v4627_v26 = vmul.f32 %v4553_v44, %v11293_v4  ;;  %v4588_v24 = vmul.f32 0.25, %v9667_v21  ;;  %v4225_v41 = vmax.f32 %v4151_v48, 0.0  ;;  %v4703_v15 = vpack.c.bf16 %v4659_v0, %v4657_v40  ;;  %v11305_v40 = vld [vmem:[#allocation170_spill] sm:$0xff] }
 0x445   : > { %v4414_v52 = vmul.f32 %v5706_v7, %v9399_v23  ;;  %v4415_v45 = vmul.f32 %v5706_v7, %v11294_v2  ;;  %v4565_v46 = vmul.f32 0.25, %v4491_v38  ;;  %v4686_v10 = vpack.c.bf16 %v4626_v55, %v4624_v56 }
 0x446   : > { %v4687_v22 = vpack.c.bf16 %v4627_v26, %v4625_v27  ;;  %v9760_v57 = vmul.f32 %v4586_v16, %v11295_v32  ;;  %v9769_v21 = vmul.f32 %v4588_v24, %v11298_v1  ;;  %v4587_v48 = vmul.f32 0.25, %v9664_v63  ;;  %v11303_v16 = vld [vmem:[#allocation99_spill] sm:$0xff]  ;;  %v11307_v27 = vld [vmem:[#allocation205_spill] sm:$0xff]  ;;  %v11313_v1 = vld [vmem:[#allocation206_spill] sm:$0xff] }
 0x447   : > { %v9763_v60 = vadd.f32 %v4414_v52, %v11296_v28  ;;  %v9766_v35 = vadd.f32 %v4415_v45, %v11297_v14  ;;  %v4589_v23 = vmul.f32 0.25, %v9676_v33  ;;  %v4554_v38 = vmul.f32 0.25, %v9609_v3  ;;  %v11301_v3 = vld [vmem:[#allocation42_spill] sm:$0xff]  ;;  %v11308_v26 = vld [vmem:[#allocation207_spill] sm:$0xff]  ;;  %v11309_v52 = vld [vmem:[#allocation200_spill] sm:$0xff] }
 0x448   : > { %4834 = vmatmul.bf16.gmra.mxu2 %v4702_v36  ;;  %v4556_v34 = vmul.f32 0.25, %v9597_v6  ;;  %v4555_v29 = vmul.f32 0.25, %v9612_v19  ;;  %v4446_v20 = vmul.f32 %v5695_v37, %v4224_v8  ;;  %v4447_v50 = vmul.f32 %v5695_v37, %v4225_v41  ;;  %v11300_v36 = vld [vmem:[#allocation39_spill] sm:$0xff]  ;;  %v11302_v6 = vld [vmem:[#allocation29_spill] sm:$0xff]  ;;  %v11312_v28 = vld [vmem:[#allocation104_spill] sm:$0xff] }
 0x449   : > { %v4704_v17 = vpack.c.bf16 %v9769_v21, %v9760_v57  ;;  %v9783_v63 = vmul.f32 %v4587_v48, %v11299_v25  ;;  %v9786_v33 = vmul.f32 %v4589_v23, %v11300_v36  ;;  %v9789_v0 = vmul.f32 %v4554_v38, %v11301_v3  ;;  %v11304_v37 = vld [vmem:[#allocation69_spill] sm:$0xff]  ;;  %v11314_v23 = vld [vmem:[#allocation87_spill] sm:$0xff]  ;;  %v11318_v36 = vld [vmem:[#allocation192_spill] sm:$0xff] }
 0x44a   : > { %v9792_v19 = vmul.f32 %v4556_v34, %v11302_v6  ;;  %v4557_v44 = vmul.f32 0.25, %v9600_v39  ;;  %v9796_v51 = vmul.f32 %v4555_v29, %v11303_v16  ;;  %v4518_v8 = vadd.f32 %v9704_v43, %v11304_v37  ;;  %v11311_v32 = vld [vmem:[#allocation89_spill] sm:$0xff] }
 0x44b   : > { %v4590_v58 = vmul.f32 0.25, %v9635_v42  ;;  %v4519_v7 = vadd.f32 %v9714_v47, %v11305_v40  ;;  %v4705_v11 = vpack.c.bf16 %v9786_v33, %v9783_v63  ;;  %v4591_v55 = vmul.f32 0.25, %v9638_v5  ;;  %v11310_v5 = vld [vmem:[#allocation214_spill] sm:$0xff]  ;;  %v11316_v34 = vld [vmem:[#allocation213_spill] sm:$0xff]  ;;  %v11323_v40 = vld [vmem:[#allocation160_spill] sm:$0xff] }
 0x44c   : > { %4937 = vmatmul.bf16.gmra.mxu3 %v4703_v15  ;;  %v4688_v56 = vpack.c.bf16 %v9792_v19, %v9789_v0  ;;  %v9808_v39 = vmul.f32 %v4557_v44, %v11306_v30  ;;  %v4592_v18 = vmul.f32 0.25, %v4518_v8  ;;  %v4558_v4 = vmul.f32 0.25, %v4484_v61  ;;  %v11319_v6 = vld [vmem:[#allocation77_spill] sm:$0xff]  ;;  %v11321_v8 = vld [vmem:[#allocation28_spill] sm:$0xff]  ;;  %v11344_v33 = vld [vmem:[#allocation27_spill] sm:$0xff] }
 0x44d   : > { %v9812_v43 = vmul.f32 %v4590_v58, %v11307_v27  ;;  %v4593_v42 = vmul.f32 0.25, %v4519_v7  ;;  %v9817_v24 = vmul.f32 %v4591_v55, %v11308_v26  ;;  %v4560_v41 = vmul.f32 0.25, %v9728_v54  ;;  %v11322_v58 = vld [vmem:[#allocation181_spill] sm:$0xff]  ;;  %v11326_v26 = vld [vmem:[#allocation64_spill] sm:$0xff] }
 0x44e   : > { %v4689_v47 = vpack.c.bf16 %v9808_v39, %v9796_v51  ;;  %v4596_v15 = vmul.f32 0.25, %v9679_v13  ;;  %4794 = vmatmul.bf16.gmra.mxu0 %v4686_v10  ;;  %v9822_v2 = vmul.f32 %v4592_v18, %v11309_v52  ;;  %v9828_v57 = vmul.f32 %v4558_v4, %v11311_v32  ;;  %v11324_v18 = vld [vmem:[#allocation140_spill] sm:$0xff]  ;;  %v4715_v39 = vld [vmem:[#allocation2 + $0x10] sm:$0xff] }
 0x44f   : > { %v9825_v45 = vmul.f32 %v4593_v42, %v11310_v5  ;;  %v4559_v61 = vmul.f32 0.25, %v9738_v53  ;;  %4897 = vmatmul.bf16.gmra.mxu1 %v4687_v22  ;;  %v9832_v14 = vmul.f32 %v4560_v41, %v11312_v28  ;;  %v4561_v54 = vmul.f32 0.25, %v9731_v9  ;;  %v11315_v53 = vld [vmem:[#allocation43_spill] sm:$0xff]  ;;  %v11325_v42 = vld [vmem:[#allocation185_spill] sm:$0xff] }
 0x450   : > { %v9836_v13 = vmul.f32 %v4596_v15, %v11313_v1  ;;  %v4597_v10 = vmul.f32 0.25, %v9695_v62  ;;  %v4706_v21 = vpack.c.bf16 %v9822_v2, %v9812_v43  ;;  %v9848_v22 = vmul.f32 %v9721_v12, %v11315_v53  ;;  %v11317_v62 = vld [vmem:[#allocation120_spill] sm:$0xff]  ;;  %v11329_v5 = vld [vmem:[#allocation81_spill] sm:$0xff] }
 0x451   : > { %v4707_v48 = vpack.c.bf16 %v9825_v45, %v9817_v24  ;;  %v9844_v38 = vmul.f32 %v4559_v61, %v11314_v23  ;;  %v4690_v9 = vpack.c.bf16 %v9832_v14, %v9828_v57  ;;  %v9853_v29 = vmul.f32 %v4561_v54, %v11316_v34  ;;  %v11332_v54 = vld [vmem:[#allocation51_spill] sm:$0xff]  ;;  %v11333_v23 = vld [vmem:[#allocation16_spill] sm:$0xff] }
 0x452   : > { %v4520_v25 = vadd.f32 %v4446_v20, %v11317_v62  ;;  %v9857_v3 = vmul.f32 %v4597_v10, %v11318_v36  ;;  %v11320_v44 = vsub.f32 1.0, %v11319_v6  ;;  %v4154_v37 = vsub.f32 1.0, %v9684_v49  ;;  %v11328_v49 = vld [vmem:[#allocation86_spill] sm:$0xff]  ;;  %v11334_v53 = vld [vmem:[#allocation96_spill] sm:$0xff]  ;;  %v4733_v14 = vld [vmem:[#allocation2 + $0xa0] sm:$0xff] }
 0x453   : > { %v3034_v12 = vadd.f32 %v11322_v58, %v11321_v8  ;;  %v9865_v7 = vmul.f32 %v4565_v46, %v11323_v40  ;;  %v4155_v30 = vsub.f32 1.0, %v9706_v59  ;;  %v4691_v55 = vpack.c.bf16 %v9853_v29, %v9844_v38  ;;  %v11331_v59 = vld [vmem:[#allocation191_spill] sm:$0xff] }
 0x454   : > { %v2669_v16 = vmax.f32 %v11320_v44, 0.0  ;;  %v4594_v20 = vmul.f32 0.25, %v4520_v25  ;;  %v4521_v27 = vadd.f32 %v4447_v50, %v11324_v18  ;;  %v1301_v4 = vsub.f32 1.0, %v11325_v42  ;;  %v11336_v25 = vld [vmem:[#allocation23_spill] sm:$0xff] }
 0x455   : > { %v11327_v41 = vsub.f32 1.0, %v11326_v26  ;;  %v1336_v52 = vsub.f32 1.0, %v11328_v49  ;;  %v11330_v32 = vunpack.i.l.bf16 %v11329_v5  ;;  %v5705_v46 = vunpack.i.l.bf16 %v9746_v31 }
 0x456   : > { %v9878_v28 = vmul.f32 %v4594_v20, %v3034_v12  ;;  %v3035_v1 = vadd.f32 %v11332_v54, %v11331_v59  ;;  %v4595_v10 = vmul.f32 0.25, %v4521_v27  ;;  %v1337_v50 = vsub.f32 1.0, %v11333_v23  ;;  %v11342_v54 = vld [vmem:[#allocation151_spill] sm:$0xff] }
 0x457   : > { %v1374_v15 = vmax.f32 %v11327_v41, 0.0  ;;  %v2928_v61 = vmul.f32 %v11330_v32, %v2669_v16  ;;  %v11335_v34 = vunpack.i.l.bf16 %v11334_v53  ;;  %v11337_v36 = vsub.f32 1.0, %v11336_v25 }
 0x458   : > { %v4228_v44 = vmax.f32 %v4154_v37, 0.0  ;;  %v4229_v8 = vmax.f32 %v4155_v30, 0.0  ;;  %v4562_v16 = vmul.f32 0.25, %v9763_v60  ;;  %4839 = vmatmul.bf16.gmra.mxu2 %v4704_v17  ;;  %v4708_v31 = vpack.c.bf16 %v9836_v13, %v9878_v28  ;;  %v11340_v13 = vld [vmem:[#allocation105_spill] sm:$0xff]  ;;  %v11341_v28 = vld [vmem:[#allocation8_spill] sm:$0xff] }
 0x459   : > { %v1633_v62 = vmul.f32 %v11335_v34, %v1374_v15  ;;  %v2670_v6 = vmax.f32 %v11337_v36, 0.0  ;;  %v4669_v58 = vmul.f32 %v4595_v10, %v3035_v1  ;;  %v1375_v12 = vmax.f32 %v1301_v4, 0.0  ;;  %v11343_v1 = vld [vmem:[#allocation182_spill] sm:$0xff]  ;;  %v4714_v36 = vld [vmem:[#allocation2 + $0x8] sm:$0xff] }
 0x45a   : > { %v11338_v40 = vmov %v11330_v32  ;;  %v4450_v18 = vmul.f32 %v5705_v46, %v4228_v44  ;;  %v4451_v27 = vmul.f32 %v5705_v46, %v4229_v8  ;;  %v1410_v41 = vmax.f32 %v1336_v52, 0.0  ;;  %v4713_v32 = vld [vmem:[#allocation2] sm:$0xff] }
 0x45b   : > { %v2929_v20 = vmul.f32 %v11338_v40, %v2670_v6  ;;  %v4709_v42 = vpack.c.bf16 %v9857_v3, %v4669_v58  ;;  %v3002_v26 = vadd.f32 %v2928_v61, %v1633_v62  ;;  %v1411_v15 = vmax.f32 %v1337_v50, 0.0  ;;  %v4734_v40 = vld [vmem:[#allocation2 + $0xa8] sm:$0xff] }
 0x45c   : > { %v11339_v37 = vmov %v11335_v34  ;;  %v4563_v60 = vmul.f32 0.25, %v9766_v35  ;;  %4942 = vmatmul.bf16.gmra.mxu3 %v4705_v11  ;;  %v1669_v4 = vmul.f32 %v11340_v13, %v1410_v41  ;;  %v4524_v59 = vadd.f32 %v4450_v18, %v11341_v28 }
 0x45d   : > { %v1634_v30 = vmul.f32 %v11339_v37, %v1375_v12  ;;  %v4636_v17 = vmul.f32 %v4562_v16, %v3002_v26  ;;  %v1670_v49 = vmul.f32 %v11340_v13, %v1411_v15  ;;  %v4765_v5 = vpop.f32.mrf.mxu0  ;;  %v4868_v3 = vpop.f32.mrf.mxu1  ;;  %v4525_v35 = vadd.f32 %v4451_v27, %v11342_v54 }
 0x45e   : > { %v4869_v52 = vadd.f32 %v4868_v3, %v4765_v5  ;;  %v3038_v10 = vadd.f32 %v11343_v1, %v1669_v4  ;;  %4799 = vmatmul.bf16.gmra.mxu0 %v4688_v56  ;;  %v4598_v50 = vmul.f32 0.25, %v4524_v59  ;;  %v4719_v5 = vld [vmem:[#allocation2 + $0x30] sm:$0xff]  ;;  %v4720_v1 = vld [vmem:[#allocation2 + $0x38] sm:$0xff] }
 0x45f   : > { %v3003_v61 = vadd.f32 %v2929_v20, %v1634_v30  ;;  %v4692_v46 = vpack.c.bf16 %v9848_v22, %v4636_v17  ;;  %v3039_v11 = vadd.f32 %v11344_v33, %v1670_v49  ;;  %4902 = vmatmul.bf16.gmra.mxu1 %v4689_v47  ;;  %v4599_v22 = vmul.f32 0.25, %v4525_v35 }
 0x460   : > { %v4962_v23 = vadd.f32 %v4869_v52, %v4713_v32  ;;  %v4672_v34 = vmul.f32 %v4598_v50, %v3038_v10  ;;  %v4736_v52 = vld [vmem:[#allocation2 + $0xb8] sm:$0xff] }
 0x461   : > { %v4637_v63 = vmul.f32 %v4563_v60, %v3003_v61  ;;  %v4673_v62 = vmul.f32 %v4599_v22, %v3039_v11  ;;  %v4735_v60 = vld [vmem:[#allocation2 + $0xb0] sm:$0xff] }
 0x462   : > { %5000 = vst.msk [vmem:[#allocation2] sm:$0xff] %vm358_vm0, %v4962_v23  ;;  %v4737_v23 = vld [vmem:[#allocation2 + $0xc0] sm:$0xff] }
 0x463   : > { %v4693_v53 = vpack.c.bf16 %v9865_v7, %v4637_v63  ;;  %v4711_v58 = vpack.c.bf16 %v4673_v62, %v4673_v62 }
 0x465   : > { %v4767_v25 = vpop.f32.mrf.mxu0  ;;  %v4870_v0 = vpop.f32.mrf.mxu1 }
 0x466   : > { %v4871_v19 = vadd.f32 %v4870_v0, %v4767_v25 }
 0x468   : > { %4844 = vmatmul.bf16.gmra.mxu2 %v4706_v21  ;;  %v4963_v56 = vadd.f32 %v4871_v19, %v4714_v36  ;;  %v4716_v21 = vld [vmem:[#allocation2 + $0x18] sm:$0xff] }
 0x46a   : > { %5001 = vst.msk [vmem:[#allocation2 + $0x8] sm:$0xff] %vm358_vm0, %v4963_v56  ;;  %v4738_v56 = vld [vmem:[#allocation2 + $0xc8] sm:$0xff] }
 0x46c   : > { %4947 = vmatmul.bf16.gmra.mxu3 %v4707_v48 }
 0x46d   : > { %v4770_v51 = vpop.f32.mrf.mxu0  ;;  %v4873_v47 = vpop.f32.mrf.mxu1 }
 0x46e   : > { %v4874_v7 = vadd.f32 %v4873_v47, %v4770_v51  ;;  %4804 = vmatmul.bf16.gmra.mxu0 %v4690_v9  ;;  %v4710_v9 = vpack.c.bf16 %v4672_v34, %v4672_v34  ;;  %v4721_v34 = vld [vmem:[#allocation2 + $0x40] sm:$0xff] }
 0x46f   : > { %4907 = vmatmul.bf16.gmra.mxu1 %v4691_v55  ;;  %v4717_v55 = vld [vmem:[#allocation2 + $0x20] sm:$0xff] }
 0x470   : > { %v4964_v43 = vadd.f32 %v4874_v7, %v4715_v39  ;;  %v4722_v7 = vld [vmem:[#allocation2 + $0x48] sm:$0xff] }
 0x472   : > { %5002 = vst.msk [vmem:[#allocation2 + $0x10] sm:$0xff] %vm358_vm0, %v4964_v43 }
 0x475   : > { %v4772_v2 = vpop.f32.mrf.mxu0  ;;  %v4875_v6 = vpop.f32.mrf.mxu1 }
 0x476   : > { %v4876_v24 = vadd.f32 %v4875_v6, %v4772_v2 }
 0x478   : > { %4849 = vmatmul.bf16.gmra.mxu2 %v4708_v31  ;;  %v4965_v45 = vadd.f32 %v4876_v24, %v4716_v21 }
 0x47a   : > { %5003 = vst.msk [vmem:[#allocation2 + $0x18] sm:$0xff] %vm358_vm0, %v4965_v45 }
 0x47c   : > { %4952 = vmatmul.bf16.gmra.mxu3 %v4709_v42  ;;  %v4718_v42 = vld [vmem:[#allocation2 + $0x28] sm:$0xff] }
 0x47e   : > { %4809 = vmatmul.bf16.gmra.mxu0 %v4692_v46 }
 0x47f   : > { %4912 = vmatmul.bf16.gmra.mxu1 %v4693_v53 }
 0x482   : > { %v4815_v57 = vpop.f32.mrf.mxu2 }
 0x484   : > { %v4918_v48 = vpop.f32.mrf.mxu3  ;;  %v4775_v29 = vpop.f32.mrf.mxu0 }
 0x485   : > { %v4919_v38 = vadd.f32 %v4918_v48, %v4815_v57  ;;  %v4878_v44 = vpop.f32.mrf.mxu1  ;;  %v4723_v57 = vld [vmem:[#allocation2 + $0x50] sm:$0xff] }
 0x486   : > { %v4879_v16 = vadd.f32 %v4878_v44, %v4775_v29 }
 0x487   : > { %v4982_v8 = vadd.f32 %v4919_v38, %v4733_v14 }
 0x488   : > { %4854 = vmatmul.bf16.gmra.mxu2 %v4710_v9  ;;  %v4966_v31 = vadd.f32 %v4879_v16, %v4717_v55  ;;  %v4739_v9 = vld [vmem:[#allocation2 + $0xd0] sm:$0xff] }
 0x489   : > { %5020 = vst.msk [vmem:[#allocation2 + $0xa0] sm:$0xff] %vm358_vm0, %v4982_v8 }
 0x48a   : > { %5004 = vst.msk [vmem:[#allocation2 + $0x20] sm:$0xff] %vm358_vm0, %v4966_v31  ;;  %v4817_v12 = vpop.f32.mrf.mxu2 }
 0x48c   : > { %4957 = vmatmul.bf16.gmra.mxu3 %v4711_v58  ;;  %v4920_v20 = vpop.f32.mrf.mxu3  ;;  %v4777_v27 = vpop.f32.mrf.mxu0  ;;  %v4724_v58 = vld [vmem:[#allocation2 + $0x58] sm:$0xff] }
 0x48d   : > { %v4921_v18 = vadd.f32 %v4920_v20, %v4817_v12  ;;  %v4880_v26 = vpop.f32.mrf.mxu1 }
 0x48e   : > { %v4881_v15 = vadd.f32 %v4880_v26, %v4777_v27 }
 0x48f   : > { %v4983_v41 = vadd.f32 %v4921_v18, %v4734_v40  ;;  %v4740_v40 = vld [vmem:[#allocation2 + $0xd8] sm:$0xff] }
 0x490   : > { %v4967_v37 = vadd.f32 %v4881_v15, %v4718_v42  ;;  %v4725_v15 = vld [vmem:[#allocation2 + $0x60] sm:$0xff] }
 0x491   : > { %5021 = vst.msk [vmem:[#allocation2 + $0xa8] sm:$0xff] %vm358_vm0, %v4983_v41 }
 0x492   : > { %5005 = vst.msk [vmem:[#allocation2 + $0x28] sm:$0xff] %vm358_vm0, %v4967_v37 }
 0x494   : > { %v4820_v30 = vpop.f32.mrf.mxu2 }
 0x496   : > { %v4923_v17 = vpop.f32.mrf.mxu3 }
 0x497   : > { %v4924_v13 = vadd.f32 %v4923_v17, %v4820_v30 }
 0x499   : > { %v4984_v4 = vadd.f32 %v4924_v13, %v4735_v60  ;;  %v4741_v60 = vld [vmem:[#allocation2 + $0xe0] sm:$0xff] }
 0x49a   : > { %v4780_v49 = vpop.f32.mrf.mxu0 }
 0x49b   : > { %5022 = vst.msk [vmem:[#allocation2 + $0xb0] sm:$0xff] %vm358_vm0, %v4984_v4 }
 0x49c   : > { %v4883_v32 = vpop.f32.mrf.mxu1  ;;  %v4822_v3 = vpop.f32.mrf.mxu2 }
 0x49d   : > { %v4884_v61 = vadd.f32 %v4883_v32, %v4780_v49 }
 0x49e   : > { %v4925_v46 = vpop.f32.mrf.mxu3 }
 0x49f   : > { %v4968_v28 = vadd.f32 %v4884_v61, %v4719_v5  ;;  %v4926_v59 = vadd.f32 %v4925_v46, %v4822_v3  ;;  %v4726_v3 = vld [vmem:[#allocation2 + $0x68] sm:$0xff] }
 0x4a0   : > { %v4742_v46 = vld [vmem:[#allocation2 + $0xe8] sm:$0xff] }
 0x4a1   : > { %5006 = vst.msk [vmem:[#allocation2 + $0x30] sm:$0xff] %vm358_vm0, %v4968_v28  ;;  %v4985_v54 = vadd.f32 %v4926_v59, %v4736_v52 }
 0x4a2   : > { %v4782_v35 = vpop.f32.mrf.mxu0 }
 0x4a3   : > { %5023 = vst.msk [vmem:[#allocation2 + $0xb8] sm:$0xff] %vm358_vm0, %v4985_v54 }
 0x4a4   : > { %v4885_v10 = vpop.f32.mrf.mxu1 }
 0x4a5   : > { %v4886_v63 = vadd.f32 %v4885_v10, %v4782_v35 }
 0x4a7   : > { %v4969_v33 = vadd.f32 %v4886_v63, %v4720_v1  ;;  %v4727_v63 = vld [vmem:[#allocation2 + $0x70] sm:$0xff] }
 0x4a9   : > { %5007 = vst.msk [vmem:[#allocation2 + $0x38] sm:$0xff] %vm358_vm0, %v4969_v33  ;;  %v4825_v11 = vpop.f32.mrf.mxu2 }
 0x4aa   : > { %v4928_v50 = vpop.f32.mrf.mxu3 }
 0x4ab   : > { %v4929_v22 = vadd.f32 %v4928_v50, %v4825_v11  ;;  %v4785_v53 = vpop.f32.mrf.mxu0 }
 0x4ac   : > { %v4888_v62 = vpop.f32.mrf.mxu1 }
 0x4ad   : > { %v4986_v25 = vadd.f32 %v4929_v22, %v4737_v23  ;;  %v4889_v36 = vadd.f32 %v4888_v62, %v4785_v53  ;;  %v4743_v23 = vld [vmem:[#allocation2 + $0xf0] sm:$0xff] }
 0x4af   : > { %5024 = vst.msk [vmem:[#allocation2 + $0xc0] sm:$0xff] %vm358_vm0, %v4986_v25  ;;  %v4970_v0 = vadd.f32 %v4889_v36, %v4721_v34  ;;  %v4728_v36 = vld [vmem:[#allocation2 + $0x78] sm:$0xff] }
 0x4b1   : > { %5008 = vst.msk [vmem:[#allocation2 + $0x40] sm:$0xff] %vm358_vm0, %v4970_v0  ;;  %v4827_v19 = vpop.f32.mrf.mxu2 }
 0x4b2   : > { %v4930_v51 = vpop.f32.mrf.mxu3 }
 0x4b3   : > { %v4931_v39 = vadd.f32 %v4930_v51, %v4827_v19  ;;  %v4787_v47 = vpop.f32.mrf.mxu0 }
 0x4b4   : > { %v4890_v43 = vpop.f32.mrf.mxu1 }
 0x4b5   : > { %v4987_v2 = vadd.f32 %v4931_v39, %v4738_v56  ;;  %v4891_v21 = vadd.f32 %v4890_v43, %v4787_v47  ;;  %v4744_v56 = vld [vmem:[#allocation2 + $0xf8] sm:$0xff] }
 0x4b7   : > { %5025 = vst.msk [vmem:[#allocation2 + $0xc8] sm:$0xff] %vm358_vm0, %v4987_v2  ;;  %v4971_v6 = vadd.f32 %v4891_v21, %v4722_v7  ;;  %v4729_v21 = vld [vmem:[#allocation2 + $0x80] sm:$0xff] }
 0x4b9   : > { %5009 = vst.msk [vmem:[#allocation2 + $0x48] sm:$0xff] %vm358_vm0, %v4971_v6 }
 0x4bb   : > { %v4830_v24 = vpop.f32.mrf.mxu2  ;;  %v4790_v45 = vpop.f32.mrf.mxu0 }
 0x4bc   : > { %v4893_v14 = vpop.f32.mrf.mxu1 }
 0x4bd   : > { %v4894_v48 = vadd.f32 %v4893_v14, %v4790_v45  ;;  %v4745_v45 = vld [vmem:[#allocation2 + $0x100] sm:$0xff] }
 0x4bf   : > { %v4933_v38 = vpop.f32.mrf.mxu3  ;;  %v4972_v55 = vadd.f32 %v4894_v48, %v4723_v57 }
 0x4c0   : > { %v4934_v29 = vadd.f32 %v4933_v38, %v4830_v24 }
 0x4c1   : > { %5010 = vst.msk [vmem:[#allocation2 + $0x50] sm:$0xff] %vm358_vm0, %v4972_v55  ;;  %v4730_v55 = vld [vmem:[#allocation2 + $0x88] sm:$0xff] }
 0x4c2   : > { %v4988_v44 = vadd.f32 %v4934_v29, %v4739_v9 }
 0x4c3   : > { %v4832_v8 = vpop.f32.mrf.mxu2  ;;  %v4792_v16 = vpop.f32.mrf.mxu0 }
 0x4c4   : > { %5026 = vst.msk [vmem:[#allocation2 + $0xd0] sm:$0xff] %vm358_vm0, %v4988_v44  ;;  %v4895_v31 = vpop.f32.mrf.mxu1 }
 0x4c5   : > { %v4896_v12 = vadd.f32 %v4895_v31, %v4792_v16  ;;  %v4746_v16 = vld [vmem:[#allocation2 + $0x108] sm:$0xff] }
 0x4c7   : > { %v4935_v20 = vpop.f32.mrf.mxu3  ;;  %v4973_v27 = vadd.f32 %v4896_v12, %v4724_v58 }
 0x4c8   : > { %v4936_v18 = vadd.f32 %v4935_v20, %v4832_v8 }
 0x4c9   : > { %5011 = vst.msk [vmem:[#allocation2 + $0x58] sm:$0xff] %vm358_vm0, %v4973_v27  ;;  %v4731_v27 = vld [vmem:[#allocation2 + $0x90] sm:$0xff] }
 0x4ca   : > { %v4989_v42 = vadd.f32 %v4936_v18, %v4740_v40 }
 0x4cb   : > { %v4835_v26 = vpop.f32.mrf.mxu2  ;;  %v4795_v41 = vpop.f32.mrf.mxu0 }
 0x4cc   : > { %5027 = vst.msk [vmem:[#allocation2 + $0xd8] sm:$0xff] %vm358_vm0, %v4989_v42  ;;  %v4898_v37 = vpop.f32.mrf.mxu1 }
 0x4cd   : > { %v4899_v30 = vadd.f32 %v4898_v37, %v4795_v41  ;;  %v4747_v41 = vld [vmem:[#allocation2 + $0x110] sm:$0xff] }
 0x4cf   : > { %v4938_v17 = vpop.f32.mrf.mxu3  ;;  %v4974_v4 = vadd.f32 %v4899_v30, %v4725_v15 }
 0x4d0   : > { %v4939_v13 = vadd.f32 %v4938_v17, %v4835_v26 }
 0x4d1   : > { %5012 = vst.msk [vmem:[#allocation2 + $0x60] sm:$0xff] %vm358_vm0, %v4974_v4  ;;  %v4732_v4 = vld [vmem:[#allocation2 + $0x98] sm:$0xff] }
 0x4d2   : > { %v4990_v49 = vadd.f32 %v4939_v13, %v4741_v60 }
 0x4d3   : > { %v4837_v5 = vpop.f32.mrf.mxu2  ;;  %v4797_v32 = vpop.f32.mrf.mxu0 }
 0x4d4   : > { %5028 = vst.msk [vmem:[#allocation2 + $0xe0] sm:$0xff] %vm358_vm0, %v4990_v49  ;;  %v4900_v61 = vpop.f32.mrf.mxu1 }
 0x4d5   : > { %v4901_v52 = vadd.f32 %v4900_v61, %v4797_v32  ;;  %v4748_v32 = vld [vmem:[#allocation2 + $0x118] sm:$0xff] }
 0x4d7   : > { %v4940_v28 = vpop.f32.mrf.mxu3  ;;  %v4975_v54 = vadd.f32 %v4901_v52, %v4726_v3 }
 0x4d8   : > { %v4941_v59 = vadd.f32 %v4940_v28, %v4837_v5 }
 0x4d9   : > { %5013 = vst.msk [vmem:[#allocation2 + $0x68] sm:$0xff] %vm358_vm0, %v4975_v54 }
 0x4da   : > { %v4991_v35 = vadd.f32 %v4941_v59, %v4742_v46  ;;  %v4749_v59 = vld [vmem:[#allocation2 + $0x120] sm:$0x3f] }
 0x4db   : > { %v4840_v1 = vpop.f32.mrf.mxu2  ;;  %v4800_v10 = vpop.f32.mrf.mxu0 }
 0x4dc   : > { %5029 = vst.msk [vmem:[#allocation2 + $0xe8] sm:$0xff] %vm358_vm0, %v4991_v35  ;;  %v4903_v33 = vpop.f32.mrf.mxu1 }
 0x4dd   : > { %v4904_v11 = vadd.f32 %v4903_v33, %v4800_v10 }
 0x4df   : > { %v4943_v50 = vpop.f32.mrf.mxu3  ;;  %v4976_v53 = vadd.f32 %v4904_v11, %v4727_v63 }
 0x4e0   : > { %v4944_v22 = vadd.f32 %v4943_v50, %v4840_v1 }
 0x4e1   : > { %5014 = vst.msk [vmem:[#allocation2 + $0x70] sm:$0xff] %vm358_vm0, %v4976_v53 }
 0x4e2   : > { %v4992_v34 = vadd.f32 %v4944_v22, %v4743_v23 }
 0x4e3   : > { %v4842_v62 = vpop.f32.mrf.mxu2  ;;  %v4802_v25 = vpop.f32.mrf.mxu0 }
 0x4e4   : > { %5030 = vst.msk [vmem:[#allocation2 + $0xf0] sm:$0xff] %vm358_vm0, %v4992_v34  ;;  %v4905_v0 = vpop.f32.mrf.mxu1 }
 0x4e5   : > { %v4906_v19 = vadd.f32 %v4905_v0, %v4802_v25 }
 0x4e7   : > { %v4945_v51 = vpop.f32.mrf.mxu3  ;;  %v4977_v47 = vadd.f32 %v4906_v19, %v4728_v36 }
 0x4e8   : > { %v4946_v39 = vadd.f32 %v4945_v51, %v4842_v62 }
 0x4e9   : > { %5015 = vst.msk [vmem:[#allocation2 + $0x78] sm:$0xff] %vm358_vm0, %v4977_v47 }
 0x4ea   : > { %v4993_v7 = vadd.f32 %v4946_v39, %v4744_v56 }
 0x4eb   : > { %v4845_v43 = vpop.f32.mrf.mxu2  ;;  %v4805_v2 = vpop.f32.mrf.mxu0 }
 0x4ec   : > { %5031 = vst.msk [vmem:[#allocation2 + $0xf8] sm:$0xff] %vm358_vm0, %v4993_v7  ;;  %v4908_v6 = vpop.f32.mrf.mxu1 }
 0x4ed   : > { %v4909_v24 = vadd.f32 %v4908_v6, %v4805_v2 }
 0x4ef   : > { %v4948_v57 = vpop.f32.mrf.mxu3  ;;  %v4978_v48 = vadd.f32 %v4909_v24, %v4729_v21 }
 0x4f0   : > { %v4949_v14 = vadd.f32 %v4948_v57, %v4845_v43 }
 0x4f1   : > { %5016 = vst.msk [vmem:[#allocation2 + $0x80] sm:$0xff] %vm358_vm0, %v4978_v48 }
 0x4f2   : > { %v4994_v9 = vadd.f32 %v4949_v14, %v4745_v45 }
 0x4f3   : > { %v4847_v38 = vpop.f32.mrf.mxu2  ;;  %v4807_v29 = vpop.f32.mrf.mxu0 }
 0x4f4   : > { %5032 = vst.msk [vmem:[#allocation2 + $0x100] sm:$0xff] %vm358_vm0, %v4994_v9  ;;  %v4910_v44 = vpop.f32.mrf.mxu1 }
 0x4f5   : > { %v4911_v8 = vadd.f32 %v4910_v44, %v4807_v29 }
 0x4f7   : > { %v4950_v58 = vpop.f32.mrf.mxu3  ;;  %v4979_v12 = vadd.f32 %v4911_v8, %v4730_v55 }
 0x4f8   : > { %v4951_v31 = vadd.f32 %v4950_v58, %v4847_v38 }
 0x4f9   : > { %5017 = vst.msk [vmem:[#allocation2 + $0x88] sm:$0xff] %vm358_vm0, %v4979_v12 }
 0x4fa   : > { %v4995_v40 = vadd.f32 %v4951_v31, %v4746_v16 }
 0x4fb   : > { %v4850_v20 = vpop.f32.mrf.mxu2  ;;  %v4810_v18 = vpop.f32.mrf.mxu0 }
 0x4fc   : > { %5033 = vst.msk [vmem:[#allocation2 + $0x108] sm:$0xff] %vm358_vm0, %v4995_v40  ;;  %v4913_v42 = vpop.f32.mrf.mxu1 }
 0x4fd   : > { %v4914_v26 = vadd.f32 %v4913_v42, %v4810_v18 }
 0x4ff   : > { %v4953_v15 = vpop.f32.mrf.mxu3  ;;  %v4980_v30 = vadd.f32 %v4914_v26, %v4731_v27 }
 0x500   : > { %v4954_v37 = vadd.f32 %v4953_v15, %v4850_v20 }
 0x501   : > { %5018 = vst.msk [vmem:[#allocation2 + $0x90] sm:$0xff] %vm358_vm0, %v4980_v30 }
 0x502   : > { %v4996_v60 = vadd.f32 %v4954_v37, %v4747_v41 }
 0x503   : > { %v4852_v17 = vpop.f32.mrf.mxu2  ;;  %v4812_v13 = vpop.f32.mrf.mxu0 }
 0x504   : > { %5034 = vst.msk [vmem:[#allocation2 + $0x110] sm:$0xff] %vm358_vm0, %v4996_v60  ;;  %v4915_v49 = vpop.f32.mrf.mxu1 }
 0x505   : > { %v4916_v5 = vadd.f32 %v4915_v49, %v4812_v13 }
 0x507   : > { %v4955_v3 = vpop.f32.mrf.mxu3  ;;  %v4981_v52 = vadd.f32 %v4916_v5, %v4732_v4 }
 0x508   : > { %v4956_v61 = vadd.f32 %v4955_v3, %v4852_v17 }
 0x509   : > { %5019 = vst.msk [vmem:[#allocation2 + $0x98] sm:$0xff] %vm358_vm0, %v4981_v52 }
 0x50a   : > { %v4997_v46 = vadd.f32 %v4956_v61, %v4748_v32 }
 0x50b   : > { %v4855_v28 = vpop.f32.mrf.mxu2 }
 0x50c   : > { %5035 = vst.msk [vmem:[#allocation2 + $0x118] sm:$0xff] %vm358_vm0, %v4997_v46 }
 0x50f   : > { %v4958_v54 = vpop.f32.mrf.mxu3 }
 0x510   : > { %v4959_v35 = vadd.f32 %v4958_v54, %v4855_v28 }
 0x512   : > { %v4998_v1 = vadd.f32 %v4959_v35, %v4749_v59 }
 0x513   : > { %v4857_v10 = vpop.f32.mrf.mxu2 }
 0x514   : > { %5037 = vst.msk [vmem:[#allocation2 + $0x120] sm:$0x3f] %vm395_vm1, %v4998_v1 }
 0x517   : > { %v4960_v63 = vpop.f32.mrf.mxu3 }
 0x518 PF: > { %v5041_v33 = vld [vmem:[#allocation2] sm:$0xff]  ;;  %v5042_v11 = vld [vmem:[#allocation2 + $0x8] sm:$0xff]  ;;  %v5043_v23 = vld [vmem:[#allocation2 + $0x10] sm:$0xff] }
 0x519   : > { %5079 = vst.msk [vmem:[%s5910_s22] sm:$0xff] %vm358_vm0, %v5041_v33  ;;  %v5044_v50 = vld [vmem:[#allocation2 + $0x18] sm:$0xff]  ;;  %v5045_v22 = vld [vmem:[#allocation2 + $0x20] sm:$0xff]  ;;  %v5046_v53 = vld [vmem:[#allocation2 + $0x28] sm:$0xff] }
 0x51a   : > { %5080 = vst.msk [vmem:[%s5910_s22 + $0x8] sm:$0xff] %vm358_vm0, %v5042_v11  ;;  %v5047_v34 = vld [vmem:[#allocation2 + $0x30] sm:$0xff]  ;;  %v5048_v62 = vld [vmem:[#allocation2 + $0x38] sm:$0xff]  ;;  %v5049_v25 = vld [vmem:[#allocation2 + $0x40] sm:$0xff] }
 0x51b   : > { %5081 = vst.msk [vmem:[%s5910_s22 + $0x10] sm:$0xff] %vm358_vm0, %v5043_v23  ;;  %v5050_v36 = vld [vmem:[#allocation2 + $0x48] sm:$0xff]  ;;  %v5051_v0 = vld [vmem:[#allocation2 + $0x50] sm:$0xff]  ;;  %v5052_v19 = vld [vmem:[#allocation2 + $0x58] sm:$0xff] }
 0x51c   : > { %5082 = vst.msk [vmem:[%s5910_s22 + $0x18] sm:$0xff] %vm358_vm0, %v5044_v50  ;;  %v5053_v56 = vld [vmem:[#allocation2 + $0x60] sm:$0xff]  ;;  %v5054_v51 = vld [vmem:[#allocation2 + $0x68] sm:$0xff]  ;;  %v5055_v39 = vld [vmem:[#allocation2 + $0x70] sm:$0xff] }
 0x51d   : > { %5083 = vst.msk [vmem:[%s5910_s22 + $0x20] sm:$0xff] %vm358_vm0, %v5045_v22  ;;  %v5056_v47 = vld [vmem:[#allocation2 + $0x78] sm:$0xff]  ;;  %v5057_v7 = vld [vmem:[#allocation2 + $0x80] sm:$0xff]  ;;  %v5058_v43 = vld [vmem:[#allocation2 + $0x88] sm:$0xff] }
 0x51e   : > { %5084 = vst.msk [vmem:[%s5910_s22 + $0x28] sm:$0xff] %vm358_vm0, %v5046_v53  ;;  %v5059_v2 = vld [vmem:[#allocation2 + $0x90] sm:$0xff]  ;;  %v5060_v21 = vld [vmem:[#allocation2 + $0x98] sm:$0xff]  ;;  %v5061_v6 = vld [vmem:[#allocation2 + $0xa0] sm:$0xff] }
 0x51f   : > { %5085 = vst.msk [vmem:[%s5910_s22 + $0x30] sm:$0xff] %vm358_vm0, %v5047_v34  ;;  %v5062_v24 = vld [vmem:[#allocation2 + $0xa8] sm:$0xff]  ;;  %v5063_v45 = vld [vmem:[#allocation2 + $0xb0] sm:$0xff]  ;;  %v5064_v57 = vld [vmem:[#allocation2 + $0xb8] sm:$0xff] }
 0x520   : > { %5086 = vst.msk [vmem:[%s5910_s22 + $0x38] sm:$0xff] %vm358_vm0, %v5048_v62  ;;  %v5065_v14 = vld [vmem:[#allocation2 + $0xc0] sm:$0xff]  ;;  %v5066_v48 = vld [vmem:[#allocation2 + $0xc8] sm:$0xff]  ;;  %v5067_v9 = vld [vmem:[#allocation2 + $0xd0] sm:$0xff] }
 0x521   : > { %5087 = vst.msk [vmem:[%s5910_s22 + $0x40] sm:$0xff] %vm358_vm0, %v5049_v25  ;;  %v5068_v38 = vld [vmem:[#allocation2 + $0xd8] sm:$0xff]  ;;  %v5069_v29 = vld [vmem:[#allocation2 + $0xe0] sm:$0xff]  ;;  %v5070_v55 = vld [vmem:[#allocation2 + $0xe8] sm:$0xff] }
 0x522   : > { %5088 = vst.msk [vmem:[%s5910_s22 + $0x48] sm:$0xff] %vm358_vm0, %v5050_v36  ;;  %v5071_v44 = vld [vmem:[#allocation2 + $0xf0] sm:$0xff]  ;;  %v5072_v8 = vld [vmem:[#allocation2 + $0xf8] sm:$0xff]  ;;  %v5073_v16 = vld [vmem:[#allocation2 + $0x100] sm:$0xff] }
 0x523   : > { %5089 = vst.msk [vmem:[%s5910_s22 + $0x50] sm:$0xff] %vm358_vm0, %v5051_v0  ;;  %v5074_v58 = vld [vmem:[#allocation2 + $0x108] sm:$0xff]  ;;  %v5075_v31 = vld [vmem:[#allocation2 + $0x110] sm:$0xff]  ;;  %v5076_v12 = vld [vmem:[#allocation2 + $0x118] sm:$0xff] }
 0x524   : > { %5090 = vst.msk [vmem:[%s5910_s22 + $0x58] sm:$0xff] %vm358_vm0, %v5052_v19  ;;  %v5077_v40 = vld [vmem:[#allocation2 + $0x120] sm:$0x3f] }
 0x525   : > { %5091 = vst.msk [vmem:[%s5910_s22 + $0x60] sm:$0xff] %vm358_vm0, %v5053_v56 }
 0x526   : > { %5092 = vst.msk [vmem:[%s5910_s22 + $0x68] sm:$0xff] %vm358_vm0, %v5054_v51 }
 0x527   : > { %5093 = vst.msk [vmem:[%s5910_s22 + $0x70] sm:$0xff] %vm358_vm0, %v5055_v39 }
 0x528   : > { %5094 = vst.msk [vmem:[%s5910_s22 + $0x78] sm:$0xff] %vm358_vm0, %v5056_v47 }
 0x529   : > { %5095 = vst.msk [vmem:[%s5910_s22 + $0x80] sm:$0xff] %vm358_vm0, %v5057_v7 }
 0x52a   : > { %5096 = vst.msk [vmem:[%s5910_s22 + $0x88] sm:$0xff] %vm358_vm0, %v5058_v43 }
 0x52b   : > { %5097 = vst.msk [vmem:[%s5910_s22 + $0x90] sm:$0xff] %vm358_vm0, %v5059_v2 }
 0x52c   : > { %5098 = vst.msk [vmem:[%s5910_s22 + $0x98] sm:$0xff] %vm358_vm0, %v5060_v21 }
 0x52d   : > { %5099 = vst.msk [vmem:[%s5910_s22 + $0xa0] sm:$0xff] %vm358_vm0, %v5061_v6 }
 0x52e   : > { %5100 = vst.msk [vmem:[%s5910_s22 + $0xa8] sm:$0xff] %vm358_vm0, %v5062_v24 }
 0x52f   : > { %5101 = vst.msk [vmem:[%s5910_s22 + $0xb0] sm:$0xff] %vm358_vm0, %v5063_v45 }
 0x530   : > { %5102 = vst.msk [vmem:[%s5910_s22 + $0xb8] sm:$0xff] %vm358_vm0, %v5064_v57 }
 0x531   : > { %5103 = vst.msk [vmem:[%s5910_s22 + $0xc0] sm:$0xff] %vm358_vm0, %v5065_v14 }
 0x532   : > { %5104 = vst.msk [vmem:[%s5910_s22 + $0xc8] sm:$0xff] %vm358_vm0, %v5066_v48 }
 0x533   : > { %5105 = vst.msk [vmem:[%s5910_s22 + $0xd0] sm:$0xff] %vm358_vm0, %v5067_v9 }
 0x534   : > { %5106 = vst.msk [vmem:[%s5910_s22 + $0xd8] sm:$0xff] %vm358_vm0, %v5068_v38 }
 0x535   : > { %5107 = vst.msk [vmem:[%s5910_s22 + $0xe0] sm:$0xff] %vm358_vm0, %v5069_v29 }
 0x536   : > { %5108 = vst.msk [vmem:[%s5910_s22 + $0xe8] sm:$0xff] %vm358_vm0, %v5070_v55 }
 0x537   : > { %5109 = vst.msk [vmem:[%s5910_s22 + $0xf0] sm:$0xff] %vm358_vm0, %v5071_v44 }
 0x538   : > { %5110 = vst.msk [vmem:[%s5910_s22 + $0xf8] sm:$0xff] %vm358_vm0, %v5072_v8 }
 0x539   : > { %5111 = vst.msk [vmem:[%s5910_s22 + $0x100] sm:$0xff] %vm358_vm0, %v5073_v16 }
 0x53a   : > { %5112 = vst.msk [vmem:[%s5910_s22 + $0x108] sm:$0xff] %vm358_vm0, %v5074_v58 }
 0x53b   : > { %5113 = vst.msk [vmem:[%s5910_s22 + $0x110] sm:$0xff] %vm358_vm0, %v5075_v31 }
 0x53c   : > { %5114 = vst.msk [vmem:[%s5910_s22 + $0x118] sm:$0xff] %vm358_vm0, %v5076_v12 }
 0x53d   : > { %5116 = vst.msk [vmem:[%s5910_s22 + $0x120] sm:$0x3f] %vm395_vm1, %v5077_v40 }
 0x53e PF: > { %s34_s1 = sadd.s32 1, %s5805_s1   ;;  %s11345_s0 = smov %s5801_s9 }
 0x53f   : > { %p31_p1 = scmp.ge.s32.totalorder %s34_s1, 5   ;;  %s11346_s9 = smov %s11348_s2 }
 0x541   :  { %33 = sbr.rel (!%p31_p1) target bundleno = 11 (0xb), region = 80 }

</bundles_post_ra>
